<compile_context>
chip_gen: v7x
topology: tpu7x:2x2x1
jax: 0.10.0
libtpu: 0.0.40
codegen_flags: <defaults>
</compile_context>

<pallas_src>
import jax
import jax.numpy as jnp
from jax.experimental import pallas as pl
from jax.experimental.pallas import tpu as pltpu


def _round_up(x, m):
    return ((x + m - 1) // m) * m


# -----------------------------------------------------------------------------
# Fused kernel (in-kernel embedding + biLSTM stack + head)
# -----------------------------------------------------------------------------
def _make_fused_kernel(num_layers, T, Bp, Hp, Vp):
    G = 4 * Hp  # per-direction gate width

    def kernel(*refs):
        it = iter(refs)
        tok_ref = next(it)                                   # (T*Bp, 1) int32
        layers = []
        for _ in range(num_layers):
            # wih_cat (Din, 8Hp) bf16, whh_f (Hp,4Hp) bf16, whh_b (Hp,4Hp) bf16,
            # bias_cat (1, 8Hp) f32
            layers.append((next(it), next(it), next(it), next(it)))
        w1_ref, b1_ref, w2_ref, b2_ref = next(it), next(it), next(it), next(it)
        out_ref = next(it)                                   # (Bp, Cp) f32
        buf_ref = next(it)                                   # (T*Bp, 2Hp) bf16
        gx_ref = next(it)                                    # (T*Bp, 8Hp) f32

        def lstm_cell(gates, c_prev):
            i_g = jax.nn.sigmoid(gates[:, 0 * Hp:1 * Hp])
            f_g = jax.nn.sigmoid(gates[:, 1 * Hp:2 * Hp])
            g_g = jnp.tanh(gates[:, 2 * Hp:3 * Hp])
            o_g = jax.nn.sigmoid(gates[:, 3 * Hp:4 * Hp])
            # c0 == 0 -> first step skips f*c_prev exactly.
            c = i_g * g_g if c_prev is None else f_g * c_prev + i_g * g_g
            h = (o_g * jnp.tanh(c)).astype(jnp.bfloat16)     # single cast, reused
            return h, c

        # ---- in-kernel embedding "gather": one-hot selection on the MXU ----
        tok = tok_ref[...]                                   # (T*Bp, 1) int32
        vocab_iota = jax.lax.broadcasted_iota(jnp.int32, (T * Bp, Vp), 1)
        onehot = (tok == vocab_iota).astype(jnp.bfloat16)    # (T*Bp, Vp)

        cur = onehot                                         # layer-0 input
        hf_last = hb_last = None

        for l, (wih_ref, whh_f_ref, whh_b_ref, b_ref) in enumerate(layers):
            is_last = (l == num_layers - 1)

            # Fused hoisted input projection: both directions, all T steps,
            # one MXU matmul (layer 0 also carries the folded embedding).
            gx_ref[...] = (jnp.dot(cur, wih_ref[...],
                                   preferred_element_type=jnp.float32)
                           + b_ref[...])

            h_f = h_b = None
            c_f = c_b = None
            for s in range(T):                               # fully unrolled
                t_f, t_b = s, T - 1 - s
                g_f = gx_ref[t_f * Bp:(t_f + 1) * Bp, 0:G]
                g_b = gx_ref[t_b * Bp:(t_b + 1) * Bp, G:2 * G]
                if s > 0:
                    # h0 == 0 -> skip the s==0 recurrent dots entirely.
                    # whh read from VMEM inside the dot (no hoisted live vregs).
                    g_f = g_f + jnp.dot(h_f, whh_f_ref[...],
                                        preferred_element_type=jnp.float32)
                    g_b = g_b + jnp.dot(h_b, whh_b_ref[...],
                                        preferred_element_type=jnp.float32)
                h_f, c_f = lstm_cell(g_f, c_f)
                h_b, c_b = lstm_cell(g_b, c_b)
                if is_last:
                    # Head only needs lstm_out[:, -1, :]: fwd h at t=T-1 and
                    # bwd h at t=T-1 (the bwd direction's FIRST step).
                    if s == 0:
                        hb_last = h_b
                    if s == T - 1:
                        hf_last = h_f
                else:
                    buf_ref[t_f * Bp:(t_f + 1) * Bp, 0:Hp] = h_f
                    buf_ref[t_b * Bp:(t_b + 1) * Bp, Hp:2 * Hp] = h_b

            if not is_last:
                cur = buf_ref[...]                           # (T*Bp, 2Hp) bf16

        # ---------------- head (fc1 + ReLU -> fc2 -> sigmoid) ----------------
        z1 = (jnp.dot(hf_last, w1_ref[0:Hp, :],
                      preferred_element_type=jnp.float32)
              + jnp.dot(hb_last, w1_ref[Hp:2 * Hp, :],
                        preferred_element_type=jnp.float32)
              + b1_ref[...])
        z1 = jnp.maximum(z1, 0.0)
        z2 = jnp.dot(z1.astype(jnp.bfloat16), w2_ref[...],
                     preferred_element_type=jnp.float32) + b2_ref[...]
        out_ref[...] = jax.nn.sigmoid(z2)

    return kernel


# -----------------------------------------------------------------------------
# Wrapper
# -----------------------------------------------------------------------------
def lstm_w2v_forward(tokens, params):
    """tokens: int32 (B, T). Returns float32 (B, num_classes) probabilities."""
    B, T = tokens.shape
    Hp = params["Hp"]
    Cp = params["Cp"]
    Vp = params["Vp"]
    C = params["num_classes"]
    num_layers = len(params["lstm"])
    Bp = max(8, _round_up(B, 8))                             # f32 sublane tile

    # Tiny time-major re-layout of the int32 indices (16 ints); the embedding
    # lookup itself happens in-kernel as a one-hot MXU matmul.
    tok = jnp.pad(jnp.transpose(tokens), ((0, 0), (0, Bp - B)))   # (T, Bp)
    tok_col = tok.reshape(T * Bp, 1).astype(jnp.int32)

    flat_weights = []
    for lp in params["lstm"]:
        flat_weights += [lp["wih"], lp["whh_f"], lp["whh_b"], lp["bias"]]
    flat_weights += [params["w1"], params["b1"], params["w2"], params["b2"]]

    vmem = pl.BlockSpec(memory_space=pltpu.MemorySpace.VMEM)
    kernel = _make_fused_kernel(num_layers, T, Bp, Hp, Vp)
    out = pl.pallas_call(
        kernel,
        out_shape=jax.ShapeDtypeStruct((Bp, Cp), jnp.float32),
        in_specs=[vmem] * (1 + len(flat_weights)),
        out_specs=vmem,
        scratch_shapes=[
            pltpu.VMEM((T * Bp, 2 * Hp), jnp.bfloat16),  # layer output (bf16)
            pltpu.VMEM((T * Bp, 8 * Hp), jnp.float32),   # fused fwd+bwd gate proj
        ],
    )(tok_col, *flat_weights)
    return out[:B, :C]


# -----------------------------------------------------------------------------
# Deterministic parameters (PyTorch layout, packed/padded for the kernel)
# -----------------------------------------------------------------------------
def make_params(key, vocab, emb_dim, hidden, num_layers, num_classes):
    H = hidden
    Hp = _round_up(max(H, 128), 128)                 # lane-aligned gate width
    Cp = _round_up(max(num_classes, 128), 128)
    Vp = _round_up(vocab, 128)                       # one-hot lane width

    def uniform(k, shape, scale):
        return jax.random.uniform(k, shape, jnp.float32, -scale, scale)

    keys = iter(jax.random.split(key, 8 * num_layers + 5))
    scale = 1.0 / jnp.sqrt(H)

    emb = jax.random.normal(next(keys), (vocab, emb_dim), jnp.float32)

    params = {"hidden": H, "Hp": Hp, "Cp": Cp, "Vp": Vp,
              "num_classes": num_classes}

    def pad_gate_cols(w_t):                          # (Din, 4H) -> (Din, 4Hp)
        out = jnp.zeros((w_t.shape[0], 4 * Hp), jnp.float32)
        for g in range(4):                           # PyTorch gate order i,f,g,o
            out = out.at[:, g * Hp:g * Hp + H].set(w_t[:, g * H:(g + 1) * H])
        return out

    def pad_hidden_rows(w, rows_out):                # rows (H | 2H) -> (Hp | 2Hp)
        out = jnp.zeros((rows_out, w.shape[1]), jnp.float32)
        out = out.at[0:H, :].set(w[0:H, :])
        if w.shape[0] == 2 * H:
            out = out.at[Hp:Hp + H, :].set(w[H:2 * H, :])
        return out

    lstm_layers = []
    d_in = emb_dim
    for layer in range(num_layers):
        packed = {}
        dir_wih, dir_bias = [], []
        for tag in ("f", "b"):
            # PyTorch-shaped weights: (4H, Din), (4H, H), (4H,)
            w_ih = uniform(next(keys), (4 * H, d_in), scale)
            w_hh = uniform(next(keys), (4 * H, H), scale)
            b_ih = uniform(next(keys), (4 * H,), scale)
            b_hh = uniform(next(keys), (4 * H,), scale)

            wih_t = pad_gate_cols(w_ih.T)                          # (Din, 4Hp)
            whh_t = pad_hidden_rows(pad_gate_cols(w_hh.T), Hp)     # (Hp, 4Hp)
            bias = pad_gate_cols((b_ih + b_hh).reshape(1, 4 * H))  # (1, 4Hp)

            dir_wih.append(wih_t)
            dir_bias.append(bias)
            packed[f"whh_{tag}"] = whh_t.astype(jnp.bfloat16)

        if layer == 0:
            # Fold the (frozen) embedding into the layer-0 input projection:
            # gx0 = onehot @ (emb @ wih0); pad vocab rows to Vp with zeros.
            w0_f = emb @ dir_wih[0]                                # (V, 4Hp)
            w0_b = emb @ dir_wih[1]
            wih_cat = jnp.zeros((Vp, 8 * Hp), jnp.float32)
            wih_cat = wih_cat.at[:vocab, 0:4 * Hp].set(w0_f)
            wih_cat = wih_cat.at[:vocab, 4 * Hp:].set(w0_b)
        else:
            wih_f = pad_hidden_rows(dir_wih[0], 2 * Hp)            # (2Hp, 4Hp)
            wih_b = pad_hidden_rows(dir_wih[1], 2 * Hp)
            wih_cat = jnp.concatenate([wih_f, wih_b], axis=1)      # (2Hp, 8Hp)

        packed["wih"] = wih_cat.astype(jnp.bfloat16)
        packed["bias"] = jnp.concatenate(dir_bias, axis=1)         # (1, 8Hp) f32
        lstm_layers.append(packed)
        d_in = 2 * H
    params["lstm"] = lstm_layers

    fc_scale1 = 1.0 / jnp.sqrt(2 * H)
    fc_scale2 = 1.0 / jnp.sqrt(128)
    w1 = uniform(next(keys), (128, 2 * H), fc_scale1)              # PyTorch (out,in)
    b1 = uniform(next(keys), (128,), fc_scale1)
    w2 = uniform(next(keys), (num_classes, 128), fc_scale2)
    b2 = uniform(next(keys), (num_classes,), fc_scale2)

    params["w1"] = pad_hidden_rows(w1.T, 2 * Hp).astype(jnp.bfloat16)   # (2Hp, 128)
    params["b1"] = b1.reshape(1, 128)
    params["w2"] = (jnp.zeros((128, Cp), jnp.float32)
                    .at[:, :num_classes].set(w2.T)).astype(jnp.bfloat16)  # (128, Cp)
    params["b2"] = jnp.zeros((1, Cp), jnp.float32).at[:, :num_classes].set(b2)
    return params


# -----------------------------------------------------------------------------
# Main
# -----------------------------------------------------------------------------
if __name__ == "__main__":
    VOCAB = 50
    EMB = 32
    HIDDEN = 32
    NUM_LAYERS = 2
    NUM_CLASSES = 10
    B, T = 2, 8

    root = jax.random.PRNGKey(0)
    k_tok, k_par = jax.random.split(root)

    tokens = jax.random.randint(k_tok, (B, T), 0, VOCAB, dtype=jnp.int32)
    params = make_params(k_par, VOCAB, EMB, HIDDEN, NUM_LAYERS, NUM_CLASSES)

    out = lstm_w2v_forward(tokens, params)
    out = jax.block_until_ready(out)

    assert out.shape == (B, NUM_CLASSES), out.shape
    assert bool(jnp.all((out >= 0.0) & (out <= 1.0)))
    print("KERNEL_OK")
</pallas_src>

<mosaic_0001>
module attributes {stable_mosaic.version = 11 : i64} {
  func.func @kernel(%arg0: memref<64x1xi32, #tpu.memory_space<vmem>>, %arg1: memref<128x1024xbf16, #tpu.memory_space<vmem>>, %arg2: memref<128x512xbf16, #tpu.memory_space<vmem>>, %arg3: memref<128x512xbf16, #tpu.memory_space<vmem>>, %arg4: memref<1x1024xf32, #tpu.memory_space<vmem>>, %arg5: memref<256x1024xbf16, #tpu.memory_space<vmem>>, %arg6: memref<128x512xbf16, #tpu.memory_space<vmem>>, %arg7: memref<128x512xbf16, #tpu.memory_space<vmem>>, %arg8: memref<1x1024xf32, #tpu.memory_space<vmem>>, %arg9: memref<256x128xbf16, #tpu.memory_space<vmem>>, %arg10: memref<1x128xf32, #tpu.memory_space<vmem>>, %arg11: memref<128x128xbf16, #tpu.memory_space<vmem>>, %arg12: memref<1x128xf32, #tpu.memory_space<vmem>>, %arg13: memref<8x128xf32, #tpu.memory_space<vmem>>, %arg14: memref<64x256xbf16, #tpu.memory_space<vmem>>, %arg15: memref<64x1024xf32, #tpu.memory_space<vmem>>) attributes {dimension_semantics = [], scalar_prefetch = 0 : i64, scratch_operands = 2 : i64, tpu.core_type = #tpu.core_type<tc>} {
    %c0 = arith.constant 0 : index
    %c0_0 = arith.constant 0 : index
    %0 = vector.load %arg0[%c0, %c0_0] : memref<64x1xi32, #tpu.memory_space<vmem>>, vector<64x1xi32>
    %1 = tpu.iota {dimensions = array<i32: 1>} : vector<64x128xi32>
    %2 = vector.broadcast %0 : vector<64x1xi32> to vector<64x128xi32>
    %3 = arith.cmpi eq, %2, %1 : vector<64x128xi32>
    %4 = arith.extui %3 : vector<64x128xi1> to vector<64x128xi32>
    %5 = arith.sitofp %4 : vector<64x128xi32> to vector<64x128xf32>
    %6 = arith.truncf %5 : vector<64x128xf32> to vector<64x128xbf16>
    %c0_1 = arith.constant 0 : index
    %c0_2 = arith.constant 0 : index
    %7 = vector.load %arg1[%c0_1, %c0_2] : memref<128x1024xbf16, #tpu.memory_space<vmem>>, vector<128x1024xbf16>
    %cst = arith.constant dense<0.000000e+00> : vector<64x1024xf32>
    %8 = tpu.matmul %6, %7, %cst {dimension_numbers = #tpu.dot_dimension_numbers<[1], [0], [0], [1], [0, 0, 1, 1], [], []>} : vector<64x128xbf16>, vector<128x1024xbf16>, vector<64x1024xf32> -> vector<64x1024xf32>
    %c0_3 = arith.constant 0 : index
    %c0_4 = arith.constant 0 : index
    %9 = vector.load %arg4[%c0_3, %c0_4] : memref<1x1024xf32, #tpu.memory_space<vmem>>, vector<1x1024xf32>
    %10 = vector.broadcast %9 : vector<1x1024xf32> to vector<64x1024xf32>
    %11 = arith.addf %8, %10 : vector<64x1024xf32>
    %c0_5 = arith.constant 0 : index
    %c0_6 = arith.constant 0 : index
    %12 = vector.load %arg15[%c0_5, %c0_6] : memref<64x1024xf32, #tpu.memory_space<vmem>>, vector<64x1024xf32>
    tpu.vector_store %arg15[%c0_5, %c0_6], %11 {strides = array<i32>} : memref<64x1024xf32, #tpu.memory_space<vmem>>, vector<64x1024xf32>,
    %c0_7 = arith.constant 0 : index
    %c0_8 = arith.constant 0 : index
    %13 = vector.load %arg15[%c0_7, %c0_8] : memref<64x1024xf32, #tpu.memory_space<vmem>>, vector<8x512xf32>
    %c56 = arith.constant 56 : index
    %c512 = arith.constant 512 : index
    %14 = vector.load %arg15[%c56, %c512] : memref<64x1024xf32, #tpu.memory_space<vmem>>, vector<8x512xf32>
    %15 = vector.extract_strided_slice %13 {offsets = [0, 0], sizes = [8, 128], strides = [1, 1]} : vector<8x512xf32> to vector<8x128xf32>
    %16 = arith.negf %15 : vector<8x128xf32>
    %17 = math.exp %16 : vector<8x128xf32>
    %cst_9 = arith.constant 1.000000e+00 : f32
    %18 = vector.broadcast %cst_9 : f32 to vector<8x128xf32>
    %19 = arith.addf %18, %17 : vector<8x128xf32>
    %20 = arith.divf %18, %19 : vector<8x128xf32>
    %21 = vector.extract_strided_slice %13 {offsets = [0, 256], sizes = [8, 128], strides = [1, 1]} : vector<8x512xf32> to vector<8x128xf32>
    %22 = math.tanh %21 : vector<8x128xf32>
    %23 = vector.extract_strided_slice %13 {offsets = [0, 384], sizes = [8, 128], strides = [1, 1]} : vector<8x512xf32> to vector<8x128xf32>
    %24 = arith.negf %23 : vector<8x128xf32>
    %25 = math.exp %24 : vector<8x128xf32>
    %cst_10 = arith.constant 1.000000e+00 : f32
    %26 = vector.broadcast %cst_10 : f32 to vector<8x128xf32>
    %27 = arith.addf %26, %25 : vector<8x128xf32>
    %28 = arith.divf %26, %27 : vector<8x128xf32>
    %29 = arith.mulf %20, %22 : vector<8x128xf32>
    %30 = math.tanh %29 : vector<8x128xf32>
    %31 = arith.mulf %28, %30 : vector<8x128xf32>
    %32 = arith.truncf %31 : vector<8x128xf32> to vector<8x128xbf16>
    %33 = vector.extract_strided_slice %14 {offsets = [0, 0], sizes = [8, 128], strides = [1, 1]} : vector<8x512xf32> to vector<8x128xf32>
    %34 = arith.negf %33 : vector<8x128xf32>
    %35 = math.exp %34 : vector<8x128xf32>
    %cst_11 = arith.constant 1.000000e+00 : f32
    %36 = vector.broadcast %cst_11 : f32 to vector<8x128xf32>
    %37 = arith.addf %36, %35 : vector<8x128xf32>
    %38 = arith.divf %36, %37 : vector<8x128xf32>
    %39 = vector.extract_strided_slice %14 {offsets = [0, 256], sizes = [8, 128], strides = [1, 1]} : vector<8x512xf32> to vector<8x128xf32>
    %40 = math.tanh %39 : vector<8x128xf32>
    %41 = vector.extract_strided_slice %14 {offsets = [0, 384], sizes = [8, 128], strides = [1, 1]} : vector<8x512xf32> to vector<8x128xf32>
    %42 = arith.negf %41 : vector<8x128xf32>
    %43 = math.exp %42 : vector<8x128xf32>
    %cst_12 = arith.constant 1.000000e+00 : f32
    %44 = vector.broadcast %cst_12 : f32 to vector<8x128xf32>
    %45 = arith.addf %44, %43 : vector<8x128xf32>
    %46 = arith.divf %44, %45 : vector<8x128xf32>
    %47 = arith.mulf %38, %40 : vector<8x128xf32>
    %48 = math.tanh %47 : vector<8x128xf32>
    %49 = arith.mulf %46, %48 : vector<8x128xf32>
    %50 = arith.truncf %49 : vector<8x128xf32> to vector<8x128xbf16>
    %c0_13 = arith.constant 0 : index
    %c0_14 = arith.constant 0 : index
    %51 = vector.load %arg14[%c0_13, %c0_14] : memref<64x256xbf16, #tpu.memory_space<vmem>>, vector<8x128xbf16>
    tpu.vector_store %arg14[%c0_13, %c0_14], %32 {strides = array<i32>} : memref<64x256xbf16, #tpu.memory_space<vmem>>, vector<8x128xbf16>,
    %c56_15 = arith.constant 56 : index
    %c128 = arith.constant 128 : index
    %52 = vector.load %arg14[%c56_15, %c128] : memref<64x256xbf16, #tpu.memory_space<vmem>>, vector<8x128xbf16>
    tpu.vector_store %arg14[%c56_15, %c128], %50 {strides = array<i32>} : memref<64x256xbf16, #tpu.memory_space<vmem>>, vector<8x128xbf16>,
    %c8 = arith.constant 8 : index
    %c0_16 = arith.constant 0 : index
    %53 = vector.load %arg15[%c8, %c0_16] : memref<64x1024xf32, #tpu.memory_space<vmem>>, vector<8x512xf32>
    %c48 = arith.constant 48 : index
    %c512_17 = arith.constant 512 : index
    %54 = vector.load %arg15[%c48, %c512_17] : memref<64x1024xf32, #tpu.memory_space<vmem>>, vector<8x512xf32>
    %c0_18 = arith.constant 0 : index
    %c0_19 = arith.constant 0 : index
    %55 = vector.load %arg2[%c0_18, %c0_19] : memref<128x512xbf16, #tpu.memory_space<vmem>>, vector<128x512xbf16>
    %cst_20 = arith.constant dense<0.000000e+00> : vector<8x512xf32>
    %56 = tpu.matmul %32, %55, %cst_20 {dimension_numbers = #tpu.dot_dimension_numbers<[1], [0], [0], [1], [0, 0, 1, 1], [], []>} : vector<8x128xbf16>, vector<128x512xbf16>, vector<8x512xf32> -> vector<8x512xf32>
    %57 = arith.addf %53, %56 : vector<8x512xf32>
    %c0_21 = arith.constant 0 : index
    %c0_22 = arith.constant 0 : index
    %58 = vector.load %arg3[%c0_21, %c0_22] : memref<128x512xbf16, #tpu.memory_space<vmem>>, vector<128x512xbf16>
    %cst_23 = arith.constant dense<0.000000e+00> : vector<8x512xf32>
    %59 = tpu.matmul %50, %58, %cst_23 {dimension_numbers = #tpu.dot_dimension_numbers<[1], [0], [0], [1], [0, 0, 1, 1], [], []>} : vector<8x128xbf16>, vector<128x512xbf16>, vector<8x512xf32> -> vector<8x512xf32>
    %60 = arith.addf %54, %59 : vector<8x512xf32>
    %61 = vector.extract_strided_slice %57 {offsets = [0, 0], sizes = [8, 128], strides = [1, 1]} : vector<8x512xf32> to vector<8x128xf32>
    %62 = arith.negf %61 : vector<8x128xf32>
    %63 = math.exp %62 : vector<8x128xf32>
    %cst_24 = arith.constant 1.000000e+00 : f32
    %64 = vector.broadcast %cst_24 : f32 to vector<8x128xf32>
    %65 = arith.addf %64, %63 : vector<8x128xf32>
    %66 = arith.divf %64, %65 : vector<8x128xf32>
    %67 = vector.extract_strided_slice %57 {offsets = [0, 128], sizes = [8, 128], strides = [1, 1]} : vector<8x512xf32> to vector<8x128xf32>
    %68 = arith.negf %67 : vector<8x128xf32>
    %69 = math.exp %68 : vector<8x128xf32>
    %cst_25 = arith.constant 1.000000e+00 : f32
    %70 = vector.broadcast %cst_25 : f32 to vector<8x128xf32>
    %71 = arith.addf %70, %69 : vector<8x128xf32>
    %72 = arith.divf %70, %71 : vector<8x128xf32>
    %73 = vector.extract_strided_slice %57 {offsets = [0, 256], sizes = [8, 128], strides = [1, 1]} : vector<8x512xf32> to vector<8x128xf32>
    %74 = math.tanh %73 : vector<8x128xf32>
    %75 = vector.extract_strided_slice %57 {offsets = [0, 384], sizes = [8, 128], strides = [1, 1]} : vector<8x512xf32> to vector<8x128xf32>
    %76 = arith.negf %75 : vector<8x128xf32>
    %77 = math.exp %76 : vector<8x128xf32>
    %cst_26 = arith.constant 1.000000e+00 : f32
    %78 = vector.broadcast %cst_26 : f32 to vector<8x128xf32>
    %79 = arith.addf %78, %77 : vector<8x128xf32>
    %80 = arith.divf %78, %79 : vector<8x128xf32>
    %81 = arith.mulf %72, %29 : vector<8x128xf32>
    %82 = arith.mulf %66, %74 : vector<8x128xf32>
    %83 = arith.addf %81, %82 : vector<8x128xf32>
    %84 = math.tanh %83 : vector<8x128xf32>
    %85 = arith.mulf %80, %84 : vector<8x128xf32>
    %86 = arith.truncf %85 : vector<8x128xf32> to vector<8x128xbf16>
    %87 = vector.extract_strided_slice %60 {offsets = [0, 0], sizes = [8, 128], strides = [1, 1]} : vector<8x512xf32> to vector<8x128xf32>
    %88 = arith.negf %87 : vector<8x128xf32>
    %89 = math.exp %88 : vector<8x128xf32>
    %cst_27 = arith.constant 1.000000e+00 : f32
    %90 = vector.broadcast %cst_27 : f32 to vector<8x128xf32>
    %91 = arith.addf %90, %89 : vector<8x128xf32>
    %92 = arith.divf %90, %91 : vector<8x128xf32>
    %93 = vector.extract_strided_slice %60 {offsets = [0, 128], sizes = [8, 128], strides = [1, 1]} : vector<8x512xf32> to vector<8x128xf32>
    %94 = arith.negf %93 : vector<8x128xf32>
    %95 = math.exp %94 : vector<8x128xf32>
    %cst_28 = arith.constant 1.000000e+00 : f32
    %96 = vector.broadcast %cst_28 : f32 to vector<8x128xf32>
    %97 = arith.addf %96, %95 : vector<8x128xf32>
    %98 = arith.divf %96, %97 : vector<8x128xf32>
    %99 = vector.extract_strided_slice %60 {offsets = [0, 256], sizes = [8, 128], strides = [1, 1]} : vector<8x512xf32> to vector<8x128xf32>
    %100 = math.tanh %99 : vector<8x128xf32>
    %101 = vector.extract_strided_slice %60 {offsets = [0, 384], sizes = [8, 128], strides = [1, 1]} : vector<8x512xf32> to vector<8x128xf32>
    %102 = arith.negf %101 : vector<8x128xf32>
    %103 = math.exp %102 : vector<8x128xf32>
    %cst_29 = arith.constant 1.000000e+00 : f32
    %104 = vector.broadcast %cst_29 : f32 to vector<8x128xf32>
    %105 = arith.addf %104, %103 : vector<8x128xf32>
    %106 = arith.divf %104, %105 : vector<8x128xf32>
    %107 = arith.mulf %98, %47 : vector<8x128xf32>
    %108 = arith.mulf %92, %100 : vector<8x128xf32>
    %109 = arith.addf %107, %108 : vector<8x128xf32>
    %110 = math.tanh %109 : vector<8x128xf32>
    %111 = arith.mulf %106, %110 : vector<8x128xf32>
    %112 = arith.truncf %111 : vector<8x128xf32> to vector<8x128xbf16>
    %c8_30 = arith.constant 8 : index
    %c0_31 = arith.constant 0 : index
    %113 = vector.load %arg14[%c8_30, %c0_31] : memref<64x256xbf16, #tpu.memory_space<vmem>>, vector<8x128xbf16>
    tpu.vector_store %arg14[%c8_30, %c0_31], %86 {strides = array<i32>} : memref<64x256xbf16, #tpu.memory_space<vmem>>, vector<8x128xbf16>,
    %c48_32 = arith.constant 48 : index
    %c128_33 = arith.constant 128 : index
    %114 = vector.load %arg14[%c48_32, %c128_33] : memref<64x256xbf16, #tpu.memory_space<vmem>>, vector<8x128xbf16>
    tpu.vector_store %arg14[%c48_32, %c128_33], %112 {strides = array<i32>} : memref<64x256xbf16, #tpu.memory_space<vmem>>, vector<8x128xbf16>,
    %c16 = arith.constant 16 : index
    %c0_34 = arith.constant 0 : index
    %115 = vector.load %arg15[%c16, %c0_34] : memref<64x1024xf32, #tpu.memory_space<vmem>>, vector<8x512xf32>
    %c40 = arith.constant 40 : index
    %c512_35 = arith.constant 512 : index
    %116 = vector.load %arg15[%c40, %c512_35] : memref<64x1024xf32, #tpu.memory_space<vmem>>, vector<8x512xf32>
    %c0_36 = arith.constant 0 : index
    %c0_37 = arith.constant 0 : index
    %117 = vector.load %arg2[%c0_36, %c0_37] : memref<128x512xbf16, #tpu.memory_space<vmem>>, vector<128x512xbf16>
    %cst_38 = arith.constant dense<0.000000e+00> : vector<8x512xf32>
    %118 = tpu.matmul %86, %117, %cst_38 {dimension_numbers = #tpu.dot_dimension_numbers<[1], [0], [0], [1], [0, 0, 1, 1], [], []>} : vector<8x128xbf16>, vector<128x512xbf16>, vector<8x512xf32> -> vector<8x512xf32>
    %119 = arith.addf %115, %118 : vector<8x512xf32>
    %c0_39 = arith.constant 0 : index
    %c0_40 = arith.constant 0 : index
    %120 = vector.load %arg3[%c0_39, %c0_40] : memref<128x512xbf16, #tpu.memory_space<vmem>>, vector<128x512xbf16>
    %cst_41 = arith.constant dense<0.000000e+00> : vector<8x512xf32>
    %121 = tpu.matmul %112, %120, %cst_41 {dimension_numbers = #tpu.dot_dimension_numbers<[1], [0], [0], [1], [0, 0, 1, 1], [], []>} : vector<8x128xbf16>, vector<128x512xbf16>, vector<8x512xf32> -> vector<8x512xf32>
    %122 = arith.addf %116, %121 : vector<8x512xf32>
    %123 = vector.extract_strided_slice %119 {offsets = [0, 0], sizes = [8, 128], strides = [1, 1]} : vector<8x512xf32> to vector<8x128xf32>
    %124 = arith.negf %123 : vector<8x128xf32>
    %125 = math.exp %124 : vector<8x128xf32>
    %cst_42 = arith.constant 1.000000e+00 : f32
    %126 = vector.broadcast %cst_42 : f32 to vector<8x128xf32>
    %127 = arith.addf %126, %125 : vector<8x128xf32>
    %128 = arith.divf %126, %127 : vector<8x128xf32>
    %129 = vector.extract_strided_slice %119 {offsets = [0, 128], sizes = [8, 128], strides = [1, 1]} : vector<8x512xf32> to vector<8x128xf32>
    %130 = arith.negf %129 : vector<8x128xf32>
    %131 = math.exp %130 : vector<8x128xf32>
    %cst_43 = arith.constant 1.000000e+00 : f32
    %132 = vector.broadcast %cst_43 : f32 to vector<8x128xf32>
    %133 = arith.addf %132, %131 : vector<8x128xf32>
    %134 = arith.divf %132, %133 : vector<8x128xf32>
    %135 = vector.extract_strided_slice %119 {offsets = [0, 256], sizes = [8, 128], strides = [1, 1]} : vector<8x512xf32> to vector<8x128xf32>
    %136 = math.tanh %135 : vector<8x128xf32>
    %137 = vector.extract_strided_slice %119 {offsets = [0, 384], sizes = [8, 128], strides = [1, 1]} : vector<8x512xf32> to vector<8x128xf32>
    %138 = arith.negf %137 : vector<8x128xf32>
    %139 = math.exp %138 : vector<8x128xf32>
    %cst_44 = arith.constant 1.000000e+00 : f32
    %140 = vector.broadcast %cst_44 : f32 to vector<8x128xf32>
    %141 = arith.addf %140, %139 : vector<8x128xf32>
    %142 = arith.divf %140, %141 : vector<8x128xf32>
    %143 = arith.mulf %134, %83 : vector<8x128xf32>
    %144 = arith.mulf %128, %136 : vector<8x128xf32>
    %145 = arith.addf %143, %144 : vector<8x128xf32>
    %146 = math.tanh %145 : vector<8x128xf32>
    %147 = arith.mulf %142, %146 : vector<8x128xf32>
    %148 = arith.truncf %147 : vector<8x128xf32> to vector<8x128xbf16>
    %149 = vector.extract_strided_slice %122 {offsets = [0, 0], sizes = [8, 128], strides = [1, 1]} : vector<8x512xf32> to vector<8x128xf32>
    %150 = arith.negf %149 : vector<8x128xf32>
    %151 = math.exp %150 : vector<8x128xf32>
    %cst_45 = arith.constant 1.000000e+00 : f32
    %152 = vector.broadcast %cst_45 : f32 to vector<8x128xf32>
    %153 = arith.addf %152, %151 : vector<8x128xf32>
    %154 = arith.divf %152, %153 : vector<8x128xf32>
    %155 = vector.extract_strided_slice %122 {offsets = [0, 128], sizes = [8, 128], strides = [1, 1]} : vector<8x512xf32> to vector<8x128xf32>
    %156 = arith.negf %155 : vector<8x128xf32>
    %157 = math.exp %156 : vector<8x128xf32>
    %cst_46 = arith.constant 1.000000e+00 : f32
    %158 = vector.broadcast %cst_46 : f32 to vector<8x128xf32>
    %159 = arith.addf %158, %157 : vector<8x128xf32>
    %160 = arith.divf %158, %159 : vector<8x128xf32>
    %161 = vector.extract_strided_slice %122 {offsets = [0, 256], sizes = [8, 128], strides = [1, 1]} : vector<8x512xf32> to vector<8x128xf32>
    %162 = math.tanh %161 : vector<8x128xf32>
    %163 = vector.extract_strided_slice %122 {offsets = [0, 384], sizes = [8, 128], strides = [1, 1]} : vector<8x512xf32> to vector<8x128xf32>
    %164 = arith.negf %163 : vector<8x128xf32>
    %165 = math.exp %164 : vector<8x128xf32>
    %cst_47 = arith.constant 1.000000e+00 : f32
    %166 = vector.broadcast %cst_47 : f32 to vector<8x128xf32>
    %167 = arith.addf %166, %165 : vector<8x128xf32>
    %168 = arith.divf %166, %167 : vector<8x128xf32>
    %169 = arith.mulf %160, %109 : vector<8x128xf32>
    %170 = arith.mulf %154, %162 : vector<8x128xf32>
    %171 = arith.addf %169, %170 : vector<8x128xf32>
    %172 = math.tanh %171 : vector<8x128xf32>
    %173 = arith.mulf %168, %172 : vector<8x128xf32>
    %174 = arith.truncf %173 : vector<8x128xf32> to vector<8x128xbf16>
    %c16_48 = arith.constant 16 : index
    %c0_49 = arith.constant 0 : index
    %175 = vector.load %arg14[%c16_48, %c0_49] : memref<64x256xbf16, #tpu.memory_space<vmem>>, vector<8x128xbf16>
    tpu.vector_store %arg14[%c16_48, %c0_49], %148 {strides = array<i32>} : memref<64x256xbf16, #tpu.memory_space<vmem>>, vector<8x128xbf16>,
    %c40_50 = arith.constant 40 : index
    %c128_51 = arith.constant 128 : index
    %176 = vector.load %arg14[%c40_50, %c128_51] : memref<64x256xbf16, #tpu.memory_space<vmem>>, vector<8x128xbf16>
    tpu.vector_store %arg14[%c40_50, %c128_51], %174 {strides = array<i32>} : memref<64x256xbf16, #tpu.memory_space<vmem>>, vector<8x128xbf16>,
    %c24 = arith.constant 24 : index
    %c0_52 = arith.constant 0 : index
    %177 = vector.load %arg15[%c24, %c0_52] : memref<64x1024xf32, #tpu.memory_space<vmem>>, vector<8x512xf32>
    %c32 = arith.constant 32 : index
    %c512_53 = arith.constant 512 : index
    %178 = vector.load %arg15[%c32, %c512_53] : memref<64x1024xf32, #tpu.memory_space<vmem>>, vector<8x512xf32>
    %c0_54 = arith.constant 0 : index
    %c0_55 = arith.constant 0 : index
    %179 = vector.load %arg2[%c0_54, %c0_55] : memref<128x512xbf16, #tpu.memory_space<vmem>>, vector<128x512xbf16>
    %cst_56 = arith.constant dense<0.000000e+00> : vector<8x512xf32>
    %180 = tpu.matmul %148, %179, %cst_56 {dimension_numbers = #tpu.dot_dimension_numbers<[1], [0], [0], [1], [0, 0, 1, 1], [], []>} : vector<8x128xbf16>, vector<128x512xbf16>, vector<8x512xf32> -> vector<8x512xf32>
    %181 = arith.addf %177, %180 : vector<8x512xf32>
    %c0_57 = arith.constant 0 : index
    %c0_58 = arith.constant 0 : index
    %182 = vector.load %arg3[%c0_57, %c0_58] : memref<128x512xbf16, #tpu.memory_space<vmem>>, vector<128x512xbf16>
    %cst_59 = arith.constant dense<0.000000e+00> : vector<8x512xf32>
    %183 = tpu.matmul %174, %182, %cst_59 {dimension_numbers = #tpu.dot_dimension_numbers<[1], [0], [0], [1], [0, 0, 1, 1], [], []>} : vector<8x128xbf16>, vector<128x512xbf16>, vector<8x512xf32> -> vector<8x512xf32>
    %184 = arith.addf %178, %183 : vector<8x512xf32>
    %185 = vector.extract_strided_slice %181 {offsets = [0, 0], sizes = [8, 128], strides = [1, 1]} : vector<8x512xf32> to vector<8x128xf32>
    %186 = arith.negf %185 : vector<8x128xf32>
    %187 = math.exp %186 : vector<8x128xf32>
    %cst_60 = arith.constant 1.000000e+00 : f32
    %188 = vector.broadcast %cst_60 : f32 to vector<8x128xf32>
    %189 = arith.addf %188, %187 : vector<8x128xf32>
    %190 = arith.divf %188, %189 : vector<8x128xf32>
    %191 = vector.extract_strided_slice %181 {offsets = [0, 128], sizes = [8, 128], strides = [1, 1]} : vector<8x512xf32> to vector<8x128xf32>
    %192 = arith.negf %191 : vector<8x128xf32>
    %193 = math.exp %192 : vector<8x128xf32>
    %cst_61 = arith.constant 1.000000e+00 : f32
    %194 = vector.broadcast %cst_61 : f32 to vector<8x128xf32>
    %195 = arith.addf %194, %193 : vector<8x128xf32>
    %196 = arith.divf %194, %195 : vector<8x128xf32>
    %197 = vector.extract_strided_slice %181 {offsets = [0, 256], sizes = [8, 128], strides = [1, 1]} : vector<8x512xf32> to vector<8x128xf32>
    %198 = math.tanh %197 : vector<8x128xf32>
    %199 = vector.extract_strided_slice %181 {offsets = [0, 384], sizes = [8, 128], strides = [1, 1]} : vector<8x512xf32> to vector<8x128xf32>
    %200 = arith.negf %199 : vector<8x128xf32>
    %201 = math.exp %200 : vector<8x128xf32>
    %cst_62 = arith.constant 1.000000e+00 : f32
    %202 = vector.broadcast %cst_62 : f32 to vector<8x128xf32>
    %203 = arith.addf %202, %201 : vector<8x128xf32>
    %204 = arith.divf %202, %203 : vector<8x128xf32>
    %205 = arith.mulf %196, %145 : vector<8x128xf32>
    %206 = arith.mulf %190, %198 : vector<8x128xf32>
    %207 = arith.addf %205, %206 : vector<8x128xf32>
    %208 = math.tanh %207 : vector<8x128xf32>
    %209 = arith.mulf %204, %208 : vector<8x128xf32>
    %210 = arith.truncf %209 : vector<8x128xf32> to vector<8x128xbf16>
    %211 = vector.extract_strided_slice %184 {offsets = [0, 0], sizes = [8, 128], strides = [1, 1]} : vector<8x512xf32> to vector<8x128xf32>
    %212 = arith.negf %211 : vector<8x128xf32>
    %213 = math.exp %212 : vector<8x128xf32>
    %cst_63 = arith.constant 1.000000e+00 : f32
    %214 = vector.broadcast %cst_63 : f32 to vector<8x128xf32>
    %215 = arith.addf %214, %213 : vector<8x128xf32>
    %216 = arith.divf %214, %215 : vector<8x128xf32>
    %217 = vector.extract_strided_slice %184 {offsets = [0, 128], sizes = [8, 128], strides = [1, 1]} : vector<8x512xf32> to vector<8x128xf32>
    %218 = arith.negf %217 : vector<8x128xf32>
    %219 = math.exp %218 : vector<8x128xf32>
    %cst_64 = arith.constant 1.000000e+00 : f32
    %220 = vector.broadcast %cst_64 : f32 to vector<8x128xf32>
    %221 = arith.addf %220, %219 : vector<8x128xf32>
    %222 = arith.divf %220, %221 : vector<8x128xf32>
    %223 = vector.extract_strided_slice %184 {offsets = [0, 256], sizes = [8, 128], strides = [1, 1]} : vector<8x512xf32> to vector<8x128xf32>
    %224 = math.tanh %223 : vector<8x128xf32>
    %225 = vector.extract_strided_slice %184 {offsets = [0, 384], sizes = [8, 128], strides = [1, 1]} : vector<8x512xf32> to vector<8x128xf32>
    %226 = arith.negf %225 : vector<8x128xf32>
    %227 = math.exp %226 : vector<8x128xf32>
    %cst_65 = arith.constant 1.000000e+00 : f32
    %228 = vector.broadcast %cst_65 : f32 to vector<8x128xf32>
    %229 = arith.addf %228, %227 : vector<8x128xf32>
    %230 = arith.divf %228, %229 : vector<8x128xf32>
    %231 = arith.mulf %222, %171 : vector<8x128xf32>
    %232 = arith.mulf %216, %224 : vector<8x128xf32>
    %233 = arith.addf %231, %232 : vector<8x128xf32>
    %234 = math.tanh %233 : vector<8x128xf32>
    %235 = arith.mulf %230, %234 : vector<8x128xf32>
    %236 = arith.truncf %235 : vector<8x128xf32> to vector<8x128xbf16>
    %c24_66 = arith.constant 24 : index
    %c0_67 = arith.constant 0 : index
    %237 = vector.load %arg14[%c24_66, %c0_67] : memref<64x256xbf16, #tpu.memory_space<vmem>>, vector<8x128xbf16>
    tpu.vector_store %arg14[%c24_66, %c0_67], %210 {strides = array<i32>} : memref<64x256xbf16, #tpu.memory_space<vmem>>, vector<8x128xbf16>,
    %c32_68 = arith.constant 32 : index
    %c128_69 = arith.constant 128 : index
    %238 = vector.load %arg14[%c32_68, %c128_69] : memref<64x256xbf16, #tpu.memory_space<vmem>>, vector<8x128xbf16>
    tpu.vector_store %arg14[%c32_68, %c128_69], %236 {strides = array<i32>} : memref<64x256xbf16, #tpu.memory_space<vmem>>, vector<8x128xbf16>,
    %c32_70 = arith.constant 32 : index
    %c0_71 = arith.constant 0 : index
    %239 = vector.load %arg15[%c32_70, %c0_71] : memref<64x1024xf32, #tpu.memory_space<vmem>>, vector<8x512xf32>
    %c24_72 = arith.constant 24 : index
    %c512_73 = arith.constant 512 : index
    %240 = vector.load %arg15[%c24_72, %c512_73] : memref<64x1024xf32, #tpu.memory_space<vmem>>, vector<8x512xf32>
    %c0_74 = arith.constant 0 : index
    %c0_75 = arith.constant 0 : index
    %241 = vector.load %arg2[%c0_74, %c0_75] : memref<128x512xbf16, #tpu.memory_space<vmem>>, vector<128x512xbf16>
    %cst_76 = arith.constant dense<0.000000e+00> : vector<8x512xf32>
    %242 = tpu.matmul %210, %241, %cst_76 {dimension_numbers = #tpu.dot_dimension_numbers<[1], [0], [0], [1], [0, 0, 1, 1], [], []>} : vector<8x128xbf16>, vector<128x512xbf16>, vector<8x512xf32> -> vector<8x512xf32>
    %243 = arith.addf %239, %242 : vector<8x512xf32>
    %c0_77 = arith.constant 0 : index
    %c0_78 = arith.constant 0 : index
    %244 = vector.load %arg3[%c0_77, %c0_78] : memref<128x512xbf16, #tpu.memory_space<vmem>>, vector<128x512xbf16>
    %cst_79 = arith.constant dense<0.000000e+00> : vector<8x512xf32>
    %245 = tpu.matmul %236, %244, %cst_79 {dimension_numbers = #tpu.dot_dimension_numbers<[1], [0], [0], [1], [0, 0, 1, 1], [], []>} : vector<8x128xbf16>, vector<128x512xbf16>, vector<8x512xf32> -> vector<8x512xf32>
    %246 = arith.addf %240, %245 : vector<8x512xf32>
    %247 = vector.extract_strided_slice %243 {offsets = [0, 0], sizes = [8, 128], strides = [1, 1]} : vector<8x512xf32> to vector<8x128xf32>
    %248 = arith.negf %247 : vector<8x128xf32>
    %249 = math.exp %248 : vector<8x128xf32>
    %cst_80 = arith.constant 1.000000e+00 : f32
    %250 = vector.broadcast %cst_80 : f32 to vector<8x128xf32>
    %251 = arith.addf %250, %249 : vector<8x128xf32>
    %252 = arith.divf %250, %251 : vector<8x128xf32>
    %253 = vector.extract_strided_slice %243 {offsets = [0, 128], sizes = [8, 128], strides = [1, 1]} : vector<8x512xf32> to vector<8x128xf32>
    %254 = arith.negf %253 : vector<8x128xf32>
    %255 = math.exp %254 : vector<8x128xf32>
    %cst_81 = arith.constant 1.000000e+00 : f32
    %256 = vector.broadcast %cst_81 : f32 to vector<8x128xf32>
    %257 = arith.addf %256, %255 : vector<8x128xf32>
    %258 = arith.divf %256, %257 : vector<8x128xf32>
    %259 = vector.extract_strided_slice %243 {offsets = [0, 256], sizes = [8, 128], strides = [1, 1]} : vector<8x512xf32> to vector<8x128xf32>
    %260 = math.tanh %259 : vector<8x128xf32>
    %261 = vector.extract_strided_slice %243 {offsets = [0, 384], sizes = [8, 128], strides = [1, 1]} : vector<8x512xf32> to vector<8x128xf32>
    %262 = arith.negf %261 : vector<8x128xf32>
    %263 = math.exp %262 : vector<8x128xf32>
    %cst_82 = arith.constant 1.000000e+00 : f32
    %264 = vector.broadcast %cst_82 : f32 to vector<8x128xf32>
    %265 = arith.addf %264, %263 : vector<8x128xf32>
    %266 = arith.divf %264, %265 : vector<8x128xf32>
    %267 = arith.mulf %258, %207 : vector<8x128xf32>
    %268 = arith.mulf %252, %260 : vector<8x128xf32>
    %269 = arith.addf %267, %268 : vector<8x128xf32>
    %270 = math.tanh %269 : vector<8x128xf32>
    %271 = arith.mulf %266, %270 : vector<8x128xf32>
    %272 = arith.truncf %271 : vector<8x128xf32> to vector<8x128xbf16>
    %273 = vector.extract_strided_slice %246 {offsets = [0, 0], sizes = [8, 128], strides = [1, 1]} : vector<8x512xf32> to vector<8x128xf32>
    %274 = arith.negf %273 : vector<8x128xf32>
    %275 = math.exp %274 : vector<8x128xf32>
    %cst_83 = arith.constant 1.000000e+00 : f32
    %276 = vector.broadcast %cst_83 : f32 to vector<8x128xf32>
    %277 = arith.addf %276, %275 : vector<8x128xf32>
    %278 = arith.divf %276, %277 : vector<8x128xf32>
    %279 = vector.extract_strided_slice %246 {offsets = [0, 128], sizes = [8, 128], strides = [1, 1]} : vector<8x512xf32> to vector<8x128xf32>
    %280 = arith.negf %279 : vector<8x128xf32>
    %281 = math.exp %280 : vector<8x128xf32>
    %cst_84 = arith.constant 1.000000e+00 : f32
    %282 = vector.broadcast %cst_84 : f32 to vector<8x128xf32>
    %283 = arith.addf %282, %281 : vector<8x128xf32>
    %284 = arith.divf %282, %283 : vector<8x128xf32>
    %285 = vector.extract_strided_slice %246 {offsets = [0, 256], sizes = [8, 128], strides = [1, 1]} : vector<8x512xf32> to vector<8x128xf32>
    %286 = math.tanh %285 : vector<8x128xf32>
    %287 = vector.extract_strided_slice %246 {offsets = [0, 384], sizes = [8, 128], strides = [1, 1]} : vector<8x512xf32> to vector<8x128xf32>
    %288 = arith.negf %287 : vector<8x128xf32>
    %289 = math.exp %288 : vector<8x128xf32>
    %cst_85 = arith.constant 1.000000e+00 : f32
    %290 = vector.broadcast %cst_85 : f32 to vector<8x128xf32>
    %291 = arith.addf %290, %289 : vector<8x128xf32>
    %292 = arith.divf %290, %291 : vector<8x128xf32>
    %293 = arith.mulf %284, %233 : vector<8x128xf32>
    %294 = arith.mulf %278, %286 : vector<8x128xf32>
    %295 = arith.addf %293, %294 : vector<8x128xf32>
    %296 = math.tanh %295 : vector<8x128xf32>
    %297 = arith.mulf %292, %296 : vector<8x128xf32>
    %298 = arith.truncf %297 : vector<8x128xf32> to vector<8x128xbf16>
    %c32_86 = arith.constant 32 : index
    %c0_87 = arith.constant 0 : index
    %299 = vector.load %arg14[%c32_86, %c0_87] : memref<64x256xbf16, #tpu.memory_space<vmem>>, vector<8x128xbf16>
    tpu.vector_store %arg14[%c32_86, %c0_87], %272 {strides = array<i32>} : memref<64x256xbf16, #tpu.memory_space<vmem>>, vector<8x128xbf16>,
    %c24_88 = arith.constant 24 : index
    %c128_89 = arith.constant 128 : index
    %300 = vector.load %arg14[%c24_88, %c128_89] : memref<64x256xbf16, #tpu.memory_space<vmem>>, vector<8x128xbf16>
    tpu.vector_store %arg14[%c24_88, %c128_89], %298 {strides = array<i32>} : memref<64x256xbf16, #tpu.memory_space<vmem>>, vector<8x128xbf16>,
    %c40_90 = arith.constant 40 : index
    %c0_91 = arith.constant 0 : index
    %301 = vector.load %arg15[%c40_90, %c0_91] : memref<64x1024xf32, #tpu.memory_space<vmem>>, vector<8x512xf32>
    %c16_92 = arith.constant 16 : index
    %c512_93 = arith.constant 512 : index
    %302 = vector.load %arg15[%c16_92, %c512_93] : memref<64x1024xf32, #tpu.memory_space<vmem>>, vector<8x512xf32>
    %c0_94 = arith.constant 0 : index
    %c0_95 = arith.constant 0 : index
    %303 = vector.load %arg2[%c0_94, %c0_95] : memref<128x512xbf16, #tpu.memory_space<vmem>>, vector<128x512xbf16>
    %cst_96 = arith.constant dense<0.000000e+00> : vector<8x512xf32>
    %304 = tpu.matmul %272, %303, %cst_96 {dimension_numbers = #tpu.dot_dimension_numbers<[1], [0], [0], [1], [0, 0, 1, 1], [], []>} : vector<8x128xbf16>, vector<128x512xbf16>, vector<8x512xf32> -> vector<8x512xf32>
    %305 = arith.addf %301, %304 : vector<8x512xf32>
    %c0_97 = arith.constant 0 : index
    %c0_98 = arith.constant 0 : index
    %306 = vector.load %arg3[%c0_97, %c0_98] : memref<128x512xbf16, #tpu.memory_space<vmem>>, vector<128x512xbf16>
    %cst_99 = arith.constant dense<0.000000e+00> : vector<8x512xf32>
    %307 = tpu.matmul %298, %306, %cst_99 {dimension_numbers = #tpu.dot_dimension_numbers<[1], [0], [0], [1], [0, 0, 1, 1], [], []>} : vector<8x128xbf16>, vector<128x512xbf16>, vector<8x512xf32> -> vector<8x512xf32>
    %308 = arith.addf %302, %307 : vector<8x512xf32>
    %309 = vector.extract_strided_slice %305 {offsets = [0, 0], sizes = [8, 128], strides = [1, 1]} : vector<8x512xf32> to vector<8x128xf32>
    %310 = arith.negf %309 : vector<8x128xf32>
    %311 = math.exp %310 : vector<8x128xf32>
    %cst_100 = arith.constant 1.000000e+00 : f32
    %312 = vector.broadcast %cst_100 : f32 to vector<8x128xf32>
    %313 = arith.addf %312, %311 : vector<8x128xf32>
    %314 = arith.divf %312, %313 : vector<8x128xf32>
    %315 = vector.extract_strided_slice %305 {offsets = [0, 128], sizes = [8, 128], strides = [1, 1]} : vector<8x512xf32> to vector<8x128xf32>
    %316 = arith.negf %315 : vector<8x128xf32>
    %317 = math.exp %316 : vector<8x128xf32>
    %cst_101 = arith.constant 1.000000e+00 : f32
    %318 = vector.broadcast %cst_101 : f32 to vector<8x128xf32>
    %319 = arith.addf %318, %317 : vector<8x128xf32>
    %320 = arith.divf %318, %319 : vector<8x128xf32>
    %321 = vector.extract_strided_slice %305 {offsets = [0, 256], sizes = [8, 128], strides = [1, 1]} : vector<8x512xf32> to vector<8x128xf32>
    %322 = math.tanh %321 : vector<8x128xf32>
    %323 = vector.extract_strided_slice %305 {offsets = [0, 384], sizes = [8, 128], strides = [1, 1]} : vector<8x512xf32> to vector<8x128xf32>
    %324 = arith.negf %323 : vector<8x128xf32>
    %325 = math.exp %324 : vector<8x128xf32>
    %cst_102 = arith.constant 1.000000e+00 : f32
    %326 = vector.broadcast %cst_102 : f32 to vector<8x128xf32>
    %327 = arith.addf %326, %325 : vector<8x128xf32>
    %328 = arith.divf %326, %327 : vector<8x128xf32>
    %329 = arith.mulf %320, %269 : vector<8x128xf32>
    %330 = arith.mulf %314, %322 : vector<8x128xf32>
    %331 = arith.addf %329, %330 : vector<8x128xf32>
    %332 = math.tanh %331 : vector<8x128xf32>
    %333 = arith.mulf %328, %332 : vector<8x128xf32>
    %334 = arith.truncf %333 : vector<8x128xf32> to vector<8x128xbf16>
    %335 = vector.extract_strided_slice %308 {offsets = [0, 0], sizes = [8, 128], strides = [1, 1]} : vector<8x512xf32> to vector<8x128xf32>
    %336 = arith.negf %335 : vector<8x128xf32>
    %337 = math.exp %336 : vector<8x128xf32>
    %cst_103 = arith.constant 1.000000e+00 : f32
    %338 = vector.broadcast %cst_103 : f32 to vector<8x128xf32>
    %339 = arith.addf %338, %337 : vector<8x128xf32>
    %340 = arith.divf %338, %339 : vector<8x128xf32>
    %341 = vector.extract_strided_slice %308 {offsets = [0, 128], sizes = [8, 128], strides = [1, 1]} : vector<8x512xf32> to vector<8x128xf32>
    %342 = arith.negf %341 : vector<8x128xf32>
    %343 = math.exp %342 : vector<8x128xf32>
    %cst_104 = arith.constant 1.000000e+00 : f32
    %344 = vector.broadcast %cst_104 : f32 to vector<8x128xf32>
    %345 = arith.addf %344, %343 : vector<8x128xf32>
    %346 = arith.divf %344, %345 : vector<8x128xf32>
    %347 = vector.extract_strided_slice %308 {offsets = [0, 256], sizes = [8, 128], strides = [1, 1]} : vector<8x512xf32> to vector<8x128xf32>
    %348 = math.tanh %347 : vector<8x128xf32>
    %349 = vector.extract_strided_slice %308 {offsets = [0, 384], sizes = [8, 128], strides = [1, 1]} : vector<8x512xf32> to vector<8x128xf32>
    %350 = arith.negf %349 : vector<8x128xf32>
    %351 = math.exp %350 : vector<8x128xf32>
    %cst_105 = arith.constant 1.000000e+00 : f32
    %352 = vector.broadcast %cst_105 : f32 to vector<8x128xf32>
    %353 = arith.addf %352, %351 : vector<8x128xf32>
    %354 = arith.divf %352, %353 : vector<8x128xf32>
    %355 = arith.mulf %346, %295 : vector<8x128xf32>
    %356 = arith.mulf %340, %348 : vector<8x128xf32>
    %357 = arith.addf %355, %356 : vector<8x128xf32>
    %358 = math.tanh %357 : vector<8x128xf32>
    %359 = arith.mulf %354, %358 : vector<8x128xf32>
    %360 = arith.truncf %359 : vector<8x128xf32> to vector<8x128xbf16>
    %c40_106 = arith.constant 40 : index
    %c0_107 = arith.constant 0 : index
    %361 = vector.load %arg14[%c40_106, %c0_107] : memref<64x256xbf16, #tpu.memory_space<vmem>>, vector<8x128xbf16>
    tpu.vector_store %arg14[%c40_106, %c0_107], %334 {strides = array<i32>} : memref<64x256xbf16, #tpu.memory_space<vmem>>, vector<8x128xbf16>,
    %c16_108 = arith.constant 16 : index
    %c128_109 = arith.constant 128 : index
    %362 = vector.load %arg14[%c16_108, %c128_109] : memref<64x256xbf16, #tpu.memory_space<vmem>>, vector<8x128xbf16>
    tpu.vector_store %arg14[%c16_108, %c128_109], %360 {strides = array<i32>} : memref<64x256xbf16, #tpu.memory_space<vmem>>, vector<8x128xbf16>,
    %c48_110 = arith.constant 48 : index
    %c0_111 = arith.constant 0 : index
    %363 = vector.load %arg15[%c48_110, %c0_111] : memref<64x1024xf32, #tpu.memory_space<vmem>>, vector<8x512xf32>
    %c8_112 = arith.constant 8 : index
    %c512_113 = arith.constant 512 : index
    %364 = vector.load %arg15[%c8_112, %c512_113] : memref<64x1024xf32, #tpu.memory_space<vmem>>, vector<8x512xf32>
    %c0_114 = arith.constant 0 : index
    %c0_115 = arith.constant 0 : index
    %365 = vector.load %arg2[%c0_114, %c0_115] : memref<128x512xbf16, #tpu.memory_space<vmem>>, vector<128x512xbf16>
    %cst_116 = arith.constant dense<0.000000e+00> : vector<8x512xf32>
    %366 = tpu.matmul %334, %365, %cst_116 {dimension_numbers = #tpu.dot_dimension_numbers<[1], [0], [0], [1], [0, 0, 1, 1], [], []>} : vector<8x128xbf16>, vector<128x512xbf16>, vector<8x512xf32> -> vector<8x512xf32>
    %367 = arith.addf %363, %366 : vector<8x512xf32>
    %c0_117 = arith.constant 0 : index
    %c0_118 = arith.constant 0 : index
    %368 = vector.load %arg3[%c0_117, %c0_118] : memref<128x512xbf16, #tpu.memory_space<vmem>>, vector<128x512xbf16>
    %cst_119 = arith.constant dense<0.000000e+00> : vector<8x512xf32>
    %369 = tpu.matmul %360, %368, %cst_119 {dimension_numbers = #tpu.dot_dimension_numbers<[1], [0], [0], [1], [0, 0, 1, 1], [], []>} : vector<8x128xbf16>, vector<128x512xbf16>, vector<8x512xf32> -> vector<8x512xf32>
    %370 = arith.addf %364, %369 : vector<8x512xf32>
    %371 = vector.extract_strided_slice %367 {offsets = [0, 0], sizes = [8, 128], strides = [1, 1]} : vector<8x512xf32> to vector<8x128xf32>
    %372 = arith.negf %371 : vector<8x128xf32>
    %373 = math.exp %372 : vector<8x128xf32>
    %cst_120 = arith.constant 1.000000e+00 : f32
    %374 = vector.broadcast %cst_120 : f32 to vector<8x128xf32>
    %375 = arith.addf %374, %373 : vector<8x128xf32>
    %376 = arith.divf %374, %375 : vector<8x128xf32>
    %377 = vector.extract_strided_slice %367 {offsets = [0, 128], sizes = [8, 128], strides = [1, 1]} : vector<8x512xf32> to vector<8x128xf32>
    %378 = arith.negf %377 : vector<8x128xf32>
    %379 = math.exp %378 : vector<8x128xf32>
    %cst_121 = arith.constant 1.000000e+00 : f32
    %380 = vector.broadcast %cst_121 : f32 to vector<8x128xf32>
    %381 = arith.addf %380, %379 : vector<8x128xf32>
    %382 = arith.divf %380, %381 : vector<8x128xf32>
    %383 = vector.extract_strided_slice %367 {offsets = [0, 256], sizes = [8, 128], strides = [1, 1]} : vector<8x512xf32> to vector<8x128xf32>
    %384 = math.tanh %383 : vector<8x128xf32>
    %385 = vector.extract_strided_slice %367 {offsets = [0, 384], sizes = [8, 128], strides = [1, 1]} : vector<8x512xf32> to vector<8x128xf32>
    %386 = arith.negf %385 : vector<8x128xf32>
    %387 = math.exp %386 : vector<8x128xf32>
    %cst_122 = arith.constant 1.000000e+00 : f32
    %388 = vector.broadcast %cst_122 : f32 to vector<8x128xf32>
    %389 = arith.addf %388, %387 : vector<8x128xf32>
    %390 = arith.divf %388, %389 : vector<8x128xf32>
    %391 = arith.mulf %382, %331 : vector<8x128xf32>
    %392 = arith.mulf %376, %384 : vector<8x128xf32>
    %393 = arith.addf %391, %392 : vector<8x128xf32>
    %394 = math.tanh %393 : vector<8x128xf32>
    %395 = arith.mulf %390, %394 : vector<8x128xf32>
    %396 = arith.truncf %395 : vector<8x128xf32> to vector<8x128xbf16>
    %397 = vector.extract_strided_slice %370 {offsets = [0, 0], sizes = [8, 128], strides = [1, 1]} : vector<8x512xf32> to vector<8x128xf32>
    %398 = arith.negf %397 : vector<8x128xf32>
    %399 = math.exp %398 : vector<8x128xf32>
    %cst_123 = arith.constant 1.000000e+00 : f32
    %400 = vector.broadcast %cst_123 : f32 to vector<8x128xf32>
    %401 = arith.addf %400, %399 : vector<8x128xf32>
    %402 = arith.divf %400, %401 : vector<8x128xf32>
    %403 = vector.extract_strided_slice %370 {offsets = [0, 128], sizes = [8, 128], strides = [1, 1]} : vector<8x512xf32> to vector<8x128xf32>
    %404 = arith.negf %403 : vector<8x128xf32>
    %405 = math.exp %404 : vector<8x128xf32>
    %cst_124 = arith.constant 1.000000e+00 : f32
    %406 = vector.broadcast %cst_124 : f32 to vector<8x128xf32>
    %407 = arith.addf %406, %405 : vector<8x128xf32>
    %408 = arith.divf %406, %407 : vector<8x128xf32>
    %409 = vector.extract_strided_slice %370 {offsets = [0, 256], sizes = [8, 128], strides = [1, 1]} : vector<8x512xf32> to vector<8x128xf32>
    %410 = math.tanh %409 : vector<8x128xf32>
    %411 = vector.extract_strided_slice %370 {offsets = [0, 384], sizes = [8, 128], strides = [1, 1]} : vector<8x512xf32> to vector<8x128xf32>
    %412 = arith.negf %411 : vector<8x128xf32>
    %413 = math.exp %412 : vector<8x128xf32>
    %cst_125 = arith.constant 1.000000e+00 : f32
    %414 = vector.broadcast %cst_125 : f32 to vector<8x128xf32>
    %415 = arith.addf %414, %413 : vector<8x128xf32>
    %416 = arith.divf %414, %415 : vector<8x128xf32>
    %417 = arith.mulf %408, %357 : vector<8x128xf32>
    %418 = arith.mulf %402, %410 : vector<8x128xf32>
    %419 = arith.addf %417, %418 : vector<8x128xf32>
    %420 = math.tanh %419 : vector<8x128xf32>
    %421 = arith.mulf %416, %420 : vector<8x128xf32>
    %422 = arith.truncf %421 : vector<8x128xf32> to vector<8x128xbf16>
    %c48_126 = arith.constant 48 : index
    %c0_127 = arith.constant 0 : index
    %423 = vector.load %arg14[%c48_126, %c0_127] : memref<64x256xbf16, #tpu.memory_space<vmem>>, vector<8x128xbf16>
    tpu.vector_store %arg14[%c48_126, %c0_127], %396 {strides = array<i32>} : memref<64x256xbf16, #tpu.memory_space<vmem>>, vector<8x128xbf16>,
    %c8_128 = arith.constant 8 : index
    %c128_129 = arith.constant 128 : index
    %424 = vector.load %arg14[%c8_128, %c128_129] : memref<64x256xbf16, #tpu.memory_space<vmem>>, vector<8x128xbf16>
    tpu.vector_store %arg14[%c8_128, %c128_129], %422 {strides = array<i32>} : memref<64x256xbf16, #tpu.memory_space<vmem>>, vector<8x128xbf16>,
    %c56_130 = arith.constant 56 : index
    %c0_131 = arith.constant 0 : index
    %425 = vector.load %arg15[%c56_130, %c0_131] : memref<64x1024xf32, #tpu.memory_space<vmem>>, vector<8x512xf32>
    %c0_132 = arith.constant 0 : index
    %c512_133 = arith.constant 512 : index
    %426 = vector.load %arg15[%c0_132, %c512_133] : memref<64x1024xf32, #tpu.memory_space<vmem>>, vector<8x512xf32>
    %c0_134 = arith.constant 0 : index
    %c0_135 = arith.constant 0 : index
    %427 = vector.load %arg2[%c0_134, %c0_135] : memref<128x512xbf16, #tpu.memory_space<vmem>>, vector<128x512xbf16>
    %cst_136 = arith.constant dense<0.000000e+00> : vector<8x512xf32>
    %428 = tpu.matmul %396, %427, %cst_136 {dimension_numbers = #tpu.dot_dimension_numbers<[1], [0], [0], [1], [0, 0, 1, 1], [], []>} : vector<8x128xbf16>, vector<128x512xbf16>, vector<8x512xf32> -> vector<8x512xf32>
    %429 = arith.addf %425, %428 : vector<8x512xf32>
    %c0_137 = arith.constant 0 : index
    %c0_138 = arith.constant 0 : index
    %430 = vector.load %arg3[%c0_137, %c0_138] : memref<128x512xbf16, #tpu.memory_space<vmem>>, vector<128x512xbf16>
    %cst_139 = arith.constant dense<0.000000e+00> : vector<8x512xf32>
    %431 = tpu.matmul %422, %430, %cst_139 {dimension_numbers = #tpu.dot_dimension_numbers<[1], [0], [0], [1], [0, 0, 1, 1], [], []>} : vector<8x128xbf16>, vector<128x512xbf16>, vector<8x512xf32> -> vector<8x512xf32>
    %432 = arith.addf %426, %431 : vector<8x512xf32>
    %433 = vector.extract_strided_slice %429 {offsets = [0, 0], sizes = [8, 128], strides = [1, 1]} : vector<8x512xf32> to vector<8x128xf32>
    %434 = arith.negf %433 : vector<8x128xf32>
    %435 = math.exp %434 : vector<8x128xf32>
    %cst_140 = arith.constant 1.000000e+00 : f32
    %436 = vector.broadcast %cst_140 : f32 to vector<8x128xf32>
    %437 = arith.addf %436, %435 : vector<8x128xf32>
    %438 = arith.divf %436, %437 : vector<8x128xf32>
    %439 = vector.extract_strided_slice %429 {offsets = [0, 128], sizes = [8, 128], strides = [1, 1]} : vector<8x512xf32> to vector<8x128xf32>
    %440 = arith.negf %439 : vector<8x128xf32>
    %441 = math.exp %440 : vector<8x128xf32>
    %cst_141 = arith.constant 1.000000e+00 : f32
    %442 = vector.broadcast %cst_141 : f32 to vector<8x128xf32>
    %443 = arith.addf %442, %441 : vector<8x128xf32>
    %444 = arith.divf %442, %443 : vector<8x128xf32>
    %445 = vector.extract_strided_slice %429 {offsets = [0, 256], sizes = [8, 128], strides = [1, 1]} : vector<8x512xf32> to vector<8x128xf32>
    %446 = math.tanh %445 : vector<8x128xf32>
    %447 = vector.extract_strided_slice %429 {offsets = [0, 384], sizes = [8, 128], strides = [1, 1]} : vector<8x512xf32> to vector<8x128xf32>
    %448 = arith.negf %447 : vector<8x128xf32>
    %449 = math.exp %448 : vector<8x128xf32>
    %cst_142 = arith.constant 1.000000e+00 : f32
    %450 = vector.broadcast %cst_142 : f32 to vector<8x128xf32>
    %451 = arith.addf %450, %449 : vector<8x128xf32>
    %452 = arith.divf %450, %451 : vector<8x128xf32>
    %453 = arith.mulf %444, %393 : vector<8x128xf32>
    %454 = arith.mulf %438, %446 : vector<8x128xf32>
    %455 = arith.addf %453, %454 : vector<8x128xf32>
    %456 = math.tanh %455 : vector<8x128xf32>
    %457 = arith.mulf %452, %456 : vector<8x128xf32>
    %458 = arith.truncf %457 : vector<8x128xf32> to vector<8x128xbf16>
    %459 = vector.extract_strided_slice %432 {offsets = [0, 0], sizes = [8, 128], strides = [1, 1]} : vector<8x512xf32> to vector<8x128xf32>
    %460 = arith.negf %459 : vector<8x128xf32>
    %461 = math.exp %460 : vector<8x128xf32>
    %cst_143 = arith.constant 1.000000e+00 : f32
    %462 = vector.broadcast %cst_143 : f32 to vector<8x128xf32>
    %463 = arith.addf %462, %461 : vector<8x128xf32>
    %464 = arith.divf %462, %463 : vector<8x128xf32>
    %465 = vector.extract_strided_slice %432 {offsets = [0, 128], sizes = [8, 128], strides = [1, 1]} : vector<8x512xf32> to vector<8x128xf32>
    %466 = arith.negf %465 : vector<8x128xf32>
    %467 = math.exp %466 : vector<8x128xf32>
    %cst_144 = arith.constant 1.000000e+00 : f32
    %468 = vector.broadcast %cst_144 : f32 to vector<8x128xf32>
    %469 = arith.addf %468, %467 : vector<8x128xf32>
    %470 = arith.divf %468, %469 : vector<8x128xf32>
    %471 = vector.extract_strided_slice %432 {offsets = [0, 256], sizes = [8, 128], strides = [1, 1]} : vector<8x512xf32> to vector<8x128xf32>
    %472 = math.tanh %471 : vector<8x128xf32>
    %473 = vector.extract_strided_slice %432 {offsets = [0, 384], sizes = [8, 128], strides = [1, 1]} : vector<8x512xf32> to vector<8x128xf32>
    %474 = arith.negf %473 : vector<8x128xf32>
    %475 = math.exp %474 : vector<8x128xf32>
    %cst_145 = arith.constant 1.000000e+00 : f32
    %476 = vector.broadcast %cst_145 : f32 to vector<8x128xf32>
    %477 = arith.addf %476, %475 : vector<8x128xf32>
    %478 = arith.divf %476, %477 : vector<8x128xf32>
    %479 = arith.mulf %470, %419 : vector<8x128xf32>
    %480 = arith.mulf %464, %472 : vector<8x128xf32>
    %481 = arith.addf %479, %480 : vector<8x128xf32>
    %482 = math.tanh %481 : vector<8x128xf32>
    %483 = arith.mulf %478, %482 : vector<8x128xf32>
    %484 = arith.truncf %483 : vector<8x128xf32> to vector<8x128xbf16>
    %c56_146 = arith.constant 56 : index
    %c0_147 = arith.constant 0 : index
    %485 = vector.load %arg14[%c56_146, %c0_147] : memref<64x256xbf16, #tpu.memory_space<vmem>>, vector<8x128xbf16>
    tpu.vector_store %arg14[%c56_146, %c0_147], %458 {strides = array<i32>} : memref<64x256xbf16, #tpu.memory_space<vmem>>, vector<8x128xbf16>,
    %c0_148 = arith.constant 0 : index
    %c128_149 = arith.constant 128 : index
    %486 = vector.load %arg14[%c0_148, %c128_149] : memref<64x256xbf16, #tpu.memory_space<vmem>>, vector<8x128xbf16>
    tpu.vector_store %arg14[%c0_148, %c128_149], %484 {strides = array<i32>} : memref<64x256xbf16, #tpu.memory_space<vmem>>, vector<8x128xbf16>,
    %c0_150 = arith.constant 0 : index
    %c0_151 = arith.constant 0 : index
    %487 = vector.load %arg14[%c0_150, %c0_151] : memref<64x256xbf16, #tpu.memory_space<vmem>>, vector<64x256xbf16>
    %c0_152 = arith.constant 0 : index
    %c0_153 = arith.constant 0 : index
    %488 = vector.load %arg5[%c0_152, %c0_153] : memref<256x1024xbf16, #tpu.memory_space<vmem>>, vector<256x1024xbf16>
    %cst_154 = arith.constant dense<0.000000e+00> : vector<64x1024xf32>
    %489 = tpu.matmul %487, %488, %cst_154 {dimension_numbers = #tpu.dot_dimension_numbers<[1], [0], [0], [1], [0, 0, 1, 1], [], []>} : vector<64x256xbf16>, vector<256x1024xbf16>, vector<64x1024xf32> -> vector<64x1024xf32>
    %c0_155 = arith.constant 0 : index
    %c0_156 = arith.constant 0 : index
    %490 = vector.load %arg8[%c0_155, %c0_156] : memref<1x1024xf32, #tpu.memory_space<vmem>>, vector<1x1024xf32>
    %491 = vector.broadcast %490 : vector<1x1024xf32> to vector<64x1024xf32>
    %492 = arith.addf %489, %491 : vector<64x1024xf32>
    %c0_157 = arith.constant 0 : index
    %c0_158 = arith.constant 0 : index
    %493 = vector.load %arg15[%c0_157, %c0_158] : memref<64x1024xf32, #tpu.memory_space<vmem>>, vector<64x1024xf32>
    tpu.vector_store %arg15[%c0_157, %c0_158], %492 {strides = array<i32>} : memref<64x1024xf32, #tpu.memory_space<vmem>>, vector<64x1024xf32>,
    %c0_159 = arith.constant 0 : index
    %c0_160 = arith.constant 0 : index
    %494 = vector.load %arg15[%c0_159, %c0_160] : memref<64x1024xf32, #tpu.memory_space<vmem>>, vector<8x512xf32>
    %c56_161 = arith.constant 56 : index
    %c512_162 = arith.constant 512 : index
    %495 = vector.load %arg15[%c56_161, %c512_162] : memref<64x1024xf32, #tpu.memory_space<vmem>>, vector<8x512xf32>
    %496 = vector.extract_strided_slice %494 {offsets = [0, 0], sizes = [8, 128], strides = [1, 1]} : vector<8x512xf32> to vector<8x128xf32>
    %497 = arith.negf %496 : vector<8x128xf32>
    %498 = math.exp %497 : vector<8x128xf32>
    %cst_163 = arith.constant 1.000000e+00 : f32
    %499 = vector.broadcast %cst_163 : f32 to vector<8x128xf32>
    %500 = arith.addf %499, %498 : vector<8x128xf32>
    %501 = arith.divf %499, %500 : vector<8x128xf32>
    %502 = vector.extract_strided_slice %494 {offsets = [0, 256], sizes = [8, 128], strides = [1, 1]} : vector<8x512xf32> to vector<8x128xf32>
    %503 = math.tanh %502 : vector<8x128xf32>
    %504 = vector.extract_strided_slice %494 {offsets = [0, 384], sizes = [8, 128], strides = [1, 1]} : vector<8x512xf32> to vector<8x128xf32>
    %505 = arith.negf %504 : vector<8x128xf32>
    %506 = math.exp %505 : vector<8x128xf32>
    %cst_164 = arith.constant 1.000000e+00 : f32
    %507 = vector.broadcast %cst_164 : f32 to vector<8x128xf32>
    %508 = arith.addf %507, %506 : vector<8x128xf32>
    %509 = arith.divf %507, %508 : vector<8x128xf32>
    %510 = arith.mulf %501, %503 : vector<8x128xf32>
    %511 = math.tanh %510 : vector<8x128xf32>
    %512 = arith.mulf %509, %511 : vector<8x128xf32>
    %513 = arith.truncf %512 : vector<8x128xf32> to vector<8x128xbf16>
    %514 = vector.extract_strided_slice %495 {offsets = [0, 0], sizes = [8, 128], strides = [1, 1]} : vector<8x512xf32> to vector<8x128xf32>
    %515 = arith.negf %514 : vector<8x128xf32>
    %516 = math.exp %515 : vector<8x128xf32>
    %cst_165 = arith.constant 1.000000e+00 : f32
    %517 = vector.broadcast %cst_165 : f32 to vector<8x128xf32>
    %518 = arith.addf %517, %516 : vector<8x128xf32>
    %519 = arith.divf %517, %518 : vector<8x128xf32>
    %520 = vector.extract_strided_slice %495 {offsets = [0, 256], sizes = [8, 128], strides = [1, 1]} : vector<8x512xf32> to vector<8x128xf32>
    %521 = math.tanh %520 : vector<8x128xf32>
    %522 = vector.extract_strided_slice %495 {offsets = [0, 384], sizes = [8, 128], strides = [1, 1]} : vector<8x512xf32> to vector<8x128xf32>
    %523 = arith.negf %522 : vector<8x128xf32>
    %524 = math.exp %523 : vector<8x128xf32>
    %cst_166 = arith.constant 1.000000e+00 : f32
    %525 = vector.broadcast %cst_166 : f32 to vector<8x128xf32>
    %526 = arith.addf %525, %524 : vector<8x128xf32>
    %527 = arith.divf %525, %526 : vector<8x128xf32>
    %528 = arith.mulf %519, %521 : vector<8x128xf32>
    %529 = math.tanh %528 : vector<8x128xf32>
    %530 = arith.mulf %527, %529 : vector<8x128xf32>
    %531 = arith.truncf %530 : vector<8x128xf32> to vector<8x128xbf16>
    %c8_167 = arith.constant 8 : index
    %c0_168 = arith.constant 0 : index
    %532 = vector.load %arg15[%c8_167, %c0_168] : memref<64x1024xf32, #tpu.memory_space<vmem>>, vector<8x512xf32>
    %c0_169 = arith.constant 0 : index
    %c0_170 = arith.constant 0 : index
    %533 = vector.load %arg6[%c0_169, %c0_170] : memref<128x512xbf16, #tpu.memory_space<vmem>>, vector<128x512xbf16>
    %cst_171 = arith.constant dense<0.000000e+00> : vector<8x512xf32>
    %534 = tpu.matmul %513, %533, %cst_171 {dimension_numbers = #tpu.dot_dimension_numbers<[1], [0], [0], [1], [0, 0, 1, 1], [], []>} : vector<8x128xbf16>, vector<128x512xbf16>, vector<8x512xf32> -> vector<8x512xf32>
    %535 = arith.addf %532, %534 : vector<8x512xf32>
    %536 = vector.extract_strided_slice %535 {offsets = [0, 0], sizes = [8, 128], strides = [1, 1]} : vector<8x512xf32> to vector<8x128xf32>
    %537 = arith.negf %536 : vector<8x128xf32>
    %538 = math.exp %537 : vector<8x128xf32>
    %cst_172 = arith.constant 1.000000e+00 : f32
    %539 = vector.broadcast %cst_172 : f32 to vector<8x128xf32>
    %540 = arith.addf %539, %538 : vector<8x128xf32>
    %541 = arith.divf %539, %540 : vector<8x128xf32>
    %542 = vector.extract_strided_slice %535 {offsets = [0, 128], sizes = [8, 128], strides = [1, 1]} : vector<8x512xf32> to vector<8x128xf32>
    %543 = arith.negf %542 : vector<8x128xf32>
    %544 = math.exp %543 : vector<8x128xf32>
    %cst_173 = arith.constant 1.000000e+00 : f32
    %545 = vector.broadcast %cst_173 : f32 to vector<8x128xf32>
    %546 = arith.addf %545, %544 : vector<8x128xf32>
    %547 = arith.divf %545, %546 : vector<8x128xf32>
    %548 = vector.extract_strided_slice %535 {offsets = [0, 256], sizes = [8, 128], strides = [1, 1]} : vector<8x512xf32> to vector<8x128xf32>
    %549 = math.tanh %548 : vector<8x128xf32>
    %550 = vector.extract_strided_slice %535 {offsets = [0, 384], sizes = [8, 128], strides = [1, 1]} : vector<8x512xf32> to vector<8x128xf32>
    %551 = arith.negf %550 : vector<8x128xf32>
    %552 = math.exp %551 : vector<8x128xf32>
    %cst_174 = arith.constant 1.000000e+00 : f32
    %553 = vector.broadcast %cst_174 : f32 to vector<8x128xf32>
    %554 = arith.addf %553, %552 : vector<8x128xf32>
    %555 = arith.divf %553, %554 : vector<8x128xf32>
    %556 = arith.mulf %547, %510 : vector<8x128xf32>
    %557 = arith.mulf %541, %549 : vector<8x128xf32>
    %558 = arith.addf %556, %557 : vector<8x128xf32>
    %559 = math.tanh %558 : vector<8x128xf32>
    %560 = arith.mulf %555, %559 : vector<8x128xf32>
    %561 = arith.truncf %560 : vector<8x128xf32> to vector<8x128xbf16>
    %c16_175 = arith.constant 16 : index
    %c0_176 = arith.constant 0 : index
    %562 = vector.load %arg15[%c16_175, %c0_176] : memref<64x1024xf32, #tpu.memory_space<vmem>>, vector<8x512xf32>
    %c0_177 = arith.constant 0 : index
    %c0_178 = arith.constant 0 : index
    %563 = vector.load %arg6[%c0_177, %c0_178] : memref<128x512xbf16, #tpu.memory_space<vmem>>, vector<128x512xbf16>
    %cst_179 = arith.constant dense<0.000000e+00> : vector<8x512xf32>
    %564 = tpu.matmul %561, %563, %cst_179 {dimension_numbers = #tpu.dot_dimension_numbers<[1], [0], [0], [1], [0, 0, 1, 1], [], []>} : vector<8x128xbf16>, vector<128x512xbf16>, vector<8x512xf32> -> vector<8x512xf32>
    %565 = arith.addf %562, %564 : vector<8x512xf32>
    %566 = vector.extract_strided_slice %565 {offsets = [0, 0], sizes = [8, 128], strides = [1, 1]} : vector<8x512xf32> to vector<8x128xf32>
    %567 = arith.negf %566 : vector<8x128xf32>
    %568 = math.exp %567 : vector<8x128xf32>
    %cst_180 = arith.constant 1.000000e+00 : f32
    %569 = vector.broadcast %cst_180 : f32 to vector<8x128xf32>
    %570 = arith.addf %569, %568 : vector<8x128xf32>
    %571 = arith.divf %569, %570 : vector<8x128xf32>
    %572 = vector.extract_strided_slice %565 {offsets = [0, 128], sizes = [8, 128], strides = [1, 1]} : vector<8x512xf32> to vector<8x128xf32>
    %573 = arith.negf %572 : vector<8x128xf32>
    %574 = math.exp %573 : vector<8x128xf32>
    %cst_181 = arith.constant 1.000000e+00 : f32
    %575 = vector.broadcast %cst_181 : f32 to vector<8x128xf32>
    %576 = arith.addf %575, %574 : vector<8x128xf32>
    %577 = arith.divf %575, %576 : vector<8x128xf32>
    %578 = vector.extract_strided_slice %565 {offsets = [0, 256], sizes = [8, 128], strides = [1, 1]} : vector<8x512xf32> to vector<8x128xf32>
    %579 = math.tanh %578 : vector<8x128xf32>
    %580 = vector.extract_strided_slice %565 {offsets = [0, 384], sizes = [8, 128], strides = [1, 1]} : vector<8x512xf32> to vector<8x128xf32>
    %581 = arith.negf %580 : vector<8x128xf32>
    %582 = math.exp %581 : vector<8x128xf32>
    %cst_182 = arith.constant 1.000000e+00 : f32
    %583 = vector.broadcast %cst_182 : f32 to vector<8x128xf32>
    %584 = arith.addf %583, %582 : vector<8x128xf32>
    %585 = arith.divf %583, %584 : vector<8x128xf32>
    %586 = arith.mulf %577, %558 : vector<8x128xf32>
    %587 = arith.mulf %571, %579 : vector<8x128xf32>
    %588 = arith.addf %586, %587 : vector<8x128xf32>
    %589 = math.tanh %588 : vector<8x128xf32>
    %590 = arith.mulf %585, %589 : vector<8x128xf32>
    %591 = arith.truncf %590 : vector<8x128xf32> to vector<8x128xbf16>
    %c24_183 = arith.constant 24 : index
    %c0_184 = arith.constant 0 : index
    %592 = vector.load %arg15[%c24_183, %c0_184] : memref<64x1024xf32, #tpu.memory_space<vmem>>, vector<8x512xf32>
    %c0_185 = arith.constant 0 : index
    %c0_186 = arith.constant 0 : index
    %593 = vector.load %arg6[%c0_185, %c0_186] : memref<128x512xbf16, #tpu.memory_space<vmem>>, vector<128x512xbf16>
    %cst_187 = arith.constant dense<0.000000e+00> : vector<8x512xf32>
    %594 = tpu.matmul %591, %593, %cst_187 {dimension_numbers = #tpu.dot_dimension_numbers<[1], [0], [0], [1], [0, 0, 1, 1], [], []>} : vector<8x128xbf16>, vector<128x512xbf16>, vector<8x512xf32> -> vector<8x512xf32>
    %595 = arith.addf %592, %594 : vector<8x512xf32>
    %596 = vector.extract_strided_slice %595 {offsets = [0, 0], sizes = [8, 128], strides = [1, 1]} : vector<8x512xf32> to vector<8x128xf32>
    %597 = arith.negf %596 : vector<8x128xf32>
    %598 = math.exp %597 : vector<8x128xf32>
    %cst_188 = arith.constant 1.000000e+00 : f32
    %599 = vector.broadcast %cst_188 : f32 to vector<8x128xf32>
    %600 = arith.addf %599, %598 : vector<8x128xf32>
    %601 = arith.divf %599, %600 : vector<8x128xf32>
    %602 = vector.extract_strided_slice %595 {offsets = [0, 128], sizes = [8, 128], strides = [1, 1]} : vector<8x512xf32> to vector<8x128xf32>
    %603 = arith.negf %602 : vector<8x128xf32>
    %604 = math.exp %603 : vector<8x128xf32>
    %cst_189 = arith.constant 1.000000e+00 : f32
    %605 = vector.broadcast %cst_189 : f32 to vector<8x128xf32>
    %606 = arith.addf %605, %604 : vector<8x128xf32>
    %607 = arith.divf %605, %606 : vector<8x128xf32>
    %608 = vector.extract_strided_slice %595 {offsets = [0, 256], sizes = [8, 128], strides = [1, 1]} : vector<8x512xf32> to vector<8x128xf32>
    %609 = math.tanh %608 : vector<8x128xf32>
    %610 = vector.extract_strided_slice %595 {offsets = [0, 384], sizes = [8, 128], strides = [1, 1]} : vector<8x512xf32> to vector<8x128xf32>
    %611 = arith.negf %610 : vector<8x128xf32>
    %612 = math.exp %611 : vector<8x128xf32>
    %cst_190 = arith.constant 1.000000e+00 : f32
    %613 = vector.broadcast %cst_190 : f32 to vector<8x128xf32>
    %614 = arith.addf %613, %612 : vector<8x128xf32>
    %615 = arith.divf %613, %614 : vector<8x128xf32>
    %616 = arith.mulf %607, %588 : vector<8x128xf32>
    %617 = arith.mulf %601, %609 : vector<8x128xf32>
    %618 = arith.addf %616, %617 : vector<8x128xf32>
    %619 = math.tanh %618 : vector<8x128xf32>
    %620 = arith.mulf %615, %619 : vector<8x128xf32>
    %621 = arith.truncf %620 : vector<8x128xf32> to vector<8x128xbf16>
    %c32_191 = arith.constant 32 : index
    %c0_192 = arith.constant 0 : index
    %622 = vector.load %arg15[%c32_191, %c0_192] : memref<64x1024xf32, #tpu.memory_space<vmem>>, vector<8x512xf32>
    %c0_193 = arith.constant 0 : index
    %c0_194 = arith.constant 0 : index
    %623 = vector.load %arg6[%c0_193, %c0_194] : memref<128x512xbf16, #tpu.memory_space<vmem>>, vector<128x512xbf16>
    %cst_195 = arith.constant dense<0.000000e+00> : vector<8x512xf32>
    %624 = tpu.matmul %621, %623, %cst_195 {dimension_numbers = #tpu.dot_dimension_numbers<[1], [0], [0], [1], [0, 0, 1, 1], [], []>} : vector<8x128xbf16>, vector<128x512xbf16>, vector<8x512xf32> -> vector<8x512xf32>
    %625 = arith.addf %622, %624 : vector<8x512xf32>
    %626 = vector.extract_strided_slice %625 {offsets = [0, 0], sizes = [8, 128], strides = [1, 1]} : vector<8x512xf32> to vector<8x128xf32>
    %627 = arith.negf %626 : vector<8x128xf32>
    %628 = math.exp %627 : vector<8x128xf32>
    %cst_196 = arith.constant 1.000000e+00 : f32
    %629 = vector.broadcast %cst_196 : f32 to vector<8x128xf32>
    %630 = arith.addf %629, %628 : vector<8x128xf32>
    %631 = arith.divf %629, %630 : vector<8x128xf32>
    %632 = vector.extract_strided_slice %625 {offsets = [0, 128], sizes = [8, 128], strides = [1, 1]} : vector<8x512xf32> to vector<8x128xf32>
    %633 = arith.negf %632 : vector<8x128xf32>
    %634 = math.exp %633 : vector<8x128xf32>
    %cst_197 = arith.constant 1.000000e+00 : f32
    %635 = vector.broadcast %cst_197 : f32 to vector<8x128xf32>
    %636 = arith.addf %635, %634 : vector<8x128xf32>
    %637 = arith.divf %635, %636 : vector<8x128xf32>
    %638 = vector.extract_strided_slice %625 {offsets = [0, 256], sizes = [8, 128], strides = [1, 1]} : vector<8x512xf32> to vector<8x128xf32>
    %639 = math.tanh %638 : vector<8x128xf32>
    %640 = vector.extract_strided_slice %625 {offsets = [0, 384], sizes = [8, 128], strides = [1, 1]} : vector<8x512xf32> to vector<8x128xf32>
    %641 = arith.negf %640 : vector<8x128xf32>
    %642 = math.exp %641 : vector<8x128xf32>
    %cst_198 = arith.constant 1.000000e+00 : f32
    %643 = vector.broadcast %cst_198 : f32 to vector<8x128xf32>
    %644 = arith.addf %643, %642 : vector<8x128xf32>
    %645 = arith.divf %643, %644 : vector<8x128xf32>
    %646 = arith.mulf %637, %618 : vector<8x128xf32>
    %647 = arith.mulf %631, %639 : vector<8x128xf32>
    %648 = arith.addf %646, %647 : vector<8x128xf32>
    %649 = math.tanh %648 : vector<8x128xf32>
    %650 = arith.mulf %645, %649 : vector<8x128xf32>
    %651 = arith.truncf %650 : vector<8x128xf32> to vector<8x128xbf16>
    %c40_199 = arith.constant 40 : index
    %c0_200 = arith.constant 0 : index
    %652 = vector.load %arg15[%c40_199, %c0_200] : memref<64x1024xf32, #tpu.memory_space<vmem>>, vector<8x512xf32>
    %c0_201 = arith.constant 0 : index
    %c0_202 = arith.constant 0 : index
    %653 = vector.load %arg6[%c0_201, %c0_202] : memref<128x512xbf16, #tpu.memory_space<vmem>>, vector<128x512xbf16>
    %cst_203 = arith.constant dense<0.000000e+00> : vector<8x512xf32>
    %654 = tpu.matmul %651, %653, %cst_203 {dimension_numbers = #tpu.dot_dimension_numbers<[1], [0], [0], [1], [0, 0, 1, 1], [], []>} : vector<8x128xbf16>, vector<128x512xbf16>, vector<8x512xf32> -> vector<8x512xf32>
    %655 = arith.addf %652, %654 : vector<8x512xf32>
    %656 = vector.extract_strided_slice %655 {offsets = [0, 0], sizes = [8, 128], strides = [1, 1]} : vector<8x512xf32> to vector<8x128xf32>
    %657 = arith.negf %656 : vector<8x128xf32>
    %658 = math.exp %657 : vector<8x128xf32>
    %cst_204 = arith.constant 1.000000e+00 : f32
    %659 = vector.broadcast %cst_204 : f32 to vector<8x128xf32>
    %660 = arith.addf %659, %658 : vector<8x128xf32>
    %661 = arith.divf %659, %660 : vector<8x128xf32>
    %662 = vector.extract_strided_slice %655 {offsets = [0, 128], sizes = [8, 128], strides = [1, 1]} : vector<8x512xf32> to vector<8x128xf32>
    %663 = arith.negf %662 : vector<8x128xf32>
    %664 = math.exp %663 : vector<8x128xf32>
    %cst_205 = arith.constant 1.000000e+00 : f32
    %665 = vector.broadcast %cst_205 : f32 to vector<8x128xf32>
    %666 = arith.addf %665, %664 : vector<8x128xf32>
    %667 = arith.divf %665, %666 : vector<8x128xf32>
    %668 = vector.extract_strided_slice %655 {offsets = [0, 256], sizes = [8, 128], strides = [1, 1]} : vector<8x512xf32> to vector<8x128xf32>
    %669 = math.tanh %668 : vector<8x128xf32>
    %670 = vector.extract_strided_slice %655 {offsets = [0, 384], sizes = [8, 128], strides = [1, 1]} : vector<8x512xf32> to vector<8x128xf32>
    %671 = arith.negf %670 : vector<8x128xf32>
    %672 = math.exp %671 : vector<8x128xf32>
    %cst_206 = arith.constant 1.000000e+00 : f32
    %673 = vector.broadcast %cst_206 : f32 to vector<8x128xf32>
    %674 = arith.addf %673, %672 : vector<8x128xf32>
    %675 = arith.divf %673, %674 : vector<8x128xf32>
    %676 = arith.mulf %667, %648 : vector<8x128xf32>
    %677 = arith.mulf %661, %669 : vector<8x128xf32>
    %678 = arith.addf %676, %677 : vector<8x128xf32>
    %679 = math.tanh %678 : vector<8x128xf32>
    %680 = arith.mulf %675, %679 : vector<8x128xf32>
    %681 = arith.truncf %680 : vector<8x128xf32> to vector<8x128xbf16>
    %c48_207 = arith.constant 48 : index
    %c0_208 = arith.constant 0 : index
    %682 = vector.load %arg15[%c48_207, %c0_208] : memref<64x1024xf32, #tpu.memory_space<vmem>>, vector<8x512xf32>
    %c0_209 = arith.constant 0 : index
    %c0_210 = arith.constant 0 : index
    %683 = vector.load %arg6[%c0_209, %c0_210] : memref<128x512xbf16, #tpu.memory_space<vmem>>, vector<128x512xbf16>
    %cst_211 = arith.constant dense<0.000000e+00> : vector<8x512xf32>
    %684 = tpu.matmul %681, %683, %cst_211 {dimension_numbers = #tpu.dot_dimension_numbers<[1], [0], [0], [1], [0, 0, 1, 1], [], []>} : vector<8x128xbf16>, vector<128x512xbf16>, vector<8x512xf32> -> vector<8x512xf32>
    %685 = arith.addf %682, %684 : vector<8x512xf32>
    %686 = vector.extract_strided_slice %685 {offsets = [0, 0], sizes = [8, 128], strides = [1, 1]} : vector<8x512xf32> to vector<8x128xf32>
    %687 = arith.negf %686 : vector<8x128xf32>
    %688 = math.exp %687 : vector<8x128xf32>
    %cst_212 = arith.constant 1.000000e+00 : f32
    %689 = vector.broadcast %cst_212 : f32 to vector<8x128xf32>
    %690 = arith.addf %689, %688 : vector<8x128xf32>
    %691 = arith.divf %689, %690 : vector<8x128xf32>
    %692 = vector.extract_strided_slice %685 {offsets = [0, 128], sizes = [8, 128], strides = [1, 1]} : vector<8x512xf32> to vector<8x128xf32>
    %693 = arith.negf %692 : vector<8x128xf32>
    %694 = math.exp %693 : vector<8x128xf32>
    %cst_213 = arith.constant 1.000000e+00 : f32
    %695 = vector.broadcast %cst_213 : f32 to vector<8x128xf32>
    %696 = arith.addf %695, %694 : vector<8x128xf32>
    %697 = arith.divf %695, %696 : vector<8x128xf32>
    %698 = vector.extract_strided_slice %685 {offsets = [0, 256], sizes = [8, 128], strides = [1, 1]} : vector<8x512xf32> to vector<8x128xf32>
    %699 = math.tanh %698 : vector<8x128xf32>
    %700 = vector.extract_strided_slice %685 {offsets = [0, 384], sizes = [8, 128], strides = [1, 1]} : vector<8x512xf32> to vector<8x128xf32>
    %701 = arith.negf %700 : vector<8x128xf32>
    %702 = math.exp %701 : vector<8x128xf32>
    %cst_214 = arith.constant 1.000000e+00 : f32
    %703 = vector.broadcast %cst_214 : f32 to vector<8x128xf32>
    %704 = arith.addf %703, %702 : vector<8x128xf32>
    %705 = arith.divf %703, %704 : vector<8x128xf32>
    %706 = arith.mulf %697, %678 : vector<8x128xf32>
    %707 = arith.mulf %691, %699 : vector<8x128xf32>
    %708 = arith.addf %706, %707 : vector<8x128xf32>
    %709 = math.tanh %708 : vector<8x128xf32>
    %710 = arith.mulf %705, %709 : vector<8x128xf32>
    %711 = arith.truncf %710 : vector<8x128xf32> to vector<8x128xbf16>
    %c56_215 = arith.constant 56 : index
    %c0_216 = arith.constant 0 : index
    %712 = vector.load %arg15[%c56_215, %c0_216] : memref<64x1024xf32, #tpu.memory_space<vmem>>, vector<8x512xf32>
    %c0_217 = arith.constant 0 : index
    %c0_218 = arith.constant 0 : index
    %713 = vector.load %arg6[%c0_217, %c0_218] : memref<128x512xbf16, #tpu.memory_space<vmem>>, vector<128x512xbf16>
    %cst_219 = arith.constant dense<0.000000e+00> : vector<8x512xf32>
    %714 = tpu.matmul %711, %713, %cst_219 {dimension_numbers = #tpu.dot_dimension_numbers<[1], [0], [0], [1], [0, 0, 1, 1], [], []>} : vector<8x128xbf16>, vector<128x512xbf16>, vector<8x512xf32> -> vector<8x512xf32>
    %715 = arith.addf %712, %714 : vector<8x512xf32>
    %716 = vector.extract_strided_slice %715 {offsets = [0, 0], sizes = [8, 128], strides = [1, 1]} : vector<8x512xf32> to vector<8x128xf32>
    %717 = arith.negf %716 : vector<8x128xf32>
    %718 = math.exp %717 : vector<8x128xf32>
    %cst_220 = arith.constant 1.000000e+00 : f32
    %719 = vector.broadcast %cst_220 : f32 to vector<8x128xf32>
    %720 = arith.addf %719, %718 : vector<8x128xf32>
    %721 = arith.divf %719, %720 : vector<8x128xf32>
    %722 = vector.extract_strided_slice %715 {offsets = [0, 128], sizes = [8, 128], strides = [1, 1]} : vector<8x512xf32> to vector<8x128xf32>
    %723 = arith.negf %722 : vector<8x128xf32>
    %724 = math.exp %723 : vector<8x128xf32>
    %cst_221 = arith.constant 1.000000e+00 : f32
    %725 = vector.broadcast %cst_221 : f32 to vector<8x128xf32>
    %726 = arith.addf %725, %724 : vector<8x128xf32>
    %727 = arith.divf %725, %726 : vector<8x128xf32>
    %728 = vector.extract_strided_slice %715 {offsets = [0, 256], sizes = [8, 128], strides = [1, 1]} : vector<8x512xf32> to vector<8x128xf32>
    %729 = math.tanh %728 : vector<8x128xf32>
    %730 = vector.extract_strided_slice %715 {offsets = [0, 384], sizes = [8, 128], strides = [1, 1]} : vector<8x512xf32> to vector<8x128xf32>
    %731 = arith.negf %730 : vector<8x128xf32>
    %732 = math.exp %731 : vector<8x128xf32>
    %cst_222 = arith.constant 1.000000e+00 : f32
    %733 = vector.broadcast %cst_222 : f32 to vector<8x128xf32>
    %734 = arith.addf %733, %732 : vector<8x128xf32>
    %735 = arith.divf %733, %734 : vector<8x128xf32>
    %736 = arith.mulf %727, %708 : vector<8x128xf32>
    %737 = arith.mulf %721, %729 : vector<8x128xf32>
    %738 = arith.addf %736, %737 : vector<8x128xf32>
    %739 = math.tanh %738 : vector<8x128xf32>
    %740 = arith.mulf %735, %739 : vector<8x128xf32>
    %741 = arith.truncf %740 : vector<8x128xf32> to vector<8x128xbf16>
    %c0_223 = arith.constant 0 : index
    %c0_224 = arith.constant 0 : index
    %742 = vector.load %arg9[%c0_223, %c0_224] : memref<256x128xbf16, #tpu.memory_space<vmem>>, vector<128x128xbf16>
    %cst_225 = arith.constant dense<0.000000e+00> : vector<8x128xf32>
    %743 = tpu.matmul %741, %742, %cst_225 {dimension_numbers = #tpu.dot_dimension_numbers<[1], [0], [0], [1], [0, 0, 1, 1], [], []>} : vector<8x128xbf16>, vector<128x128xbf16>, vector<8x128xf32> -> vector<8x128xf32>
    %c128_226 = arith.constant 128 : index
    %c0_227 = arith.constant 0 : index
    %744 = vector.load %arg9[%c128_226, %c0_227] : memref<256x128xbf16, #tpu.memory_space<vmem>>, vector<128x128xbf16>
    %cst_228 = arith.constant dense<0.000000e+00> : vector<8x128xf32>
    %745 = tpu.matmul %531, %744, %cst_228 {dimension_numbers = #tpu.dot_dimension_numbers<[1], [0], [0], [1], [0, 0, 1, 1], [], []>} : vector<8x128xbf16>, vector<128x128xbf16>, vector<8x128xf32> -> vector<8x128xf32>
    %746 = arith.addf %743, %745 : vector<8x128xf32>
    %c0_229 = arith.constant 0 : index
    %c0_230 = arith.constant 0 : index
    %747 = vector.load %arg10[%c0_229, %c0_230] : memref<1x128xf32, #tpu.memory_space<vmem>>, vector<1x128xf32>
    %748 = vector.broadcast %747 : vector<1x128xf32> to vector<8x128xf32>
    %749 = arith.addf %746, %748 : vector<8x128xf32>
    %cst_231 = arith.constant 0.000000e+00 : f32
    %750 = vector.broadcast %cst_231 : f32 to vector<8x128xf32>
    %751 = arith.maximumf %749, %750 : vector<8x128xf32>
    %752 = arith.truncf %751 : vector<8x128xf32> to vector<8x128xbf16>
    %c0_232 = arith.constant 0 : index
    %c0_233 = arith.constant 0 : index
    %753 = vector.load %arg11[%c0_232, %c0_233] : memref<128x128xbf16, #tpu.memory_space<vmem>>, vector<128x128xbf16>
    %cst_234 = arith.constant dense<0.000000e+00> : vector<8x128xf32>
    %754 = tpu.matmul %752, %753, %cst_234 {dimension_numbers = #tpu.dot_dimension_numbers<[1], [0], [0], [1], [0, 0, 1, 1], [], []>} : vector<8x128xbf16>, vector<128x128xbf16>, vector<8x128xf32> -> vector<8x128xf32>
    %c0_235 = arith.constant 0 : index
    %c0_236 = arith.constant 0 : index
    %755 = vector.load %arg12[%c0_235, %c0_236] : memref<1x128xf32, #tpu.memory_space<vmem>>, vector<1x128xf32>
    %756 = vector.broadcast %755 : vector<1x128xf32> to vector<8x128xf32>
    %757 = arith.addf %754, %756 : vector<8x128xf32>
    %758 = arith.negf %757 : vector<8x128xf32>
    %759 = math.exp %758 : vector<8x128xf32>
    %cst_237 = arith.constant 1.000000e+00 : f32
    %760 = vector.broadcast %cst_237 : f32 to vector<8x128xf32>
    %761 = arith.addf %760, %759 : vector<8x128xf32>
    %762 = arith.divf %760, %761 : vector<8x128xf32>
    %c0_238 = arith.constant 0 : index
    %c0_239 = arith.constant 0 : index
    %763 = vector.load %arg13[%c0_238, %c0_239] : memref<8x128xf32, #tpu.memory_space<vmem>>, vector<8x128xf32>
    tpu.vector_store %arg13[%c0_238, %c0_239], %762 {strides = array<i32>} : memref<8x128xf32, #tpu.memory_space<vmem>>, vector<8x128xf32>,
    return
  }
}

</mosaic_0001>

<bundles_post_ra>
// kernel: tpu_custom_call.1
= control target key start
LH: loop header
LB: loop body
LE: loop exit
PB: predicated region body
PF: predicated region fallthrough
CT: control target
= control target key end

     0   :  { %18 = vsyncpa [#allocation5], 0  ;;  %s11965_s0 = inlined_call_operand.vmem [shape: s32[64,1], index: 0, kind: input, shape index: {}]   ;;  %s11966_s1 = inlined_call_operand.hbm [shape: bf16[128,1024], index: 1, kind: input, shape index: {}]   ;;  %s11967_s2 = inlined_call_operand.hbm [shape: bf16[128,512], index: 2, kind: input, shape index: {}]   ;;  %s11968_s3 = inlined_call_operand.hbm [shape: bf16[128,512], index: 3, kind: input, shape index: {}]   ;;  %s11969_s4 = inlined_call_operand.vmem [shape: f32[1,1024], index: 4, kind: input, shape index: {}]   ;;  %s11970_s5 = inlined_call_operand.hbm [shape: bf16[256,1024], index: 5, kind: input, shape index: {}]   ;;  %s11971_s6 = inlined_call_operand.hbm [shape: bf16[128,512], index: 6, kind: input, shape index: {}]   ;;  %s11972_s7 = inlined_call_operand.hbm [shape: bf16[128,512], index: 7, kind: input, shape index: {}]   ;;  %s11973_s8 = inlined_call_operand.vmem [shape: f32[1,1024], index: 8, kind: input, shape index: {}]   ;;  %s11974_s9 = inlined_call_operand.hbm [shape: bf16[256,128], index: 9, kind: input, shape index: {}]   ;;  %s11975_s10 = inlined_call_operand.vmem [shape: f32[1,128], index: 10, kind: input, shape index: {}]   ;;  %s11976_s11 = inlined_call_operand.vmem [shape: bf16[128,128], index: 11, kind: input, shape index: {}]   ;;  %s11977_s12 = inlined_call_operand.vmem [shape: f32[1,128], index: 12, kind: input, shape index: {}]   ;;  %s11978_s13 = inlined_call_operand.hbm [shape: f32[8,128], index: 13, kind: output, shape index: {}]  }
   0x1   :  { %19 = vsyncpa [#allocation8], 0 }
   0x2   :  { %20 = vsyncpa [#allocation11], 0 }
   0x3   :  { %21 = vsyncpa [#allocation14], 0 }
   0x4   :  { %22 = vsyncpa [#allocation6], 0  ;;  %s9907_s25 = smov [#allocation7]   ;;  %s9721_s29 = scalar_lea.hbm %s11967_s2, 4096 }
   0x5   :  { %s42_s26 = sshll.u32 %s9907_s25, 4  ;;  %p9722_p0 = scmp.ne.s32.totalorder %s11967_s2, %s9721_s29  ;;  %s43_s26 = int_to_ptr.vmem [resolvable:$true] %s42_s26 }
   0x6   :  { %p9725_p1 = scmp.lt.u32.totalorder %s9721_s29, %s11967_s2 }
   0x8   :  { %p9727_p2 = pnand %p9725_p1, %p9722_p0 }
   0xa   :  { %9730 = shalt.err (!%p9727_p2)
}
   0xb   :  { %s9731_s17 = scalar_lea.vmem %s43_s26, 4096  ;;  %p9736_p4 = scmp.lt.s32.totalorder %s43_s26, %s43_s26 }
   0xc   :  { %p9732_p3 = scmp.ne.s32.totalorder %s43_s26, %s9731_s17  ;;  %p9737_p5 = scmp.lt.s32.totalorder %s9731_s17, %s9731_s17 }
   0xe   :  { %p9738_p6 = por %p9737_p5, %p9736_p4 }
  0x10   :  { %p9739_p7 = pnand %p9738_p6, %p9732_p3 }
  0x12   :  { %9742 = shalt.err (!%p9739_p7)
}
  0x13   :  { %s9908_s18 = smov 256   ;;  %s9909_s19 = smov 16  }
  0x14   :  { %48 = dma.hbm_to_vmem [thread:$0]  %s11967_s2, 4096, %s43_s26, [#allocation8], %s9908_s18, %s9908_s18, %s9909_s19  }
  0x15   :  { %s9910_s22 = smov [#allocation10]   ;;  %s9911_s24 = smov [#allocation13]  }
  0x16   :  { %s68_s23 = sshll.u32 %s9910_s22, 4  ;;  %s92_s25 = sshll.u32 %s9911_s24, 4  ;;  %s69_s23 = int_to_ptr.vmem [resolvable:$true] %s68_s23  ;;  %s93_s25 = int_to_ptr.vmem [resolvable:$true] %s92_s25 }
  0x17   :  { %s9743_s29 = scalar_lea.hbm %s11970_s5, 16384 }
  0x18   :  { %p9744_p8 = scmp.ne.s32.totalorder %s11970_s5, %s9743_s29  ;;  %p9747_p9 = scmp.lt.u32.totalorder %s9743_s29, %s11970_s5 }
  0x1a   :  { %p9749_p10 = pnand %p9747_p9, %p9744_p8 }
  0x1c   :  { %9752 = shalt.err (!%p9749_p10)
}
  0x1d   :  { %s9753_s2 = scalar_lea.vmem %s69_s23, 16384  ;;  %p9758_p12 = scmp.lt.s32.totalorder %s69_s23, %s69_s23 }
  0x1e   :  { %p9754_p11 = scmp.ne.s32.totalorder %s69_s23, %s9753_s2  ;;  %p9759_p13 = scmp.lt.s32.totalorder %s9753_s2, %s9753_s2 }
  0x20   :  { %p9760_p0 = por %p9759_p13, %p9758_p12 }
  0x22   :  { %p9761_p1 = pnand %p9760_p0, %p9754_p11 }
  0x24   :  { %9764 = shalt.err (!%p9761_p1)
}
  0x25   :  { %s9912_s26 = smov 512   ;;  %s9913_s17 = smov 32  }
  0x26   :  { %74 = dma.hbm_to_vmem [thread:$0]  %s11970_s5, 16384, %s69_s23, [#allocation11], %s9912_s26, %s9912_s26, %s9913_s17  }
  0x27   :  { %s9765_s27 = scalar_lea.hbm %s11972_s7, 4096 }
  0x28   :  { %p9766_p2 = scmp.ne.s32.totalorder %s11972_s7, %s9765_s27  ;;  %p9769_p3 = scmp.lt.u32.totalorder %s9765_s27, %s11972_s7 }
  0x2a   :  { %p9771_p4 = pnand %p9769_p3, %p9766_p2 }
  0x2c   :  { %9774 = shalt.err (!%p9771_p4)
}
  0x2d   :  { %s9775_s15 = scalar_lea.vmem %s93_s25, 4096  ;;  %p9780_p6 = scmp.lt.s32.totalorder %s93_s25, %s93_s25 }
  0x2e   :  { %p9776_p5 = scmp.ne.s32.totalorder %s93_s25, %s9775_s15  ;;  %p9781_p7 = scmp.lt.s32.totalorder %s9775_s15, %s9775_s15 }
  0x30   :  { %p9782_p8 = por %p9781_p7, %p9780_p6 }
  0x32   :  { %p9783_p9 = pnand %p9782_p8, %p9776_p5 }
  0x34   :  { %9786 = shalt.err (!%p9783_p9)
}
  0x35   :  { %98 = dma.hbm_to_vmem [thread:$0]  %s11972_s7, 4096, %s93_s25, [#allocation14], %s9908_s18, %s9908_s18, %s9909_s19  }
  0x36   :  { %s9914_s16 = smov [#allocation4]   ;;  %s9915_s20 = smov [#allocation9]  }
  0x37   :  { %s30_s2 = sshll.u32 %s9914_s16, 4  ;;  %s54_s21 = sshll.u32 %s9915_s20, 4  ;;  %s31_s2 = int_to_ptr.vmem [resolvable:$true] %s30_s2  ;;  %s55_s21 = int_to_ptr.vmem [resolvable:$true] %s54_s21 }
  0x38   :  { %s9787_s27 = scalar_lea.hbm %s11966_s1, 8192 }
  0x39   :  { %p9788_p10 = scmp.ne.s32.totalorder %s11966_s1, %s9787_s27  ;;  %p9791_p11 = scmp.lt.u32.totalorder %s9787_s27, %s11966_s1 }
  0x3b   :  { %p9793_p12 = pnand %p9791_p11, %p9788_p10 }
  0x3d   :  { %9796 = shalt.err (!%p9793_p12)
}
  0x3e   :  { %s9797_s7 = scalar_lea.vmem %s31_s2, 8192  ;;  %p9802_p0 = scmp.lt.s32.totalorder %s31_s2, %s31_s2 }
  0x3f   :  { %p9798_p13 = scmp.ne.s32.totalorder %s31_s2, %s9797_s7  ;;  %p9803_p1 = scmp.lt.s32.totalorder %s9797_s7, %s9797_s7 }
  0x41   :  { %p9804_p2 = por %p9803_p1, %p9802_p0 }
  0x43   :  { %p9805_p3 = pnand %p9804_p2, %p9798_p13 }
  0x45   :  { %9808 = shalt.err (!%p9805_p3)
}
  0x46   :  { %36 = dma.hbm_to_vmem [thread:$0]  %s11966_s1, 8192, %s31_s2, [#allocation5], %s9912_s26, %s9912_s26, %s9913_s17  }
  0x47   :  { %s9809_s16 = scalar_lea.hbm %s11968_s3, 4096 }
  0x48   :  { %p9810_p4 = scmp.ne.s32.totalorder %s11968_s3, %s9809_s16  ;;  %p9813_p5 = scmp.lt.u32.totalorder %s9809_s16, %s11968_s3 }
  0x4a   :  { %p9815_p6 = pnand %p9813_p5, %p9810_p4 }
  0x4c   :  { %9818 = shalt.err (!%p9815_p6)
}
  0x4d   :  { %s9819_s28 = scalar_lea.vmem %s55_s21, 4096  ;;  %p9824_p8 = scmp.lt.s32.totalorder %s55_s21, %s55_s21 }
  0x4e   :  { %p9820_p7 = scmp.ne.s32.totalorder %s55_s21, %s9819_s28  ;;  %p9825_p9 = scmp.lt.s32.totalorder %s9819_s28, %s9819_s28 }
  0x50   :  { %p9826_p10 = por %p9825_p9, %p9824_p8 }
  0x52   :  { %p9827_p11 = pnand %p9826_p10, %p9820_p7 }
  0x54   :  { %9830 = shalt.err (!%p9827_p11)
}
  0x55   :  { %60 = dma.hbm_to_vmem [thread:$0]  %s11968_s3, 4096, %s55_s21, [#allocation8], %s9908_s18, %s9908_s18, %s9909_s19  }
  0x56   :  { %s9916_s17 = smov [#allocation12]   ;;  %s9917_s29 = smov [#allocation15]  }
  0x57   :  { %s80_s2 = sshll.u32 %s9916_s17, 4  ;;  %s106_s30 = sshll.u32 %s9917_s29, 4  ;;  %s81_s2 = int_to_ptr.vmem [resolvable:$true] %s80_s2  ;;  %s107_s30 = int_to_ptr.vmem [resolvable:$true] %s106_s30 }
  0x58   :  { %s9831_s25 = scalar_lea.hbm %s11971_s6, 4096 }
  0x59   :  { %p9832_p12 = scmp.ne.s32.totalorder %s11971_s6, %s9831_s25  ;;  %p9835_p13 = scmp.lt.u32.totalorder %s9831_s25, %s11971_s6 }
  0x5b   :  { %p9837_p0 = pnand %p9835_p13, %p9832_p12 }
  0x5d   :  { %9840 = shalt.err (!%p9837_p0)
}
  0x5e   :  { %s9841_s3 = scalar_lea.vmem %s81_s2, 4096  ;;  %p9846_p2 = scmp.lt.s32.totalorder %s81_s2, %s81_s2 }
  0x5f   :  { %p9842_p1 = scmp.ne.s32.totalorder %s81_s2, %s9841_s3  ;;  %p9847_p3 = scmp.lt.s32.totalorder %s9841_s3, %s9841_s3 }
  0x61   :  { %p9848_p4 = por %p9847_p3, %p9846_p2 }
  0x63   :  { %p9849_p5 = pnand %p9848_p4, %p9842_p1 }
  0x65   :  { %9852 = shalt.err (!%p9849_p5)
}
  0x66   :  { %86 = dma.hbm_to_vmem [thread:$0]  %s11971_s6, 4096, %s81_s2, [#allocation11], %s9908_s18, %s9908_s18, %s9909_s19  }
  0x67   :  { %s9853_s27 = scalar_lea.hbm %s11974_s9, 2048 }
  0x68   :  { %p9854_p6 = scmp.ne.s32.totalorder %s11974_s9, %s9853_s27  ;;  %p9857_p7 = scmp.lt.u32.totalorder %s9853_s27, %s11974_s9 }
  0x6a   :  { %p9859_p8 = pnand %p9857_p7, %p9854_p6 }
  0x6c   :  { %9862 = shalt.err (!%p9859_p8)
}
  0x6d   :  { %s9863_s29 = scalar_lea.vmem %s107_s30, 2048  ;;  %p9868_p10 = scmp.lt.s32.totalorder %s107_s30, %s107_s30 }
  0x6e   :  { %p9864_p9 = scmp.ne.s32.totalorder %s107_s30, %s9863_s29  ;;  %p9869_p11 = scmp.lt.s32.totalorder %s9863_s29, %s9863_s29 }
  0x70   :  { %p9870_p12 = por %p9869_p11, %p9868_p10 }
  0x72   :  { %p9871_p13 = pnand %p9870_p12, %p9864_p9 }
  0x74   :  { %9874 = shalt.err (!%p9871_p13)
}
  0x75   :  { %s9918_s6 = smov 64   ;;  %s9919_s18 = smov 4  }
  0x76   :  { %112 = dma.hbm_to_vmem [thread:$0]  %s11974_s9, 2048, %s107_s30, [#allocation14], %s9918_s6, %s9918_s6, %s9919_s18  }
  0x77   :  { %9897 = dma.done.wait [#allocation5], 8192  }
  0x78   :  { %9898 = vsyncadd [#allocation5], 4294959104 }
  0x79   :  { %9899 = dma.done.wait [#allocation8], 8192  }
  0x7a   :  { %9900 = vsyncadd [#allocation8], 4294959104 }
  0x7b   :  { %9901 = dma.done.wait [#allocation11], 20480  }
  0x7c   :  { %9902 = vsyncadd [#allocation11], 4294946816 }
  0x7d   :  { %9903 = dma.done.wait [#allocation14], 6144  }
  0x7e   :  { %9904 = vsyncadd [#allocation14], 4294961152  ;;  %v11983_v0 = vmov 0   ;;  %v143_v1 = vld [vmem:[%s11965_s0 + $0x10] sm:$0xff]  ;;  %v141_v2 = vld [vmem:[%s11965_s0] sm:$0xff]  ;;  %vm9923_vm12 = vmmov 0  }
  0x7f   :  { %8844 = vset.pattern.permute.xlu1 %v11983_v0  ;;  %8843 = vset.pattern.permute.xlu0 %v11983_v0  ;;  %v144_v3 = vld [vmem:[%s11965_s0 + $0x18] sm:$0xff]  ;;  %v142_v4 = vld [vmem:[%s11965_s0 + $0x8] sm:$0xff]  ;;  %v203_v5 = vld [vmem:[#allocation4] sm:$0xff] }
  0x80   :  { %661 = vmatprep.mubr.bf16.mxu0 %v11983_v0  ;;  %734 = vmatprep.mubr.bf16.mxu1 %v11983_v0  ;;  %v207_v6 = vld [vmem:[#allocation4 + $0x20] sm:$0xff]  ;;  %v204_v7 = vld [vmem:[#allocation4 + $0x8] sm:$0xff]  ;;  %v148_v33 = vld [vmem:[%s11965_s0 + $0x38] sm:$0xff] }
  0x81   :  { %158 = vperm.xlu1 %8844, %v143_v1   ;;  %152 = vperm.xlu0 %8843, %v141_v2   ;;  %v208_v8 = vld [vmem:[#allocation4 + $0x28] sm:$0xff]  ;;  %v7937_v10 = vcombine.high %v203_v5, %v207_v6  ;;  %v7936_v11 = vcombine.low %v203_v5, %v207_v6  ;;  %v211_v14 = vld [vmem:[#allocation4 + $0x40] sm:$0xff]  ;;  %v147_v34 = vld [vmem:[%s11965_s0 + $0x30] sm:$0xff] }
  0x82   :  { %v146_v9 = vld [vmem:[%s11965_s0 + $0x28] sm:$0xff]  ;;  %v7939_v12 = vcombine.high %v204_v7, %v208_v8  ;;  %v7938_v13 = vcombine.low %v204_v7, %v208_v8  ;;  %v215_v15 = vld [vmem:[#allocation4 + $0x60] sm:$0xff]  ;;  %v10125_v43 = vld [vmem:[#allocation4 + $0x10] sm:$0xff] }
  0x83   :  { %v212_v16 = vld [vmem:[#allocation4 + $0x48] sm:$0xff]  ;;  %v7945_v17 = vcombine.high %v211_v14, %v215_v15  ;;  %v219_v19 = vld [vmem:[#allocation4 + $0x80] sm:$0xff]  ;;  %629 = vmatprep.subr.bf16.mxu0 %v7937_v10  ;;  %v7944_v25 = vcombine.low %v211_v14, %v215_v15  ;;  %v10127_v44 = vld [vmem:[#allocation4 + $0x30] sm:$0xff] }
  0x84   :  { %v216_v18 = vld [vmem:[#allocation4 + $0x68] sm:$0xff]  ;;  %v223_v20 = vld [vmem:[#allocation4 + $0xa0] sm:$0xff]  ;;  %702 = vmatprep.subr.bf16.mxu1 %v7939_v12  ;;  %630 = vmatpush1.bf16.msra.mxu0 %v7936_v11  ;;  %v7940_v45 = vcombine.low %v10125_v43, %v10127_v44  ;;  %v10131_v46 = vld [vmem:[#allocation4 + $0x18] sm:$0xff] }
  0x85   :  { %161 = vperm.xlu1 %8844, %v144_v3   ;;  %155 = vperm.xlu0 %8843, %v142_v4   ;;  %v145_v21 = vld [vmem:[%s11965_s0 + $0x20] sm:$0xff]  ;;  %v7947_v22 = vcombine.high %v212_v16, %v216_v18  ;;  %v220_v23 = vld [vmem:[#allocation4 + $0x88] sm:$0xff]  ;;  %v7946_v26 = vcombine.low %v212_v16, %v216_v18  ;;  %v7953_v27 = vcombine.high %v219_v19, %v223_v20  ;;  %v10133_v47 = vld [vmem:[#allocation4 + $0x38] sm:$0xff]  ;;  %v149_v18 = vlaneseq }
  0x86   :  { %v224_v24 = vld [vmem:[#allocation4 + $0xa8] sm:$0xff]  ;;  %703 = vmatpush1.bf16.msra.mxu1 %v7938_v13  ;;  %631 = vmatprep.subr.bf16.mxu0 %v7945_v17  ;;  %v227_v29 = vld [vmem:[#allocation4 + $0xc0] sm:$0xff]  ;;  %v7952_v35 = vcombine.low %v219_v19, %v223_v20  ;;  %v7942_v50 = vcombine.low %v10131_v46, %v10133_v47  ;;  %v7941_v16 = vcombine.high %v10125_v43, %v10127_v44  ;;  %v234_v43 = vld [vmem:[#allocation4 + $0xf8] sm:$0xff] }
  0x87   :  { %704 = vmatprep.subr.bf16.mxu1 %v7947_v22  ;;  %v7955_v28 = vcombine.high %v220_v23, %v224_v24  ;;  %v231_v30 = vld [vmem:[#allocation4 + $0xe0] sm:$0xff]  ;;  %v228_v31 = vld [vmem:[#allocation4 + $0xc8] sm:$0xff]  ;;  %v7954_v36 = vcombine.low %v220_v23, %v224_v24  ;;  %v7943_v17 = vcombine.high %v10131_v46, %v10133_v47  ;;  %v10142_v19 = vand.u32 127, %v149_v18  ;;  %v217_v22 = vld [vmem:[#allocation4 + $0x70] sm:$0xff] }
  0x88   :  { %v232_v32 = vld [vmem:[#allocation4 + $0xe8] sm:$0xff]  ;;  %632 = vmatpush1.bf16.msra.mxu0 %v7944_v25  ;;  %v7961_v37 = vcombine.high %v227_v29, %v231_v30  ;;  %v235_v39 = vld [vmem:[#allocation4 + $0x100] sm:$0xff]  ;;  %v7960_v48 = vcombine.low %v227_v29, %v231_v30  ;;  %v214_v23 = vld [vmem:[#allocation4 + $0x58] sm:$0xff] }
  0x89   :  { %167 = vperm.xlu1 %8844, %v146_v9   ;;  %164 = vperm.xlu0 %8843, %v145_v21   ;;  %v7963_v38 = vcombine.high %v228_v31, %v232_v32  ;;  %v239_v40 = vld [vmem:[#allocation4 + $0x120] sm:$0xff]  ;;  %v236_v41 = vld [vmem:[#allocation4 + $0x108] sm:$0xff]  ;;  %v7962_v49 = vcombine.low %v228_v31, %v232_v32  ;;  %v213_v21 = vld [vmem:[#allocation4 + $0x50] sm:$0xff] }
  0x8a   :  { %705 = vmatpush1.bf16.msra.mxu1 %v7946_v26  ;;  %633 = vmatprep.subr.bf16.mxu0 %v7953_v27  ;;  %v240_v42 = vld [vmem:[#allocation4 + $0x128] sm:$0xff]  ;;  %v7969_v51 = vcombine.high %v235_v39, %v239_v40  ;;  %v243_v53 = vld [vmem:[#allocation4 + $0x140] sm:$0xff]  ;;  %v7968_v57 = vcombine.low %v235_v39, %v239_v40  ;;  %v218_v24 = vld [vmem:[#allocation4 + $0x78] sm:$0xff]  ;;  %v7949_v30 = vcombine.high %v213_v21, %v217_v22 }
  0x8b   :  { %706 = vmatprep.subr.bf16.mxu1 %v7955_v28  ;;  %v7971_v52 = vcombine.high %v236_v41, %v240_v42  ;;  %v247_v54 = vld [vmem:[#allocation4 + $0x160] sm:$0xff]  ;;  %v244_v55 = vld [vmem:[#allocation4 + $0x148] sm:$0xff]  ;;  %v7970_v58 = vcombine.low %v236_v41, %v240_v42  ;;  %v221_v27 = vld [vmem:[#allocation4 + $0x90] sm:$0xff]  ;;  %v7951_v31 = vcombine.high %v214_v23, %v218_v24 }
  0x8c   :  { %634 = vmatpush1.bf16.msra.mxu0 %v7952_v35  ;;  %v248_v56 = vld [vmem:[#allocation4 + $0x168] sm:$0xff]  ;;  %v251_v59 = vld [vmem:[#allocation4 + $0x180] sm:$0xff]  ;;  %v7977_v60 = vcombine.high %v243_v53, %v247_v54  ;;  %v7976_v2 = vcombine.low %v243_v53, %v247_v54  ;;  %v225_v28 = vld [vmem:[#allocation4 + $0xb0] sm:$0xff]  ;;  %v7948_v35 = vcombine.low %v213_v21, %v217_v22 }
  0x8d   :  { %173 = vperm.xlu1 %8844, %v148_v33   ;;  %170 = vperm.xlu0 %8843, %v147_v34   ;;  %v7979_v61 = vcombine.high %v244_v55, %v248_v56  ;;  %v255_v62 = vld [vmem:[#allocation4 + $0x1a0] sm:$0xff]  ;;  %v252_v63 = vld [vmem:[#allocation4 + $0x188] sm:$0xff]  ;;  %v7978_v3 = vcombine.low %v244_v55, %v248_v56  ;;  %v222_v29 = vld [vmem:[#allocation4 + $0x98] sm:$0xff]  ;;  %v9921_v34 = vmov 1.0|1.0   ;;  %v7956_v44 = vcombine.low %v221_v27, %v225_v28 }
  0x8e   :  { %707 = vmatpush1.bf16.msra.mxu1 %v7954_v36  ;;  %635 = vmatprep.subr.bf16.mxu0 %v7961_v37  ;;  %v256_v1 = vld [vmem:[#allocation4 + $0x1a8] sm:$0xff]  ;;  %v259_v4 = vld [vmem:[#allocation4 + $0x1c0] sm:$0xff]  ;;  %v7985_v5 = vcombine.high %v251_v59, %v255_v62  ;;  %v7984_v10 = vcombine.low %v251_v59, %v255_v62  ;;  %v226_v32 = vld [vmem:[#allocation4 + $0xb8] sm:$0xff]  ;;  %v7950_v36 = vcombine.low %v214_v23, %v218_v24 }
  0x8f   :  { %708 = vmatprep.subr.bf16.mxu1 %v7963_v38  ;;  %v7987_v6 = vcombine.high %v252_v63, %v256_v1  ;;  %v263_v7 = vld [vmem:[#allocation4 + $0x1e0] sm:$0xff]  ;;  %v260_v8 = vld [vmem:[#allocation4 + $0x1c8] sm:$0xff]  ;;  %v7986_v11 = vcombine.low %v252_v63, %v256_v1  ;;  %v7957_v37 = vcombine.high %v221_v27, %v225_v28  ;;  %v7959_v38 = vcombine.high %v222_v29, %v226_v32  ;;  %v229_v39 = vld [vmem:[#allocation4 + $0xd0] sm:$0xff] }
  0x90   :  { %636 = vmatpush1.bf16.msra.mxu0 %v7960_v48  ;;  %v264_v9 = vld [vmem:[#allocation4 + $0x1e8] sm:$0xff]  ;;  %v7993_v12 = vcombine.high %v259_v4, %v263_v7  ;;  %v7992_v14 = vcombine.low %v259_v4, %v263_v7  ;;  %v233_v41 = vld [vmem:[#allocation4 + $0xf0] sm:$0xff]  ;;  %v230_v42 = vld [vmem:[#allocation4 + $0xd8] sm:$0xff] }
  0x91   :  { %637 = vmatprep.subr.bf16.mxu0 %v7969_v51  ;;  %v7995_v13 = vcombine.high %v260_v8, %v264_v9  ;;  %v7994_v15 = vcombine.low %v260_v8, %v264_v9  ;;  %v7965_v46 = vcombine.high %v229_v39, %v233_v41  ;;  %v7967_v47 = vcombine.high %v230_v42, %v234_v43  ;;  %v237_v48 = vld [vmem:[#allocation4 + $0x110] sm:$0xff]  ;;  %v238_v51 = vld [vmem:[#allocation4 + $0x118] sm:$0xff] }
  0x92   :  { %709 = vmatpush1.bf16.msra.mxu1 %v7962_v49  ;;  %v241_v49 = vld [vmem:[#allocation4 + $0x130] sm:$0xff]  ;;  %v7964_v55 = vcombine.low %v229_v39, %v233_v41  ;;  %v7966_v56 = vcombine.low %v230_v42, %v234_v43  ;;  %v250_v62 = vld [vmem:[#allocation4 + $0x178] sm:$0xff] }
  0x93   :  { %710 = vmatprep.subr.bf16.mxu1 %v7971_v52  ;;  %v242_v52 = vld [vmem:[#allocation4 + $0x138] sm:$0xff]  ;;  %v245_v59 = vld [vmem:[#allocation4 + $0x150] sm:$0xff]  ;;  %v7972_v63 = vcombine.low %v237_v48, %v241_v49 }
  0x94   :  { %638 = vmatpush1.bf16.msra.mxu0 %v7968_v57  ;;  %v7973_v57 = vcombine.high %v237_v48, %v241_v49  ;;  %v7974_v1 = vcombine.low %v238_v51, %v242_v52  ;;  %v253_v4 = vld [vmem:[#allocation4 + $0x190] sm:$0xff]  ;;  %v254_v7 = vld [vmem:[#allocation4 + $0x198] sm:$0xff] }
  0x95   :  { %639 = vmatprep.subr.bf16.mxu0 %v7977_v60  ;;  %v249_v60 = vld [vmem:[#allocation4 + $0x170] sm:$0xff]  ;;  %v258_v8 = vld [vmem:[#allocation4 + $0x1b8] sm:$0xff] }
  0x96   :  { %711 = vmatpush1.bf16.msra.mxu1 %v7970_v58  ;;  %v7975_v58 = vcombine.high %v238_v51, %v242_v52  ;;  %v7990_v22 = vcombine.low %v254_v7, %v258_v8  ;;  %v10238_v27 = vld [vmem:[#allocation7 + $0x4] ss:$16 sps:$4 sm:$0xff]   ;;  %v10240_v28 = vld [vmem:[#allocation7 + $0xc] ss:$16 sps:$4 sm:$0xff]   ;;  %v10254_v33 = vld [vmem:[#allocation7 + $0x20] ss:$16 sps:$4 sm:$0xff]  }
  0x97   :  { %712 = vmatprep.subr.bf16.mxu1 %v7979_v61  ;;  %v246_v61 = vld [vmem:[#allocation4 + $0x158] sm:$0xff]  ;;  %v10274_v39 = vld [vmem:[#allocation7 + $0x64] ss:$16 sps:$4 sm:$0xff]   ;;  %v10278_v41 = vld [vmem:[#allocation7 + $0x60] ss:$16 sps:$4 sm:$0xff]  }
  0x98   :  { %640 = vmatpush1.bf16.msra.mxu0 %v7976_v2  ;;  %v7981_v2 = vcombine.high %v245_v59, %v249_v60  ;;  %v10280_v42 = vld [vmem:[#allocation7 + $0x68] ss:$16 sps:$4 sm:$0xff]   ;;  %v10286_v43 = vld [vmem:[#allocation7 + $0x84] ss:$16 sps:$4 sm:$0xff]   ;;  %v10300_v48 = vld [vmem:[#allocation7 + $0xac] ss:$16 sps:$4 sm:$0xff]  }
  0x99   :  { %641 = vmatprep.subr.bf16.mxu0 %v7985_v5  ;;  %v257_v5 = vld [vmem:[#allocation4 + $0x1b0] sm:$0xff] }
  0x9a   :  { %713 = vmatpush1.bf16.msra.mxu1 %v7978_v3  ;;  %v7983_v3 = vcombine.high %v246_v61, %v250_v62  ;;  %v7988_v21 = vcombine.low %v253_v4, %v257_v5  ;;  %v10302_v49 = vld [vmem:[#allocation7 + $0xa0] ss:$16 sps:$4 sm:$0xff]   ;;  %v10312_v52 = vld [vmem:[#allocation7 + $0xc4] ss:$16 sps:$4 sm:$0xff]  }
  0x9b   :  { %714 = vmatprep.subr.bf16.mxu1 %v7987_v6  ;;  %v10310_v51 = vld [vmem:[#allocation7 + $0xc0] ss:$16 sps:$4 sm:$0xff]  }
  0x9c   :  { %642 = vmatpush1.bf16.msra.mxu0 %v7984_v10 }
  0x9d   :  { %643 = vmatprep.subr.bf16.mxu0 %v7993_v12  ;;  %v7982_v12 = vcombine.low %v246_v61, %v250_v62  ;;  %v10341_v61 = vshrl.u32 %v149_v18, 7 }
  0x9e   :  { %715 = vmatpush1.bf16.msra.mxu1 %v7986_v11  ;;  %v7980_v11 = vcombine.low %v245_v59, %v249_v60  ;;  %v10334_v59 = vld [vmem:[#allocation9 + $0x4] ss:$16 sps:$4 sm:$0xff]   ;;  %v10336_v60 = vld [vmem:[#allocation9 + $0xc] ss:$16 sps:$4 sm:$0xff]  }
  0x9f   :  { %716 = vmatprep.subr.bf16.mxu1 %v7995_v13  ;;  %v7989_v13 = vcombine.high %v253_v4, %v257_v5  ;;  %12046 = vst [vmem:[#allocation22_spill] sm:$0xff] %v10341_v61  ;;  %v11982_v62 = vsub.s32 0, %v10341_v61 }
  0xa0   :  { %644 = vmatpush1.bf16.msra.mxu0 %v7992_v14  ;;  %v7991_v14 = vcombine.high %v254_v7, %v258_v8 }
  0xa1   :  { %775 = vmatprep.subr.bf16.mxu0 %v7941_v16  ;;  %v265_v16 = vld [vmem:[#allocation4 + $0x1f0] sm:$0xff] }
  0xa2   :  { %717 = vmatpush1.bf16.msra.mxu1 %v7994_v15  ;;  %v261_v15 = vld [vmem:[#allocation4 + $0x1d0] sm:$0xff] }
  0xa3   :  { %848 = vmatprep.subr.bf16.mxu1 %v7943_v17  ;;  %v262_v17 = vld [vmem:[#allocation4 + $0x1d8] sm:$0xff]  ;;  %v7997_v23 = vcombine.high %v261_v15, %v265_v16 }
 0x100   :  { %v153_v20 = vpop.permute.xlu0 %152  ;;  %v159_v26 = vpop.permute.xlu1 %158 }
 0x101   :  { %vm175_vm1 = vcmp.eq.s32.totalorder %v153_v20, %v10142_v19  ;;  %vm177_vm3 = vcmp.eq.s32.totalorder %v159_v26, %v10142_v19  ;;  %v266_v20 = vld [vmem:[#allocation4 + $0x1f8] sm:$0xff] }
 0x102   :  { %v7999_v24 = vcombine.high %v262_v17, %v266_v20  ;;  %v7998_v26 = vcombine.low %v262_v17, %v266_v20  ;;  %v11979_v17 = vsub.s32 1, %v10341_v61 }
 0x104   :  { %v156_v25 = vpop.permute.xlu0 %155  ;;  %v162_v40 = vpop.permute.xlu1 %161 }
 0x105   :  { %vm176_vm0 = vcmp.eq.s32.totalorder %v156_v25, %v10142_v19  ;;  %vm178_vm4 = vcmp.eq.s32.totalorder %v162_v40, %v10142_v19  ;;  %v10276_v40 = vld [vmem:[#allocation7 + $0x6c] ss:$16 sps:$4 sm:$0xff]  }
 0x106   :  { %vm10146_vm2 = vmpackc.low %vm176_vm0, %vm175_vm1 }
 0x107   :  { %8001 = vmatmul.mubr.msk.bf16.vlgmr.msra.gmra.mrb[0].mxu0 %vm10146_vm2, %v9921_v34  ;;  %8009 = vmatmul.mubr.msk.bf16.vlgmr.msra.gmra.mrb[0].mxu1 %vm10146_vm2, %v9921_v34  ;;  %vm10166_vm5 = vmpackc.low %vm178_vm4, %vm177_vm3 }
 0x108   :  { %776 = vmatpush1.bf16.msra.mxu0 %v7940_v45  ;;  %849 = vmatpush1.bf16.msra.mxu1 %v7942_v50  ;;  %v7958_v45 = vcombine.low %v222_v29, %v226_v32  ;;  %v168_v53 = vpop.permute.xlu1 %167  ;;  %v165_v54 = vpop.permute.xlu0 %164  ;;  %v10242_v29 = vld [vmem:[#allocation7] ss:$16 sps:$4 sm:$0xff]   ;;  %v10252_v32 = vld [vmem:[#allocation7 + $0x2c] ss:$16 sps:$4 sm:$0xff]   ;;  %v10304_v50 = vld [vmem:[#allocation7 + $0xa8] ss:$16 sps:$4 sm:$0xff]  }
 0x109   :  { %777 = vmatprep.subr.bf16.mxu0 %v7949_v30  ;;  %850 = vmatprep.subr.bf16.mxu1 %v7951_v31  ;;  %vm180_vm6 = vcmp.eq.s32.totalorder %v168_v53, %v10142_v19  ;;  %vm179_vm7 = vcmp.eq.s32.totalorder %v165_v54, %v10142_v19  ;;  %v10244_v30 = vld [vmem:[#allocation7 + $0x8] ss:$16 sps:$4 sm:$0xff]   ;;  %v10250_v31 = vld [vmem:[#allocation7 + $0x24] ss:$16 sps:$4 sm:$0xff]   ;;  %v10316_v54 = vld [vmem:[#allocation7 + $0xcc] ss:$16 sps:$4 sm:$0xff]  }
 0x10a   :  { %671 = vmatprep.mubr.bf16.mxu0 %v11983_v0  ;;  %744 = vmatprep.mubr.bf16.mxu1 %v11983_v0  ;;  %vm10180_vm8 = vmpackc.low %vm180_vm6, %vm179_vm7  ;;  %v10314_v53 = vld [vmem:[#allocation7 + $0xc8] ss:$16 sps:$4 sm:$0xff]  }
 0x10c   :  { %778 = vmatpush1.bf16.msra.mxu0 %v7948_v35  ;;  %851 = vmatpush1.bf16.msra.mxu1 %v7950_v36  ;;  %v174_v9 = vpop.permute.xlu1 %173  ;;  %v171_v10 = vpop.permute.xlu0 %170  ;;  %v10262_v35 = vld [vmem:[#allocation7 + $0x44] ss:$16 sps:$4 sm:$0xff]   ;;  %v10264_v36 = vld [vmem:[#allocation7 + $0x4c] ss:$16 sps:$4 sm:$0xff]  }
 0x10d   :  { %779 = vmatprep.subr.bf16.mxu0 %v7957_v37  ;;  %852 = vmatprep.subr.bf16.mxu1 %v7959_v38  ;;  %vm182_vm9 = vcmp.eq.s32.totalorder %v174_v9, %v10142_v19  ;;  %vm181_vm10 = vcmp.eq.s32.totalorder %v171_v10, %v10142_v19  ;;  %v7996_v19 = vcombine.low %v261_v15, %v265_v16  ;;  %v10266_v37 = vld [vmem:[#allocation7 + $0x40] ss:$16 sps:$4 sm:$0xff]   ;;  %v10268_v38 = vld [vmem:[#allocation7 + $0x48] ss:$16 sps:$4 sm:$0xff]  }
 0x10e   :  { %vm10194_vm11 = vmpackc.low %vm182_vm9, %vm181_vm10 }
 0x10f   :  { %8003 = vmatmul.mubr.msk.bf16.gmra.mrb[4].mxu0 %vm10166_vm5, %v9921_v34  ;;  %8011 = vmatmul.mubr.msk.bf16.gmra.mrb[4].mxu1 %vm10166_vm5, %v9921_v34 }
 0x110   :  { %780 = vmatpush1.bf16.msra.mxu0 %v7956_v44  ;;  %853 = vmatpush1.bf16.msra.mxu1 %v7958_v45  ;;  %v10288_v44 = vld [vmem:[#allocation7 + $0x8c] ss:$16 sps:$4 sm:$0xff]   ;;  %v10290_v45 = vld [vmem:[#allocation7 + $0x80] ss:$16 sps:$4 sm:$0xff]  }
 0x111   :  { %781 = vmatprep.subr.bf16.mxu0 %v7965_v46  ;;  %854 = vmatprep.subr.bf16.mxu1 %v7967_v47  ;;  %v10292_v46 = vld [vmem:[#allocation7 + $0x88] ss:$16 sps:$4 sm:$0xff]   ;;  %v10298_v47 = vld [vmem:[#allocation7 + $0xa4] ss:$16 sps:$4 sm:$0xff]  }
 0x112   :  { %681 = vmatprep.mubr.bf16.mxu0 %v11983_v0  ;;  %754 = vmatprep.mubr.bf16.mxu1 %v11983_v0 }
 0x114   :  { %782 = vmatpush1.bf16.msra.mxu0 %v7964_v55  ;;  %855 = vmatpush1.bf16.msra.mxu1 %v7966_v56  ;;  %v10322_v55 = vld [vmem:[#allocation7 + $0xe4] ss:$16 sps:$4 sm:$0xff]   ;;  %v10324_v56 = vld [vmem:[#allocation7 + $0xec] ss:$16 sps:$4 sm:$0xff]  }
 0x115   :  { %783 = vmatprep.subr.bf16.mxu0 %v7973_v57  ;;  %856 = vmatprep.subr.bf16.mxu1 %v7975_v58  ;;  %v10326_v57 = vld [vmem:[#allocation7 + $0xe0] ss:$16 sps:$4 sm:$0xff]   ;;  %v10328_v58 = vld [vmem:[#allocation7 + $0xe8] ss:$16 sps:$4 sm:$0xff]  }
 0x117   :  { %8005 = vmatmul.mubr.msk.bf16.gmra.mrb[8].mxu0 %vm10180_vm8, %v9921_v34  ;;  %8013 = vmatmul.mubr.msk.bf16.gmra.mrb[8].mxu1 %vm10180_vm8, %v9921_v34 }
 0x118   :  { %784 = vmatpush1.bf16.msra.mxu0 %v7972_v63  ;;  %857 = vmatpush1.bf16.msra.mxu1 %v7974_v1  ;;  %v10347_v63 = vld [vmem:[%s11969_s4] sm:$0xff] }
 0x119   :  { %785 = vmatprep.subr.bf16.mxu0 %v7981_v2  ;;  %858 = vmatprep.subr.bf16.mxu1 %v7983_v3  ;;  %v10352_v1 = vrot.slane %v10347_v63, %v11982_v62  ;;  %v11981_v2 = vsub.s32 2, %v10341_v61  ;;  %v11980_v3 = vsub.s32 3, %v10341_v61 }
 0x11a   :  { %691 = vmatprep.mubr.bf16.mxu0 %v11983_v0  ;;  %764 = vmatprep.mubr.bf16.mxu1 %v11983_v0 }
 0x11b   :  { %v10360_v6 = vrot.slane %v10347_v63, %v11981_v2  ;;  %v10365_v8 = vrot.slane %v10347_v63, %v11980_v3 }
 0x11c   :  { %786 = vmatpush1.bf16.msra.mxu0 %v7980_v11  ;;  %859 = vmatpush1.bf16.msra.mxu1 %v7982_v12 }
 0x11d   :  { %787 = vmatprep.subr.bf16.mxu0 %v7989_v13  ;;  %860 = vmatprep.subr.bf16.mxu1 %v7991_v14 }
 0x11f   :  { %8007 = vmatmul.mubr.msk.bf16.gmra.mrb[12].mxu0 %vm10194_vm11, %v9921_v34  ;;  %8015 = vmatmul.mubr.msk.bf16.gmra.mrb[12].mxu1 %vm10194_vm11, %v9921_v34 }
 0x120   :  { %788 = vmatpush1.bf16.msra.mxu0 %v7988_v21  ;;  %861 = vmatpush1.bf16.msra.mxu1 %v7990_v22  ;;  %v10383_v22 = vrot.slane %v10347_v63, %v11979_v17 }
 0x121   :  { %789 = vmatprep.subr.bf16.mxu0 %v7997_v23  ;;  %862 = vmatprep.subr.bf16.mxu1 %v7999_v24 }
 0x122   :  { %807 = vmatprep.mubr.bf16.mxu0 %v11983_v0  ;;  %880 = vmatprep.mubr.bf16.mxu1 %v11983_v0 }
 0x124   :  { %790 = vmatpush1.bf16.msra.mxu0 %v7996_v19  ;;  %863 = vmatpush1.bf16.msra.mxu1 %v7998_v26 }
 0x125   :  { %1230 = vmatprep.subr.bf16.mxu0 %v10238_v27  ;;  %1271 = vmatprep.subr.bf16.mxu1 %v10240_v28 }
 0x127   :  { %8017 = vmatmul.mubr.msk.bf16.vlgmr.msra.gmra.mrb[16].mxu0 %vm10146_vm2, %v9921_v34  ;;  %8025 = vmatmul.mubr.msk.bf16.vlgmr.msra.gmra.mrb[16].mxu1 %vm10146_vm2, %v9921_v34 }
 0x128   :  { %817 = vmatprep.mubr.bf16.mxu0 %v11983_v0  ;;  %890 = vmatprep.mubr.bf16.mxu1 %v11983_v0 }
 0x129   :  { %1231 = vmatpush1.bf16.msra.mxu0 %v10242_v29  ;;  %1272 = vmatpush1.bf16.msra.mxu1 %v10244_v30 }
 0x12a   :  { %1232 = vmatprep.subr.bf16.mxu0 %v10250_v31  ;;  %1273 = vmatprep.subr.bf16.mxu1 %v10252_v32 }
 0x12d   :  { %1233 = vmatpush1.bf16.msra.mxu0 %v10254_v33 }
 0x12e   :  { %1234 = vmatprep.subr.bf16.mxu0 %v10262_v35 }
 0x12f   :  { %8019 = vmatmul.mubr.msk.bf16.gmra.mrb[20].mxu0 %vm10166_vm5, %v9921_v34  ;;  %8027 = vmatmul.mubr.msk.bf16.gmra.mrb[20].mxu1 %vm10166_vm5, %v9921_v34 }
 0x130   :  { %827 = vmatprep.mubr.bf16.mxu0 %v11983_v0  ;;  %900 = vmatprep.mubr.bf16.mxu1 %v11983_v0 }
 0x131   :  { %1235 = vmatpush1.bf16.msra.mxu0 %v10266_v37 }
 0x132   :  { %1236 = vmatprep.subr.bf16.mxu0 %v10274_v39 }
 0x135   :  { %1237 = vmatpush1.bf16.msra.mxu0 %v10278_v41 }
 0x136   :  { %1238 = vmatprep.subr.bf16.mxu0 %v10286_v43 }
 0x137   :  { %8021 = vmatmul.mubr.msk.bf16.gmra.mrb[24].mxu0 %vm10180_vm8, %v9921_v34  ;;  %8029 = vmatmul.mubr.msk.bf16.gmra.mrb[24].mxu1 %vm10180_vm8, %v9921_v34 }
 0x138   :  { %837 = vmatprep.mubr.bf16.mxu0 %v11983_v0  ;;  %910 = vmatprep.mubr.bf16.mxu1 %v11983_v0 }
 0x139   :  { %1239 = vmatpush1.bf16.msra.mxu0 %v10290_v45 }
 0x13a   :  { %1240 = vmatprep.subr.bf16.mxu0 %v10298_v47 }
 0x13d   :  { %1241 = vmatpush1.bf16.msra.mxu0 %v10302_v49 }
 0x13e   :  { %1242 = vmatprep.subr.bf16.mxu0 %v10312_v52 }
 0x13f   :  { %8023 = vmatmul.mubr.msk.bf16.gmra.mrb[28].mxu0 %vm10194_vm11, %v9921_v34  ;;  %8031 = vmatmul.mubr.msk.bf16.gmra.mrb[28].mxu1 %vm10194_vm11, %v9921_v34  ;;  %v10256_v34 = vld [vmem:[#allocation7 + $0x28] ss:$16 sps:$4 sm:$0xff]  }
 0x140   :  { %1262 = vmatprep.mubr.bf16.mxu0 %v11983_v0  ;;  %1303 = vmatprep.mubr.bf16.mxu1 %v11983_v0 }
 0x141   :  { %1274 = vmatpush1.bf16.msra.mxu1 %v10256_v34  ;;  %1243 = vmatpush1.bf16.msra.mxu0 %v10310_v51 }
 0x142   :  { %1275 = vmatprep.subr.bf16.mxu1 %v10264_v36  ;;  %1244 = vmatprep.subr.bf16.mxu0 %v10322_v55 }
 0x145   :  { %1276 = vmatpush1.bf16.msra.mxu1 %v10268_v38  ;;  %1245 = vmatpush1.bf16.msra.mxu0 %v10326_v57 }
 0x146   :  { %1277 = vmatprep.subr.bf16.mxu1 %v10276_v40  ;;  %1508 = vmatprep.subr.bf16.mxu0 %v10334_v59 }
 0x149   :  { %1278 = vmatpush1.bf16.msra.mxu1 %v10280_v42 }
 0x14a   :  { %1279 = vmatprep.subr.bf16.mxu1 %v10288_v44 }
 0x14d   :  { %1280 = vmatpush1.bf16.msra.mxu1 %v10292_v46 }
 0x14e   :  { %1281 = vmatprep.subr.bf16.mxu1 %v10300_v48 }
 0x151   :  { %1282 = vmatpush1.bf16.msra.mxu1 %v10304_v50 }
 0x152   :  { %1283 = vmatprep.subr.bf16.mxu1 %v10316_v54 }
 0x155   :  { %1284 = vmatpush1.bf16.msra.mxu1 %v10314_v53 }
 0x156   :  { %1285 = vmatprep.subr.bf16.mxu1 %v10324_v56 }
 0x159   :  { %1286 = vmatpush1.bf16.msra.mxu1 %v10328_v58 }
 0x15a   :  { %1549 = vmatprep.subr.bf16.mxu1 %v10336_v60 }
 0x1da   :  { %v663_v4 = vpop.f32.mrb[0].mxu0  ;;  %v736_v5 = vpop.f32.mrb[0].mxu1 }
 0x1db   :  { %v664_v18 = vadd.f32 %v663_v4, %v10352_v1  ;;  %v665_v7 = vpop.f32.mrb[1].mxu0  ;;  %v738_v9 = vpop.f32.mrb[1].mxu1 }
 0x1dc   :  { %v667_v10 = vpop.f32.mrb[2].mxu0  ;;  %v740_v11 = vpop.f32.mrb[2].mxu1  ;;  %v739_v21 = vadd.f32 %v738_v9, %v10365_v8 }
 0x1dd   :  { %v8032_v12 = vmul.f32 -1.442695, %v664_v18  ;;  %v10368_v13 = vadd.f32 %v667_v10, %v10352_v1  ;;  %v10371_v14 = vadd.f32 %v740_v11, %v10360_v6  ;;  %v10373_v15 = vpop.f32.mrb[3].mxu0  ;;  %v742_v16 = vpop.f32.mrb[3].mxu1 }
 0x1de   :  { %v10377_v20 = vadd.f32 %v742_v16, %v10365_v8  ;;  %v8033_v25 = vmul.f32 -1.442695, %v739_v21 }
 0x1df   :  { %9301 = vpow2.f32 %v8032_v12 }
 0x1e0   :  { %9303 = vpow2.f32 %v8033_v25 }
 0x1e2   :  { %v673_v23 = vpop.f32.mrb[4].mxu0  ;;  %v746_v24 = vpop.f32.mrb[4].mxu1 }
 0x1e3   :  { %v10386_v19 = vadd.f32 %v673_v23, %v10352_v1  ;;  %v10389_v26 = vadd.f32 %v746_v24, %v10360_v6  ;;  %v675_v4 = vpop.f32.mrb[5].mxu0  ;;  %v748_v18 = vpop.f32.mrb[5].mxu1 }
 0x1e4   :  { %v10392_v7 = vadd.f32 %v675_v4, %v10383_v22  ;;  %v10395_v9 = vadd.f32 %v748_v18, %v10365_v8  ;;  %v677_v10 = vpop.f32.mrb[6].mxu0  ;;  %v750_v11 = vpop.f32.mrb[6].mxu1  ;;  %v737_v4 = vadd.f32 %v736_v5, %v10360_v6 }
 0x1e5   :  { %12047 = vst [vmem:[#allocation23_spill] sm:$0xff] %v10386_v19  ;;  %12048 = vst [vmem:[#allocation24_spill] sm:$0xff] %v10389_v26  ;;  %v10398_v12 = vadd.f32 %v677_v10, %v10352_v1  ;;  %v10401_v16 = vadd.f32 %v750_v11, %v10360_v6  ;;  %v679_v21 = vpop.f32.mrb[7].mxu0  ;;  %v752_v23 = vpop.f32.mrb[7].mxu1  ;;  %v10573_v19 = vld [vmem:[#allocation9 + $0x40] ss:$16 sps:$4 sm:$0xff]  }
 0x1e6   :  { %12049 = vst [vmem:[#allocation25_spill] sm:$0xff] %v10392_v7  ;;  %12050 = vst [vmem:[#allocation26_spill] sm:$0xff] %v10395_v9  ;;  %v10404_v24 = vadd.f32 %v679_v21, %v10383_v22  ;;  %v10407_v17 = vadd.f32 %v752_v23, %v10365_v8  ;;  %9305 = vtanh.f32 %v737_v4 }
 0x1e7   :  { %12051 = vst [vmem:[#allocation27_spill] sm:$0xff] %v10398_v12  ;;  %12052 = vst [vmem:[#allocation28_spill] sm:$0xff] %v10401_v16 }
 0x1e8   :  { %12053 = vst [vmem:[#allocation29_spill] sm:$0xff] %v10404_v24  ;;  %12054 = vst [vmem:[#allocation30_spill] sm:$0xff] %v10407_v17 }
 0x1e9   :  { %v9302_v18 = vpop.eup %9301  ;;  %12102 = vst [vmem:[#allocation74_spill] sm:$0xff] %v10573_v19 }
 0x1ea   :  { %v994_v3 = vadd.f32 1.0, %v9302_v18  ;;  %v683_v2 = vpop.f32.mrb[8].mxu0  ;;  %v756_v62 = vpop.f32.mrb[8].mxu1 }
 0x1eb   :  { %v10411_v10 = vadd.f32 %v683_v2, %v10352_v1  ;;  %v10414_v11 = vadd.f32 %v756_v62, %v10360_v6  ;;  %v685_v0 = vpop.f32.mrb[9].mxu0  ;;  %v758_v21 = vpop.f32.mrb[9].mxu1 }
 0x1ec   :  { %9307 = vrcp.f32 %v994_v3  ;;  %v10417_v23 = vadd.f32 %v685_v0, %v10383_v22  ;;  %v10420_v5 = vadd.f32 %v758_v21, %v10365_v8  ;;  %v687_v25 = vpop.f32.mrb[10].mxu0  ;;  %v760_v18 = vpop.f32.mrb[10].mxu1 }
 0x1ed   :  { %12055 = vst [vmem:[#allocation31_spill] sm:$0xff] %v10411_v10  ;;  %12056 = vst [vmem:[#allocation32_spill] sm:$0xff] %v10414_v11  ;;  %v10423_v17 = vadd.f32 %v687_v25, %v10352_v1  ;;  %v10426_v2 = vadd.f32 %v760_v18, %v10360_v6  ;;  %v689_v4 = vpop.f32.mrb[11].mxu0  ;;  %v762_v62 = vpop.f32.mrb[11].mxu1 }
 0x1ee   :  { %12057 = vst [vmem:[#allocation33_spill] sm:$0xff] %v10417_v23  ;;  %12058 = vst [vmem:[#allocation34_spill] sm:$0xff] %v10420_v5  ;;  %v10429_v11 = vadd.f32 %v689_v4, %v10383_v22  ;;  %v10432_v3 = vadd.f32 %v762_v62, %v10365_v8  ;;  %v9304_v0 = vpop.eup %9303  ;;  %v291_v4 = vsub.s32 5, %v10341_v61 }
 0x1ef   :  { %12059 = vst [vmem:[#allocation35_spill] sm:$0xff] %v10423_v17  ;;  %12060 = vst [vmem:[#allocation36_spill] sm:$0xff] %v10426_v2 }
 0x1f0   :  { %12061 = vst [vmem:[#allocation37_spill] sm:$0xff] %v10429_v11  ;;  %12062 = vst [vmem:[#allocation38_spill] sm:$0xff] %v10432_v3  ;;  %v1001_v11 = vadd.f32 1.0, %v9304_v0 }
 0x1f2   :  { %v693_v23 = vpop.f32.mrb[12].mxu0  ;;  %v766_v21 = vpop.f32.mrb[12].mxu1  ;;  %9309 = vrcp.f32 %v1001_v11 }
 0x1f3   :  { %v10436_v10 = vadd.f32 %v693_v23, %v10352_v1  ;;  %v10439_v25 = vadd.f32 %v766_v21, %v10360_v6  ;;  %v695_v18 = vpop.f32.mrb[13].mxu0  ;;  %v768_v2 = vpop.f32.mrb[13].mxu1  ;;  %v12071_v23 = vsub.s32 4, %v10341_v61 }
 0x1f4   :  { %v10444_v62 = vadd.f32 %v695_v18, %v10383_v22  ;;  %v10447_v3 = vadd.f32 %v768_v2, %v10365_v8  ;;  %v697_v5 = vpop.f32.mrb[14].mxu0  ;;  %v770_v24 = vpop.f32.mrb[14].mxu1 }
 0x1f5   :  { %12063 = vst [vmem:[#allocation39_spill] sm:$0xff] %v10436_v10  ;;  %12064 = vst [vmem:[#allocation40_spill] sm:$0xff] %v10439_v25  ;;  %v9306_v10 = vpop.eup %9305  ;;  %v10451_v21 = vadd.f32 %v697_v5, %v10352_v1  ;;  %v10454_v25 = vadd.f32 %v770_v24, %v10360_v6  ;;  %v699_v17 = vpop.f32.mrb[15].mxu0  ;;  %v12072_v1 = vsub.s32 6, %v10341_v61  ;;  %v10475_v24 = vrot.slane %v10347_v63, %v291_v4 }
 0x1f6   :  { %12065 = vst [vmem:[#allocation41_spill] sm:$0xff] %v10444_v62  ;;  %12066 = vst [vmem:[#allocation42_spill] sm:$0xff] %v10447_v3  ;;  %v772_v16 = vpop.f32.mrb[15].mxu1  ;;  %v9308_v0 = vpop.eup %9307  ;;  %v10457_v18 = vadd.f32 %v699_v17, %v10383_v22  ;;  %v10467_v62 = vrot.slane %v10347_v63, %v12071_v23  ;;  %v12074_v17 = vsub.s32 7, %v10341_v61 }
 0x1f7   :  { %12067 = vst [vmem:[#allocation43_spill] sm:$0xff] %v10451_v21  ;;  %12068 = vst [vmem:[#allocation44_spill] sm:$0xff] %v10454_v25  ;;  %v10460_v2 = vadd.f32 %v772_v16, %v10365_v8  ;;  %v10462_v3 = vmul.f32 %v9308_v0, %v9306_v10  ;;  %v10472_v6 = vrot.slane %v10347_v63, %v12072_v1 }
 0x1f8   :  { %12069 = vst [vmem:[#allocation45_spill] sm:$0xff] %v10457_v18  ;;  %12073 = vst [vmem:[#allocation47_spill] sm:$0xff] %v10475_v24  ;;  %v10480_v8 = vrot.slane %v10347_v63, %v12074_v17 }
 0x1f9   :  { %12070 = vst [vmem:[#allocation46_spill] sm:$0xff] %v10460_v2  ;;  %9311 = vtanh.f32 %v10462_v3 }
 0x1fa   :  { %v809_v16 = vpop.f32.mrb[16].mxu0  ;;  %v882_v10 = vpop.f32.mrb[16].mxu1 }
 0x1fb   :  { %v10484_v5 = vadd.f32 %v809_v16, %v10467_v62  ;;  %v10487_v23 = vadd.f32 %v882_v10, %v10472_v6  ;;  %v811_v0 = vpop.f32.mrb[17].mxu0  ;;  %v884_v11 = vpop.f32.mrb[17].mxu1 }
 0x1fc   :  { %v10490_v4 = vadd.f32 %v811_v0, %v10475_v24  ;;  %v10493_v1 = vadd.f32 %v884_v11, %v10480_v8  ;;  %v813_v63 = vpop.f32.mrb[18].mxu0  ;;  %v886_v17 = vpop.f32.mrb[18].mxu1 }
 0x1fd   :  { %12075 = vst [vmem:[#allocation48_spill] sm:$0xff] %v10484_v5  ;;  %12076 = vst [vmem:[#allocation49_spill] sm:$0xff] %v10487_v23  ;;  %v10496_v61 = vadd.f32 %v813_v63, %v10467_v62  ;;  %v10499_v2 = vadd.f32 %v886_v17, %v10472_v6  ;;  %v815_v16 = vpop.f32.mrb[19].mxu0  ;;  %v888_v5 = vpop.f32.mrb[19].mxu1 }
 0x1fe   :  { %12077 = vst [vmem:[#allocation50_spill] sm:$0xff] %v10490_v4  ;;  %12078 = vst [vmem:[#allocation51_spill] sm:$0xff] %v10493_v1  ;;  %v10502_v10 = vadd.f32 %v815_v16, %v10475_v24  ;;  %v10505_v23 = vadd.f32 %v888_v5, %v10480_v8  ;;  %v9310_v0 = vpop.eup %9309 }
 0x1ff   :  { %12079 = vst [vmem:[#allocation52_spill] sm:$0xff] %v10496_v61  ;;  %12080 = vst [vmem:[#allocation53_spill] sm:$0xff] %v10499_v2 }
 0x200   :  { %12081 = vst [vmem:[#allocation54_spill] sm:$0xff] %v10502_v10  ;;  %12082 = vst [vmem:[#allocation55_spill] sm:$0xff] %v10505_v23 }
 0x202   :  { %v819_v4 = vpop.f32.mrb[20].mxu0  ;;  %v892_v11 = vpop.f32.mrb[20].mxu1 }
 0x203   :  { %v9312_v1 = vpop.eup %9311  ;;  %v10508_v18 = vadd.f32 %v819_v4, %v10467_v62  ;;  %v10511_v63 = vadd.f32 %v892_v11, %v10472_v6  ;;  %v821_v17 = vpop.f32.mrb[21].mxu0 }
 0x204   :  { %v894_v25 = vpop.f32.mrb[21].mxu1  ;;  %v10514_v21 = vadd.f32 %v821_v17, %v10475_v24  ;;  %v823_v5 = vpop.f32.mrb[22].mxu0  ;;  %v1006_v10 = vmul.f32 %v9312_v1, %v9310_v0  ;;  %v10535_v1 = vld [vmem:[#allocation9 + $0x24] ss:$16 sps:$4 sm:$0xff]   ;;  %v10537_v0 = vld [vmem:[#allocation9 + $0x2c] ss:$16 sps:$4 sm:$0xff]  }
 0x205   :  { %12083 = vst [vmem:[#allocation56_spill] sm:$0xff] %v10508_v18  ;;  %12084 = vst [vmem:[#allocation57_spill] sm:$0xff] %v10511_v63  ;;  %v10517_v16 = vadd.f32 %v894_v25, %v10480_v8  ;;  %v896_v23 = vpop.f32.mrb[22].mxu1  ;;  %v10520_v2 = vadd.f32 %v823_v5, %v10467_v62  ;;  %v825_v61 = vpop.f32.mrb[23].mxu0  ;;  %v10525_v63 = vld [vmem:[#allocation9] ss:$16 sps:$4 sm:$0xff]  }
 0x206   :  { %12085 = vst [vmem:[#allocation58_spill] sm:$0xff] %v10514_v21  ;;  %v10523_v4 = vadd.f32 %v896_v23, %v10472_v6  ;;  %v898_v11 = vpop.f32.mrb[23].mxu1  ;;  %v10527_v18 = vld [vmem:[#allocation9 + $0x8] ss:$16 sps:$4 sm:$0xff]   ;;  %v10530_v17 = vadd.f32 %v825_v61, %v10475_v24  ;;  %v10541_v23 = vld [vmem:[#allocation9 + $0x20] ss:$16 sps:$4 sm:$0xff]  }
 0x207   :  { %12086 = vst [vmem:[#allocation59_spill] sm:$0xff] %v10517_v16  ;;  %12087 = vst [vmem:[#allocation60_spill] sm:$0xff] %v10520_v2  ;;  %v10533_v25 = vadd.f32 %v898_v11, %v10480_v8  ;;  %v1007_v16 = vpack.c.bf16 %v1006_v10, %v1006_v10  ;;  %v10543_v5 = vld [vmem:[#allocation9 + $0x28] ss:$16 sps:$4 sm:$0xff]   ;;  %v10547_v10 = vld [vmem:[#allocation9 + $0x44] ss:$16 sps:$4 sm:$0xff]  }
 0x208   :  { %12088 = vst [vmem:[#allocation61_spill] sm:$0xff] %v10523_v4  ;;  %12089 = vst [vmem:[#allocation62_spill] sm:$0xff] %v10530_v17  ;;  %v10549_v11 = vld [vmem:[#allocation9 + $0x4c] ss:$16 sps:$4 sm:$0xff]   ;;  %v12097_v2 = vmov 0  }
 0x209   :  { %12090 = vst [vmem:[#allocation63_spill] sm:$0xff] %v10533_v25  ;;  %1025 = vst [vmem:[#allocation2] sm:$0xf] %v1007_v16  ;;  %1263 = vmatmul.mubr.bf16.vlgmr.msra.gmra.mrb[32].mxu0 %v1007_v16  ;;  %1304 = vmatmul.mubr.bf16.vlgmr.msra.gmra.mrb[32].mxu1 %v1007_v16 }
 0x20a   :  { %1509 = vmatpush1.bf16.msra.mxu0 %v10525_v63  ;;  %1550 = vmatpush1.bf16.msra.mxu1 %v10527_v18  ;;  %12091 = vst [vmem:[#allocation64_spill] sm:$0xff] %v10541_v23  ;;  %12092 = vst [vmem:[#allocation65_spill] sm:$0xff] %v10543_v5  ;;  %v829_v61 = vpop.f32.mrb[24].mxu0  ;;  %v902_v21 = vpop.f32.mrb[24].mxu1 }
 0x20b   :  { %1510 = vmatprep.subr.bf16.mxu0 %v10535_v1  ;;  %1551 = vmatprep.subr.bf16.mxu1 %v10537_v0  ;;  %12093 = vst [vmem:[#allocation66_spill] sm:$0xff] %v10547_v10  ;;  %12094 = vst [vmem:[#allocation67_spill] sm:$0xff] %v10549_v11  ;;  %v10552_v16 = vadd.f32 %v829_v61, %v10467_v62  ;;  %v10555_v25 = vadd.f32 %v902_v21, %v10472_v6  ;;  %v831_v17 = vpop.f32.mrb[25].mxu0  ;;  %v904_v4 = vpop.f32.mrb[25].mxu1 }
 0x20c   :  { %1540 = vmatprep.mubr.bf16.mxu0 %v12097_v2  ;;  %1581 = vmatprep.mubr.bf16.mxu1 %v12097_v2  ;;  %v10560_v12 = vadd.f32 %v831_v17, %v10475_v24  ;;  %v10563_v9 = vadd.f32 %v904_v4, %v10480_v8  ;;  %v833_v7 = vpop.f32.mrb[26].mxu0  ;;  %v906_v26 = vpop.f32.mrb[26].mxu1  ;;  %v10575_v17 = vld [vmem:[#allocation9 + $0x48] ss:$16 sps:$4 sm:$0xff]  }
 0x20d   :  { %12095 = vst [vmem:[#allocation68_spill] sm:$0xff] %v10552_v16  ;;  %12096 = vst [vmem:[#allocation69_spill] sm:$0xff] %v10555_v25  ;;  %v10566_v61 = vadd.f32 %v833_v7, %v10467_v62  ;;  %v10569_v21 = vadd.f32 %v906_v26, %v10472_v6  ;;  %v835_v25 = vpop.f32.mrb[27].mxu0  ;;  %v908_v16 = vpop.f32.mrb[27].mxu1  ;;  %v10585_v26 = vld [vmem:[#allocation9 + $0x64] ss:$16 sps:$4 sm:$0xff]  }
 0x20e   :  { %12098 = vst [vmem:[#allocation70_spill] sm:$0xff] %v10560_v12  ;;  %12099 = vst [vmem:[#allocation71_spill] sm:$0xff] %v10563_v9  ;;  %1511 = vmatpush1.bf16.msra.mxu0 %v10541_v23  ;;  %1552 = vmatpush1.bf16.msra.mxu1 %v10543_v5  ;;  %v10578_v4 = vadd.f32 %v835_v25, %v10475_v24  ;;  %v10581_v9 = vadd.f32 %v908_v16, %v10480_v8  ;;  %v10587_v7 = vld [vmem:[#allocation9 + $0x6c] ss:$16 sps:$4 sm:$0xff]   ;;  %v10591_v12 = vld [vmem:[#allocation9 + $0x60] ss:$16 sps:$4 sm:$0xff]  }
 0x20f   :  { %12100 = vst [vmem:[#allocation72_spill] sm:$0xff] %v10566_v61  ;;  %12101 = vst [vmem:[#allocation73_spill] sm:$0xff] %v10569_v21  ;;  %1512 = vmatprep.subr.bf16.mxu0 %v10547_v10  ;;  %1553 = vmatprep.subr.bf16.mxu1 %v10549_v11  ;;  %v10593_v21 = vld [vmem:[#allocation9 + $0x68] ss:$16 sps:$4 sm:$0xff]   ;;  %v10597_v16 = vld [vmem:[#allocation9 + $0x84] ss:$16 sps:$4 sm:$0xff]  }
 0x210   :  { %12103 = vst [vmem:[#allocation75_spill] sm:$0xff] %v10575_v17  ;;  %12104 = vst [vmem:[#allocation76_spill] sm:$0xff] %v10578_v4 }
 0x211   :  { %12105 = vst [vmem:[#allocation77_spill] sm:$0xff] %v10581_v9  ;;  %12106 = vst [vmem:[#allocation78_spill] sm:$0xff] %v10585_v26  ;;  %v10599_v9 = vld [vmem:[#allocation9 + $0x8c] ss:$16 sps:$4 sm:$0xff]  }
 0x212   :  { %12107 = vst [vmem:[#allocation79_spill] sm:$0xff] %v10587_v7  ;;  %1513 = vmatpush1.bf16.msra.mxu0 %v10573_v19  ;;  %1554 = vmatpush1.bf16.msra.mxu1 %v10575_v17  ;;  %v839_v25 = vpop.f32.mrb[28].mxu0  ;;  %v912_v4 = vpop.f32.mrb[28].mxu1  ;;  %12108 = vst [vmem:[#allocation80_spill] sm:$0xff] %v10597_v16 }
 0x213   :  { %1514 = vmatprep.subr.bf16.mxu0 %v10585_v26  ;;  %1555 = vmatprep.subr.bf16.mxu1 %v10587_v7  ;;  %12109 = vst [vmem:[#allocation81_spill] sm:$0xff] %v10599_v9  ;;  %v10602_v61 = vadd.f32 %v839_v25, %v10467_v62  ;;  %v10605_v19 = vadd.f32 %v912_v4, %v10472_v6  ;;  %v10607_v17 = vpop.f32.mrb[29].mxu0  ;;  %v914_v24 = vpop.f32.mrb[29].mxu1  ;;  %v10615_v25 = vld [vmem:[#allocation9 + $0x80] ss:$16 sps:$4 sm:$0xff]  }
 0x214   :  { %v10610_v11 = vadd.f32 %v914_v24, %v10480_v8  ;;  %v843_v10 = vpop.f32.mrb[30].mxu0  ;;  %v916_v26 = vpop.f32.mrb[30].mxu1  ;;  %v10617_v4 = vld [vmem:[#allocation9 + $0x88] ss:$16 sps:$4 sm:$0xff]   ;;  %v10621_v24 = vld [vmem:[#allocation9 + $0xa4] ss:$16 sps:$4 sm:$0xff]  }
 0x215   :  { %12110 = vst [vmem:[#allocation82_spill] sm:$0xff] %v10605_v19  ;;  %v844_v7 = vadd.f32 %v843_v10, %v10467_v62  ;;  %v845_v5 = vpop.f32.mrb[31].mxu0  ;;  %v918_v23 = vpop.f32.mrb[31].mxu1  ;;  %12112 = vst [vmem:[#allocation84_spill] sm:$0xff] %v10621_v24  ;;  %v10630_v10 = vld [vmem:[#allocation9 + $0xa8] ss:$16 sps:$4 sm:$0xff]  }
 0x216   :  { %12111 = vst [vmem:[#allocation83_spill] sm:$0xff] %v10610_v11  ;;  %1515 = vmatpush1.bf16.msra.mxu0 %v10591_v12  ;;  %1556 = vmatpush1.bf16.msra.mxu1 %v10593_v21  ;;  %v10623_v11 = vld [vmem:[#allocation9 + $0xac] ss:$16 sps:$4 sm:$0xff]   ;;  %v919_v62 = vadd.f32 %v918_v23, %v10480_v8  ;;  %v10628_v5 = vld [vmem:[#allocation9 + $0xa0] ss:$16 sps:$4 sm:$0xff]   ;;  %12114 = vst [vmem:[#allocation86_spill] sm:$0xff] %v10630_v10 }
 0x217   :  { %1516 = vmatprep.subr.bf16.mxu0 %v10597_v16  ;;  %1557 = vmatprep.subr.bf16.mxu1 %v10599_v9  ;;  %12113 = vst [vmem:[#allocation85_spill] sm:$0xff] %v10623_v11  ;;  %v8034_v19 = vmul.f32 -1.442695, %v844_v7  ;;  %v10634_v9 = vld [vmem:[#allocation9 + $0xc4] ss:$16 sps:$4 sm:$0xff]  }
 0x218   :  { %12115 = vst [vmem:[#allocation87_spill] sm:$0xff] %v10634_v9  ;;  %v10636_v16 = vld [vmem:[#allocation9 + $0xcc] ss:$16 sps:$4 sm:$0xff]   ;;  %v8035_v7 = vmul.f32 -1.442695, %v919_v62 }
 0x219   :  { %9313 = vpow2.f32 %v8034_v19  ;;  %12116 = vst [vmem:[#allocation88_spill] sm:$0xff] %v10636_v16  ;;  %v10640_v19 = vld [vmem:[#allocation9 + $0xc0] ss:$16 sps:$4 sm:$0xff]   ;;  %v10642_v8 = vld [vmem:[#allocation9 + $0xc8] ss:$16 sps:$4 sm:$0xff]  }
 0x21a   :  { %1517 = vmatpush1.bf16.msra.mxu0 %v10615_v25  ;;  %1558 = vmatpush1.bf16.msra.mxu1 %v10617_v4  ;;  %12117 = vst [vmem:[#allocation89_spill] sm:$0xff] %v10640_v19  ;;  %12118 = vst [vmem:[#allocation90_spill] sm:$0xff] %v10642_v8  ;;  %v10646_v23 = vld [vmem:[#allocation9 + $0xe4] ss:$16 sps:$4 sm:$0xff]   ;;  %9315 = vpow2.f32 %v8035_v7  ;;  %v10653_v62 = vld [vmem:[#allocation9 + $0xe0] ss:$16 sps:$4 sm:$0xff]  }
 0x21b   :  { %1518 = vmatprep.subr.bf16.mxu0 %v10621_v24  ;;  %1559 = vmatprep.subr.bf16.mxu1 %v10623_v11  ;;  %12119 = vst [vmem:[#allocation91_spill] sm:$0xff] %v10646_v23  ;;  %v10648_v11 = vld [vmem:[#allocation9 + $0xec] ss:$16 sps:$4 sm:$0xff]   ;;  %v917_v24 = vadd.f32 %v916_v26, %v10472_v6  ;;  %12121 = vst [vmem:[#allocation93_spill] sm:$0xff] %v10653_v62 }
 0x21c   :  { %12120 = vst [vmem:[#allocation92_spill] sm:$0xff] %v10648_v11 }
 0x21d   :  { %9317 = vtanh.f32 %v917_v24 }
 0x21e   :  { %1519 = vmatpush1.bf16.msra.mxu0 %v10628_v5  ;;  %1560 = vmatpush1.bf16.msra.mxu1 %v10630_v10  ;;  %v10655_v10 = vld [vmem:[#allocation9 + $0xe8] ss:$16 sps:$4 sm:$0xff]  }
 0x21f   :  { %1520 = vmatprep.subr.bf16.mxu0 %v10634_v9  ;;  %1561 = vmatprep.subr.bf16.mxu1 %v10636_v16 }
 0x222   :  { %1521 = vmatpush1.bf16.msra.mxu0 %v10640_v19  ;;  %1562 = vmatpush1.bf16.msra.mxu1 %v10642_v8 }
 0x223   :  { %1522 = vmatprep.subr.bf16.mxu0 %v10646_v23  ;;  %1563 = vmatprep.subr.bf16.mxu1 %v10648_v11  ;;  %v9314_v16 = vpop.eup %9313 }
 0x224   :  { %v1011_v9 = vadd.f32 1.0, %v9314_v16  ;;  %v9316_v6 = vpop.eup %9315 }
 0x225   :  { %v1018_v26 = vadd.f32 1.0, %v9316_v6  ;;  %v12131_v6 = vld [vmem:[#allocation79_spill] sm:$0xff] }
 0x226   :  { %1523 = vmatpush1.bf16.msra.mxu0 %v10653_v62  ;;  %1564 = vmatpush1.bf16.msra.mxu1 %v10655_v10  ;;  %9319 = vrcp.f32 %v1011_v9 }
 0x227   :  { %1849 = vmatprep.subr.bf16.mxu0 %v10238_v27  ;;  %1890 = vmatprep.subr.bf16.mxu1 %v10240_v28  ;;  %v9318_v7 = vpop.eup %9317  ;;  %9321 = vrcp.f32 %v1018_v26  ;;  %v670_v27 = vadd.f32 %v10373_v15, %v10383_v22  ;;  %v12125_v15 = vld [vmem:[#allocation67_spill] sm:$0xff] }
 0x230   :  { %v9320_v8 = vpop.eup %9319 }
 0x231   :  { %v10663_v19 = vmul.f32 %v9320_v8, %v9318_v7  ;;  %v9322_v16 = vpop.eup %9321  ;;  %v12132_v7 = vld [vmem:[#allocation83_spill] sm:$0xff] }
 0x233   :  { %9323 = vtanh.f32 %v10663_v19 }
 0x23d   :  { %v9324_v24 = vpop.eup %9323 }
 0x23e   :  { %v1023_v11 = vmul.f32 %v9324_v24, %v9322_v16 }
 0x240   :  { %v1024_v62 = vpack.c.bf16 %v1023_v11, %v1023_v11 }
 0x242   :  { %v1027_v23 = vrot.slane %v1024_v62, 4  ;;  %1541 = vmatmul.mubr.bf16.vlgmr.msra.gmra.mrb[36].mxu0 %v1024_v62  ;;  %1582 = vmatmul.mubr.bf16.vlgmr.msra.gmra.mrb[36].mxu1 %v1024_v62  ;;  %v12130_v62 = vld [vmem:[#allocation78_spill] sm:$0xff] }
 0x243   :  { %1850 = vmatpush1.bf16.msra.mxu0 %v10242_v29  ;;  %1891 = vmatpush1.bf16.msra.mxu1 %v10244_v30 }
 0x244   :  { %1029 = vst [vmem:[#allocation2 + $0x38] sm:$0xf0] %v1027_v23  ;;  %1851 = vmatprep.subr.bf16.mxu0 %v10250_v31  ;;  %1892 = vmatprep.subr.bf16.mxu1 %v10252_v32 }
 0x245   :  { %1881 = vmatprep.mubr.bf16.mxu0 %v12097_v2  ;;  %1922 = vmatprep.mubr.bf16.mxu1 %v12097_v2 }
 0x247   :  { %1852 = vmatpush1.bf16.msra.mxu0 %v10254_v33  ;;  %1893 = vmatpush1.bf16.msra.mxu1 %v10256_v34 }
 0x248   :  { %1853 = vmatprep.subr.bf16.mxu0 %v10262_v35  ;;  %1894 = vmatprep.subr.bf16.mxu1 %v10264_v36 }
 0x24b   :  { %1854 = vmatpush1.bf16.msra.mxu0 %v10266_v37  ;;  %1895 = vmatpush1.bf16.msra.mxu1 %v10268_v38 }
 0x24c   :  { %1855 = vmatprep.subr.bf16.mxu0 %v10274_v39  ;;  %1896 = vmatprep.subr.bf16.mxu1 %v10276_v40 }
 0x24f   :  { %1856 = vmatpush1.bf16.msra.mxu0 %v10278_v41  ;;  %1897 = vmatpush1.bf16.msra.mxu1 %v10280_v42 }
 0x250   :  { %1857 = vmatprep.subr.bf16.mxu0 %v10286_v43  ;;  %1898 = vmatprep.subr.bf16.mxu1 %v10288_v44 }
 0x253   :  { %1858 = vmatpush1.bf16.msra.mxu0 %v10290_v45  ;;  %1899 = vmatpush1.bf16.msra.mxu1 %v10292_v46 }
 0x254   :  { %1859 = vmatprep.subr.bf16.mxu0 %v10298_v47  ;;  %1900 = vmatprep.subr.bf16.mxu1 %v10300_v48 }
 0x257   :  { %1860 = vmatpush1.bf16.msra.mxu0 %v10302_v49  ;;  %1901 = vmatpush1.bf16.msra.mxu1 %v10304_v50 }
 0x258   :  { %1861 = vmatprep.subr.bf16.mxu0 %v10312_v52  ;;  %1902 = vmatprep.subr.bf16.mxu1 %v10316_v54 }
 0x25b   :  { %1862 = vmatpush1.bf16.msra.mxu0 %v10310_v51  ;;  %1903 = vmatpush1.bf16.msra.mxu1 %v10314_v53 }
 0x25c   :  { %1863 = vmatprep.subr.bf16.mxu0 %v10322_v55  ;;  %1904 = vmatprep.subr.bf16.mxu1 %v10324_v56 }
 0x25f   :  { %1864 = vmatpush1.bf16.msra.mxu0 %v10326_v57  ;;  %1905 = vmatpush1.bf16.msra.mxu1 %v10328_v58 }
 0x260   :  { %2127 = vmatprep.subr.bf16.mxu0 %v10334_v59  ;;  %2168 = vmatprep.subr.bf16.mxu1 %v10336_v60  ;;  %v12122_v60 = vld [vmem:[#allocation64_spill] sm:$0xff] }
 0x2dc   :  { %v1264_v28 = vpop.f32.mrb[32].mxu0  ;;  %v1305_v29 = vpop.f32.mrb[32].mxu1 }
 0x2dd   :  { %v1312_v30 = vadd.f32 %v1264_v28, %v10368_v13  ;;  %v1314_v31 = vadd.f32 %v1305_v29, %v10371_v14  ;;  %v1266_v32 = vpop.f32.mrb[33].mxu0  ;;  %v1307_v33 = vpop.f32.mrb[33].mxu1  ;;  %v12123_v13 = vld [vmem:[#allocation65_spill] sm:$0xff]  ;;  %v12124_v14 = vld [vmem:[#allocation66_spill] sm:$0xff] }
 0x2de   :  { %v1313_v34 = vadd.f32 %v1266_v32, %v670_v27  ;;  %v1315_v35 = vadd.f32 %v1307_v33, %v10377_v20  ;;  %v1268_v36 = vpop.f32.mrb[34].mxu0  ;;  %v1309_v37 = vpop.f32.mrb[34].mxu1  ;;  %v12126_v20 = vld [vmem:[#allocation47_spill] sm:$0xff]  ;;  %v12135_v32 = vld [vmem:[#allocation84_spill] sm:$0xff]  ;;  %v12136_v33 = vld [vmem:[#allocation85_spill] sm:$0xff] }
 0x2df   :  { %v8100_v38 = vmul.f32 -1.442695, %v1312_v30  ;;  %v1269_v39 = vpop.f32.mrb[35].mxu0  ;;  %v1310_v40 = vpop.f32.mrb[35].mxu1  ;;  %v842_v22 = vadd.f32 %v10607_v17, %v12126_v20  ;;  %v10782_v20 = vld [vmem:[#allocation7 + $0x48] ss:$16 sps:$4 sm:$0xff]  }
 0x2e0   :  { %v8101_v41 = vmul.f32 -1.442695, %v1313_v34  ;;  %v8102_v42 = vmul.f32 -1.442695, %v1315_v35  ;;  %v12139_v35 = vld [vmem:[#allocation88_spill] sm:$0xff]  ;;  %v12142_v40 = vld [vmem:[#allocation91_spill] sm:$0xff] }
 0x2e1   :  { %9325 = vpow2.f32 %v8100_v38 }
 0x2e2   :  { %9327 = vpow2.f32 %v8101_v41  ;;  %v12143_v41 = vld [vmem:[#allocation92_spill] sm:$0xff] }
 0x2e3   :  { %9329 = vpow2.f32 %v8102_v42 }
 0x2e4   :  { %9331 = vtanh.f32 %v1314_v31  ;;  %v12134_v31 = vld [vmem:[#allocation81_spill] sm:$0xff] }
 0x2eb   :  { %v9326_v43 = vpop.eup %9325 }
 0x2ec   :  { %v9328_v44 = vpop.eup %9327  ;;  %v1597_v45 = vadd.f32 1.0, %v9326_v43 }
 0x2ed   :  { %v1603_v46 = vadd.f32 1.0, %v9328_v44  ;;  %v9330_v47 = vpop.eup %9329 }
 0x2ee   :  { %9333 = vrcp.f32 %v1597_v45  ;;  %v9332_v48 = vpop.eup %9331  ;;  %v1610_v52 = vadd.f32 1.0, %v9330_v47 }
 0x2ef   :  { %9335 = vrcp.f32 %v1603_v46 }
 0x2f0   :  { %9337 = vrcp.f32 %v1610_v52 }
 0x2f8   :  { %v9334_v49 = vpop.eup %9333 }
 0x2f9   :  { %v9336_v50 = vpop.eup %9335  ;;  %v1614_v51 = vmul.f32 %v9334_v49, %v9332_v48 }
 0x2fa   :  { %v1613_v53 = vmul.f32 %v9336_v50, %v10462_v3  ;;  %v9338_v55 = vpop.eup %9337 }
 0x2fc   :  { %v10706_v54 = vadd.f32 %v1614_v51, %v1613_v53 }
 0x2fe   :  { %9339 = vtanh.f32 %v10706_v54 }
 0x308   :  { %v9340_v56 = vpop.eup %9339 }
 0x309   :  { %v1617_v57 = vmul.f32 %v9340_v56, %v9338_v55  ;;  %v10754_v55 = vld [vmem:[#allocation7 + $0xc] ss:$16 sps:$4 sm:$0xff]   ;;  %v10758_v56 = vld [vmem:[#allocation7 + $0x8] ss:$16 sps:$4 sm:$0xff]  }
 0x30b   :  { %v1618_v58 = vpack.c.bf16 %v1617_v57, %v1617_v57  ;;  %v10764_v57 = vld [vmem:[#allocation7 + $0x24] ss:$16 sps:$4 sm:$0xff]  }
 0x30d   :  { %v1645_v59 = vrot.slane %v1618_v58, 4  ;;  %1882 = vmatmul.mubr.bf16.vlgmr.msra.gmra.mrb[40].mxu0 %v1618_v58  ;;  %1923 = vmatmul.mubr.bf16.vlgmr.msra.gmra.mrb[40].mxu1 %v1618_v58  ;;  %v10766_v58 = vld [vmem:[#allocation7 + $0x2c] ss:$16 sps:$4 sm:$0xff]  }
 0x30e   :  { %2128 = vmatpush1.bf16.msra.mxu0 %v10525_v63  ;;  %2169 = vmatpush1.bf16.msra.mxu1 %v10527_v18  ;;  %v12127_v18 = vld [vmem:[#allocation74_spill] sm:$0xff]  ;;  %v12128_v63 = vld [vmem:[#allocation75_spill] sm:$0xff] }
 0x30f   :  { %1647 = vst [vmem:[#allocation2] sm:$0xf0] %v1645_v59  ;;  %2129 = vmatprep.subr.bf16.mxu0 %v10535_v1  ;;  %2170 = vmatprep.subr.bf16.mxu1 %v10537_v0  ;;  %v12129_v0 = vld [vmem:[#allocation82_spill] sm:$0xff]  ;;  %v10768_v59 = vld [vmem:[#allocation7 + $0x20] ss:$16 sps:$4 sm:$0xff]  }
 0x310   :  { %2159 = vmatprep.mubr.bf16.mxu0 %v12097_v2  ;;  %2200 = vmatprep.mubr.bf16.mxu1 %v12097_v2 }
 0x312   :  { %2130 = vmatpush1.bf16.msra.mxu0 %v12122_v60  ;;  %2171 = vmatpush1.bf16.msra.mxu1 %v12123_v13  ;;  %v10770_v60 = vld [vmem:[#allocation7 + $0x28] ss:$16 sps:$4 sm:$0xff]   ;;  %v10776_v13 = vld [vmem:[#allocation7 + $0x44] ss:$16 sps:$4 sm:$0xff]  }
 0x313   :  { %2131 = vmatprep.subr.bf16.mxu0 %v12124_v14  ;;  %2172 = vmatprep.subr.bf16.mxu1 %v12125_v15  ;;  %v10778_v14 = vld [vmem:[#allocation7 + $0x4c] ss:$16 sps:$4 sm:$0xff]   ;;  %v10780_v15 = vld [vmem:[#allocation7 + $0x40] ss:$16 sps:$4 sm:$0xff]  }
 0x315   :  { %v1542_v9 = vpop.f32.mrb[36].mxu0  ;;  %v1583_v3 = vpop.f32.mrb[36].mxu1 }
 0x316   :  { %2132 = vmatpush1.bf16.msra.mxu0 %v12127_v18  ;;  %2173 = vmatpush1.bf16.msra.mxu1 %v12128_v63  ;;  %v1590_v1 = vadd.f32 %v1542_v9, %v10602_v61  ;;  %v1592_v11 = vadd.f32 %v1583_v3, %v12129_v0  ;;  %v1544_v8 = vpop.f32.mrb[37].mxu0  ;;  %v1585_v23 = vpop.f32.mrb[37].mxu1  ;;  %v12133_v61 = vld [vmem:[#allocation80_spill] sm:$0xff]  ;;  %v10792_v3 = vld [vmem:[#allocation7 + $0x60] ss:$16 sps:$4 sm:$0xff]  }
 0x317   :  { %2133 = vmatprep.subr.bf16.mxu0 %v12130_v62  ;;  %2174 = vmatprep.subr.bf16.mxu1 %v12131_v6  ;;  %v1591_v26 = vadd.f32 %v1544_v8, %v842_v22  ;;  %v1593_v16 = vadd.f32 %v1585_v23, %v12132_v7  ;;  %v1546_v17 = vpop.f32.mrb[38].mxu0  ;;  %v1587_v24 = vpop.f32.mrb[38].mxu1  ;;  %v10788_v22 = vld [vmem:[#allocation7 + $0x64] ss:$16 sps:$4 sm:$0xff]   ;;  %v10790_v9 = vld [vmem:[#allocation7 + $0x6c] ss:$16 sps:$4 sm:$0xff]  }
 0x318   :  { %v8103_v27 = vmul.f32 -1.442695, %v1590_v1  ;;  %v1547_v28 = vpop.f32.mrb[39].mxu0  ;;  %v1588_v29 = vpop.f32.mrb[39].mxu1  ;;  %v10794_v18 = vld [vmem:[#allocation7 + $0x68] ss:$16 sps:$4 sm:$0xff]  }
 0x319   :  { %v8104_v30 = vmul.f32 -1.442695, %v1591_v26  ;;  %v8105_v34 = vmul.f32 -1.442695, %v1593_v16  ;;  %v10800_v63 = vld [vmem:[#allocation7 + $0x80] ss:$16 sps:$4 sm:$0xff]  }
 0x31a   :  { %2134 = vmatpush1.bf16.msra.mxu0 %v10591_v12  ;;  %2175 = vmatpush1.bf16.msra.mxu1 %v10593_v21  ;;  %9341 = vpow2.f32 %v8103_v27  ;;  %v12137_v12 = vld [vmem:[#allocation86_spill] sm:$0xff]  ;;  %v12138_v21 = vld [vmem:[#allocation87_spill] sm:$0xff] }
 0x31b   :  { %2135 = vmatprep.subr.bf16.mxu0 %v12133_v61  ;;  %2176 = vmatprep.subr.bf16.mxu1 %v12134_v31  ;;  %9343 = vpow2.f32 %v8104_v30  ;;  %v10802_v1 = vld [vmem:[#allocation7 + $0x84] ss:$16 sps:$4 sm:$0xff]   ;;  %v10804_v0 = vld [vmem:[#allocation7 + $0x88] ss:$16 sps:$4 sm:$0xff]   ;;  %v10811_v23 = vld [vmem:[#allocation7 + $0xac] ss:$16 sps:$4 sm:$0xff]  }
 0x31c   :  { %9345 = vpow2.f32 %v8105_v34  ;;  %v10808_v8 = vld [vmem:[#allocation7 + $0xa4] ss:$16 sps:$4 sm:$0xff]   ;;  %v10815_v62 = vld [vmem:[#allocation7 + $0xa0] ss:$16 sps:$4 sm:$0xff]   ;;  %v10819_v6 = vld [vmem:[#allocation7 + $0xa8] ss:$16 sps:$4 sm:$0xff]  }
 0x31d   :  { %9347 = vtanh.f32 %v1592_v11  ;;  %v10806_v11 = vld [vmem:[#allocation7 + $0x8c] ss:$16 sps:$4 sm:$0xff]   ;;  %v10821_v26 = vld [vmem:[#allocation7 + $0xc4] ss:$16 sps:$4 sm:$0xff]   ;;  %v10827_v16 = vld [vmem:[#allocation7 + $0xc0] ss:$16 sps:$4 sm:$0xff]  }
 0x31e   :  { %2136 = vmatpush1.bf16.msra.mxu0 %v10615_v25  ;;  %2177 = vmatpush1.bf16.msra.mxu1 %v10617_v4  ;;  %v12140_v25 = vld [vmem:[#allocation89_spill] sm:$0xff]  ;;  %v12141_v4 = vld [vmem:[#allocation90_spill] sm:$0xff] }
 0x31f   :  { %2137 = vmatprep.subr.bf16.mxu0 %v12135_v32  ;;  %2178 = vmatprep.subr.bf16.mxu1 %v12136_v33  ;;  %v10824_v7 = vld [vmem:[#allocation7 + $0xcc] ss:$16 sps:$4 sm:$0xff]   ;;  %v10831_v17 = vld [vmem:[#allocation7 + $0xc8] ss:$16 sps:$4 sm:$0xff]   ;;  %v10833_v24 = vld [vmem:[#allocation7 + $0xe4] ss:$16 sps:$4 sm:$0xff]  }
 0x320   :  { %v10836_v27 = vld [vmem:[#allocation7 + $0xec] ss:$16 sps:$4 sm:$0xff]   ;;  %v10839_v28 = vld [vmem:[#allocation7 + $0xe0] ss:$16 sps:$4 sm:$0xff]   ;;  %v10843_v29 = vld [vmem:[#allocation7 + $0xe8] ss:$16 sps:$4 sm:$0xff]  }
 0x321   :  { %v10848_v30 = vld [vmem:[#allocation9 + $0x4] ss:$16 sps:$4 sm:$0xff]   ;;  %v10850_v61 = vld [vmem:[#allocation9 + $0xc] ss:$16 sps:$4 sm:$0xff]  }
 0x322   :  { %2138 = vmatpush1.bf16.msra.mxu0 %v10628_v5  ;;  %2179 = vmatpush1.bf16.msra.mxu1 %v12137_v12  ;;  %v12144_v5 = vld [vmem:[#allocation93_spill] sm:$0xff]  ;;  %v12145_v33 = vld [vmem:[#allocation23_spill] sm:$0xff]  ;;  %v12146_v12 = vld [vmem:[#allocation24_spill] sm:$0xff] }
 0x323   :  { %2139 = vmatprep.subr.bf16.mxu0 %v12138_v21  ;;  %2180 = vmatprep.subr.bf16.mxu1 %v12139_v35 }
 0x324   :  { %v9342_v36 = vpop.eup %9341 }
 0x325   :  { %v9344_v37 = vpop.eup %9343  ;;  %v1622_v38 = vadd.f32 1.0, %v9342_v36 }
 0x326   :  { %2140 = vmatpush1.bf16.msra.mxu0 %v12140_v25  ;;  %2181 = vmatpush1.bf16.msra.mxu1 %v12141_v4  ;;  %v1628_v39 = vadd.f32 1.0, %v9344_v37  ;;  %v9346_v42 = vpop.eup %9345  ;;  %v12147_v37 = vld [vmem:[#allocation25_spill] sm:$0xff]  ;;  %v12148_v25 = vld [vmem:[#allocation26_spill] sm:$0xff] }
 0x327   :  { %2141 = vmatprep.subr.bf16.mxu0 %v12142_v40  ;;  %2182 = vmatprep.subr.bf16.mxu1 %v12143_v41  ;;  %9349 = vrcp.f32 %v1622_v38  ;;  %v9348_v43 = vpop.eup %9347  ;;  %v1635_v47 = vadd.f32 1.0, %v9346_v42 }
 0x328   :  { %9351 = vrcp.f32 %v1628_v39 }
 0x329   :  { %9353 = vrcp.f32 %v1635_v47 }
 0x32a   :  { %2142 = vmatpush1.bf16.msra.mxu0 %v12144_v5  ;;  %2183 = vmatpush1.bf16.msra.mxu1 %v10655_v10  ;;  %v10752_v10 = vld [vmem:[#allocation7 + $0x4] ss:$16 sps:$4 sm:$0xff]  }
 0x32b   :  { %2468 = vmatprep.subr.bf16.mxu0 %v10752_v10  ;;  %2509 = vmatprep.subr.bf16.mxu1 %v10754_v55 }
 0x331   :  { %v9350_v44 = vpop.eup %9349 }
 0x332   :  { %v9352_v45 = vpop.eup %9351  ;;  %v1639_v46 = vmul.f32 %v9350_v44, %v9348_v43 }
 0x333   :  { %v1638_v48 = vmul.f32 %v9352_v45, %v10663_v19  ;;  %v9354_v50 = vpop.eup %9353  ;;  %v10756_v19 = vld [vmem:[#allocation7] ss:$16 sps:$4 sm:$0xff]  }
 0x335   :  { %v10747_v49 = vadd.f32 %v1639_v46, %v1638_v48 }
 0x337   :  { %9355 = vtanh.f32 %v10747_v49 }
 0x341   :  { %v9356_v51 = vpop.eup %9355 }
 0x342   :  { %v1642_v52 = vmul.f32 %v9356_v51, %v9354_v50 }
 0x344   :  { %v1643_v53 = vpack.c.bf16 %v1642_v52, %v1642_v52 }
 0x346   :  { %1648 = vst [vmem:[#allocation2 + $0x38] sm:$0xf] %v1643_v53  ;;  %2160 = vmatmul.mubr.bf16.vlgmr.msra.gmra.mrb[44].mxu0 %v1643_v53  ;;  %2201 = vmatmul.mubr.bf16.vlgmr.msra.gmra.mrb[44].mxu1 %v1643_v53 }
 0x347   :  { %2500 = vmatprep.mubr.bf16.mxu0 %v12097_v2  ;;  %2541 = vmatprep.mubr.bf16.mxu1 %v12097_v2 }
 0x348   :  { %2469 = vmatpush1.bf16.msra.mxu0 %v10756_v19  ;;  %2510 = vmatpush1.bf16.msra.mxu1 %v10758_v56 }
 0x349   :  { %2470 = vmatprep.subr.bf16.mxu0 %v10764_v57  ;;  %2511 = vmatprep.subr.bf16.mxu1 %v10766_v58 }
 0x34c   :  { %2471 = vmatpush1.bf16.msra.mxu0 %v10768_v59  ;;  %2512 = vmatpush1.bf16.msra.mxu1 %v10770_v60 }
 0x34d   :  { %2472 = vmatprep.subr.bf16.mxu0 %v10776_v13  ;;  %2513 = vmatprep.subr.bf16.mxu1 %v10778_v14 }
 0x350   :  { %2473 = vmatpush1.bf16.msra.mxu0 %v10780_v15  ;;  %2514 = vmatpush1.bf16.msra.mxu1 %v10782_v20 }
 0x351   :  { %2474 = vmatprep.subr.bf16.mxu0 %v10788_v22  ;;  %2515 = vmatprep.subr.bf16.mxu1 %v10790_v9 }
 0x354   :  { %2475 = vmatpush1.bf16.msra.mxu0 %v10792_v3  ;;  %2516 = vmatpush1.bf16.msra.mxu1 %v10794_v18 }
 0x355   :  { %2476 = vmatprep.subr.bf16.mxu0 %v10802_v1  ;;  %2517 = vmatprep.subr.bf16.mxu1 %v10806_v11 }
 0x358   :  { %2477 = vmatpush1.bf16.msra.mxu0 %v10800_v63  ;;  %2518 = vmatpush1.bf16.msra.mxu1 %v10804_v0 }
 0x359   :  { %2478 = vmatprep.subr.bf16.mxu0 %v10808_v8  ;;  %2519 = vmatprep.subr.bf16.mxu1 %v10811_v23 }
 0x35c   :  { %2479 = vmatpush1.bf16.msra.mxu0 %v10815_v62  ;;  %2520 = vmatpush1.bf16.msra.mxu1 %v10819_v6 }
 0x35d   :  { %2480 = vmatprep.subr.bf16.mxu0 %v10821_v26  ;;  %2521 = vmatprep.subr.bf16.mxu1 %v10824_v7 }
 0x360   :  { %2481 = vmatpush1.bf16.msra.mxu0 %v10827_v16  ;;  %2522 = vmatpush1.bf16.msra.mxu1 %v10831_v17 }
 0x361   :  { %2482 = vmatprep.subr.bf16.mxu0 %v10833_v24  ;;  %2523 = vmatprep.subr.bf16.mxu1 %v10836_v27 }
 0x364   :  { %2483 = vmatpush1.bf16.msra.mxu0 %v10839_v28  ;;  %2524 = vmatpush1.bf16.msra.mxu1 %v10843_v29 }
 0x365   :  { %2746 = vmatprep.subr.bf16.mxu0 %v10848_v30  ;;  %2787 = vmatprep.subr.bf16.mxu1 %v10850_v61 }
 0x3e0   :  { %v1883_v31 = vpop.f32.mrb[40].mxu0  ;;  %v1924_v32 = vpop.f32.mrb[40].mxu1 }
 0x3e1   :  { %v1931_v34 = vadd.f32 %v1883_v31, %v12145_v33  ;;  %v1933_v21 = vadd.f32 %v1924_v32, %v12146_v12  ;;  %v1885_v35 = vpop.f32.mrb[41].mxu0  ;;  %v1926_v36 = vpop.f32.mrb[41].mxu1 }
 0x3e2   :  { %v1932_v38 = vadd.f32 %v1885_v35, %v12147_v37  ;;  %v1934_v4 = vadd.f32 %v1926_v36, %v12148_v25  ;;  %v1887_v39 = vpop.f32.mrb[42].mxu0  ;;  %v1928_v40 = vpop.f32.mrb[42].mxu1  ;;  %v10864_v37 = vld [vmem:[#allocation9 + $0x8] ss:$16 sps:$4 sm:$0xff]   ;;  %v10866_v25 = vld [vmem:[#allocation9 + $0x24] ss:$16 sps:$4 sm:$0xff]  }
 0x3e3   :  { %v8170_v41 = vmul.f32 -1.442695, %v1931_v34  ;;  %v1888_v5 = vpop.f32.mrb[43].mxu0  ;;  %v1929_v42 = vpop.f32.mrb[43].mxu1  ;;  %v10874_v39 = vld [vmem:[#allocation9 + $0x28] ss:$16 sps:$4 sm:$0xff]  }
 0x3e4   :  { %v8171_v43 = vmul.f32 -1.442695, %v1932_v38  ;;  %v8172_v44 = vmul.f32 -1.442695, %v1934_v4  ;;  %v10868_v4 = vld [vmem:[#allocation9 + $0x2c] ss:$16 sps:$4 sm:$0xff]  }
 0x3e5   :  { %9357 = vpow2.f32 %v8170_v41  ;;  %v10878_v40 = vld [vmem:[#allocation9 + $0x44] ss:$16 sps:$4 sm:$0xff]   ;;  %v10880_v41 = vld [vmem:[#allocation9 + $0x4c] ss:$16 sps:$4 sm:$0xff]   ;;  %v10886_v5 = vld [vmem:[#allocation9 + $0x40] ss:$16 sps:$4 sm:$0xff]  }
 0x3e6   :  { %9359 = vpow2.f32 %v8171_v43  ;;  %12149 = vst [vmem:[#allocation64_spill] sm:$0xff] %v10878_v40  ;;  %12150 = vst [vmem:[#allocation65_spill] sm:$0xff] %v10880_v41  ;;  %v10888_v42 = vld [vmem:[#allocation9 + $0x48] ss:$16 sps:$4 sm:$0xff]   ;;  %v10892_v43 = vld [vmem:[#allocation9 + $0x64] ss:$16 sps:$4 sm:$0xff]  }
 0x3e7   :  { %9361 = vpow2.f32 %v8172_v44  ;;  %12151 = vst [vmem:[#allocation66_spill] sm:$0xff] %v10886_v5  ;;  %12152 = vst [vmem:[#allocation67_spill] sm:$0xff] %v10888_v42  ;;  %v10894_v44 = vld [vmem:[#allocation9 + $0x6c] ss:$16 sps:$4 sm:$0xff]  }
 0x3e8   :  { %9363 = vtanh.f32 %v1933_v21  ;;  %v10862_v21 = vld [vmem:[#allocation9] ss:$16 sps:$4 sm:$0xff]   ;;  %12153 = vst [vmem:[#allocation47_spill] sm:$0xff] %v10894_v44 }
 0x3ef   :  { %v9358_v45 = vpop.eup %9357 }
 0x3f0   :  { %v9360_v46 = vpop.eup %9359  ;;  %v2216_v47 = vadd.f32 1.0, %v9358_v45 }
 0x3f1   :  { %v2222_v48 = vadd.f32 1.0, %v9360_v46  ;;  %v9362_v50 = vpop.eup %9361 }
 0x3f2   :  { %9365 = vrcp.f32 %v2216_v47  ;;  %v9364_v51 = vpop.eup %9363  ;;  %v2229_v32 = vadd.f32 1.0, %v9362_v50  ;;  %v10898_v47 = vld [vmem:[#allocation9 + $0x60] ss:$16 sps:$4 sm:$0xff]   ;;  %v12154_v50 = vld [vmem:[#allocation72_spill] sm:$0xff] }
 0x3f3   :  { %9367 = vrcp.f32 %v2222_v48  ;;  %v10900_v48 = vld [vmem:[#allocation9 + $0x68] ss:$16 sps:$4 sm:$0xff]  }
 0x3f4   :  { %9369 = vrcp.f32 %v2229_v32 }
 0x3fc   :  { %v9366_v52 = vpop.eup %9365 }
 0x3fd   :  { %v9368_v53 = vpop.eup %9367  ;;  %v2233_v31 = vmul.f32 %v9366_v52, %v9364_v51  ;;  %v12155_v52 = vld [vmem:[#allocation73_spill] sm:$0xff] }
 0x3fe   :  { %v2232_v33 = vmul.f32 %v9368_v53, %v10706_v54  ;;  %v9370_v12 = vpop.eup %9369  ;;  %v10872_v54 = vld [vmem:[#allocation9 + $0x20] ss:$16 sps:$4 sm:$0xff]  }
 0x400   :  { %v10859_v34 = vadd.f32 %v2233_v31, %v2232_v33  ;;  %v10906_v33 = vld [vmem:[#allocation9 + $0x84] ss:$16 sps:$4 sm:$0xff]  }
 0x402   :  { %9371 = vtanh.f32 %v10859_v34 }
 0x40c   :  { %v9372_v35 = vpop.eup %9371 }
 0x40d   :  { %v2236_v36 = vmul.f32 %v9372_v35, %v9370_v12  ;;  %v10908_v12 = vld [vmem:[#allocation9 + $0x8c] ss:$16 sps:$4 sm:$0xff]  }
 0x40e   :  { %v12156_v35 = vld [vmem:[#allocation76_spill] sm:$0xff] }
 0x40f   :  { %v2237_v38 = vpack.c.bf16 %v2236_v36, %v2236_v36 }
 0x411   :  { %2263 = vst [vmem:[#allocation2 + $0x10] sm:$0xf] %v2237_v38  ;;  %2501 = vmatmul.mubr.bf16.vlgmr.msra.gmra.mrb[48].mxu0 %v2237_v38  ;;  %2542 = vmatmul.mubr.bf16.vlgmr.msra.gmra.mrb[48].mxu1 %v2237_v38  ;;  %v12157_v38 = vld [vmem:[#allocation77_spill] sm:$0xff] }
 0x412   :  { %2747 = vmatpush1.bf16.msra.mxu0 %v10862_v21  ;;  %2788 = vmatpush1.bf16.msra.mxu1 %v10864_v37 }
 0x413   :  { %2748 = vmatprep.subr.bf16.mxu0 %v10866_v25  ;;  %2789 = vmatprep.subr.bf16.mxu1 %v10868_v4 }
 0x414   :  { %2778 = vmatprep.mubr.bf16.mxu0 %v12097_v2  ;;  %2819 = vmatprep.mubr.bf16.mxu1 %v12097_v2 }
 0x416   :  { %2749 = vmatpush1.bf16.msra.mxu0 %v10872_v54  ;;  %2790 = vmatpush1.bf16.msra.mxu1 %v10874_v39 }
 0x417   :  { %2750 = vmatprep.subr.bf16.mxu0 %v10878_v40  ;;  %2791 = vmatprep.subr.bf16.mxu1 %v10880_v41 }
 0x419   :  { %v2161_v45 = vpop.f32.mrb[44].mxu0  ;;  %v2202_v46 = vpop.f32.mrb[44].mxu1 }
 0x41a   :  { %2751 = vmatpush1.bf16.msra.mxu0 %v10886_v5  ;;  %2792 = vmatpush1.bf16.msra.mxu1 %v10888_v42  ;;  %v2209_v51 = vadd.f32 %v2161_v45, %v12154_v50  ;;  %v2211_v53 = vadd.f32 %v2202_v46, %v12155_v52  ;;  %v2163_v31 = vpop.f32.mrb[45].mxu0  ;;  %v2204_v32 = vpop.f32.mrb[45].mxu1  ;;  %v10914_v52 = vld [vmem:[#allocation9 + $0x80] ss:$16 sps:$4 sm:$0xff]  }
 0x41b   :  { %2752 = vmatprep.subr.bf16.mxu0 %v10892_v43  ;;  %2793 = vmatprep.subr.bf16.mxu1 %v10894_v44  ;;  %v2210_v36 = vadd.f32 %v2163_v31, %v12156_v35  ;;  %v2212_v42 = vadd.f32 %v2204_v32, %v12157_v38  ;;  %v2165_v5 = vpop.f32.mrb[46].mxu0  ;;  %v2206_v41 = vpop.f32.mrb[46].mxu1  ;;  %v10916_v44 = vld [vmem:[#allocation9 + $0x88] ss:$16 sps:$4 sm:$0xff]   ;;  %v10920_v31 = vld [vmem:[#allocation9 + $0xa4] ss:$16 sps:$4 sm:$0xff]  }
 0x41c   :  { %v8173_v40 = vmul.f32 -1.442695, %v2209_v51  ;;  %v2166_v45 = vpop.f32.mrb[47].mxu0  ;;  %v2207_v50 = vpop.f32.mrb[47].mxu1  ;;  %12158 = vst [vmem:[#allocation74_spill] sm:$0xff] %v10920_v31 }
 0x41d   :  { %v8174_v46 = vmul.f32 -1.442695, %v2210_v36  ;;  %v10922_v41 = vld [vmem:[#allocation9 + $0xac] ss:$16 sps:$4 sm:$0xff]   ;;  %v10926_v5 = vld [vmem:[#allocation9 + $0xa0] ss:$16 sps:$4 sm:$0xff]  }
 0x41e   :  { %2753 = vmatpush1.bf16.msra.mxu0 %v10898_v47  ;;  %2794 = vmatpush1.bf16.msra.mxu1 %v10900_v48  ;;  %9373 = vpow2.f32 %v8173_v40  ;;  %12159 = vst [vmem:[#allocation75_spill] sm:$0xff] %v10922_v41  ;;  %v10928_v51 = vld [vmem:[#allocation9 + $0xa8] ss:$16 sps:$4 sm:$0xff]   ;;  %v10932_v40 = vld [vmem:[#allocation9 + $0xc4] ss:$16 sps:$4 sm:$0xff]  }
 0x41f   :  { %2754 = vmatprep.subr.bf16.mxu0 %v10906_v33  ;;  %2795 = vmatprep.subr.bf16.mxu1 %v10908_v12  ;;  %9375 = vpow2.f32 %v8174_v46  ;;  %12160 = vst [vmem:[#allocation82_spill] sm:$0xff] %v10928_v51  ;;  %12161 = vst [vmem:[#allocation78_spill] sm:$0xff] %v10932_v40  ;;  %v10934_v32 = vld [vmem:[#allocation9 + $0xcc] ss:$16 sps:$4 sm:$0xff]   ;;  %v8175_v35 = vmul.f32 -1.442695, %v2212_v42 }
 0x420   :  { %12162 = vst [vmem:[#allocation79_spill] sm:$0xff] %v10934_v32  ;;  %v10938_v36 = vld [vmem:[#allocation9 + $0xc0] ss:$16 sps:$4 sm:$0xff]   ;;  %v10940_v38 = vld [vmem:[#allocation9 + $0xc8] ss:$16 sps:$4 sm:$0xff]  }
 0x421   :  { %12163 = vst [vmem:[#allocation83_spill] sm:$0xff] %v10938_v36  ;;  %12164 = vst [vmem:[#allocation80_spill] sm:$0xff] %v10940_v38  ;;  %v10944_v45 = vld [vmem:[#allocation9 + $0xe4] ss:$16 sps:$4 sm:$0xff]   ;;  %v10946_v50 = vld [vmem:[#allocation9 + $0xec] ss:$16 sps:$4 sm:$0xff]   ;;  %9377 = vpow2.f32 %v8175_v35 }
 0x422   :  { %2755 = vmatpush1.bf16.msra.mxu0 %v10914_v52  ;;  %2796 = vmatpush1.bf16.msra.mxu1 %v10916_v44  ;;  %12165 = vst [vmem:[#allocation81_spill] sm:$0xff] %v10944_v45  ;;  %v10950_v42 = vld [vmem:[#allocation9 + $0xe0] ss:$16 sps:$4 sm:$0xff]   ;;  %9379 = vtanh.f32 %v2211_v53 }
 0x423   :  { %2756 = vmatprep.subr.bf16.mxu0 %v10920_v31  ;;  %2797 = vmatprep.subr.bf16.mxu1 %v10922_v41  ;;  %12166 = vst [vmem:[#allocation84_spill] sm:$0xff] %v10950_v42 }
 0x426   :  { %2757 = vmatpush1.bf16.msra.mxu0 %v10926_v5  ;;  %2798 = vmatpush1.bf16.msra.mxu1 %v10928_v51  ;;  %v10952_v51 = vld [vmem:[#allocation9 + $0xe8] ss:$16 sps:$4 sm:$0xff]  }
 0x427   :  { %2758 = vmatprep.subr.bf16.mxu0 %v10932_v40  ;;  %2799 = vmatprep.subr.bf16.mxu1 %v10934_v32  ;;  %12167 = vst [vmem:[#allocation85_spill] sm:$0xff] %v10952_v51 }
 0x428   :  { %v9374_v46 = vpop.eup %9373 }
 0x429   :  { %v9376_v41 = vpop.eup %9375  ;;  %v2241_v31 = vadd.f32 1.0, %v9374_v46 }
 0x42a   :  { %2759 = vmatpush1.bf16.msra.mxu0 %v10938_v36  ;;  %2800 = vmatpush1.bf16.msra.mxu1 %v10940_v38  ;;  %v2247_v40 = vadd.f32 1.0, %v9376_v41 }
 0x42b   :  { %2760 = vmatprep.subr.bf16.mxu0 %v10944_v45  ;;  %2801 = vmatprep.subr.bf16.mxu1 %v10946_v50  ;;  %9381 = vrcp.f32 %v2241_v31  ;;  %v9378_v35 = vpop.eup %9377 }
 0x42c   :  { %9383 = vrcp.f32 %v2247_v40  ;;  %v9380_v46 = vpop.eup %9379  ;;  %v2254_v41 = vadd.f32 1.0, %v9378_v35  ;;  %v12177_v35 = vld [vmem:[#allocation69_spill] sm:$0xff] }
 0x42e   :  { %2761 = vmatpush1.bf16.msra.mxu0 %v10950_v42  ;;  %2802 = vmatpush1.bf16.msra.mxu1 %v10952_v51  ;;  %9385 = vrcp.f32 %v2254_v41 }
 0x42f   :  { %3087 = vmatprep.subr.bf16.mxu0 %v10752_v10  ;;  %3128 = vmatprep.subr.bf16.mxu1 %v10754_v55 }
 0x435   :  { %v9382_v38 = vpop.eup %9381 }
 0x436   :  { %v9384_v36 = vpop.eup %9383  ;;  %v2258_v53 = vmul.f32 %v9382_v38, %v9380_v46  ;;  %v12173_v38 = vld [vmem:[#allocation65_spill] sm:$0xff] }
 0x437   :  { %v2257_v45 = vmul.f32 %v9384_v36, %v10747_v49 }
 0x438   :  { %v9386_v31 = vpop.eup %9385 }
 0x439   :  { %v10961_v32 = vadd.f32 %v2258_v53, %v2257_v45 }
 0x43b   :  { %9387 = vtanh.f32 %v10961_v32 }
 0x445   :  { %v9388_v40 = vpop.eup %9387 }
 0x446   :  { %v2261_v51 = vmul.f32 %v9388_v40, %v9386_v31  ;;  %v12180_v40 = vld [vmem:[#allocation71_spill] sm:$0xff] }
 0x448   :  { %v2262_v42 = vpack.c.bf16 %v2261_v51, %v2261_v51 }
 0x44a   :  { %v2265_v10 = vrot.slane %v2262_v42, 4  ;;  %2779 = vmatmul.mubr.bf16.vlgmr.msra.gmra.mrb[52].mxu0 %v2262_v42  ;;  %2820 = vmatmul.mubr.bf16.vlgmr.msra.gmra.mrb[52].mxu1 %v2262_v42  ;;  %v12175_v42 = vld [vmem:[#allocation67_spill] sm:$0xff] }
 0x44b   :  { %3088 = vmatpush1.bf16.msra.mxu0 %v10756_v19  ;;  %3129 = vmatpush1.bf16.msra.mxu1 %v10758_v56  ;;  %v12168_v19 = vld [vmem:[#allocation27_spill] sm:$0xff] }
 0x44c   :  { %2267 = vst [vmem:[#allocation2 + $0x28] sm:$0xf0] %v2265_v10  ;;  %3089 = vmatprep.subr.bf16.mxu0 %v10764_v57  ;;  %3130 = vmatprep.subr.bf16.mxu1 %v10766_v58  ;;  %v12169_v57 = vld [vmem:[#allocation28_spill] sm:$0xff] }
 0x44d   :  { %3119 = vmatprep.mubr.bf16.mxu0 %v12097_v2  ;;  %3160 = vmatprep.mubr.bf16.mxu1 %v12097_v2 }
 0x44f   :  { %3090 = vmatpush1.bf16.msra.mxu0 %v10768_v59  ;;  %3131 = vmatpush1.bf16.msra.mxu1 %v10770_v60 }
 0x450   :  { %3091 = vmatprep.subr.bf16.mxu0 %v10776_v13  ;;  %3132 = vmatprep.subr.bf16.mxu1 %v10778_v14  ;;  %v12170_v13 = vld [vmem:[#allocation29_spill] sm:$0xff] }
 0x453   :  { %3092 = vmatpush1.bf16.msra.mxu0 %v10780_v15  ;;  %3133 = vmatpush1.bf16.msra.mxu1 %v10782_v20  ;;  %v12171_v15 = vld [vmem:[#allocation30_spill] sm:$0xff] }
 0x454   :  { %3093 = vmatprep.subr.bf16.mxu0 %v10788_v22  ;;  %3134 = vmatprep.subr.bf16.mxu1 %v10790_v9 }
 0x457   :  { %3094 = vmatpush1.bf16.msra.mxu0 %v10792_v3  ;;  %3135 = vmatpush1.bf16.msra.mxu1 %v10794_v18 }
 0x458   :  { %3095 = vmatprep.subr.bf16.mxu0 %v10802_v1  ;;  %3136 = vmatprep.subr.bf16.mxu1 %v10806_v11 }
 0x45b   :  { %3096 = vmatpush1.bf16.msra.mxu0 %v10800_v63  ;;  %3137 = vmatpush1.bf16.msra.mxu1 %v10804_v0 }
 0x45c   :  { %3097 = vmatprep.subr.bf16.mxu0 %v10808_v8  ;;  %3138 = vmatprep.subr.bf16.mxu1 %v10811_v23 }
 0x45f   :  { %3098 = vmatpush1.bf16.msra.mxu0 %v10815_v62  ;;  %3139 = vmatpush1.bf16.msra.mxu1 %v10819_v6 }
 0x460   :  { %3099 = vmatprep.subr.bf16.mxu0 %v10821_v26  ;;  %3140 = vmatprep.subr.bf16.mxu1 %v10824_v7 }
 0x463   :  { %3100 = vmatpush1.bf16.msra.mxu0 %v10827_v16  ;;  %3141 = vmatpush1.bf16.msra.mxu1 %v10831_v17 }
 0x464   :  { %3101 = vmatprep.subr.bf16.mxu0 %v10833_v24  ;;  %3142 = vmatprep.subr.bf16.mxu1 %v10836_v27 }
 0x467   :  { %3102 = vmatpush1.bf16.msra.mxu0 %v10839_v28  ;;  %3143 = vmatpush1.bf16.msra.mxu1 %v10843_v29 }
 0x468   :  { %3365 = vmatprep.subr.bf16.mxu0 %v10848_v30  ;;  %3406 = vmatprep.subr.bf16.mxu1 %v10850_v61 }
 0x4e4   :  { %v2502_v49 = vpop.f32.mrb[48].mxu0  ;;  %v2543_v55 = vpop.f32.mrb[48].mxu1 }
 0x4e5   :  { %v2550_v56 = vadd.f32 %v2502_v49, %v12168_v19  ;;  %v2552_v58 = vadd.f32 %v2543_v55, %v12169_v57  ;;  %v2504_v59 = vpop.f32.mrb[49].mxu0  ;;  %v2545_v60 = vpop.f32.mrb[49].mxu1 }
 0x4e6   :  { %v2551_v14 = vadd.f32 %v2504_v59, %v12170_v13  ;;  %v2553_v20 = vadd.f32 %v2545_v60, %v12171_v15  ;;  %v2506_v22 = vpop.f32.mrb[50].mxu0  ;;  %v2547_v9 = vpop.f32.mrb[50].mxu1  ;;  %v12182_v59 = vld [vmem:[#allocation75_spill] sm:$0xff] }
 0x4e7   :  { %v8240_v3 = vmul.f32 -1.442695, %v2550_v56  ;;  %v2507_v18 = vpop.f32.mrb[51].mxu0  ;;  %v2548_v63 = vpop.f32.mrb[51].mxu1  ;;  %v12185_v13 = vld [vmem:[#allocation79_spill] sm:$0xff]  ;;  %v12190_v22 = vld [vmem:[#allocation85_spill] sm:$0xff] }
 0x4e8   :  { %v8241_v1 = vmul.f32 -1.442695, %v2551_v14  ;;  %v8242_v0 = vmul.f32 -1.442695, %v2553_v20  ;;  %v12188_v20 = vld [vmem:[#allocation81_spill] sm:$0xff] }
 0x4e9   :  { %9389 = vpow2.f32 %v8240_v3 }
 0x4ea   :  { %9391 = vpow2.f32 %v8241_v1 }
 0x4eb   :  { %9393 = vpow2.f32 %v8242_v0 }
 0x4ec   :  { %9395 = vtanh.f32 %v2552_v58 }
 0x4f3   :  { %v9390_v11 = vpop.eup %9389 }
 0x4f4   :  { %v9392_v8 = vpop.eup %9391  ;;  %v2835_v23 = vadd.f32 1.0, %v9390_v11 }
 0x4f5   :  { %v2841_v62 = vadd.f32 1.0, %v9392_v8  ;;  %v9394_v6 = vpop.eup %9393 }
 0x4f6   :  { %9397 = vrcp.f32 %v2835_v23  ;;  %v9396_v26 = vpop.eup %9395  ;;  %v2848_v24 = vadd.f32 1.0, %v9394_v6 }
 0x4f7   :  { %9399 = vrcp.f32 %v2841_v62 }
 0x4f8   :  { %9401 = vrcp.f32 %v2848_v24  ;;  %v11062_v24 = vld [vmem:[#allocation7 + $0x2c] ss:$16 sps:$4 sm:$0xff]  }
 0x500   :  { %v9398_v7 = vpop.eup %9397 }
 0x501   :  { %v9400_v16 = vpop.eup %9399  ;;  %v2852_v17 = vmul.f32 %v9398_v7, %v9396_v26  ;;  %v11048_v26 = vld [vmem:[#allocation7 + $0x4] ss:$16 sps:$4 sm:$0xff]   ;;  %v11050_v7 = vld [vmem:[#allocation7 + $0xc] ss:$16 sps:$4 sm:$0xff]  }
 0x502   :  { %v2851_v27 = vmul.f32 %v9400_v16, %v10859_v34  ;;  %v9402_v29 = vpop.eup %9401  ;;  %v12172_v34 = vld [vmem:[#allocation64_spill] sm:$0xff] }
 0x503   :  { %v11054_v16 = vld [vmem:[#allocation7 + $0x8] ss:$16 sps:$4 sm:$0xff]  }
 0x504   :  { %v11003_v28 = vadd.f32 %v2852_v17, %v2851_v27  ;;  %v11060_v17 = vld [vmem:[#allocation7 + $0x24] ss:$16 sps:$4 sm:$0xff]   ;;  %v11064_v27 = vld [vmem:[#allocation7 + $0x20] ss:$16 sps:$4 sm:$0xff]  }
 0x506   :  { %9403 = vtanh.f32 %v11003_v28 }
 0x510   :  { %v9404_v30 = vpop.eup %9403 }
 0x511   :  { %v2855_v61 = vmul.f32 %v9404_v30, %v9402_v29  ;;  %v11066_v29 = vld [vmem:[#allocation7 + $0x28] ss:$16 sps:$4 sm:$0xff]   ;;  %v11072_v30 = vld [vmem:[#allocation7 + $0x44] ss:$16 sps:$4 sm:$0xff]  }
 0x513   :  { %v2856_v51 = vpack.c.bf16 %v2855_v61, %v2855_v61  ;;  %v11074_v61 = vld [vmem:[#allocation7 + $0x4c] ss:$16 sps:$4 sm:$0xff]  }
 0x515   :  { %v2883_v36 = vrot.slane %v2856_v51, 4  ;;  %3120 = vmatmul.mubr.bf16.vlgmr.msra.gmra.mrb[56].mxu0 %v2856_v51  ;;  %3161 = vmatmul.mubr.bf16.vlgmr.msra.gmra.mrb[56].mxu1 %v2856_v51  ;;  %v11076_v51 = vld [vmem:[#allocation7 + $0x40] ss:$16 sps:$4 sm:$0xff]  }
 0x516   :  { %3366 = vmatpush1.bf16.msra.mxu0 %v10862_v21  ;;  %3407 = vmatpush1.bf16.msra.mxu1 %v10864_v37  ;;  %v12174_v37 = vld [vmem:[#allocation66_spill] sm:$0xff] }
 0x517   :  { %2885 = vst [vmem:[#allocation2 + $0x10] sm:$0xf0] %v2883_v36  ;;  %3367 = vmatprep.subr.bf16.mxu0 %v10866_v25  ;;  %3408 = vmatprep.subr.bf16.mxu1 %v10868_v4  ;;  %v12176_v25 = vld [vmem:[#allocation68_spill] sm:$0xff] }
 0x518   :  { %3397 = vmatprep.mubr.bf16.mxu0 %v12097_v2  ;;  %3438 = vmatprep.mubr.bf16.mxu1 %v12097_v2  ;;  %v11078_v36 = vld [vmem:[#allocation7 + $0x48] ss:$16 sps:$4 sm:$0xff]  }
 0x51a   :  { %3368 = vmatpush1.bf16.msra.mxu0 %v10872_v54  ;;  %3409 = vmatpush1.bf16.msra.mxu1 %v10874_v39  ;;  %v12178_v54 = vld [vmem:[#allocation47_spill] sm:$0xff]  ;;  %v12179_v39 = vld [vmem:[#allocation70_spill] sm:$0xff] }
 0x51b   :  { %3369 = vmatprep.subr.bf16.mxu0 %v12172_v34  ;;  %3410 = vmatprep.subr.bf16.mxu1 %v12173_v38  ;;  %v11084_v34 = vld [vmem:[#allocation7 + $0x64] ss:$16 sps:$4 sm:$0xff]   ;;  %v11086_v38 = vld [vmem:[#allocation7 + $0x6c] ss:$16 sps:$4 sm:$0xff]  }
 0x51d   :  { %v2780_v21 = vpop.f32.mrb[52].mxu0  ;;  %v2821_v45 = vpop.f32.mrb[52].mxu1 }
 0x51e   :  { %3370 = vmatpush1.bf16.msra.mxu0 %v12174_v37  ;;  %3411 = vmatpush1.bf16.msra.mxu1 %v12175_v42  ;;  %v2828_v4 = vadd.f32 %v2780_v21, %v12176_v25  ;;  %v2830_v46 = vadd.f32 %v2821_v45, %v12177_v35  ;;  %v2782_v53 = vpop.f32.mrb[53].mxu0  ;;  %v2823_v41 = vpop.f32.mrb[53].mxu1  ;;  %v11088_v21 = vld [vmem:[#allocation7 + $0x60] ss:$16 sps:$4 sm:$0xff]   ;;  %v11090_v45 = vld [vmem:[#allocation7 + $0x68] ss:$16 sps:$4 sm:$0xff]  }
 0x51f   :  { %3371 = vmatprep.subr.bf16.mxu0 %v10892_v43  ;;  %3412 = vmatprep.subr.bf16.mxu1 %v12178_v54  ;;  %v2829_v31 = vadd.f32 %v2782_v53, %v12179_v39  ;;  %v2831_v10 = vadd.f32 %v2823_v41, %v12180_v40  ;;  %v2784_v49 = vpop.f32.mrb[54].mxu0  ;;  %v2825_v55 = vpop.f32.mrb[54].mxu1  ;;  %v12181_v43 = vld [vmem:[#allocation74_spill] sm:$0xff]  ;;  %v11096_v37 = vld [vmem:[#allocation7 + $0x80] ss:$16 sps:$4 sm:$0xff]  }
 0x520   :  { %v8243_v19 = vmul.f32 -1.442695, %v2828_v4  ;;  %v2785_v56 = vpop.f32.mrb[55].mxu0  ;;  %v2826_v57 = vpop.f32.mrb[55].mxu1  ;;  %v11098_v42 = vld [vmem:[#allocation7 + $0x84] ss:$16 sps:$4 sm:$0xff]  }
 0x521   :  { %v8244_v58 = vmul.f32 -1.442695, %v2829_v31  ;;  %v8245_v60 = vmul.f32 -1.442695, %v2831_v10  ;;  %v11100_v25 = vld [vmem:[#allocation7 + $0x88] ss:$16 sps:$4 sm:$0xff]  }
 0x522   :  { %3372 = vmatpush1.bf16.msra.mxu0 %v10898_v47  ;;  %3413 = vmatpush1.bf16.msra.mxu1 %v10900_v48  ;;  %9405 = vpow2.f32 %v8243_v19  ;;  %v12183_v47 = vld [vmem:[#allocation82_spill] sm:$0xff]  ;;  %v11104_v35 = vld [vmem:[#allocation7 + $0xa4] ss:$16 sps:$4 sm:$0xff]   ;;  %v11111_v53 = vld [vmem:[#allocation7 + $0xa0] ss:$16 sps:$4 sm:$0xff]  }
 0x523   :  { %3373 = vmatprep.subr.bf16.mxu0 %v10906_v33  ;;  %3414 = vmatprep.subr.bf16.mxu1 %v10908_v12  ;;  %9407 = vpow2.f32 %v8244_v58  ;;  %v12184_v48 = vld [vmem:[#allocation78_spill] sm:$0xff]  ;;  %v11117_v54 = vld [vmem:[#allocation7 + $0xc4] ss:$16 sps:$4 sm:$0xff]   ;;  %v11123_v31 = vld [vmem:[#allocation7 + $0xc0] ss:$16 sps:$4 sm:$0xff]  }
 0x524   :  { %9409 = vpow2.f32 %v8245_v60  ;;  %v11102_v4 = vld [vmem:[#allocation7 + $0x8c] ss:$16 sps:$4 sm:$0xff]   ;;  %v11115_v41 = vld [vmem:[#allocation7 + $0xa8] ss:$16 sps:$4 sm:$0xff]   ;;  %v11129_v10 = vld [vmem:[#allocation7 + $0xe4] ss:$16 sps:$4 sm:$0xff]  }
 0x525   :  { %9411 = vtanh.f32 %v2830_v46  ;;  %v11107_v46 = vld [vmem:[#allocation7 + $0xac] ss:$16 sps:$4 sm:$0xff]   ;;  %v11127_v40 = vld [vmem:[#allocation7 + $0xc8] ss:$16 sps:$4 sm:$0xff]   ;;  %v11135_v55 = vld [vmem:[#allocation7 + $0xe0] ss:$16 sps:$4 sm:$0xff]  }
 0x526   :  { %3374 = vmatpush1.bf16.msra.mxu0 %v10914_v52  ;;  %3415 = vmatpush1.bf16.msra.mxu1 %v10916_v44  ;;  %v12186_v52 = vld [vmem:[#allocation83_spill] sm:$0xff]  ;;  %v12187_v44 = vld [vmem:[#allocation80_spill] sm:$0xff] }
 0x527   :  { %3375 = vmatprep.subr.bf16.mxu0 %v12181_v43  ;;  %3416 = vmatprep.subr.bf16.mxu1 %v12182_v59  ;;  %v11120_v39 = vld [vmem:[#allocation7 + $0xcc] ss:$16 sps:$4 sm:$0xff]   ;;  %v11139_v19 = vld [vmem:[#allocation7 + $0xe8] ss:$16 sps:$4 sm:$0xff]   ;;  %v11144_v56 = vld [vmem:[#allocation9 + $0x4] ss:$16 sps:$4 sm:$0xff]  }
 0x528   :  { %v11132_v49 = vld [vmem:[#allocation7 + $0xec] ss:$16 sps:$4 sm:$0xff]   ;;  %v12191_v59 = vld [vmem:[#allocation31_spill] sm:$0xff] }
 0x529   :  { %v11146_v57 = vld [vmem:[#allocation9 + $0xc] ss:$16 sps:$4 sm:$0xff]  }
 0x52a   :  { %3376 = vmatpush1.bf16.msra.mxu0 %v10926_v5  ;;  %3417 = vmatpush1.bf16.msra.mxu1 %v12183_v47  ;;  %v12189_v5 = vld [vmem:[#allocation84_spill] sm:$0xff] }
 0x52b   :  { %3377 = vmatprep.subr.bf16.mxu0 %v12184_v48  ;;  %3418 = vmatprep.subr.bf16.mxu1 %v12185_v13  ;;  %v12192_v47 = vld [vmem:[#allocation32_spill] sm:$0xff] }
 0x52c   :  { %v9406_v33 = vpop.eup %9405 }
 0x52d   :  { %v9408_v12 = vpop.eup %9407  ;;  %v2860_v14 = vadd.f32 1.0, %v9406_v33 }
 0x52e   :  { %3378 = vmatpush1.bf16.msra.mxu0 %v12186_v52  ;;  %3419 = vmatpush1.bf16.msra.mxu1 %v12187_v44  ;;  %v2866_v15 = vadd.f32 1.0, %v9408_v12  ;;  %v9410_v9 = vpop.eup %9409  ;;  %v12193_v12 = vld [vmem:[#allocation33_spill] sm:$0xff]  ;;  %v12194_v52 = vld [vmem:[#allocation34_spill] sm:$0xff] }
 0x52f   :  { %3379 = vmatprep.subr.bf16.mxu0 %v12188_v20  ;;  %3420 = vmatprep.subr.bf16.mxu1 %v10946_v50  ;;  %9413 = vrcp.f32 %v2860_v14  ;;  %v9412_v3 = vpop.eup %9411  ;;  %v2873_v0 = vadd.f32 1.0, %v9410_v9 }
 0x530   :  { %9415 = vrcp.f32 %v2866_v15 }
 0x531   :  { %9417 = vrcp.f32 %v2873_v0 }
 0x532   :  { %3380 = vmatpush1.bf16.msra.mxu0 %v12189_v5  ;;  %3421 = vmatpush1.bf16.msra.mxu1 %v12190_v22 }
 0x533   :  { %3706 = vmatprep.subr.bf16.mxu0 %v11048_v26  ;;  %3747 = vmatprep.subr.bf16.mxu1 %v11050_v7 }
 0x539   :  { %v9414_v18 = vpop.eup %9413 }
 0x53a   :  { %v9416_v63 = vpop.eup %9415  ;;  %v2877_v1 = vmul.f32 %v9414_v18, %v9412_v3 }
 0x53b   :  { %v2876_v11 = vmul.f32 %v9416_v63, %v10961_v32  ;;  %v9418_v50 = vpop.eup %9417  ;;  %v11052_v32 = vld [vmem:[#allocation7] ss:$16 sps:$4 sm:$0xff]  }
 0x53d   :  { %v11043_v8 = vadd.f32 %v2877_v1, %v2876_v11 }
 0x53f   :  { %9419 = vtanh.f32 %v11043_v8 }
 0x549   :  { %v9420_v23 = vpop.eup %9419 }
 0x54a   :  { %v2880_v62 = vmul.f32 %v9420_v23, %v9418_v50 }
 0x54c   :  { %v2881_v6 = vpack.c.bf16 %v2880_v62, %v2880_v62 }
 0x54e   :  { %2886 = vst [vmem:[#allocation2 + $0x28] sm:$0xf] %v2881_v6  ;;  %3398 = vmatmul.mubr.bf16.vlgmr.msra.gmra.mrb[60].mxu0 %v2881_v6  ;;  %3439 = vmatmul.mubr.bf16.vlgmr.msra.gmra.mrb[60].mxu1 %v2881_v6 }
 0x54f   :  { %3738 = vmatprep.mubr.bf16.mxu0 %v12097_v2  ;;  %3779 = vmatprep.mubr.bf16.mxu1 %v12097_v2 }
 0x550   :  { %3707 = vmatpush1.bf16.msra.mxu0 %v11052_v32  ;;  %3748 = vmatpush1.bf16.msra.mxu1 %v11054_v16 }
 0x551   :  { %3708 = vmatprep.subr.bf16.mxu0 %v11060_v17  ;;  %3749 = vmatprep.subr.bf16.mxu1 %v11062_v24 }
 0x554   :  { %3709 = vmatpush1.bf16.msra.mxu0 %v11064_v27  ;;  %3750 = vmatpush1.bf16.msra.mxu1 %v11066_v29 }
 0x555   :  { %3710 = vmatprep.subr.bf16.mxu0 %v11072_v30  ;;  %3751 = vmatprep.subr.bf16.mxu1 %v11074_v61 }
 0x558   :  { %3711 = vmatpush1.bf16.msra.mxu0 %v11076_v51  ;;  %3752 = vmatpush1.bf16.msra.mxu1 %v11078_v36 }
 0x559   :  { %3712 = vmatprep.subr.bf16.mxu0 %v11084_v34  ;;  %3753 = vmatprep.subr.bf16.mxu1 %v11086_v38 }
 0x55c   :  { %3713 = vmatpush1.bf16.msra.mxu0 %v11088_v21  ;;  %3754 = vmatpush1.bf16.msra.mxu1 %v11090_v45 }
 0x55d   :  { %3714 = vmatprep.subr.bf16.mxu0 %v11098_v42  ;;  %3755 = vmatprep.subr.bf16.mxu1 %v11102_v4 }
 0x560   :  { %3715 = vmatpush1.bf16.msra.mxu0 %v11096_v37  ;;  %3756 = vmatpush1.bf16.msra.mxu1 %v11100_v25 }
 0x561   :  { %3716 = vmatprep.subr.bf16.mxu0 %v11104_v35  ;;  %3757 = vmatprep.subr.bf16.mxu1 %v11107_v46 }
 0x564   :  { %3717 = vmatpush1.bf16.msra.mxu0 %v11111_v53  ;;  %3758 = vmatpush1.bf16.msra.mxu1 %v11115_v41 }
 0x565   :  { %3718 = vmatprep.subr.bf16.mxu0 %v11117_v54  ;;  %3759 = vmatprep.subr.bf16.mxu1 %v11120_v39 }
 0x568   :  { %3719 = vmatpush1.bf16.msra.mxu0 %v11123_v31  ;;  %3760 = vmatpush1.bf16.msra.mxu1 %v11127_v40 }
 0x569   :  { %3720 = vmatprep.subr.bf16.mxu0 %v11129_v10  ;;  %3761 = vmatprep.subr.bf16.mxu1 %v11132_v49 }
 0x56c   :  { %3721 = vmatpush1.bf16.msra.mxu0 %v11135_v55  ;;  %3762 = vmatpush1.bf16.msra.mxu1 %v11139_v19 }
 0x56d   :  { %3984 = vmatprep.subr.bf16.mxu0 %v11144_v56  ;;  %4025 = vmatprep.subr.bf16.mxu1 %v11146_v57 }
 0x5e8   :  { %v3121_v58 = vpop.f32.mrb[56].mxu0  ;;  %v3162_v43 = vpop.f32.mrb[56].mxu1 }
 0x5e9   :  { %v3169_v60 = vadd.f32 %v3121_v58, %v12191_v59  ;;  %v3171_v48 = vadd.f32 %v3162_v43, %v12192_v47  ;;  %v3123_v13 = vpop.f32.mrb[57].mxu0  ;;  %v3164_v33 = vpop.f32.mrb[57].mxu1 }
 0x5ea   :  { %v3170_v14 = vadd.f32 %v3123_v13, %v12193_v12  ;;  %v3172_v44 = vadd.f32 %v3164_v33, %v12194_v52  ;;  %v3125_v15 = vpop.f32.mrb[58].mxu0  ;;  %v3166_v20 = vpop.f32.mrb[58].mxu1  ;;  %v11160_v12 = vld [vmem:[#allocation9 + $0x8] ss:$16 sps:$4 sm:$0xff]   ;;  %v11162_v52 = vld [vmem:[#allocation9 + $0x24] ss:$16 sps:$4 sm:$0xff]  }
 0x5eb   :  { %v8310_v5 = vmul.f32 -1.442695, %v3169_v60  ;;  %v3126_v22 = vpop.f32.mrb[59].mxu0  ;;  %v3167_v9 = vpop.f32.mrb[59].mxu1  ;;  %v11170_v15 = vld [vmem:[#allocation9 + $0x28] ss:$16 sps:$4 sm:$0xff]  }
 0x5ec   :  { %v8311_v3 = vmul.f32 -1.442695, %v3170_v14  ;;  %v8312_v18 = vmul.f32 -1.442695, %v3172_v44  ;;  %v11164_v44 = vld [vmem:[#allocation9 + $0x2c] ss:$16 sps:$4 sm:$0xff]  }
 0x5ed   :  { %9421 = vpow2.f32 %v8310_v5  ;;  %v11174_v20 = vld [vmem:[#allocation9 + $0x44] ss:$16 sps:$4 sm:$0xff]   ;;  %v11176_v5 = vld [vmem:[#allocation9 + $0x4c] ss:$16 sps:$4 sm:$0xff]   ;;  %v11182_v22 = vld [vmem:[#allocation9 + $0x40] ss:$16 sps:$4 sm:$0xff]  }
 0x5ee   :  { %9423 = vpow2.f32 %v8311_v3  ;;  %12195 = vst [vmem:[#allocation86_spill] sm:$0xff] %v11174_v20  ;;  %12196 = vst [vmem:[#allocation87_spill] sm:$0xff] %v11176_v5  ;;  %v11184_v9 = vld [vmem:[#allocation9 + $0x48] ss:$16 sps:$4 sm:$0xff]   ;;  %v11188_v3 = vld [vmem:[#allocation9 + $0x64] ss:$16 sps:$4 sm:$0xff]  }
 0x5ef   :  { %9425 = vpow2.f32 %v8312_v18  ;;  %12197 = vst [vmem:[#allocation88_spill] sm:$0xff] %v11182_v22  ;;  %12198 = vst [vmem:[#allocation89_spill] sm:$0xff] %v11184_v9  ;;  %v11190_v18 = vld [vmem:[#allocation9 + $0x6c] ss:$16 sps:$4 sm:$0xff]  }
 0x5f0   :  { %9427 = vtanh.f32 %v3171_v48  ;;  %v11158_v48 = vld [vmem:[#allocation9] ss:$16 sps:$4 sm:$0xff]   ;;  %12199 = vst [vmem:[#allocation90_spill] sm:$0xff] %v11190_v18 }
 0x5f7   :  { %v9422_v63 = vpop.eup %9421 }
 0x5f8   :  { %v9424_v1 = vpop.eup %9423  ;;  %v3454_v0 = vadd.f32 1.0, %v9422_v63 }
 0x5f9   :  { %v3460_v11 = vadd.f32 1.0, %v9424_v1  ;;  %v9426_v50 = vpop.eup %9425 }
 0x5fa   :  { %9429 = vrcp.f32 %v3454_v0  ;;  %v9428_v23 = vpop.eup %9427  ;;  %v3467_v43 = vadd.f32 1.0, %v9426_v50  ;;  %v11194_v0 = vld [vmem:[#allocation9 + $0x60] ss:$16 sps:$4 sm:$0xff]   ;;  %v12200_v50 = vld [vmem:[#allocation60_spill] sm:$0xff] }
 0x5fb   :  { %9431 = vrcp.f32 %v3460_v11  ;;  %v11196_v11 = vld [vmem:[#allocation9 + $0x68] ss:$16 sps:$4 sm:$0xff]  }
 0x5fc   :  { %9433 = vrcp.f32 %v3467_v43 }
 0x604   :  { %v9430_v62 = vpop.eup %9429 }
 0x605   :  { %v9432_v6 = vpop.eup %9431  ;;  %v3471_v58 = vmul.f32 %v9430_v62, %v9428_v23  ;;  %v12201_v62 = vld [vmem:[#allocation61_spill] sm:$0xff] }
 0x606   :  { %v3470_v59 = vmul.f32 %v9432_v6, %v11003_v28  ;;  %v9434_v47 = vpop.eup %9433  ;;  %v11168_v28 = vld [vmem:[#allocation9 + $0x20] ss:$16 sps:$4 sm:$0xff]  }
 0x608   :  { %v11155_v60 = vadd.f32 %v3471_v58, %v3470_v59  ;;  %v11202_v59 = vld [vmem:[#allocation9 + $0x84] ss:$16 sps:$4 sm:$0xff]  }
 0x60a   :  { %9435 = vtanh.f32 %v11155_v60 }
 0x614   :  { %v9436_v13 = vpop.eup %9435 }
 0x615   :  { %v3474_v33 = vmul.f32 %v9436_v13, %v9434_v47  ;;  %v11204_v47 = vld [vmem:[#allocation9 + $0x8c] ss:$16 sps:$4 sm:$0xff]  }
 0x616   :  { %v12202_v13 = vld [vmem:[#allocation62_spill] sm:$0xff] }
 0x617   :  { %v3475_v14 = vpack.c.bf16 %v3474_v33, %v3474_v33 }
 0x619   :  { %3501 = vst [vmem:[#allocation2 + $0x20] sm:$0xf] %v3475_v14  ;;  %3739 = vmatmul.mubr.bf16.vlgmr.msra.gmra.mrb[64].mxu0 %v3475_v14  ;;  %3780 = vmatmul.mubr.bf16.vlgmr.msra.gmra.mrb[64].mxu1 %v3475_v14  ;;  %v12203_v14 = vld [vmem:[#allocation63_spill] sm:$0xff] }
 0x61a   :  { %3985 = vmatpush1.bf16.msra.mxu0 %v11158_v48  ;;  %4026 = vmatpush1.bf16.msra.mxu1 %v11160_v12 }
 0x61b   :  { %3986 = vmatprep.subr.bf16.mxu0 %v11162_v52  ;;  %4027 = vmatprep.subr.bf16.mxu1 %v11164_v44 }
 0x61c   :  { %4016 = vmatprep.mubr.bf16.mxu0 %v12097_v2  ;;  %4057 = vmatprep.mubr.bf16.mxu1 %v12097_v2 }
 0x61e   :  { %3987 = vmatpush1.bf16.msra.mxu0 %v11168_v28  ;;  %4028 = vmatpush1.bf16.msra.mxu1 %v11170_v15 }
 0x61f   :  { %3988 = vmatprep.subr.bf16.mxu0 %v11174_v20  ;;  %4029 = vmatprep.subr.bf16.mxu1 %v11176_v5 }
 0x621   :  { %v3399_v63 = vpop.f32.mrb[60].mxu0  ;;  %v3440_v1 = vpop.f32.mrb[60].mxu1 }
 0x622   :  { %3989 = vmatpush1.bf16.msra.mxu0 %v11182_v22  ;;  %4030 = vmatpush1.bf16.msra.mxu1 %v11184_v9  ;;  %v3447_v23 = vadd.f32 %v3399_v63, %v12200_v50  ;;  %v3449_v6 = vadd.f32 %v3440_v1, %v12201_v62  ;;  %v3401_v58 = vpop.f32.mrb[61].mxu0  ;;  %v3442_v43 = vpop.f32.mrb[61].mxu1  ;;  %v11210_v62 = vld [vmem:[#allocation9 + $0x80] ss:$16 sps:$4 sm:$0xff]  }
 0x623   :  { %3990 = vmatprep.subr.bf16.mxu0 %v11188_v3  ;;  %4031 = vmatprep.subr.bf16.mxu1 %v11190_v18  ;;  %v3448_v33 = vadd.f32 %v3401_v58, %v12202_v13  ;;  %v3450_v9 = vadd.f32 %v3442_v43, %v12203_v14  ;;  %v3403_v22 = vpop.f32.mrb[62].mxu0  ;;  %v3444_v5 = vpop.f32.mrb[62].mxu1  ;;  %v11212_v18 = vld [vmem:[#allocation9 + $0x88] ss:$16 sps:$4 sm:$0xff]   ;;  %v11216_v58 = vld [vmem:[#allocation9 + $0xa4] ss:$16 sps:$4 sm:$0xff]  }
 0x624   :  { %v8313_v20 = vmul.f32 -1.442695, %v3447_v23  ;;  %v3404_v63 = vpop.f32.mrb[63].mxu0  ;;  %v3445_v50 = vpop.f32.mrb[63].mxu1  ;;  %12204 = vst [vmem:[#allocation91_spill] sm:$0xff] %v11216_v58 }
 0x625   :  { %v8314_v1 = vmul.f32 -1.442695, %v3448_v33  ;;  %v11218_v5 = vld [vmem:[#allocation9 + $0xac] ss:$16 sps:$4 sm:$0xff]   ;;  %v11222_v22 = vld [vmem:[#allocation9 + $0xa0] ss:$16 sps:$4 sm:$0xff]  }
 0x626   :  { %3991 = vmatpush1.bf16.msra.mxu0 %v11194_v0  ;;  %4032 = vmatpush1.bf16.msra.mxu1 %v11196_v11  ;;  %9437 = vpow2.f32 %v8313_v20  ;;  %12205 = vst [vmem:[#allocation92_spill] sm:$0xff] %v11218_v5  ;;  %v11224_v23 = vld [vmem:[#allocation9 + $0xa8] ss:$16 sps:$4 sm:$0xff]   ;;  %v11228_v20 = vld [vmem:[#allocation9 + $0xc4] ss:$16 sps:$4 sm:$0xff]  }
 0x627   :  { %3992 = vmatprep.subr.bf16.mxu0 %v11202_v59  ;;  %4033 = vmatprep.subr.bf16.mxu1 %v11204_v47  ;;  %9439 = vpow2.f32 %v8314_v1  ;;  %12206 = vst [vmem:[#allocation93_spill] sm:$0xff] %v11224_v23  ;;  %12207 = vst [vmem:[#allocation23_spill] sm:$0xff] %v11228_v20  ;;  %v11230_v43 = vld [vmem:[#allocation9 + $0xcc] ss:$16 sps:$4 sm:$0xff]   ;;  %v8315_v13 = vmul.f32 -1.442695, %v3450_v9 }
 0x628   :  { %12208 = vst [vmem:[#allocation24_spill] sm:$0xff] %v11230_v43  ;;  %v11234_v33 = vld [vmem:[#allocation9 + $0xc0] ss:$16 sps:$4 sm:$0xff]   ;;  %v11236_v14 = vld [vmem:[#allocation9 + $0xc8] ss:$16 sps:$4 sm:$0xff]  }
 0x629   :  { %12209 = vst [vmem:[#allocation25_spill] sm:$0xff] %v11234_v33  ;;  %12210 = vst [vmem:[#allocation26_spill] sm:$0xff] %v11236_v14  ;;  %v11240_v63 = vld [vmem:[#allocation9 + $0xe4] ss:$16 sps:$4 sm:$0xff]   ;;  %v11242_v50 = vld [vmem:[#allocation9 + $0xec] ss:$16 sps:$4 sm:$0xff]   ;;  %9441 = vpow2.f32 %v8315_v13 }
 0x62a   :  { %3993 = vmatpush1.bf16.msra.mxu0 %v11210_v62  ;;  %4034 = vmatpush1.bf16.msra.mxu1 %v11212_v18  ;;  %12211 = vst [vmem:[#allocation72_spill] sm:$0xff] %v11240_v63  ;;  %v11246_v9 = vld [vmem:[#allocation9 + $0xe0] ss:$16 sps:$4 sm:$0xff]   ;;  %9443 = vtanh.f32 %v3449_v6 }
 0x62b   :  { %3994 = vmatprep.subr.bf16.mxu0 %v11216_v58  ;;  %4035 = vmatprep.subr.bf16.mxu1 %v11218_v5  ;;  %12212 = vst [vmem:[#allocation73_spill] sm:$0xff] %v11246_v9 }
 0x62e   :  { %3995 = vmatpush1.bf16.msra.mxu0 %v11222_v22  ;;  %4036 = vmatpush1.bf16.msra.mxu1 %v11224_v23  ;;  %v11248_v23 = vld [vmem:[#allocation9 + $0xe8] ss:$16 sps:$4 sm:$0xff]  }
 0x62f   :  { %3996 = vmatprep.subr.bf16.mxu0 %v11228_v20  ;;  %4037 = vmatprep.subr.bf16.mxu1 %v11230_v43  ;;  %12213 = vst [vmem:[#allocation76_spill] sm:$0xff] %v11248_v23 }
 0x630   :  { %v9438_v1 = vpop.eup %9437 }
 0x631   :  { %v9440_v5 = vpop.eup %9439  ;;  %v3479_v58 = vadd.f32 1.0, %v9438_v1 }
 0x632   :  { %3997 = vmatpush1.bf16.msra.mxu0 %v11234_v33  ;;  %4038 = vmatpush1.bf16.msra.mxu1 %v11236_v14  ;;  %v3485_v20 = vadd.f32 1.0, %v9440_v5 }
 0x633   :  { %3998 = vmatprep.subr.bf16.mxu0 %v11240_v63  ;;  %4039 = vmatprep.subr.bf16.mxu1 %v11242_v50  ;;  %9445 = vrcp.f32 %v3479_v58  ;;  %v9442_v13 = vpop.eup %9441 }
 0x634   :  { %9447 = vrcp.f32 %v3485_v20  ;;  %v9444_v1 = vpop.eup %9443  ;;  %v3492_v5 = vadd.f32 1.0, %v9442_v13  ;;  %v12223_v13 = vld [vmem:[#allocation57_spill] sm:$0xff] }
 0x636   :  { %3999 = vmatpush1.bf16.msra.mxu0 %v11246_v9  ;;  %4040 = vmatpush1.bf16.msra.mxu1 %v11248_v23  ;;  %9449 = vrcp.f32 %v3492_v5 }
 0x637   :  { %4325 = vmatprep.subr.bf16.mxu0 %v11048_v26  ;;  %4366 = vmatprep.subr.bf16.mxu1 %v11050_v7 }
 0x63d   :  { %v9446_v14 = vpop.eup %9445 }
 0x63e   :  { %v9448_v33 = vpop.eup %9447  ;;  %v3496_v6 = vmul.f32 %v9446_v14, %v9444_v1  ;;  %v12219_v14 = vld [vmem:[#allocation87_spill] sm:$0xff] }
 0x63f   :  { %v3495_v63 = vmul.f32 %v9448_v33, %v11043_v8 }
 0x640   :  { %v9450_v58 = vpop.eup %9449 }
 0x641   :  { %v11257_v43 = vadd.f32 %v3496_v6, %v3495_v63 }
 0x643   :  { %9451 = vtanh.f32 %v11257_v43 }
 0x64d   :  { %v9452_v20 = vpop.eup %9451 }
 0x64e   :  { %v3499_v23 = vmul.f32 %v9452_v20, %v9450_v58  ;;  %v12226_v20 = vld [vmem:[#allocation59_spill] sm:$0xff] }
 0x650   :  { %v3500_v9 = vpack.c.bf16 %v3499_v23, %v3499_v23 }
 0x652   :  { %v3503_v26 = vrot.slane %v3500_v9, 4  ;;  %4017 = vmatmul.mubr.bf16.vlgmr.msra.gmra.mrb[68].mxu0 %v3500_v9  ;;  %4058 = vmatmul.mubr.bf16.vlgmr.msra.gmra.mrb[68].mxu1 %v3500_v9  ;;  %v12221_v9 = vld [vmem:[#allocation89_spill] sm:$0xff] }
 0x653   :  { %4326 = vmatpush1.bf16.msra.mxu0 %v11052_v32  ;;  %4367 = vmatpush1.bf16.msra.mxu1 %v11054_v16  ;;  %v12214_v32 = vld [vmem:[#allocation35_spill] sm:$0xff] }
 0x654   :  { %3505 = vst [vmem:[#allocation2 + $0x18] sm:$0xf0] %v3503_v26  ;;  %4327 = vmatprep.subr.bf16.mxu0 %v11060_v17  ;;  %4368 = vmatprep.subr.bf16.mxu1 %v11062_v24  ;;  %v12215_v17 = vld [vmem:[#allocation36_spill] sm:$0xff] }
 0x655   :  { %4357 = vmatprep.mubr.bf16.mxu0 %v12097_v2  ;;  %4398 = vmatprep.mubr.bf16.mxu1 %v12097_v2 }
 0x657   :  { %4328 = vmatpush1.bf16.msra.mxu0 %v11064_v27  ;;  %4369 = vmatpush1.bf16.msra.mxu1 %v11066_v29 }
 0x658   :  { %4329 = vmatprep.subr.bf16.mxu0 %v11072_v30  ;;  %4370 = vmatprep.subr.bf16.mxu1 %v11074_v61  ;;  %v12216_v30 = vld [vmem:[#allocation37_spill] sm:$0xff] }
 0x65b   :  { %4330 = vmatpush1.bf16.msra.mxu0 %v11076_v51  ;;  %4371 = vmatpush1.bf16.msra.mxu1 %v11078_v36  ;;  %v12217_v51 = vld [vmem:[#allocation38_spill] sm:$0xff] }
 0x65c   :  { %4331 = vmatprep.subr.bf16.mxu0 %v11084_v34  ;;  %4372 = vmatprep.subr.bf16.mxu1 %v11086_v38 }
 0x65f   :  { %4332 = vmatpush1.bf16.msra.mxu0 %v11088_v21  ;;  %4373 = vmatpush1.bf16.msra.mxu1 %v11090_v45 }
 0x660   :  { %4333 = vmatprep.subr.bf16.mxu0 %v11098_v42  ;;  %4374 = vmatprep.subr.bf16.mxu1 %v11102_v4 }
 0x663   :  { %4334 = vmatpush1.bf16.msra.mxu0 %v11096_v37  ;;  %4375 = vmatpush1.bf16.msra.mxu1 %v11100_v25 }
 0x664   :  { %4335 = vmatprep.subr.bf16.mxu0 %v11104_v35  ;;  %4376 = vmatprep.subr.bf16.mxu1 %v11107_v46 }
 0x667   :  { %4336 = vmatpush1.bf16.msra.mxu0 %v11111_v53  ;;  %4377 = vmatpush1.bf16.msra.mxu1 %v11115_v41 }
 0x668   :  { %4337 = vmatprep.subr.bf16.mxu0 %v11117_v54  ;;  %4378 = vmatprep.subr.bf16.mxu1 %v11120_v39 }
 0x66b   :  { %4338 = vmatpush1.bf16.msra.mxu0 %v11123_v31  ;;  %4379 = vmatpush1.bf16.msra.mxu1 %v11127_v40 }
 0x66c   :  { %4339 = vmatprep.subr.bf16.mxu0 %v11129_v10  ;;  %4380 = vmatprep.subr.bf16.mxu1 %v11132_v49 }
 0x66f   :  { %4340 = vmatpush1.bf16.msra.mxu0 %v11135_v55  ;;  %4381 = vmatpush1.bf16.msra.mxu1 %v11139_v19 }
 0x670   :  { %4603 = vmatprep.subr.bf16.mxu0 %v11144_v56  ;;  %4644 = vmatprep.subr.bf16.mxu1 %v11146_v57 }
 0x6ec   :  { %v3740_v8 = vpop.f32.mrb[64].mxu0  ;;  %v3781_v7 = vpop.f32.mrb[64].mxu1 }
 0x6ed   :  { %v3788_v16 = vadd.f32 %v3740_v8, %v12214_v32  ;;  %v3790_v24 = vadd.f32 %v3781_v7, %v12215_v17  ;;  %v3742_v27 = vpop.f32.mrb[65].mxu0  ;;  %v3783_v29 = vpop.f32.mrb[65].mxu1 }
 0x6ee   :  { %v3789_v61 = vadd.f32 %v3742_v27, %v12216_v30  ;;  %v3791_v36 = vadd.f32 %v3783_v29, %v12217_v51  ;;  %v3744_v34 = vpop.f32.mrb[66].mxu0  ;;  %v3785_v38 = vpop.f32.mrb[66].mxu1  ;;  %v12228_v27 = vld [vmem:[#allocation92_spill] sm:$0xff] }
 0x6ef   :  { %v8380_v21 = vmul.f32 -1.442695, %v3788_v16  ;;  %v3745_v45 = vpop.f32.mrb[67].mxu0  ;;  %v3786_v37 = vpop.f32.mrb[67].mxu1  ;;  %v12231_v30 = vld [vmem:[#allocation24_spill] sm:$0xff] }
 0x6f0   :  { %v8381_v42 = vmul.f32 -1.442695, %v3789_v61  ;;  %v8382_v25 = vmul.f32 -1.442695, %v3791_v36  ;;  %v12234_v36 = vld [vmem:[#allocation72_spill] sm:$0xff] }
 0x6f1   :  { %9453 = vpow2.f32 %v8380_v21  ;;  %v12236_v34 = vld [vmem:[#allocation76_spill] sm:$0xff] }
 0x6f2   :  { %9455 = vpow2.f32 %v8381_v42 }
 0x6f3   :  { %9457 = vpow2.f32 %v8382_v25 }
 0x6f4   :  { %9459 = vtanh.f32 %v3790_v24 }
 0x6fb   :  { %v9454_v4 = vpop.eup %9453 }
 0x6fc   :  { %v9456_v35 = vpop.eup %9455  ;;  %v4073_v46 = vadd.f32 1.0, %v9454_v4 }
 0x6fd   :  { %v4079_v53 = vadd.f32 1.0, %v9456_v35  ;;  %v9458_v41 = vpop.eup %9457 }
 0x6fe   :  { %9461 = vrcp.f32 %v4073_v46  ;;  %v9460_v54 = vpop.eup %9459  ;;  %v4086_v10 = vadd.f32 1.0, %v9458_v41 }
 0x6ff   :  { %9463 = vrcp.f32 %v4079_v53 }
 0x700   :  { %9465 = vrcp.f32 %v4086_v10  ;;  %v9144_v10 = vld [vmem:[#allocation7 + $0x2c] ss:$16 sps:$4 sm:$0xff]  }
 0x708   :  { %v9462_v39 = vpop.eup %9461 }
 0x709   :  { %v9464_v31 = vpop.eup %9463  ;;  %v4090_v40 = vmul.f32 %v9462_v39, %v9460_v54  ;;  %v9135_v54 = vld [vmem:[#allocation7 + $0x4] ss:$16 sps:$4 sm:$0xff]   ;;  %v9138_v39 = vld [vmem:[#allocation7 + $0xc] ss:$16 sps:$4 sm:$0xff]  }
 0x70a   :  { %v4089_v49 = vmul.f32 %v9464_v31, %v11155_v60  ;;  %v9466_v19 = vpop.eup %9465  ;;  %v12218_v60 = vld [vmem:[#allocation86_spill] sm:$0xff]  ;;  %v9133_v31 = vld [vmem:[#allocation7] ss:$16 sps:$4 sm:$0xff]  }
 0x70c   :  { %v11299_v55 = vadd.f32 %v4090_v40, %v4089_v49  ;;  %v9141_v40 = vld [vmem:[#allocation7 + $0x24] ss:$16 sps:$4 sm:$0xff]   ;;  %v9139_v49 = vld [vmem:[#allocation7 + $0x20] ss:$16 sps:$4 sm:$0xff]  }
 0x70e   :  { %9467 = vtanh.f32 %v11299_v55 }
 0x718   :  { %v9468_v56 = vpop.eup %9467 }
 0x719   :  { %v4093_v57 = vmul.f32 %v9468_v56, %v9466_v19  ;;  %v9142_v19 = vld [vmem:[#allocation7 + $0x28] ss:$16 sps:$4 sm:$0xff]   ;;  %v9147_v56 = vld [vmem:[#allocation7 + $0x44] ss:$16 sps:$4 sm:$0xff]  }
 0x71b   :  { %v4094_v23 = vpack.c.bf16 %v4093_v57, %v4093_v57  ;;  %v9150_v57 = vld [vmem:[#allocation7 + $0x4c] ss:$16 sps:$4 sm:$0xff]  }
 0x71d   :  { %v4121_v33 = vrot.slane %v4094_v23, 4  ;;  %4358 = vmatmul.mubr.bf16.vlgmr.msra.gmra.mrb[72].mxu0 %v4094_v23  ;;  %4399 = vmatmul.mubr.bf16.vlgmr.msra.gmra.mrb[72].mxu1 %v4094_v23  ;;  %v9145_v23 = vld [vmem:[#allocation7 + $0x40] ss:$16 sps:$4 sm:$0xff]  }
 0x71e   :  { %4604 = vmatpush1.bf16.msra.mxu0 %v11158_v48  ;;  %4645 = vmatpush1.bf16.msra.mxu1 %v11160_v12  ;;  %v12220_v12 = vld [vmem:[#allocation88_spill] sm:$0xff] }
 0x71f   :  { %4123 = vst [vmem:[#allocation2 + $0x20] sm:$0xf0] %v4121_v33  ;;  %4605 = vmatprep.subr.bf16.mxu0 %v11162_v52  ;;  %4646 = vmatprep.subr.bf16.mxu1 %v11164_v44  ;;  %v12222_v52 = vld [vmem:[#allocation56_spill] sm:$0xff] }
 0x720   :  { %4635 = vmatprep.mubr.bf16.mxu0 %v12097_v2  ;;  %4676 = vmatprep.mubr.bf16.mxu1 %v12097_v2  ;;  %v9148_v33 = vld [vmem:[#allocation7 + $0x48] ss:$16 sps:$4 sm:$0xff]  }
 0x722   :  { %4606 = vmatpush1.bf16.msra.mxu0 %v11168_v28  ;;  %4647 = vmatpush1.bf16.msra.mxu1 %v11170_v15  ;;  %v12224_v28 = vld [vmem:[#allocation90_spill] sm:$0xff] }
 0x723   :  { %4607 = vmatprep.subr.bf16.mxu0 %v12218_v60  ;;  %4648 = vmatprep.subr.bf16.mxu1 %v12219_v14  ;;  %v12225_v15 = vld [vmem:[#allocation58_spill] sm:$0xff]  ;;  %v9153_v60 = vld [vmem:[#allocation7 + $0x64] ss:$16 sps:$4 sm:$0xff]  }
 0x724   :  { %v9156_v14 = vld [vmem:[#allocation7 + $0x6c] ss:$16 sps:$4 sm:$0xff]  }
 0x725   :  { %v4018_v48 = vpop.f32.mrb[68].mxu0  ;;  %v4059_v63 = vpop.f32.mrb[68].mxu1 }
 0x726   :  { %4608 = vmatpush1.bf16.msra.mxu0 %v12220_v12  ;;  %4649 = vmatpush1.bf16.msra.mxu1 %v12221_v9  ;;  %v4066_v44 = vadd.f32 %v4018_v48, %v12222_v52  ;;  %v4068_v1 = vadd.f32 %v4059_v63, %v12223_v13  ;;  %v4020_v6 = vpop.f32.mrb[69].mxu0  ;;  %v4061_v5 = vpop.f32.mrb[69].mxu1  ;;  %v9151_v48 = vld [vmem:[#allocation7 + $0x60] ss:$16 sps:$4 sm:$0xff]   ;;  %v9154_v63 = vld [vmem:[#allocation7 + $0x68] ss:$16 sps:$4 sm:$0xff]  }
 0x727   :  { %4609 = vmatprep.subr.bf16.mxu0 %v11188_v3  ;;  %4650 = vmatprep.subr.bf16.mxu1 %v12224_v28  ;;  %v4067_v58 = vadd.f32 %v4020_v6, %v12225_v15  ;;  %v4069_v26 = vadd.f32 %v4061_v5, %v12226_v20  ;;  %v4022_v8 = vpop.f32.mrb[70].mxu0  ;;  %v4063_v7 = vpop.f32.mrb[70].mxu1  ;;  %v12227_v3 = vld [vmem:[#allocation91_spill] sm:$0xff]  ;;  %v9160_v52 = vld [vmem:[#allocation7 + $0x88] ss:$16 sps:$4 sm:$0xff]  }
 0x728   :  { %v8383_v32 = vmul.f32 -1.442695, %v4066_v44  ;;  %v4023_v16 = vpop.f32.mrb[71].mxu0  ;;  %v4064_v17 = vpop.f32.mrb[71].mxu1  ;;  %v9157_v12 = vld [vmem:[#allocation7 + $0x80] ss:$16 sps:$4 sm:$0xff]  }
 0x729   :  { %v8384_v24 = vmul.f32 -1.442695, %v4067_v58  ;;  %v8385_v29 = vmul.f32 -1.442695, %v4069_v26  ;;  %v9159_v9 = vld [vmem:[#allocation7 + $0x84] ss:$16 sps:$4 sm:$0xff]  }
 0x72a   :  { %4610 = vmatpush1.bf16.msra.mxu0 %v11194_v0  ;;  %4651 = vmatpush1.bf16.msra.mxu1 %v11196_v11  ;;  %9469 = vpow2.f32 %v8383_v32  ;;  %v12229_v0 = vld [vmem:[#allocation93_spill] sm:$0xff]  ;;  %v12230_v11 = vld [vmem:[#allocation23_spill] sm:$0xff]  ;;  %v9162_v44 = vld [vmem:[#allocation7 + $0x8c] ss:$16 sps:$4 sm:$0xff]  }
 0x72b   :  { %4611 = vmatprep.subr.bf16.mxu0 %v11202_v59  ;;  %4652 = vmatprep.subr.bf16.mxu1 %v11204_v47  ;;  %9471 = vpow2.f32 %v8384_v24  ;;  %v9165_v13 = vld [vmem:[#allocation7 + $0xa4] ss:$16 sps:$4 sm:$0xff]   ;;  %v9163_v6 = vld [vmem:[#allocation7 + $0xa0] ss:$16 sps:$4 sm:$0xff]   ;;  %v9166_v5 = vld [vmem:[#allocation7 + $0xa8] ss:$16 sps:$4 sm:$0xff]  }
 0x72c   :  { %9473 = vpow2.f32 %v8385_v29  ;;  %v9171_v28 = vld [vmem:[#allocation7 + $0xc4] ss:$16 sps:$4 sm:$0xff]   ;;  %v9174_v15 = vld [vmem:[#allocation7 + $0xcc] ss:$16 sps:$4 sm:$0xff]   ;;  %v9169_v58 = vld [vmem:[#allocation7 + $0xc0] ss:$16 sps:$4 sm:$0xff]  }
 0x72d   :  { %9475 = vtanh.f32 %v4068_v1  ;;  %v9168_v1 = vld [vmem:[#allocation7 + $0xac] ss:$16 sps:$4 sm:$0xff]   ;;  %v9172_v20 = vld [vmem:[#allocation7 + $0xc8] ss:$16 sps:$4 sm:$0xff]   ;;  %v9177_v26 = vld [vmem:[#allocation7 + $0xe4] ss:$16 sps:$4 sm:$0xff]  }
 0x72e   :  { %4612 = vmatpush1.bf16.msra.mxu0 %v11210_v62  ;;  %4653 = vmatpush1.bf16.msra.mxu1 %v11212_v18  ;;  %v12232_v62 = vld [vmem:[#allocation25_spill] sm:$0xff]  ;;  %v12233_v18 = vld [vmem:[#allocation26_spill] sm:$0xff] }
 0x72f   :  { %4613 = vmatprep.subr.bf16.mxu0 %v12227_v3  ;;  %4654 = vmatprep.subr.bf16.mxu1 %v12228_v27  ;;  %v9180_v8 = vld [vmem:[#allocation7 + $0xec] ss:$16 sps:$4 sm:$0xff]   ;;  %v9175_v7 = vld [vmem:[#allocation7 + $0xe0] ss:$16 sps:$4 sm:$0xff]   ;;  %v9178_v32 = vld [vmem:[#allocation7 + $0xe8] ss:$16 sps:$4 sm:$0xff]  }
 0x730   :  { %v9183_v16 = vld [vmem:[#allocation9 + $0x4] ss:$16 sps:$4 sm:$0xff]   ;;  %v9186_v17 = vld [vmem:[#allocation9 + $0xc] ss:$16 sps:$4 sm:$0xff]  }
 0x731   :  { %v12237_v27 = vld [vmem:[#allocation39_spill] sm:$0xff] }
 0x732   :  { %4614 = vmatpush1.bf16.msra.mxu0 %v11222_v22  ;;  %4655 = vmatpush1.bf16.msra.mxu1 %v12229_v0  ;;  %v12235_v22 = vld [vmem:[#allocation73_spill] sm:$0xff]  ;;  %v12238_v0 = vld [vmem:[#allocation40_spill] sm:$0xff] }
 0x733   :  { %4615 = vmatprep.subr.bf16.mxu0 %v12230_v11  ;;  %4656 = vmatprep.subr.bf16.mxu1 %v12231_v30 }
 0x734   :  { %v9470_v59 = vpop.eup %9469 }
 0x735   :  { %v9472_v47 = vpop.eup %9471  ;;  %v4098_v61 = vadd.f32 1.0, %v9470_v59 }
 0x736   :  { %4616 = vmatpush1.bf16.msra.mxu0 %v12232_v62  ;;  %4657 = vmatpush1.bf16.msra.mxu1 %v12233_v18  ;;  %v4104_v51 = vadd.f32 1.0, %v9472_v47  ;;  %v9474_v38 = vpop.eup %9473  ;;  %v12239_v47 = vld [vmem:[#allocation41_spill] sm:$0xff]  ;;  %v12240_v62 = vld [vmem:[#allocation42_spill] sm:$0xff] }
 0x737   :  { %4617 = vmatprep.subr.bf16.mxu0 %v12234_v36  ;;  %4658 = vmatprep.subr.bf16.mxu1 %v11242_v50  ;;  %9477 = vrcp.f32 %v4098_v61  ;;  %v9476_v21 = vpop.eup %9475  ;;  %v4111_v25 = vadd.f32 1.0, %v9474_v38 }
 0x738   :  { %9479 = vrcp.f32 %v4104_v51 }
 0x739   :  { %9481 = vrcp.f32 %v4111_v25 }
 0x73a   :  { %4618 = vmatpush1.bf16.msra.mxu0 %v12235_v22  ;;  %4659 = vmatpush1.bf16.msra.mxu1 %v12236_v34 }
 0x73b   :  { %4944 = vmatprep.subr.bf16.mxu0 %v9135_v54  ;;  %4985 = vmatprep.subr.bf16.mxu1 %v9138_v39 }
 0x741   :  { %v9478_v45 = vpop.eup %9477 }
 0x742   :  { %v9480_v37 = vpop.eup %9479  ;;  %v4115_v42 = vmul.f32 %v9478_v45, %v9476_v21 }
 0x743   :  { %v4114_v4 = vmul.f32 %v9480_v37, %v11257_v43  ;;  %v9482_v50 = vpop.eup %9481  ;;  %v9136_v43 = vld [vmem:[#allocation7 + $0x8] ss:$16 sps:$4 sm:$0xff]  }
 0x745   :  { %v11339_v35 = vadd.f32 %v4115_v42, %v4114_v4 }
 0x747   :  { %9483 = vtanh.f32 %v11339_v35 }
 0x751   :  { %v9484_v46 = vpop.eup %9483 }
 0x752   :  { %v4118_v53 = vmul.f32 %v9484_v46, %v9482_v50 }
 0x754   :  { %v4119_v41 = vpack.c.bf16 %v4118_v53, %v4118_v53 }
 0x756   :  { %4124 = vst [vmem:[#allocation2 + $0x18] sm:$0xf] %v4119_v41  ;;  %4636 = vmatmul.mubr.bf16.vlgmr.msra.gmra.mrb[76].mxu0 %v4119_v41  ;;  %4677 = vmatmul.mubr.bf16.vlgmr.msra.gmra.mrb[76].mxu1 %v4119_v41 }
 0x757   :  { %4976 = vmatprep.mubr.bf16.mxu0 %v12097_v2  ;;  %5017 = vmatprep.mubr.bf16.mxu1 %v12097_v2 }
 0x758   :  { %4945 = vmatpush1.bf16.msra.mxu0 %v9133_v31  ;;  %4986 = vmatpush1.bf16.msra.mxu1 %v9136_v43 }
 0x759   :  { %4946 = vmatprep.subr.bf16.mxu0 %v9141_v40  ;;  %4987 = vmatprep.subr.bf16.mxu1 %v9144_v10 }
 0x75c   :  { %4947 = vmatpush1.bf16.msra.mxu0 %v9139_v49  ;;  %4988 = vmatpush1.bf16.msra.mxu1 %v9142_v19  ;;  %v9181_v19 = vld [vmem:[#allocation9] ss:$16 sps:$4 sm:$0xff]  }
 0x75d   :  { %4948 = vmatprep.subr.bf16.mxu0 %v9147_v56  ;;  %4989 = vmatprep.subr.bf16.mxu1 %v9150_v57  ;;  %v9184_v56 = vld [vmem:[#allocation9 + $0x8] ss:$16 sps:$4 sm:$0xff]  }
 0x760   :  { %4949 = vmatpush1.bf16.msra.mxu0 %v9145_v23  ;;  %4990 = vmatpush1.bf16.msra.mxu1 %v9148_v33  ;;  %v9189_v23 = vld [vmem:[#allocation9 + $0x24] ss:$16 sps:$4 sm:$0xff]   ;;  %v9192_v33 = vld [vmem:[#allocation9 + $0x2c] ss:$16 sps:$4 sm:$0xff]  }
 0x761   :  { %4950 = vmatprep.subr.bf16.mxu0 %v9153_v60  ;;  %4991 = vmatprep.subr.bf16.mxu1 %v9156_v14  ;;  %v9187_v60 = vld [vmem:[#allocation9 + $0x20] ss:$16 sps:$4 sm:$0xff]   ;;  %v9195_v14 = vld [vmem:[#allocation9 + $0x44] ss:$16 sps:$4 sm:$0xff]  }
 0x764   :  { %4951 = vmatpush1.bf16.msra.mxu0 %v9151_v48  ;;  %4992 = vmatpush1.bf16.msra.mxu1 %v9154_v63  ;;  %v9198_v48 = vld [vmem:[#allocation9 + $0x4c] ss:$16 sps:$4 sm:$0xff]   ;;  %v9193_v63 = vld [vmem:[#allocation9 + $0x40] ss:$16 sps:$4 sm:$0xff]  }
 0x765   :  { %4952 = vmatprep.subr.bf16.mxu0 %v9159_v9  ;;  %4993 = vmatprep.subr.bf16.mxu1 %v9162_v44  ;;  %v9201_v9 = vld [vmem:[#allocation9 + $0x64] ss:$16 sps:$4 sm:$0xff]  }
 0x768   :  { %4953 = vmatpush1.bf16.msra.mxu0 %v9157_v12  ;;  %4994 = vmatpush1.bf16.msra.mxu1 %v9160_v52  ;;  %v9196_v12 = vld [vmem:[#allocation9 + $0x48] ss:$16 sps:$4 sm:$0xff]   ;;  %v9204_v52 = vld [vmem:[#allocation9 + $0x6c] ss:$16 sps:$4 sm:$0xff]  }
 0x769   :  { %4954 = vmatprep.subr.bf16.mxu0 %v9165_v13  ;;  %4995 = vmatprep.subr.bf16.mxu1 %v9168_v1  ;;  %v9199_v1 = vld [vmem:[#allocation9 + $0x60] ss:$16 sps:$4 sm:$0xff]  }
 0x76c   :  { %4955 = vmatpush1.bf16.msra.mxu0 %v9163_v6  ;;  %4996 = vmatpush1.bf16.msra.mxu1 %v9166_v5  ;;  %v9202_v6 = vld [vmem:[#allocation9 + $0x68] ss:$16 sps:$4 sm:$0xff]  }
 0x76d   :  { %4956 = vmatprep.subr.bf16.mxu0 %v9171_v28  ;;  %4997 = vmatprep.subr.bf16.mxu1 %v9174_v15  ;;  %v12241_v5 = vld [vmem:[#allocation52_spill] sm:$0xff]  ;;  %v12242_v15 = vld [vmem:[#allocation53_spill] sm:$0xff] }
 0x770   :  { %4957 = vmatpush1.bf16.msra.mxu0 %v9169_v58  ;;  %4998 = vmatpush1.bf16.msra.mxu1 %v9172_v20 }
 0x771   :  { %4958 = vmatprep.subr.bf16.mxu0 %v9177_v26  ;;  %4999 = vmatprep.subr.bf16.mxu1 %v9180_v8  ;;  %v9207_v8 = vld [vmem:[#allocation9 + $0x84] ss:$16 sps:$4 sm:$0xff]  }
 0x774   :  { %4959 = vmatpush1.bf16.msra.mxu0 %v9175_v7  ;;  %5000 = vmatpush1.bf16.msra.mxu1 %v9178_v32  ;;  %v9210_v7 = vld [vmem:[#allocation9 + $0x8c] ss:$16 sps:$4 sm:$0xff]  }
 0x775   :  { %5222 = vmatprep.subr.bf16.mxu0 %v9183_v16  ;;  %5263 = vmatprep.subr.bf16.mxu1 %v9186_v17  ;;  %v12243_v32 = vld [vmem:[#allocation54_spill] sm:$0xff]  ;;  %v12244_v17 = vld [vmem:[#allocation55_spill] sm:$0xff] }
 0x7f0   :  { %v4359_v24 = vpop.f32.mrb[72].mxu0  ;;  %v4400_v3 = vpop.f32.mrb[72].mxu1 }
 0x7f1   :  { %v4407_v29 = vadd.f32 %v4359_v24, %v12237_v27  ;;  %v4409_v11 = vadd.f32 %v4400_v3, %v12238_v0  ;;  %v4361_v30 = vpop.f32.mrb[73].mxu0  ;;  %v4402_v59 = vpop.f32.mrb[73].mxu1 }
 0x7f2   :  { %v4408_v61 = vadd.f32 %v4361_v30, %v12239_v47  ;;  %v4410_v18 = vadd.f32 %v4402_v59, %v12240_v62  ;;  %v4363_v51 = vpop.f32.mrb[74].mxu0  ;;  %v4404_v36 = vpop.f32.mrb[74].mxu1  ;;  %v9205_v59 = vld [vmem:[#allocation9 + $0x80] ss:$16 sps:$4 sm:$0xff]   ;;  %v9208_v47 = vld [vmem:[#allocation9 + $0x88] ss:$16 sps:$4 sm:$0xff]  }
 0x7f3   :  { %v8450_v22 = vmul.f32 -1.442695, %v4407_v29  ;;  %v4364_v34 = vpop.f32.mrb[75].mxu0  ;;  %v4405_v38 = vpop.f32.mrb[75].mxu1  ;;  %v9216_v62 = vld [vmem:[#allocation9 + $0xac] ss:$16 sps:$4 sm:$0xff]  }
 0x7f4   :  { %v8451_v21 = vmul.f32 -1.442695, %v4408_v61  ;;  %v8452_v45 = vmul.f32 -1.442695, %v4410_v18  ;;  %v9213_v61 = vld [vmem:[#allocation9 + $0xa4] ss:$16 sps:$4 sm:$0xff]  }
 0x7f5   :  { %9485 = vpow2.f32 %v8450_v22  ;;  %v9211_v18 = vld [vmem:[#allocation9 + $0xa0] ss:$16 sps:$4 sm:$0xff]   ;;  %v9214_v51 = vld [vmem:[#allocation9 + $0xa8] ss:$16 sps:$4 sm:$0xff]   ;;  %v9219_v36 = vld [vmem:[#allocation9 + $0xc4] ss:$16 sps:$4 sm:$0xff]  }
 0x7f6   :  { %9487 = vpow2.f32 %v8451_v21  ;;  %v9222_v22 = vld [vmem:[#allocation9 + $0xcc] ss:$16 sps:$4 sm:$0xff]   ;;  %v9217_v38 = vld [vmem:[#allocation9 + $0xc0] ss:$16 sps:$4 sm:$0xff]   ;;  %v9220_v21 = vld [vmem:[#allocation9 + $0xc8] ss:$16 sps:$4 sm:$0xff]  }
 0x7f7   :  { %9489 = vpow2.f32 %v8452_v45  ;;  %v9225_v45 = vld [vmem:[#allocation9 + $0xe4] ss:$16 sps:$4 sm:$0xff]  }
 0x7f8   :  { %9491 = vtanh.f32 %v4409_v11 }
 0x7ff   :  { %v9486_v37 = vpop.eup %9485 }
 0x800   :  { %v9488_v42 = vpop.eup %9487  ;;  %v4692_v25 = vadd.f32 1.0, %v9486_v37  ;;  %v9228_v37 = vld [vmem:[#allocation9 + $0xec] ss:$16 sps:$4 sm:$0xff]  }
 0x801   :  { %v4698_v4 = vadd.f32 1.0, %v9488_v42  ;;  %v9490_v50 = vpop.eup %9489 }
 0x802   :  { %9493 = vrcp.f32 %v4692_v25  ;;  %v9492_v46 = vpop.eup %9491  ;;  %v4705_v39 = vadd.f32 1.0, %v9490_v50  ;;  %v9223_v50 = vld [vmem:[#allocation9 + $0xe0] ss:$16 sps:$4 sm:$0xff]  }
 0x803   :  { %9495 = vrcp.f32 %v4698_v4 }
 0x804   :  { %9497 = vrcp.f32 %v4705_v39 }
 0x80c   :  { %v9494_v53 = vpop.eup %9493 }
 0x80d   :  { %v9496_v41 = vpop.eup %9495  ;;  %v4709_v54 = vmul.f32 %v9494_v53, %v9492_v46  ;;  %v9226_v46 = vld [vmem:[#allocation9 + $0xe8] ss:$16 sps:$4 sm:$0xff]  }
 0x80e   :  { %v4708_v31 = vmul.f32 %v9496_v41, %v11299_v55  ;;  %v9498_v40 = vpop.eup %9497  ;;  %v9190_v55 = vld [vmem:[#allocation9 + $0x28] ss:$16 sps:$4 sm:$0xff]  }
 0x810   :  { %v11349_v43 = vadd.f32 %v4709_v54, %v4708_v31 }
 0x812   :  { %9499 = vtanh.f32 %v11349_v43 }
 0x81c   :  { %v9500_v10 = vpop.eup %9499 }
 0x81d   :  { %v4712_v49 = vmul.f32 %v9500_v10, %v9498_v40 }
 0x81f   :  { %v4713_v57 = vpack.c.bf16 %v4712_v49, %v4712_v49 }
 0x821   :  { %4739 = vst [vmem:[#allocation2 + $0x30] sm:$0xf] %v4713_v57  ;;  %4977 = vmatmul.mubr.bf16.vlgmr.msra.gmra.mrb[80].mxu0 %v4713_v57  ;;  %5018 = vmatmul.mubr.bf16.vlgmr.msra.gmra.mrb[80].mxu1 %v4713_v57 }
 0x822   :  { %5223 = vmatpush1.bf16.msra.mxu0 %v9181_v19  ;;  %5264 = vmatpush1.bf16.msra.mxu1 %v9184_v56 }
 0x823   :  { %5224 = vmatprep.subr.bf16.mxu0 %v9189_v23  ;;  %5265 = vmatprep.subr.bf16.mxu1 %v9192_v33 }
 0x824   :  { %5254 = vmatprep.mubr.bf16.mxu0 %v12097_v2  ;;  %5295 = vmatprep.mubr.bf16.mxu1 %v12097_v2 }
 0x826   :  { %5225 = vmatpush1.bf16.msra.mxu0 %v9187_v60  ;;  %5266 = vmatpush1.bf16.msra.mxu1 %v9190_v55  ;;  %v5371_v55 = vld [vmem:[#allocation10] sm:$0xff] }
 0x827   :  { %5226 = vmatprep.subr.bf16.mxu0 %v9195_v14  ;;  %5267 = vmatprep.subr.bf16.mxu1 %v9198_v48  ;;  %v5375_v14 = vld [vmem:[#allocation10 + $0x20] sm:$0xff]  ;;  %v5372_v48 = vld [vmem:[#allocation10 + $0x8] sm:$0xff] }
 0x829   :  { %v4637_v44 = vpop.f32.mrb[76].mxu0  ;;  %v4678_v13 = vpop.f32.mrb[76].mxu1 }
 0x82a   :  { %5227 = vmatpush1.bf16.msra.mxu0 %v9193_v63  ;;  %5268 = vmatpush1.bf16.msra.mxu1 %v9196_v12  ;;  %v4685_v28 = vadd.f32 %v4637_v44, %v12241_v5  ;;  %v4687_v58 = vadd.f32 %v4678_v13, %v12242_v15  ;;  %v4639_v20 = vpop.f32.mrb[77].mxu0  ;;  %v4680_v26 = vpop.f32.mrb[77].mxu1  ;;  %v8527_v63 = vcombine.high %v5371_v55, %v5375_v14  ;;  %v5376_v12 = vld [vmem:[#allocation10 + $0x28] sm:$0xff]  ;;  %v5379_v44 = vld [vmem:[#allocation10 + $0x40] sm:$0xff] }
 0x82b   :  { %5228 = vmatprep.subr.bf16.mxu0 %v9201_v9  ;;  %5269 = vmatprep.subr.bf16.mxu1 %v9204_v52  ;;  %v4686_v16 = vadd.f32 %v4639_v20, %v12243_v32  ;;  %v4688_v24 = vadd.f32 %v4680_v26, %v12244_v17  ;;  %v4641_v3 = vpop.f32.mrb[78].mxu0  ;;  %v4682_v27 = vpop.f32.mrb[78].mxu1  ;;  %v8526_v9 = vcombine.low %v5371_v55, %v5375_v14  ;;  %v5383_v13 = vld [vmem:[#allocation10 + $0x60] sm:$0xff]  ;;  %v5384_v5 = vld [vmem:[#allocation10 + $0x68] sm:$0xff] }
 0x82c   :  { %v8453_v29 = vmul.f32 -1.442695, %v4685_v28  ;;  %v4642_v0 = vpop.f32.mrb[79].mxu0  ;;  %v4683_v11 = vpop.f32.mrb[79].mxu1  ;;  %v8529_v52 = vcombine.high %v5372_v48, %v5376_v12  ;;  %v8534_v28 = vcombine.low %v5379_v44, %v5383_v13  ;;  %v5387_v20 = vld [vmem:[#allocation10 + $0x80] sm:$0xff]  ;;  %v5392_v32 = vld [vmem:[#allocation10 + $0xa8] sm:$0xff] }
 0x82d   :  { %v8454_v30 = vmul.f32 -1.442695, %v4686_v16  ;;  %v8455_v34 = vmul.f32 -1.442695, %v4688_v24  ;;  %v5391_v26 = vld [vmem:[#allocation10 + $0xa0] sm:$0xff]  ;;  %v5400_v11 = vld [vmem:[#allocation10 + $0xe8] sm:$0xff] }
 0x82e   :  { %5229 = vmatpush1.bf16.msra.mxu0 %v9199_v1  ;;  %5270 = vmatpush1.bf16.msra.mxu1 %v9202_v6  ;;  %9501 = vpow2.f32 %v8453_v29  ;;  %v5380_v1 = vld [vmem:[#allocation10 + $0x48] sm:$0xff]  ;;  %v8535_v6 = vcombine.high %v5379_v44, %v5383_v13  ;;  %v8542_v16 = vcombine.low %v5387_v20, %v5391_v26  ;;  %v5395_v3 = vld [vmem:[#allocation10 + $0xc0] sm:$0xff] }
 0x82f   :  { %5230 = vmatprep.subr.bf16.mxu0 %v9207_v8  ;;  %5271 = vmatprep.subr.bf16.mxu1 %v9210_v7  ;;  %9503 = vpow2.f32 %v8454_v30  ;;  %v8537_v15 = vcombine.high %v5380_v1, %v5384_v5  ;;  %v5388_v8 = vld [vmem:[#allocation10 + $0x88] sm:$0xff]  ;;  %v8543_v7 = vcombine.high %v5387_v20, %v5391_v26  ;;  %v5399_v27 = vld [vmem:[#allocation10 + $0xe0] sm:$0xff] }
 0x830   :  { %9505 = vpow2.f32 %v8455_v34  ;;  %v8544_v17 = vcombine.low %v5388_v8, %v5392_v32  ;;  %v8545_v24 = vcombine.high %v5388_v8, %v5392_v32  ;;  %v5396_v29 = vld [vmem:[#allocation10 + $0xc8] sm:$0xff]  ;;  %v8551_v0 = vcombine.high %v5395_v3, %v5399_v27  ;;  %v5455_v32 = vld [vmem:[#allocation10 + $0x2a0] sm:$0xff] }
 0x831   :  { %9507 = vtanh.f32 %v4687_v58  ;;  %v8536_v58 = vcombine.low %v5380_v1, %v5384_v5  ;;  %v8550_v30 = vcombine.low %v5395_v3, %v5399_v27  ;;  %v5447_v5 = vld [vmem:[#allocation10 + $0x260] sm:$0xff] }
 0x832   :  { %5231 = vmatpush1.bf16.msra.mxu0 %v9205_v59  ;;  %5272 = vmatpush1.bf16.msra.mxu1 %v9208_v47  ;;  %v8552_v59 = vcombine.low %v5396_v29, %v5400_v11  ;;  %v8553_v47 = vcombine.high %v5396_v29, %v5400_v11  ;;  %v5463_v11 = vld [vmem:[#allocation10 + $0x2e0] sm:$0xff] }
 0x833   :  { %5232 = vmatprep.subr.bf16.mxu0 %v9213_v61  ;;  %5273 = vmatprep.subr.bf16.mxu1 %v9216_v62  ;;  %v5403_v61 = vld [vmem:[#allocation10 + $0x100] sm:$0xff] }
 0x834   :  { %v5407_v62 = vld [vmem:[#allocation10 + $0x120] sm:$0xff] }
 0x836   :  { %5233 = vmatpush1.bf16.msra.mxu0 %v9211_v18  ;;  %5274 = vmatpush1.bf16.msra.mxu1 %v9214_v51  ;;  %v5404_v18 = vld [vmem:[#allocation10 + $0x108] sm:$0xff]  ;;  %v8559_v51 = vcombine.high %v5403_v61, %v5407_v62 }
 0x837   :  { %5234 = vmatprep.subr.bf16.mxu0 %v9219_v36  ;;  %5275 = vmatprep.subr.bf16.mxu1 %v9222_v22  ;;  %v5408_v36 = vld [vmem:[#allocation10 + $0x128] sm:$0xff]  ;;  %v8558_v22 = vcombine.low %v5403_v61, %v5407_v62 }
 0x838   :  { %v9502_v42 = vpop.eup %9501  ;;  %v8560_v34 = vcombine.low %v5404_v18, %v5408_v36 }
 0x839   :  { %v9504_v25 = vpop.eup %9503  ;;  %v4717_v4 = vadd.f32 1.0, %v9502_v42 }
 0x83a   :  { %5235 = vmatpush1.bf16.msra.mxu0 %v9217_v38  ;;  %5276 = vmatpush1.bf16.msra.mxu1 %v9220_v21  ;;  %v4723_v53 = vadd.f32 1.0, %v9504_v25  ;;  %v9506_v41 = vpop.eup %9505  ;;  %v8561_v38 = vcombine.high %v5404_v18, %v5408_v36  ;;  %v5411_v21 = vld [vmem:[#allocation10 + $0x140] sm:$0xff]  ;;  %v5416_v25 = vld [vmem:[#allocation10 + $0x168] sm:$0xff] }
 0x83b   :  { %5236 = vmatprep.subr.bf16.mxu0 %v9225_v45  ;;  %5277 = vmatprep.subr.bf16.mxu1 %v9228_v37  ;;  %9509 = vrcp.f32 %v4717_v4  ;;  %v9508_v54 = vpop.eup %9507  ;;  %v4730_v10 = vadd.f32 1.0, %v9506_v41  ;;  %v5415_v45 = vld [vmem:[#allocation10 + $0x160] sm:$0xff]  ;;  %v5412_v37 = vld [vmem:[#allocation10 + $0x148] sm:$0xff] }
 0x83c   :  { %9511 = vrcp.f32 %v4723_v53  ;;  %v8567_v42 = vcombine.high %v5411_v21, %v5415_v45  ;;  %v8566_v4 = vcombine.low %v5411_v21, %v5415_v45  ;;  %v5419_v53 = vld [vmem:[#allocation10 + $0x180] sm:$0xff] }
 0x83d   :  { %9513 = vrcp.f32 %v4730_v10  ;;  %v5423_v41 = vld [vmem:[#allocation10 + $0x1a0] sm:$0xff] }
 0x83e   :  { %5237 = vmatpush1.bf16.msra.mxu0 %v9223_v50  ;;  %5278 = vmatpush1.bf16.msra.mxu1 %v9226_v46  ;;  %v8568_v50 = vcombine.low %v5412_v37, %v5416_v25  ;;  %v8569_v46 = vcombine.high %v5412_v37, %v5416_v25  ;;  %v5471_v36 = vld [vmem:[#allocation10 + $0x320] sm:$0xff] }
 0x83f   :  { %6181 = vmatprep.subr.bf16.mxu0 %v8527_v63  ;;  %6254 = vmatprep.subr.bf16.mxu1 %v8529_v52  ;;  %v5435_v63 = vld [vmem:[#allocation10 + $0x200] sm:$0xff]  ;;  %v5440_v52 = vld [vmem:[#allocation10 + $0x228] sm:$0xff] }
 0x840   :  { %v5479_v25 = vld [vmem:[#allocation10 + $0x360] sm:$0xff] }
 0x845   :  { %v9510_v39 = vpop.eup %9509 }
 0x846   :  { %v9512_v31 = vpop.eup %9511  ;;  %v4734_v40 = vmul.f32 %v9510_v39, %v9508_v54  ;;  %v5420_v54 = vld [vmem:[#allocation10 + $0x188] sm:$0xff]  ;;  %v8575_v39 = vcombine.high %v5419_v53, %v5423_v41 }
 0x847   :  { %v4733_v49 = vmul.f32 %v9512_v31, %v11339_v35  ;;  %v9514_v56 = vpop.eup %9513  ;;  %v8528_v35 = vcombine.low %v5372_v48, %v5376_v12  ;;  %v5424_v31 = vld [vmem:[#allocation10 + $0x1a8] sm:$0xff]  ;;  %v5439_v12 = vld [vmem:[#allocation10 + $0x220] sm:$0xff] }
 0x848   :  { %v8576_v10 = vcombine.low %v5420_v54, %v5424_v31  ;;  %v8590_v44 = vcombine.low %v5435_v63, %v5439_v12 }
 0x849   :  { %v11359_v19 = vadd.f32 %v4734_v40, %v4733_v49  ;;  %v8574_v40 = vcombine.low %v5419_v53, %v5423_v41  ;;  %v8577_v49 = vcombine.high %v5420_v54, %v5424_v31  ;;  %v5487_v31 = vld [vmem:[#allocation10 + $0x3a0] sm:$0xff] }
 0x84b   :  { %9515 = vtanh.f32 %v11359_v19 }
 0x855   :  { %v9516_v57 = vpop.eup %9515 }
 0x856   :  { %v4737_v23 = vmul.f32 %v9516_v57, %v9514_v56  ;;  %v5427_v56 = vld [vmem:[#allocation10 + $0x1c0] sm:$0xff] }
 0x857   :  { %v5431_v57 = vld [vmem:[#allocation10 + $0x1e0] sm:$0xff] }
 0x858   :  { %v4738_v33 = vpack.c.bf16 %v4737_v23, %v4737_v23  ;;  %v5428_v23 = vld [vmem:[#allocation10 + $0x1c8] sm:$0xff]  ;;  %v8582_v55 = vcombine.low %v5427_v56, %v5431_v57 }
 0x85a   :  { %v4741_v60 = vrot.slane %v4738_v33, 4  ;;  %5255 = vmatmul.mubr.bf16.vlgmr.msra.gmra.mrb[84].mxu0 %v4738_v33  ;;  %5296 = vmatmul.mubr.bf16.vlgmr.msra.gmra.mrb[84].mxu1 %v4738_v33  ;;  %v8583_v33 = vcombine.high %v5427_v56, %v5431_v57 }
 0x85b   :  { %6182 = vmatpush1.bf16.msra.mxu0 %v8526_v9  ;;  %6255 = vmatpush1.bf16.msra.mxu1 %v8528_v35  ;;  %v5436_v9 = vld [vmem:[#allocation10 + $0x208] sm:$0xff]  ;;  %v8591_v35 = vcombine.high %v5435_v63, %v5439_v12 }
 0x85c   :  { %4743 = vst [vmem:[#allocation2 + $0x8] sm:$0xf0] %v4741_v60  ;;  %6183 = vmatprep.subr.bf16.mxu0 %v8535_v6  ;;  %6256 = vmatprep.subr.bf16.mxu1 %v8537_v15  ;;  %v5432_v60 = vld [vmem:[#allocation10 + $0x1e8] sm:$0xff]  ;;  %v8592_v13 = vcombine.low %v5436_v9, %v5440_v52  ;;  %v8593_v1 = vcombine.high %v5436_v9, %v5440_v52  ;;  %v5443_v6 = vld [vmem:[#allocation10 + $0x240] sm:$0xff]  ;;  %v11364_v52 = vld [vmem:[#allocation10 + $0x30] sm:$0xff] }
 0x85d   :  { %v8584_v14 = vcombine.low %v5428_v23, %v5432_v60  ;;  %v8585_v48 = vcombine.high %v5428_v23, %v5432_v60  ;;  %v8599_v15 = vcombine.high %v5443_v6, %v5447_v5  ;;  %v8598_v20 = vcombine.low %v5443_v6, %v5447_v5  ;;  %v5495_v60 = vld [vmem:[#allocation10 + $0x3e0] sm:$0xff] }
 0x85f   :  { %6184 = vmatpush1.bf16.msra.mxu0 %v8534_v28  ;;  %6257 = vmatpush1.bf16.msra.mxu1 %v8536_v58  ;;  %v5444_v28 = vld [vmem:[#allocation10 + $0x248] sm:$0xff] }
 0x860   :  { %6185 = vmatprep.subr.bf16.mxu0 %v8543_v7  ;;  %6258 = vmatprep.subr.bf16.mxu1 %v8545_v24  ;;  %v5448_v58 = vld [vmem:[#allocation10 + $0x268] sm:$0xff]  ;;  %v5451_v7 = vld [vmem:[#allocation10 + $0x280] sm:$0xff] }
 0x861   :  { %v8600_v26 = vcombine.low %v5444_v28, %v5448_v58  ;;  %v8601_v8 = vcombine.high %v5444_v28, %v5448_v58  ;;  %v5456_v24 = vld [vmem:[#allocation10 + $0x2a8] sm:$0xff]  ;;  %v8606_v3 = vcombine.low %v5451_v7, %v5455_v32 }
 0x863   :  { %6186 = vmatpush1.bf16.msra.mxu0 %v8542_v16  ;;  %6259 = vmatpush1.bf16.msra.mxu1 %v8544_v17  ;;  %v5452_v16 = vld [vmem:[#allocation10 + $0x288] sm:$0xff]  ;;  %v8607_v17 = vcombine.high %v5451_v7, %v5455_v32 }
 0x864   :  { %6187 = vmatprep.subr.bf16.mxu0 %v8551_v0  ;;  %6260 = vmatprep.subr.bf16.mxu1 %v8553_v47  ;;  %v8608_v27 = vcombine.low %v5452_v16, %v5456_v24  ;;  %v8609_v29 = vcombine.high %v5452_v16, %v5456_v24  ;;  %v5459_v0 = vld [vmem:[#allocation10 + $0x2c0] sm:$0xff]  ;;  %v5464_v47 = vld [vmem:[#allocation10 + $0x2e8] sm:$0xff] }
 0x865   :  { %v8614_v61 = vcombine.low %v5459_v0, %v5463_v11 }
 0x867   :  { %6188 = vmatpush1.bf16.msra.mxu0 %v8550_v30  ;;  %6261 = vmatpush1.bf16.msra.mxu1 %v8552_v59  ;;  %v5460_v30 = vld [vmem:[#allocation10 + $0x2c8] sm:$0xff]  ;;  %v8615_v59 = vcombine.high %v5459_v0, %v5463_v11 }
 0x868   :  { %6189 = vmatprep.subr.bf16.mxu0 %v8559_v51  ;;  %6262 = vmatprep.subr.bf16.mxu1 %v8561_v38  ;;  %v8616_v62 = vcombine.low %v5460_v30, %v5464_v47  ;;  %v8617_v18 = vcombine.high %v5460_v30, %v5464_v47  ;;  %v5467_v51 = vld [vmem:[#allocation10 + $0x300] sm:$0xff]  ;;  %v5472_v38 = vld [vmem:[#allocation10 + $0x328] sm:$0xff] }
 0x869   :  { %v8622_v21 = vcombine.low %v5467_v51, %v5471_v36 }
 0x86b   :  { %6190 = vmatpush1.bf16.msra.mxu0 %v8558_v22  ;;  %6263 = vmatpush1.bf16.msra.mxu1 %v8560_v34  ;;  %v5468_v22 = vld [vmem:[#allocation10 + $0x308] sm:$0xff]  ;;  %v8623_v34 = vcombine.high %v5467_v51, %v5471_v36 }
 0x86c   :  { %6191 = vmatprep.subr.bf16.mxu0 %v8567_v42  ;;  %6264 = vmatprep.subr.bf16.mxu1 %v8569_v46  ;;  %v8624_v45 = vcombine.low %v5468_v22, %v5472_v38  ;;  %v8625_v37 = vcombine.high %v5468_v22, %v5472_v38  ;;  %v5475_v42 = vld [vmem:[#allocation10 + $0x340] sm:$0xff]  ;;  %v5480_v46 = vld [vmem:[#allocation10 + $0x368] sm:$0xff] }
 0x86d   :  { %v8630_v53 = vcombine.low %v5475_v42, %v5479_v25 }
 0x86f   :  { %6192 = vmatpush1.bf16.msra.mxu0 %v8566_v4  ;;  %6265 = vmatpush1.bf16.msra.mxu1 %v8568_v50  ;;  %v5476_v4 = vld [vmem:[#allocation10 + $0x348] sm:$0xff]  ;;  %v8631_v50 = vcombine.high %v5475_v42, %v5479_v25 }
 0x870   :  { %6193 = vmatprep.subr.bf16.mxu0 %v8575_v39  ;;  %6266 = vmatprep.subr.bf16.mxu1 %v8577_v49  ;;  %v8632_v41 = vcombine.low %v5476_v4, %v5480_v46  ;;  %v8633_v54 = vcombine.high %v5476_v4, %v5480_v46  ;;  %v5483_v39 = vld [vmem:[#allocation10 + $0x380] sm:$0xff]  ;;  %v5488_v49 = vld [vmem:[#allocation10 + $0x3a8] sm:$0xff] }
 0x871   :  { %v8638_v56 = vcombine.low %v5483_v39, %v5487_v31 }
 0x873   :  { %6194 = vmatpush1.bf16.msra.mxu0 %v8574_v40  ;;  %6267 = vmatpush1.bf16.msra.mxu1 %v8576_v10  ;;  %v5484_v40 = vld [vmem:[#allocation10 + $0x388] sm:$0xff]  ;;  %v8639_v10 = vcombine.high %v5483_v39, %v5487_v31  ;;  %v12249_v31 = vld [vmem:[#allocation48_spill] sm:$0xff] }
 0x874   :  { %6195 = vmatprep.subr.bf16.mxu0 %v8583_v33  ;;  %6268 = vmatprep.subr.bf16.mxu1 %v8585_v48  ;;  %v8640_v57 = vcombine.low %v5484_v40, %v5488_v49  ;;  %v8641_v23 = vcombine.high %v5484_v40, %v5488_v49  ;;  %v5491_v33 = vld [vmem:[#allocation10 + $0x3c0] sm:$0xff]  ;;  %v5496_v48 = vld [vmem:[#allocation10 + $0x3e8] sm:$0xff] }
 0x875   :  { %v8646_v63 = vcombine.low %v5491_v33, %v5495_v60 }
 0x877   :  { %6196 = vmatpush1.bf16.msra.mxu0 %v8582_v55  ;;  %6269 = vmatpush1.bf16.msra.mxu1 %v8584_v14  ;;  %v5492_v55 = vld [vmem:[#allocation10 + $0x3c8] sm:$0xff]  ;;  %v8647_v14 = vcombine.high %v5491_v33, %v5495_v60 }
 0x878   :  { %6197 = vmatprep.subr.bf16.mxu0 %v8591_v35  ;;  %6270 = vmatprep.subr.bf16.mxu1 %v8593_v1  ;;  %v8649_v12 = vcombine.high %v5492_v55, %v5496_v48  ;;  %v8648_v9 = vcombine.low %v5492_v55, %v5496_v48  ;;  %v11362_v35 = vld [vmem:[#allocation10 + $0x10] sm:$0xff]  ;;  %v11370_v1 = vld [vmem:[#allocation10 + $0x38] sm:$0xff] }
 0x879   :  { %v8530_v6 = vcombine.low %v11362_v35, %v11364_v52 }
 0x87b   :  { %6198 = vmatpush1.bf16.msra.mxu0 %v8590_v44  ;;  %6271 = vmatpush1.bf16.msra.mxu1 %v8592_v13  ;;  %v11366_v44 = vld [vmem:[#allocation10 + $0x18] sm:$0xff]  ;;  %v8531_v13 = vcombine.high %v11362_v35, %v11364_v52 }
 0x87c   :  { %6199 = vmatprep.subr.bf16.mxu0 %v8599_v15  ;;  %6272 = vmatprep.subr.bf16.mxu1 %v8601_v8  ;;  %v8532_v5 = vcombine.low %v11366_v44, %v11370_v1  ;;  %v8533_v28 = vcombine.high %v11366_v44, %v11370_v1  ;;  %v12246_v8 = vld [vmem:[#allocation44_spill] sm:$0xff] }
 0x87d   :  { %v5398_v35 = vld [vmem:[#allocation10 + $0xd8] sm:$0xff] }
 0x87e   :  { %v5402_v52 = vld [vmem:[#allocation10 + $0xf8] sm:$0xff] }
 0x87f   :  { %6200 = vmatpush1.bf16.msra.mxu0 %v8598_v20  ;;  %6273 = vmatpush1.bf16.msra.mxu1 %v8600_v26  ;;  %v12245_v20 = vld [vmem:[#allocation43_spill] sm:$0xff] }
 0x880   :  { %6201 = vmatprep.subr.bf16.mxu0 %v8607_v17  ;;  %6274 = vmatprep.subr.bf16.mxu1 %v8609_v29  ;;  %v12247_v17 = vld [vmem:[#allocation45_spill] sm:$0xff] }
 0x883   :  { %6202 = vmatpush1.bf16.msra.mxu0 %v8606_v3  ;;  %6275 = vmatpush1.bf16.msra.mxu1 %v8608_v27  ;;  %v12248_v3 = vld [vmem:[#allocation46_spill] sm:$0xff] }
 0x884   :  { %6203 = vmatprep.subr.bf16.mxu0 %v8615_v59  ;;  %6276 = vmatprep.subr.bf16.mxu1 %v8617_v18 }
 0x887   :  { %6204 = vmatpush1.bf16.msra.mxu0 %v8614_v61  ;;  %6277 = vmatpush1.bf16.msra.mxu1 %v8616_v62 }
 0x888   :  { %6205 = vmatprep.subr.bf16.mxu0 %v8623_v34  ;;  %6278 = vmatprep.subr.bf16.mxu1 %v8625_v37 }
 0x88b   :  { %6206 = vmatpush1.bf16.msra.mxu0 %v8622_v21  ;;  %6279 = vmatpush1.bf16.msra.mxu1 %v8624_v45 }
 0x88c   :  { %6207 = vmatprep.subr.bf16.mxu0 %v8631_v50  ;;  %6280 = vmatprep.subr.bf16.mxu1 %v8633_v54 }
 0x88f   :  { %6208 = vmatpush1.bf16.msra.mxu0 %v8630_v53  ;;  %6281 = vmatpush1.bf16.msra.mxu1 %v8632_v41 }
 0x890   :  { %6209 = vmatprep.subr.bf16.mxu0 %v8639_v10  ;;  %6282 = vmatprep.subr.bf16.mxu1 %v8641_v23  ;;  %v12250_v10 = vld [vmem:[#allocation49_spill] sm:$0xff]  ;;  %v12251_v23 = vld [vmem:[#allocation50_spill] sm:$0xff] }
 0x893   :  { %6210 = vmatpush1.bf16.msra.mxu0 %v8638_v56  ;;  %6283 = vmatpush1.bf16.msra.mxu1 %v8640_v57 }
 0x894   :  { %6211 = vmatprep.subr.bf16.mxu0 %v8647_v14  ;;  %6284 = vmatprep.subr.bf16.mxu1 %v8649_v12 }
 0x897   :  { %6212 = vmatpush1.bf16.msra.mxu0 %v8646_v63  ;;  %6285 = vmatpush1.bf16.msra.mxu1 %v8648_v9 }
 0x898   :  { %6327 = vmatprep.subr.bf16.mxu0 %v8531_v13  ;;  %6400 = vmatprep.subr.bf16.mxu1 %v8533_v28 }
 0x8f4   :  { %v4978_v15 = vpop.f32.mrb[80].mxu0  ;;  %v5019_v58 = vpop.f32.mrb[80].mxu1 }
 0x8f5   :  { %v5026_v26 = vadd.f32 %v4978_v15, %v12245_v20  ;;  %v5028_v7 = vadd.f32 %v5019_v58, %v12246_v8  ;;  %v4980_v32 = vpop.f32.mrb[81].mxu0  ;;  %v5021_v16 = vpop.f32.mrb[81].mxu1 }
 0x8f6   :  { %v5027_v24 = vadd.f32 %v4980_v32, %v12247_v17  ;;  %v5029_v27 = vadd.f32 %v5021_v16, %v12248_v3  ;;  %v4982_v29 = vpop.f32.mrb[82].mxu0  ;;  %v5023_v0 = vpop.f32.mrb[82].mxu1 }
 0x8f7   :  { %v8520_v11 = vmul.f32 -1.442695, %v5026_v26  ;;  %v4983_v30 = vpop.f32.mrb[83].mxu0  ;;  %v5024_v59 = vpop.f32.mrb[83].mxu1 }
 0x8f8   :  { %v8521_v47 = vmul.f32 -1.442695, %v5027_v24  ;;  %v8522_v61 = vmul.f32 -1.442695, %v5029_v27  ;;  %v5381_v30 = vld [vmem:[#allocation10 + $0x50] sm:$0xff] }
 0x8f9   :  { %9517 = vpow2.f32 %v8520_v11  ;;  %v5385_v59 = vld [vmem:[#allocation10 + $0x70] sm:$0xff] }
 0x8fa   :  { %9519 = vpow2.f32 %v8521_v47  ;;  %v5382_v47 = vld [vmem:[#allocation10 + $0x58] sm:$0xff] }
 0x8fb   :  { %9521 = vpow2.f32 %v8522_v61  ;;  %v5386_v61 = vld [vmem:[#allocation10 + $0x78] sm:$0xff] }
 0x8fc   :  { %9523 = vtanh.f32 %v5028_v7 }
 0x903   :  { %v9518_v62 = vpop.eup %9517 }
 0x904   :  { %v9520_v18 = vpop.eup %9519  ;;  %v5311_v51 = vadd.f32 1.0, %v9518_v62 }
 0x905   :  { %v5317_v36 = vadd.f32 1.0, %v9520_v18  ;;  %v9522_v22 = vpop.eup %9521  ;;  %v11390_v18 = vld [vmem:[#allocation2] sm:$0xff] }
 0x906   :  { %9525 = vrcp.f32 %v5311_v51  ;;  %v9524_v34 = vpop.eup %9523  ;;  %v5324_v37 = vadd.f32 1.0, %v9522_v22  ;;  %v5389_v51 = vld [vmem:[#allocation10 + $0x90] sm:$0xff] }
 0x907   :  { %9527 = vrcp.f32 %v5317_v36  ;;  %v8541_v36 = vcombine.high %v5382_v47, %v5386_v61  ;;  %v5393_v22 = vld [vmem:[#allocation10 + $0xb0] sm:$0xff] }
 0x908   :  { %9529 = vrcp.f32 %v5324_v37  ;;  %v8540_v37 = vcombine.low %v5382_v47, %v5386_v61  ;;  %v8546_v44 = vcombine.low %v5389_v51, %v5393_v22  ;;  %v5442_v47 = vld [vmem:[#allocation10 + $0x238] sm:$0xff] }
 0x910   :  { %v9526_v38 = vpop.eup %9525 }
 0x911   :  { %v9528_v21 = vpop.eup %9527  ;;  %v5328_v45 = vmul.f32 %v9526_v38, %v9524_v34  ;;  %v5390_v34 = vld [vmem:[#allocation10 + $0x98] sm:$0xff] }
 0x912   :  { %v5327_v42 = vmul.f32 %v9528_v21, %v11349_v43  ;;  %v9530_v4 = vpop.eup %9529  ;;  %v12252_v43 = vld [vmem:[#allocation51_spill] sm:$0xff]  ;;  %v5394_v38 = vld [vmem:[#allocation10 + $0xb8] sm:$0xff] }
 0x913   :  { %v11402_v21 = vld [vmem:[#allocation2 + $0x18] sm:$0xff]  ;;  %v8548_v1 = vcombine.low %v5390_v34, %v5394_v38 }
 0x914   :  { %v5329_v25 = vadd.f32 %v5328_v45, %v5327_v42  ;;  %v8538_v45 = vcombine.low %v5381_v30, %v5385_v59  ;;  %v8547_v42 = vcombine.high %v5389_v51, %v5393_v22  ;;  %v5445_v22 = vld [vmem:[#allocation10 + $0x250] sm:$0xff] }
 0x916   :  { %9531 = vtanh.f32 %v5329_v25  ;;  %v8549_v25 = vcombine.high %v5390_v34, %v5394_v38  ;;  %v5449_v34 = vld [vmem:[#allocation10 + $0x270] sm:$0xff]  ;;  %v5446_v38 = vld [vmem:[#allocation10 + $0x258] sm:$0xff] }
 0x920   :  { %v9532_v50 = vpop.eup %9531 }
 0x921   :  { %v5331_v46 = vmul.f32 %v9532_v50, %v9530_v4  ;;  %v5397_v4 = vld [vmem:[#allocation10 + $0xd0] sm:$0xff] }
 0x922   :  { %v5401_v50 = vld [vmem:[#allocation10 + $0xf0] sm:$0xff] }
 0x923   :  { %v5332_v53 = vpack.c.bf16 %v5331_v46, %v5331_v46  ;;  %v8555_v46 = vcombine.high %v5397_v4, %v5401_v50 }
 0x925   :  { %v5359_v41 = vrot.slane %v5332_v53, 4  ;;  %v8557_v53 = vcombine.high %v5398_v35, %v5402_v52 }
 0x927   :  { %5361 = vst [vmem:[#allocation2 + $0x30] sm:$0xf0] %v5359_v41  ;;  %v5409_v41 = vld [vmem:[#allocation10 + $0x130] sm:$0xff] }
 0x92d   :  { %v5256_v54 = vpop.f32.mrb[84].mxu0  ;;  %v5297_v39 = vpop.f32.mrb[84].mxu1 }
 0x92e   :  { %v5304_v40 = vadd.f32 %v5256_v54, %v12249_v31  ;;  %v5306_v49 = vadd.f32 %v5297_v39, %v12250_v10  ;;  %v5258_v56 = vpop.f32.mrb[85].mxu0  ;;  %v5299_v57 = vpop.f32.mrb[85].mxu1  ;;  %v5406_v54 = vld [vmem:[#allocation10 + $0x118] sm:$0xff]  ;;  %v11410_v31 = vld [vmem:[#allocation2 + $0x28] sm:$0xff]  ;;  %v8556_v10 = vcombine.low %v5398_v35, %v5402_v52  ;;  %v5457_v35 = vld [vmem:[#allocation10 + $0x2b0] sm:$0xff] }
 0x92f   :  { %v5305_v33 = vadd.f32 %v5258_v56, %v12251_v23  ;;  %v5307_v60 = vadd.f32 %v5299_v57, %v12252_v43  ;;  %v5260_v55 = vpop.f32.mrb[86].mxu0  ;;  %v5301_v14 = vpop.f32.mrb[86].mxu1  ;;  %v5410_v39 = vld [vmem:[#allocation10 + $0x138] sm:$0xff]  ;;  %v5413_v57 = vld [vmem:[#allocation10 + $0x150] sm:$0xff] }
 0x930   :  { %v8523_v48 = vmul.f32 -1.442695, %v5304_v40  ;;  %v5261_v63 = vpop.f32.mrb[87].mxu0  ;;  %v5302_v12 = vpop.f32.mrb[87].mxu1  ;;  %v8554_v40 = vcombine.low %v5397_v4, %v5401_v50  ;;  %v8565_v56 = vcombine.high %v5406_v54, %v5410_v39  ;;  %v5417_v23 = vld [vmem:[#allocation10 + $0x170] sm:$0xff]  ;;  %v5418_v43 = vld [vmem:[#allocation10 + $0x178] sm:$0xff]  ;;  %v8564_v55 = vcombine.low %v5406_v54, %v5410_v39 }
 0x931   :  { %v8524_v9 = vmul.f32 -1.442695, %v5305_v33  ;;  %v8525_v13 = vmul.f32 -1.442695, %v5307_v60  ;;  %v5414_v33 = vld [vmem:[#allocation10 + $0x158] sm:$0xff]  ;;  %v11414_v14 = vld [vmem:[#allocation2 + $0x20] sm:$0xff]  ;;  %v8571_v63 = vcombine.high %v5413_v57, %v5417_v23 }
 0x932   :  { %9533 = vpow2.f32 %v8523_v48  ;;  %v5421_v48 = vld [vmem:[#allocation10 + $0x190] sm:$0xff]  ;;  %v8573_v12 = vcombine.high %v5414_v33, %v5418_v43  ;;  %v5454_v52 = vld [vmem:[#allocation10 + $0x298] sm:$0xff] }
 0x933   :  { %9535 = vpow2.f32 %v8524_v9  ;;  %v5425_v9 = vld [vmem:[#allocation10 + $0x1b0] sm:$0xff]  ;;  %v5462_v54 = vld [vmem:[#allocation10 + $0x2d8] sm:$0xff] }
 0x934   :  { %9537 = vpow2.f32 %v8525_v13  ;;  %v5422_v13 = vld [vmem:[#allocation10 + $0x198] sm:$0xff]  ;;  %v5453_v50 = vld [vmem:[#allocation10 + $0x290] sm:$0xff] }
 0x935   :  { %9539 = vtanh.f32 %v5306_v49  ;;  %v5466_v39 = vld [vmem:[#allocation10 + $0x2f8] sm:$0xff] }
 0x93c   :  { %v9534_v28 = vpop.eup %9533 }
 0x93d   :  { %v9536_v15 = vpop.eup %9535  ;;  %v5336_v58 = vadd.f32 1.0, %v9534_v28  ;;  %v5426_v28 = vld [vmem:[#allocation10 + $0x1b8] sm:$0xff] }
 0x93e   :  { %v5342_v20 = vadd.f32 1.0, %v9536_v15  ;;  %v9538_v26 = vpop.eup %9537  ;;  %v11418_v15 = vld [vmem:[#allocation2 + $0x38] sm:$0xff] }
 0x93f   :  { %9541 = vrcp.f32 %v5336_v58  ;;  %v9540_v8 = vpop.eup %9539  ;;  %v5349_v17 = vadd.f32 1.0, %v9538_v26  ;;  %v8570_v58 = vcombine.low %v5413_v57, %v5417_v23  ;;  %v8579_v26 = vcombine.high %v5421_v48, %v5425_v9  ;;  %v5469_v57 = vld [vmem:[#allocation10 + $0x310] sm:$0xff] }
 0x940   :  { %9543 = vrcp.f32 %v5342_v20  ;;  %v8572_v20 = vcombine.low %v5414_v33, %v5418_v43  ;;  %v5473_v23 = vld [vmem:[#allocation10 + $0x330] sm:$0xff]  ;;  %v5470_v33 = vld [vmem:[#allocation10 + $0x318] sm:$0xff] }
 0x941   :  { %9545 = vrcp.f32 %v5349_v17  ;;  %v5434_v17 = vld [vmem:[#allocation10 + $0x1f8] sm:$0xff] }
 0x942   :  { %v5474_v43 = vld [vmem:[#allocation10 + $0x338] sm:$0xff] }
 0x949   :  { %v9542_v7 = vpop.eup %9541 }
 0x94a   :  { %v9544_v32 = vpop.eup %9543  ;;  %v5353_v16 = vmul.f32 %v9542_v7, %v9540_v8  ;;  %v8581_v8 = vcombine.high %v5422_v13, %v5426_v28  ;;  %v5429_v7 = vld [vmem:[#allocation10 + $0x1d0] sm:$0xff] }
 0x94b   :  { %v5352_v24 = vmul.f32 %v9544_v32, %v11359_v19  ;;  %v9546_v27 = vpop.eup %9545  ;;  %v8539_v19 = vcombine.high %v5381_v30, %v5385_v59  ;;  %v5433_v32 = vld [vmem:[#allocation10 + $0x1f0] sm:$0xff]  ;;  %v5438_v59 = vld [vmem:[#allocation10 + $0x218] sm:$0xff] }
 0x94c   :  { %v8586_v61 = vcombine.low %v5429_v7, %v5433_v32 }
 0x94d   :  { %v5354_v3 = vadd.f32 %v5353_v16, %v5352_v24  ;;  %v5430_v16 = vld [vmem:[#allocation10 + $0x1d8] sm:$0xff]  ;;  %v8578_v24 = vcombine.low %v5421_v48, %v5425_v9  ;;  %v8627_v48 = vcombine.high %v5469_v57, %v5473_v23  ;;  %v5481_v9 = vld [vmem:[#allocation10 + $0x370] sm:$0xff] }
 0x94e   :  { %v8589_v30 = vcombine.high %v5430_v16, %v5434_v17  ;;  %v8588_v51 = vcombine.low %v5430_v16, %v5434_v17  ;;  %v5486_v16 = vld [vmem:[#allocation10 + $0x398] sm:$0xff] }
 0x94f   :  { %9547 = vtanh.f32 %v5354_v3  ;;  %v8580_v3 = vcombine.low %v5422_v13, %v5426_v28  ;;  %v5478_v13 = vld [vmem:[#allocation10 + $0x358] sm:$0xff] }
 0x950   :  { %v5482_v28 = vld [vmem:[#allocation10 + $0x378] sm:$0xff] }
 0x951   :  { %v5490_v17 = vld [vmem:[#allocation10 + $0x3b8] sm:$0xff] }
 0x959   :  { %v9548_v29 = vpop.eup %9547 }
 0x95a   :  { %v5356_v0 = vmul.f32 %v9548_v29, %v9546_v27  ;;  %v5437_v27 = vld [vmem:[#allocation10 + $0x210] sm:$0xff] }
 0x95b   :  { %v5441_v29 = vld [vmem:[#allocation10 + $0x230] sm:$0xff] }
 0x95c   :  { %v5357_v11 = vpack.c.bf16 %v5356_v0, %v5356_v0  ;;  %v11422_v0 = vld [vmem:[#allocation2 + $0x30] sm:$0xff] }
 0x95e   :  { %5362 = vst [vmem:[#allocation2 + $0x8] sm:$0xf] %v5357_v11  ;;  %v8587_v11 = vcombine.high %v5429_v7, %v5433_v32  ;;  %v5485_v7 = vld [vmem:[#allocation10 + $0x390] sm:$0xff] }
 0x95f   :  { %v5489_v32 = vld [vmem:[#allocation10 + $0x3b0] sm:$0xff] }
 0x965   :  { %v11388_v62 = vld [vmem:[#allocation2 + $0x8] sm:$0xff] }
 0x966   :  { %6213 = vmatprep.mubr.bf16.mxu0 %v11388_v62  ;;  %6286 = vmatprep.mubr.bf16.mxu1 %v11388_v62 }
 0x967   :  { %6214 = vmatmul.mubr.bf16.vlgmr.msra.gmra.mrb[88].mxu0 %v11390_v18  ;;  %6287 = vmatmul.mubr.bf16.vlgmr.msra.gmra.mrb[88].mxu1 %v11390_v18 }
 0x968   :  { %6328 = vmatpush1.bf16.msra.mxu0 %v8530_v6  ;;  %6401 = vmatpush1.bf16.msra.mxu1 %v8532_v5  ;;  %v11406_v6 = vld [vmem:[#allocation2 + $0x10] sm:$0xff] }
 0x969   :  { %6223 = vmatprep.mubr.bf16.mxu0 %v11402_v21  ;;  %6296 = vmatprep.mubr.bf16.mxu1 %v11402_v21  ;;  %v5405_v5 = vld [vmem:[#allocation10 + $0x110] sm:$0xff] }
 0x96a   :  { %6329 = vmatprep.subr.bf16.mxu0 %v8539_v19  ;;  %6402 = vmatprep.subr.bf16.mxu1 %v8541_v36  ;;  %v8563_v49 = vcombine.high %v5405_v5, %v5409_v41  ;;  %v8562_v60 = vcombine.low %v5405_v5, %v5409_v41  ;;  %v8595_v19 = vcombine.high %v5437_v27, %v5441_v29  ;;  %v5465_v41 = vld [vmem:[#allocation10 + $0x2f0] sm:$0xff] }
 0x96b   :  { %v8597_v36 = vcombine.high %v5438_v59, %v5442_v47  ;;  %v8611_v5 = vcombine.high %v5453_v50, %v5457_v35 }
 0x96c   :  { %6330 = vmatpush1.bf16.msra.mxu0 %v8538_v45  ;;  %6403 = vmatpush1.bf16.msra.mxu1 %v8540_v37  ;;  %v5450_v45 = vld [vmem:[#allocation10 + $0x278] sm:$0xff]  ;;  %v8594_v37 = vcombine.low %v5437_v27, %v5441_v29  ;;  %v8643_v27 = vcombine.high %v5485_v7, %v5489_v32  ;;  %v8645_v29 = vcombine.high %v5486_v16, %v5490_v17 }
 0x96d   :  { %6331 = vmatprep.subr.bf16.mxu0 %v8547_v42  ;;  %6404 = vmatprep.subr.bf16.mxu1 %v8549_v25  ;;  %v8596_v42 = vcombine.low %v5438_v59, %v5442_v47  ;;  %v8603_v25 = vcombine.high %v5445_v22, %v5449_v34  ;;  %v8605_v4 = vcombine.high %v5446_v38, %v5450_v45  ;;  %v5494_v59 = vld [vmem:[#allocation10 + $0x3d8] sm:$0xff] }
 0x96e   :  { %v5498_v47 = vld [vmem:[#allocation10 + $0x3f8] sm:$0xff] }
 0x96f   :  { %6224 = vmatmul.mubr.bf16.gmra.mrb[92].mxu0 %v11406_v6  ;;  %6297 = vmatmul.mubr.bf16.gmra.mrb[92].mxu1 %v11406_v6 }
 0x970   :  { %6332 = vmatpush1.bf16.msra.mxu0 %v8546_v44  ;;  %6405 = vmatpush1.bf16.msra.mxu1 %v8548_v1  ;;  %v8602_v44 = vcombine.low %v5445_v22, %v5449_v34  ;;  %v8604_v1 = vcombine.low %v5446_v38, %v5450_v45  ;;  %v8652_v34 = vcombine.low %v5494_v59, %v5498_v47  ;;  %v11462_v38 = vld [vmem:[#allocation12 + $0x28] ss:$16 sps:$4 sm:$0xff]   ;;  %v11468_v45 = vld [vmem:[#allocation12 + $0x44] ss:$16 sps:$4 sm:$0xff]  }
 0x971   :  { %6233 = vmatprep.mubr.bf16.mxu0 %v11410_v31  ;;  %6306 = vmatprep.mubr.bf16.mxu1 %v11410_v31 }
 0x972   :  { %6333 = vmatprep.subr.bf16.mxu0 %v8555_v46  ;;  %6406 = vmatprep.subr.bf16.mxu1 %v8557_v53  ;;  %v5461_v53 = vld [vmem:[#allocation10 + $0x2d0] sm:$0xff] }
 0x974   :  { %6334 = vmatpush1.bf16.msra.mxu0 %v8554_v40  ;;  %6407 = vmatpush1.bf16.msra.mxu1 %v8556_v10  ;;  %v8610_v40 = vcombine.low %v5453_v50, %v5457_v35  ;;  %v11482_v50 = vld [vmem:[#allocation12 + $0x6c] ss:$16 sps:$4 sm:$0xff]   ;;  %v11484_v35 = vld [vmem:[#allocation12 + $0x60] ss:$16 sps:$4 sm:$0xff]  }
 0x975   :  { %6335 = vmatprep.subr.bf16.mxu0 %v8563_v49  ;;  %6408 = vmatprep.subr.bf16.mxu1 %v8565_v56  ;;  %v8619_v49 = vcombine.high %v5461_v53, %v5465_v41  ;;  %v8621_v56 = vcombine.high %v5462_v54, %v5466_v39 }
 0x977   :  { %6234 = vmatmul.mubr.bf16.gmra.mrb[96].mxu0 %v11414_v14  ;;  %6307 = vmatmul.mubr.bf16.gmra.mrb[96].mxu1 %v11414_v14 }
 0x978   :  { %6336 = vmatpush1.bf16.msra.mxu0 %v8562_v60  ;;  %6409 = vmatpush1.bf16.msra.mxu1 %v8564_v55  ;;  %v8618_v60 = vcombine.low %v5461_v53, %v5465_v41  ;;  %v8620_v55 = vcombine.low %v5462_v54, %v5466_v39  ;;  %v11504_v53 = vld [vmem:[#allocation12 + $0xac] ss:$16 sps:$4 sm:$0xff]   ;;  %v11508_v41 = vld [vmem:[#allocation12 + $0xa0] ss:$16 sps:$4 sm:$0xff]   ;;  %v11510_v54 = vld [vmem:[#allocation12 + $0xa8] ss:$16 sps:$4 sm:$0xff]  }
 0x979   :  { %6243 = vmatprep.mubr.bf16.mxu0 %v11418_v15  ;;  %6316 = vmatprep.mubr.bf16.mxu1 %v11418_v15  ;;  %v11514_v39 = vld [vmem:[#allocation12 + $0xc4] ss:$16 sps:$4 sm:$0xff]  }
 0x97a   :  { %6337 = vmatprep.subr.bf16.mxu0 %v8571_v63  ;;  %6410 = vmatprep.subr.bf16.mxu1 %v8573_v12  ;;  %v8629_v63 = vcombine.high %v5470_v33, %v5474_v43  ;;  %v5477_v12 = vld [vmem:[#allocation10 + $0x350] sm:$0xff] }
 0x97c   :  { %6338 = vmatpush1.bf16.msra.mxu0 %v8570_v58  ;;  %6411 = vmatpush1.bf16.msra.mxu1 %v8572_v20  ;;  %v8626_v58 = vcombine.low %v5469_v57, %v5473_v23  ;;  %v8628_v20 = vcombine.low %v5470_v33, %v5474_v43  ;;  %v11528_v57 = vld [vmem:[#allocation12 + $0xec] ss:$16 sps:$4 sm:$0xff]   ;;  %v11532_v23 = vld [vmem:[#allocation12 + $0xe0] ss:$16 sps:$4 sm:$0xff]   ;;  %v11534_v33 = vld [vmem:[#allocation12 + $0xe8] ss:$16 sps:$4 sm:$0xff]  }
 0x97d   :  { %6339 = vmatprep.subr.bf16.mxu0 %v8579_v26  ;;  %6412 = vmatprep.subr.bf16.mxu1 %v8581_v8  ;;  %v8635_v26 = vcombine.high %v5477_v12, %v5481_v9  ;;  %v8637_v8 = vcombine.high %v5478_v13, %v5482_v28  ;;  %v11545_v43 = vld [vmem:[%s11973_s8] sm:$0xff] }
 0x97f   :  { %6244 = vmatmul.mubr.bf16.gmra.mrb[100].mxu0 %v11422_v0  ;;  %6317 = vmatmul.mubr.bf16.gmra.mrb[100].mxu1 %v11422_v0 }
 0x980   :  { %6340 = vmatpush1.bf16.msra.mxu0 %v8578_v24  ;;  %6413 = vmatpush1.bf16.msra.mxu1 %v8580_v3  ;;  %v8634_v24 = vcombine.low %v5477_v12, %v5481_v9  ;;  %v8636_v3 = vcombine.low %v5478_v13, %v5482_v28 }
 0x981   :  { %6359 = vmatprep.mubr.bf16.mxu0 %v11388_v62  ;;  %6432 = vmatprep.mubr.bf16.mxu1 %v11388_v62  ;;  %v5458_v62 = vld [vmem:[#allocation10 + $0x2b8] sm:$0xff] }
 0x982   :  { %6341 = vmatprep.subr.bf16.mxu0 %v8587_v11  ;;  %6414 = vmatprep.subr.bf16.mxu1 %v8589_v30  ;;  %v8613_v46 = vcombine.high %v5454_v52, %v5458_v62  ;;  %v8612_v10 = vcombine.low %v5454_v52, %v5458_v62  ;;  %v5493_v11 = vld [vmem:[#allocation10 + $0x3d0] sm:$0xff]  ;;  %v11486_v52 = vld [vmem:[#allocation12 + $0x68] ss:$16 sps:$4 sm:$0xff]  }
 0x983   :  { %v5497_v30 = vld [vmem:[#allocation10 + $0x3f0] sm:$0xff] }
 0x984   :  { %6342 = vmatpush1.bf16.msra.mxu0 %v8586_v61  ;;  %6415 = vmatpush1.bf16.msra.mxu1 %v8588_v51  ;;  %v8642_v61 = vcombine.low %v5485_v7, %v5489_v32  ;;  %v8644_v51 = vcombine.low %v5486_v16, %v5490_v17  ;;  %v8650_v22 = vcombine.low %v5493_v11, %v5497_v30  ;;  %v11492_v62 = vld [vmem:[#allocation12 + $0x84] ss:$16 sps:$4 sm:$0xff]  }
 0x985   :  { %6343 = vmatprep.subr.bf16.mxu0 %v8595_v19  ;;  %6416 = vmatprep.subr.bf16.mxu1 %v8597_v36  ;;  %v8651_v19 = vcombine.high %v5493_v11, %v5497_v30  ;;  %v8653_v36 = vcombine.high %v5494_v59, %v5498_v47 }
 0x988   :  { %6344 = vmatpush1.bf16.msra.mxu0 %v8594_v37  ;;  %6417 = vmatpush1.bf16.msra.mxu1 %v8596_v42  ;;  %v11470_v37 = vld [vmem:[#allocation12 + $0x4c] ss:$16 sps:$4 sm:$0xff]   ;;  %v11472_v42 = vld [vmem:[#allocation12 + $0x40] ss:$16 sps:$4 sm:$0xff]  }
 0x989   :  { %6345 = vmatprep.subr.bf16.mxu0 %v8603_v25  ;;  %6418 = vmatprep.subr.bf16.mxu1 %v8605_v4  ;;  %v11474_v25 = vld [vmem:[#allocation12 + $0x48] ss:$16 sps:$4 sm:$0xff]   ;;  %v11480_v4 = vld [vmem:[#allocation12 + $0x64] ss:$16 sps:$4 sm:$0xff]  }
 0x98c   :  { %6346 = vmatpush1.bf16.msra.mxu0 %v8602_v44  ;;  %6419 = vmatpush1.bf16.msra.mxu1 %v8604_v1  ;;  %v11494_v44 = vld [vmem:[#allocation12 + $0x8c] ss:$16 sps:$4 sm:$0xff]   ;;  %v11496_v1 = vld [vmem:[#allocation12 + $0x80] ss:$16 sps:$4 sm:$0xff]  }
 0x98d   :  { %6347 = vmatprep.subr.bf16.mxu0 %v8611_v5  ;;  %6420 = vmatprep.subr.bf16.mxu1 %v8613_v46  ;;  %v11498_v5 = vld [vmem:[#allocation12 + $0x88] ss:$16 sps:$4 sm:$0xff]   ;;  %v11502_v46 = vld [vmem:[#allocation12 + $0xa4] ss:$16 sps:$4 sm:$0xff]  }
 0x990   :  { %6348 = vmatpush1.bf16.msra.mxu0 %v8610_v40  ;;  %6421 = vmatpush1.bf16.msra.mxu1 %v8612_v10  ;;  %v11516_v40 = vld [vmem:[#allocation12 + $0xcc] ss:$16 sps:$4 sm:$0xff]   ;;  %v11520_v10 = vld [vmem:[#allocation12 + $0xc0] ss:$16 sps:$4 sm:$0xff]  }
 0x991   :  { %6349 = vmatprep.subr.bf16.mxu0 %v8619_v49  ;;  %6422 = vmatprep.subr.bf16.mxu1 %v8621_v56  ;;  %v11522_v49 = vld [vmem:[#allocation12 + $0xc8] ss:$16 sps:$4 sm:$0xff]   ;;  %v11526_v56 = vld [vmem:[#allocation12 + $0xe4] ss:$16 sps:$4 sm:$0xff]  }
 0x994   :  { %6350 = vmatpush1.bf16.msra.mxu0 %v8618_v60  ;;  %6423 = vmatpush1.bf16.msra.mxu1 %v8620_v55  ;;  %v12253_v60 = vld [vmem:[#allocation22_spill] sm:$0xff] }
 0x995   :  { %6351 = vmatprep.subr.bf16.mxu0 %v8627_v48  ;;  %6424 = vmatprep.subr.bf16.mxu1 %v8629_v63  ;;  %v12254_v55 = vsub.s32 0, %v12253_v60  ;;  %v12255_v13 = vsub.s32 2, %v12253_v60  ;;  %v12257_v30 = vsub.s32 1, %v12253_v60 }
 0x997   :  { %v11550_v48 = vrot.slane %v11545_v43, %v12254_v55  ;;  %v11556_v28 = vrot.slane %v11545_v43, %v12255_v13  ;;  %v11578_v59 = vrot.slane %v11545_v43, %v12257_v30 }
 0x998   :  { %6352 = vmatpush1.bf16.msra.mxu0 %v8626_v58  ;;  %6425 = vmatpush1.bf16.msra.mxu1 %v8628_v20  ;;  %v12256_v20 = vsub.s32 3, %v12253_v60 }
 0x999   :  { %6353 = vmatprep.subr.bf16.mxu0 %v8635_v26  ;;  %6426 = vmatprep.subr.bf16.mxu1 %v8637_v8 }
 0x99a   :  { %v11561_v26 = vrot.slane %v11545_v43, %v12256_v20 }
 0x99c   :  { %6354 = vmatpush1.bf16.msra.mxu0 %v8634_v24  ;;  %6427 = vmatpush1.bf16.msra.mxu1 %v8636_v3 }
 0x99d   :  { %6355 = vmatprep.subr.bf16.mxu0 %v8643_v27  ;;  %6428 = vmatprep.subr.bf16.mxu1 %v8645_v29 }
 0x9a0   :  { %6356 = vmatpush1.bf16.msra.mxu0 %v8642_v61  ;;  %6429 = vmatpush1.bf16.msra.mxu1 %v8644_v51 }
 0x9a1   :  { %6357 = vmatprep.subr.bf16.mxu0 %v8651_v19  ;;  %6430 = vmatprep.subr.bf16.mxu1 %v8653_v36 }
 0x9a4   :  { %6358 = vmatpush1.bf16.msra.mxu0 %v8650_v22  ;;  %6431 = vmatpush1.bf16.msra.mxu1 %v8652_v34 }
 0x9a7   :  { %6360 = vmatmul.mubr.bf16.vlgmr.msra.gmra.mrb[104].mxu0 %v11390_v18  ;;  %6433 = vmatmul.mubr.bf16.vlgmr.msra.gmra.mrb[104].mxu1 %v11390_v18  ;;  %v11444_v18 = vld [vmem:[#allocation12 + $0x4] ss:$16 sps:$4 sm:$0xff]  }
 0x9a8   :  { %6369 = vmatprep.mubr.bf16.mxu0 %v11402_v21  ;;  %6442 = vmatprep.mubr.bf16.mxu1 %v11402_v21  ;;  %v11446_v21 = vld [vmem:[#allocation12 + $0xc] ss:$16 sps:$4 sm:$0xff]  }
 0x9a9   :  { %6773 = vmatprep.subr.bf16.mxu0 %v11444_v18  ;;  %6814 = vmatprep.subr.bf16.mxu1 %v11446_v21 }
 0x9af   :  { %6370 = vmatmul.mubr.bf16.gmra.mrb[108].mxu0 %v11406_v6  ;;  %6443 = vmatmul.mubr.bf16.gmra.mrb[108].mxu1 %v11406_v6  ;;  %v11448_v6 = vld [vmem:[#allocation12] ss:$16 sps:$4 sm:$0xff]  }
 0x9b0   :  { %6379 = vmatprep.mubr.bf16.mxu0 %v11410_v31  ;;  %6452 = vmatprep.mubr.bf16.mxu1 %v11410_v31  ;;  %v11450_v31 = vld [vmem:[#allocation12 + $0x8] ss:$16 sps:$4 sm:$0xff]  }
 0x9b1   :  { %6774 = vmatpush1.bf16.msra.mxu0 %v11448_v6  ;;  %6815 = vmatpush1.bf16.msra.mxu1 %v11450_v31 }
 0x9b7   :  { %6380 = vmatmul.mubr.bf16.gmra.mrb[112].mxu0 %v11414_v14  ;;  %6453 = vmatmul.mubr.bf16.gmra.mrb[112].mxu1 %v11414_v14  ;;  %v11456_v14 = vld [vmem:[#allocation12 + $0x24] ss:$16 sps:$4 sm:$0xff]  }
 0x9b8   :  { %6389 = vmatprep.mubr.bf16.mxu0 %v11418_v15  ;;  %6462 = vmatprep.mubr.bf16.mxu1 %v11418_v15  ;;  %v11458_v15 = vld [vmem:[#allocation12 + $0x2c] ss:$16 sps:$4 sm:$0xff]  }
 0x9b9   :  { %6775 = vmatprep.subr.bf16.mxu0 %v11456_v14  ;;  %6816 = vmatprep.subr.bf16.mxu1 %v11458_v15 }
 0x9ba   :  { %6817 = vmatpush1.bf16.msra.mxu1 %v11462_v38 }
 0x9bb   :  { %6818 = vmatprep.subr.bf16.mxu1 %v11470_v37 }
 0x9be   :  { %6819 = vmatpush1.bf16.msra.mxu1 %v11474_v25 }
 0x9bf   :  { %6390 = vmatmul.mubr.bf16.gmra.mrb[116].mxu0 %v11422_v0  ;;  %6463 = vmatmul.mubr.bf16.gmra.mrb[116].mxu1 %v11422_v0  ;;  %v11460_v0 = vld [vmem:[#allocation12 + $0x20] ss:$16 sps:$4 sm:$0xff]  }
 0x9c0   :  { %6805 = vmatprep.mubr.bf16.mxu0 %v12097_v2  ;;  %6846 = vmatprep.mubr.bf16.mxu1 %v12097_v2 }
 0x9c1   :  { %6776 = vmatpush1.bf16.msra.mxu0 %v11460_v0  ;;  %6820 = vmatprep.subr.bf16.mxu1 %v11482_v50 }
 0x9c2   :  { %6777 = vmatprep.subr.bf16.mxu0 %v11468_v45  ;;  %6821 = vmatpush1.bf16.msra.mxu1 %v11486_v52 }
 0x9c3   :  { %6822 = vmatprep.subr.bf16.mxu1 %v11494_v44 }
 0x9c5   :  { %6778 = vmatpush1.bf16.msra.mxu0 %v11472_v42 }
 0x9c6   :  { %6779 = vmatprep.subr.bf16.mxu0 %v11480_v4  ;;  %6823 = vmatpush1.bf16.msra.mxu1 %v11498_v5 }
 0x9c7   :  { %6824 = vmatprep.subr.bf16.mxu1 %v11504_v53 }
 0x9c9   :  { %6780 = vmatpush1.bf16.msra.mxu0 %v11484_v35 }
 0x9ca   :  { %6781 = vmatprep.subr.bf16.mxu0 %v11492_v62  ;;  %6825 = vmatpush1.bf16.msra.mxu1 %v11510_v54 }
 0x9cb   :  { %6826 = vmatprep.subr.bf16.mxu1 %v11516_v40 }
 0x9cd   :  { %6782 = vmatpush1.bf16.msra.mxu0 %v11496_v1 }
 0x9ce   :  { %6783 = vmatprep.subr.bf16.mxu0 %v11502_v46  ;;  %6827 = vmatpush1.bf16.msra.mxu1 %v11522_v49 }
 0x9cf   :  { %6828 = vmatprep.subr.bf16.mxu1 %v11528_v57 }
 0x9d1   :  { %6784 = vmatpush1.bf16.msra.mxu0 %v11508_v41 }
 0x9d2   :  { %6785 = vmatprep.subr.bf16.mxu0 %v11514_v39  ;;  %6829 = vmatpush1.bf16.msra.mxu1 %v11534_v33 }
 0x9d3   :  { %6929 = vmatprep.subr.bf16.mxu1 %v11446_v21 }
 0x9d5   :  { %6786 = vmatpush1.bf16.msra.mxu0 %v11520_v10 }
 0x9d6   :  { %6787 = vmatprep.subr.bf16.mxu0 %v11526_v56 }
 0x9d9   :  { %6788 = vmatpush1.bf16.msra.mxu0 %v11532_v23 }
 0x9da   :  { %6888 = vmatprep.subr.bf16.mxu0 %v11444_v18 }
 0xa3a   :  { %v6215_v63 = vpop.f32.mrb[88].mxu0  ;;  %v6288_v12 = vpop.f32.mrb[88].mxu1 }
 0xa3b   :  { %v6216_v9 = vadd.f32 %v6215_v63, %v11550_v48  ;;  %v6217_v58 = vpop.f32.mrb[89].mxu0  ;;  %v6290_v8 = vpop.f32.mrb[89].mxu1 }
 0xa3c   :  { %v6219_v7 = vpop.f32.mrb[90].mxu0  ;;  %v6292_v32 = vpop.f32.mrb[90].mxu1  ;;  %v6291_v11 = vadd.f32 %v6290_v8, %v11561_v26 }
 0xa3d   :  { %v8654_v16 = vmul.f32 -1.442695, %v6216_v9  ;;  %v11564_v17 = vadd.f32 %v6219_v7, %v11550_v48  ;;  %v11567_v24 = vadd.f32 %v6292_v32, %v11556_v28  ;;  %v11569_v3 = vpop.f32.mrb[91].mxu0  ;;  %v6294_v27 = vpop.f32.mrb[91].mxu1 }
 0xa3e   :  { %v11572_v29 = vadd.f32 %v6294_v27, %v11561_v26  ;;  %v8655_v51 = vmul.f32 -1.442695, %v6291_v11  ;;  %v6289_v27 = vadd.f32 %v6288_v12, %v11556_v28 }
 0xa3f   :  { %9549 = vpow2.f32 %v8654_v16 }
 0xa40   :  { %9551 = vpow2.f32 %v8655_v51 }
 0xa41   :  { %9553 = vtanh.f32 %v6289_v27 }
 0xa42   :  { %v6225_v47 = vpop.f32.mrb[92].mxu0  ;;  %v6298_v61 = vpop.f32.mrb[92].mxu1 }
 0xa43   :  { %v11581_v19 = vadd.f32 %v6225_v47, %v11550_v48  ;;  %v11584_v36 = vadd.f32 %v6298_v61, %v11556_v28  ;;  %v6227_v22 = vpop.f32.mrb[93].mxu0  ;;  %v6300_v34 = vpop.f32.mrb[93].mxu1 }
 0xa44   :  { %v11587_v55 = vadd.f32 %v6227_v22, %v11578_v59  ;;  %v11590_v63 = vadd.f32 %v6300_v34, %v11561_v26  ;;  %v6229_v9 = vpop.f32.mrb[94].mxu0  ;;  %v6302_v13 = vpop.f32.mrb[94].mxu1 }
 0xa45   :  { %v11593_v58 = vadd.f32 %v6229_v9, %v11550_v48  ;;  %v11596_v20 = vadd.f32 %v6302_v13, %v11556_v28  ;;  %v6231_v8 = vpop.f32.mrb[95].mxu0  ;;  %v6304_v7 = vpop.f32.mrb[95].mxu1 }
 0xa46   :  { %v11599_v32 = vadd.f32 %v6231_v8, %v11578_v59  ;;  %v11602_v16 = vadd.f32 %v6304_v7, %v11561_v26 }
 0xa47   :  { %12258 = vst [vmem:[#allocation77_spill] sm:$0xff] %v11596_v20 }
 0xa48   :  { %12259 = vst [vmem:[#allocation27_spill] sm:$0xff] %v11599_v32  ;;  %12260 = vst [vmem:[#allocation28_spill] sm:$0xff] %v11602_v16 }
 0xa49   :  { %v9550_v11 = vpop.eup %9549 }
 0xa4a   :  { %v6546_v30 = vadd.f32 1.0, %v9550_v11  ;;  %v6235_v47 = vpop.f32.mrb[96].mxu0  ;;  %v6308_v61 = vpop.f32.mrb[96].mxu1 }
 0xa4b   :  { %v11606_v22 = vadd.f32 %v6235_v47, %v11550_v48  ;;  %v11609_v34 = vadd.f32 %v6308_v61, %v11556_v28  ;;  %v6237_v9 = vpop.f32.mrb[97].mxu0  ;;  %v6310_v13 = vpop.f32.mrb[97].mxu1 }
 0xa4c   :  { %9555 = vrcp.f32 %v6546_v30  ;;  %v11612_v8 = vadd.f32 %v6237_v9, %v11578_v59  ;;  %v11615_v12 = vadd.f32 %v6310_v13, %v11561_v26  ;;  %v6239_v51 = vpop.f32.mrb[98].mxu0  ;;  %v6312_v7 = vpop.f32.mrb[98].mxu1 }
 0xa4d   :  { %12261 = vst [vmem:[#allocation29_spill] sm:$0xff] %v11606_v22  ;;  %12262 = vst [vmem:[#allocation30_spill] sm:$0xff] %v11609_v34  ;;  %v11618_v11 = vadd.f32 %v6239_v51, %v11550_v48  ;;  %v11621_v27 = vadd.f32 %v6312_v7, %v11556_v28  ;;  %v6241_v47 = vpop.f32.mrb[99].mxu0  ;;  %v6314_v61 = vpop.f32.mrb[99].mxu1 }
 0xa4e   :  { %12263 = vst [vmem:[#allocation64_spill] sm:$0xff] %v11612_v8  ;;  %12264 = vst [vmem:[#allocation65_spill] sm:$0xff] %v11615_v12  ;;  %v11624_v34 = vadd.f32 %v6241_v47, %v11578_v59  ;;  %v11627_v30 = vadd.f32 %v6314_v61, %v11561_v26  ;;  %v9552_v9 = vpop.eup %9551 }
 0xa4f   :  { %12265 = vst [vmem:[#allocation66_spill] sm:$0xff] %v11618_v11  ;;  %12266 = vst [vmem:[#allocation67_spill] sm:$0xff] %v11621_v27  ;;  %v6553_v27 = vadd.f32 1.0, %v9552_v9 }
 0xa50   :  { %12267 = vst [vmem:[#allocation68_spill] sm:$0xff] %v11624_v34  ;;  %12268 = vst [vmem:[#allocation69_spill] sm:$0xff] %v11627_v30  ;;  %v9554_v34 = vpop.eup %9553 }
 0xa51   :  { %9557 = vrcp.f32 %v6553_v27 }
 0xa52   :  { %v6245_v8 = vpop.f32.mrb[100].mxu0  ;;  %v6318_v13 = vpop.f32.mrb[100].mxu1 }
 0xa53   :  { %v11630_v12 = vadd.f32 %v6245_v8, %v11550_v48  ;;  %v11633_v51 = vadd.f32 %v6318_v13, %v11556_v28  ;;  %v6247_v11 = vpop.f32.mrb[101].mxu0  ;;  %v6320_v7 = vpop.f32.mrb[101].mxu1 }
 0xa54   :  { %v11636_v22 = vadd.f32 %v6247_v11, %v11578_v59  ;;  %v11639_v47 = vadd.f32 %v6320_v7, %v11561_v26  ;;  %v6249_v61 = vpop.f32.mrb[102].mxu0  ;;  %v6322_v30 = vpop.f32.mrb[102].mxu1 }
 0xa55   :  { %12269 = vst [vmem:[#allocation47_spill] sm:$0xff] %v11630_v12  ;;  %12270 = vst [vmem:[#allocation70_spill] sm:$0xff] %v11633_v51  ;;  %v11642_v16 = vadd.f32 %v6249_v61, %v11550_v48  ;;  %v11645_v8 = vadd.f32 %v6322_v30, %v11556_v28  ;;  %v6251_v13 = vpop.f32.mrb[103].mxu0  ;;  %v6324_v51 = vpop.f32.mrb[103].mxu1 }
 0xa56   :  { %12271 = vst [vmem:[#allocation71_spill] sm:$0xff] %v11636_v22  ;;  %12272 = vst [vmem:[#allocation74_spill] sm:$0xff] %v11639_v47  ;;  %v9556_v12 = vpop.eup %9555  ;;  %v11648_v9 = vadd.f32 %v6251_v13, %v11578_v59  ;;  %v11651_v11 = vadd.f32 %v6324_v51, %v11561_v26 }
 0xa57   :  { %12273 = vst [vmem:[#allocation75_spill] sm:$0xff] %v11642_v16  ;;  %12274 = vst [vmem:[#allocation82_spill] sm:$0xff] %v11645_v8  ;;  %v11653_v7 = vmul.f32 %v9556_v12, %v9554_v34 }
 0xa58   :  { %12275 = vst [vmem:[#allocation78_spill] sm:$0xff] %v11648_v9  ;;  %12276 = vst [vmem:[#allocation79_spill] sm:$0xff] %v11651_v11 }
 0xa59   :  { %9559 = vtanh.f32 %v11653_v7 }
 0xa5b   :  { %v9558_v47 = vpop.eup %9557 }
 0xa63   :  { %v9560_v48 = vpop.eup %9559 }
 0xa64   :  { %v6558_v61 = vmul.f32 %v9560_v48, %v9558_v47 }
 0xa66   :  { %v6559_v16 = vpack.c.bf16 %v6558_v61, %v6558_v61 }
 0xa68   :  { %6806 = vmatmul.mubr.bf16.vlgmr.msra.gmra.mrb[120].mxu0 %v6559_v16  ;;  %6847 = vmatmul.mubr.bf16.vlgmr.msra.gmra.mrb[120].mxu1 %v6559_v16 }
 0xa69   :  { %6889 = vmatpush1.bf16.msra.mxu0 %v11448_v6  ;;  %6930 = vmatpush1.bf16.msra.mxu1 %v11450_v31 }
 0xa6a   :  { %6890 = vmatprep.subr.bf16.mxu0 %v11456_v14  ;;  %6931 = vmatprep.subr.bf16.mxu1 %v11458_v15 }
 0xa6b   :  { %6920 = vmatprep.mubr.bf16.mxu0 %v12097_v2  ;;  %6961 = vmatprep.mubr.bf16.mxu1 %v12097_v2 }
 0xa6d   :  { %6891 = vmatpush1.bf16.msra.mxu0 %v11460_v0  ;;  %6932 = vmatpush1.bf16.msra.mxu1 %v11462_v38 }
 0xa6e   :  { %6892 = vmatprep.subr.bf16.mxu0 %v11468_v45  ;;  %6933 = vmatprep.subr.bf16.mxu1 %v11470_v37 }
 0xa71   :  { %6893 = vmatpush1.bf16.msra.mxu0 %v11472_v42  ;;  %6934 = vmatpush1.bf16.msra.mxu1 %v11474_v25 }
 0xa72   :  { %6894 = vmatprep.subr.bf16.mxu0 %v11480_v4  ;;  %6935 = vmatprep.subr.bf16.mxu1 %v11482_v50 }
 0xa75   :  { %6895 = vmatpush1.bf16.msra.mxu0 %v11484_v35  ;;  %6936 = vmatpush1.bf16.msra.mxu1 %v11486_v52 }
 0xa76   :  { %6896 = vmatprep.subr.bf16.mxu0 %v11492_v62  ;;  %6937 = vmatprep.subr.bf16.mxu1 %v11494_v44 }
 0xa79   :  { %6897 = vmatpush1.bf16.msra.mxu0 %v11496_v1  ;;  %6938 = vmatpush1.bf16.msra.mxu1 %v11498_v5 }
 0xa7a   :  { %v6361_v28 = vpop.f32.mrb[104].mxu0  ;;  %v6434_v26 = vpop.f32.mrb[104].mxu1  ;;  %6898 = vmatprep.subr.bf16.mxu0 %v11502_v46  ;;  %6939 = vmatprep.subr.bf16.mxu1 %v11504_v53 }
 0xa7b   :  { %v6363_v16 = vpop.f32.mrb[105].mxu0  ;;  %v6436_v34 = vpop.f32.mrb[105].mxu1 }
 0xa7c   :  { %v6365_v12 = vpop.f32.mrb[106].mxu0  ;;  %v6438_v27 = vpop.f32.mrb[106].mxu1 }
 0xa7d   :  { %v6367_v30 = vpop.f32.mrb[107].mxu0  ;;  %v6440_v51 = vpop.f32.mrb[107].mxu1  ;;  %6899 = vmatpush1.bf16.msra.mxu0 %v11508_v41  ;;  %6940 = vmatpush1.bf16.msra.mxu1 %v11510_v54 }
 0xa7e   :  { %6900 = vmatprep.subr.bf16.mxu0 %v11514_v39  ;;  %6941 = vmatprep.subr.bf16.mxu1 %v11516_v40 }
 0xa81   :  { %6901 = vmatpush1.bf16.msra.mxu0 %v11520_v10  ;;  %6942 = vmatpush1.bf16.msra.mxu1 %v11522_v49 }
 0xa82   :  { %v6371_v47 = vpop.f32.mrb[108].mxu0  ;;  %v6444_v13 = vpop.f32.mrb[108].mxu1  ;;  %6902 = vmatprep.subr.bf16.mxu0 %v11526_v56  ;;  %6943 = vmatprep.subr.bf16.mxu1 %v11528_v57 }
 0xa83   :  { %v6373_v48 = vpop.f32.mrb[109].mxu0  ;;  %v6446_v61 = vpop.f32.mrb[109].mxu1 }
 0xa84   :  { %v6375_v28 = vpop.f32.mrb[110].mxu0  ;;  %v6448_v26 = vpop.f32.mrb[110].mxu1 }
 0xa85   :  { %v6377_v16 = vpop.f32.mrb[111].mxu0  ;;  %v6450_v34 = vpop.f32.mrb[111].mxu1  ;;  %6903 = vmatpush1.bf16.msra.mxu0 %v11532_v23  ;;  %6944 = vmatpush1.bf16.msra.mxu1 %v11534_v33  ;;  %v12277_v28 = vsub.s32 4, %v12253_v60 }
 0xa86   :  { %7003 = vmatprep.subr.bf16.mxu0 %v11444_v18  ;;  %7044 = vmatprep.subr.bf16.mxu1 %v11446_v21 }
 0xa87   :  { %v5520_v26 = vrot.slane %v11545_v43, %v12277_v28 }
 0xa8a   :  { %v6381_v12 = vpop.f32.mrb[112].mxu0  ;;  %v6454_v27 = vpop.f32.mrb[112].mxu1 }
 0xa8b   :  { %v6383_v30 = vpop.f32.mrb[113].mxu0  ;;  %v6456_v51 = vpop.f32.mrb[113].mxu1  ;;  %v12278_v12 = vsub.s32 7, %v12253_v60 }
 0xa8c   :  { %v6385_v47 = vpop.f32.mrb[114].mxu0  ;;  %v6458_v13 = vpop.f32.mrb[114].mxu1 }
 0xa8d   :  { %v6387_v48 = vpop.f32.mrb[115].mxu0  ;;  %v6460_v61 = vpop.f32.mrb[115].mxu1  ;;  %v5532_v27 = vrot.slane %v11545_v43, %v12278_v12  ;;  %v12279_v13 = vsub.s32 6, %v12253_v60 }
 0xa8f   :  { %v5528_v48 = vrot.slane %v11545_v43, %v12279_v13  ;;  %v6222_v43 = vadd.f32 %v11569_v3, %v11578_v59 }
 0xa92   :  { %v6391_v16 = vpop.f32.mrb[116].mxu0  ;;  %v6464_v34 = vpop.f32.mrb[116].mxu1 }
 0xa93   :  { %v6393_v11 = vpop.f32.mrb[117].mxu0  ;;  %v6466_v9 = vpop.f32.mrb[117].mxu1 }
 0xa94   :  { %v6395_v8 = vpop.f32.mrb[118].mxu0  ;;  %v6468_v22 = vpop.f32.mrb[118].mxu1 }
 0xa95   :  { %v6396_v32 = vadd.f32 %v6395_v8, %v5520_v26  ;;  %v6397_v20 = vpop.f32.mrb[119].mxu0  ;;  %v6470_v30 = vpop.f32.mrb[119].mxu1  ;;  %v6469_v28 = vadd.f32 %v6468_v22, %v5528_v48 }
 0xa96   :  { %v6471_v47 = vadd.f32 %v6470_v30, %v5532_v27 }
 0xa97   :  { %v8656_v51 = vmul.f32 -1.442695, %v6396_v32 }
 0xa98   :  { %v8657_v61 = vmul.f32 -1.442695, %v6471_v47 }
 0xa99   :  { %9561 = vpow2.f32 %v8656_v51 }
 0xa9a   :  { %9563 = vpow2.f32 %v8657_v61 }
 0xa9b   :  { %9565 = vtanh.f32 %v6469_v28 }
 0xaa3   :  { %v9562_v9 = vpop.eup %9561 }
 0xaa4   :  { %v6563_v11 = vadd.f32 1.0, %v9562_v9  ;;  %v9564_v20 = vpop.eup %9563 }
 0xaa5   :  { %v6570_v8 = vadd.f32 1.0, %v9564_v20  ;;  %v9566_v26 = vpop.eup %9565 }
 0xaa6   :  { %9567 = vrcp.f32 %v6563_v11 }
 0xaa7   :  { %9569 = vrcp.f32 %v6570_v8 }
 0xab0   :  { %v9568_v16 = vpop.eup %9567 }
 0xab1   :  { %v6573_v34 = vmul.f32 %v9568_v16, %v9566_v26  ;;  %v9570_v32 = vpop.eup %9569 }
 0xab3   :  { %9571 = vtanh.f32 %v6573_v34 }
 0xabd   :  { %v9572_v12 = vpop.eup %9571 }
 0xabe   :  { %v11699_v27 = vmul.f32 %v9572_v12, %v9570_v32 }
 0xb3b   :  { %v6807_v60 = vpop.f32.mrb[120].mxu0  ;;  %v6848_v22 = vpop.f32.mrb[120].mxu1 }
 0xb3c   :  { %v6855_v30 = vadd.f32 %v6807_v60, %v11564_v17  ;;  %v6857_v51 = vadd.f32 %v6848_v22, %v11567_v24  ;;  %v6809_v47 = vpop.f32.mrb[121].mxu0  ;;  %v6850_v13 = vpop.f32.mrb[121].mxu1 }
 0xb3d   :  { %v6856_v48 = vadd.f32 %v6809_v47, %v6222_v43  ;;  %v6858_v61 = vadd.f32 %v6850_v13, %v11572_v29  ;;  %v6811_v28 = vpop.f32.mrb[122].mxu0  ;;  %v6852_v9 = vpop.f32.mrb[122].mxu1 }
 0xb3e   :  { %v8690_v11 = vmul.f32 -1.442695, %v6855_v30  ;;  %v6812_v20 = vpop.f32.mrb[123].mxu0  ;;  %v6853_v8 = vpop.f32.mrb[123].mxu1 }
 0xb3f   :  { %v8691_v26 = vmul.f32 -1.442695, %v6856_v48  ;;  %v8692_v3 = vmul.f32 -1.442695, %v6858_v61 }
 0xb40   :  { %9573 = vpow2.f32 %v8690_v11 }
 0xb41   :  { %9575 = vpow2.f32 %v8691_v26 }
 0xb42   :  { %9577 = vpow2.f32 %v8692_v3 }
 0xb43   :  { %9579 = vtanh.f32 %v6857_v51 }
 0xb4a   :  { %v9574_v59 = vpop.eup %9573 }
 0xb4b   :  { %v9576_v16 = vpop.eup %9575  ;;  %v6862_v34 = vadd.f32 1.0, %v9574_v59 }
 0xb4c   :  { %v6868_v17 = vadd.f32 1.0, %v9576_v16  ;;  %v9578_v24 = vpop.eup %9577 }
 0xb4d   :  { %9581 = vrcp.f32 %v6862_v34  ;;  %v9580_v32 = vpop.eup %9579  ;;  %v6875_v60 = vadd.f32 1.0, %v9578_v24 }
 0xb4e   :  { %9583 = vrcp.f32 %v6868_v17 }
 0xb4f   :  { %9585 = vrcp.f32 %v6875_v60 }
 0xb57   :  { %v9582_v29 = vpop.eup %9581 }
 0xb58   :  { %v9584_v12 = vpop.eup %9583  ;;  %v6879_v43 = vmul.f32 %v9582_v29, %v9580_v32 }
 0xb59   :  { %v6878_v22 = vmul.f32 %v9584_v12, %v11653_v7  ;;  %v9586_v47 = vpop.eup %9585 }
 0xb5b   :  { %v11707_v30 = vadd.f32 %v6879_v43, %v6878_v22 }
 0xb5d   :  { %9587 = vtanh.f32 %v11707_v30 }
 0xb67   :  { %v9588_v13 = vpop.eup %9587 }
 0xb68   :  { %v6882_v48 = vmul.f32 %v9588_v13, %v9586_v47 }
 0xb6a   :  { %v6883_v51 = vpack.c.bf16 %v6882_v48, %v6882_v48 }
 0xb6c   :  { %6921 = vmatmul.mubr.bf16.vlgmr.msra.gmra.mrb[124].mxu0 %v6883_v51  ;;  %6962 = vmatmul.mubr.bf16.vlgmr.msra.gmra.mrb[124].mxu1 %v6883_v51 }
 0xb6d   :  { %7004 = vmatpush1.bf16.msra.mxu0 %v11448_v6  ;;  %7045 = vmatpush1.bf16.msra.mxu1 %v11450_v31 }
 0xb6e   :  { %7005 = vmatprep.subr.bf16.mxu0 %v11456_v14  ;;  %7046 = vmatprep.subr.bf16.mxu1 %v11458_v15 }
 0xb6f   :  { %7035 = vmatprep.mubr.bf16.mxu0 %v12097_v2  ;;  %7076 = vmatprep.mubr.bf16.mxu1 %v12097_v2 }
 0xb71   :  { %7006 = vmatpush1.bf16.msra.mxu0 %v11460_v0  ;;  %7047 = vmatpush1.bf16.msra.mxu1 %v11462_v38 }
 0xb72   :  { %7007 = vmatprep.subr.bf16.mxu0 %v11468_v45  ;;  %7048 = vmatprep.subr.bf16.mxu1 %v11470_v37 }
 0xb75   :  { %7008 = vmatpush1.bf16.msra.mxu0 %v11472_v42  ;;  %7049 = vmatpush1.bf16.msra.mxu1 %v11474_v25 }
 0xb76   :  { %7009 = vmatprep.subr.bf16.mxu0 %v11480_v4  ;;  %7050 = vmatprep.subr.bf16.mxu1 %v11482_v50 }
 0xb79   :  { %7010 = vmatpush1.bf16.msra.mxu0 %v11484_v35  ;;  %7051 = vmatpush1.bf16.msra.mxu1 %v11486_v52 }
 0xb7a   :  { %7011 = vmatprep.subr.bf16.mxu0 %v11492_v62  ;;  %7052 = vmatprep.subr.bf16.mxu1 %v11494_v44 }
 0xb7d   :  { %7012 = vmatpush1.bf16.msra.mxu0 %v11496_v1  ;;  %7053 = vmatpush1.bf16.msra.mxu1 %v11498_v5 }
 0xb7e   :  { %7013 = vmatprep.subr.bf16.mxu0 %v11502_v46  ;;  %7054 = vmatprep.subr.bf16.mxu1 %v11504_v53 }
 0xb81   :  { %7014 = vmatpush1.bf16.msra.mxu0 %v11508_v41  ;;  %7055 = vmatpush1.bf16.msra.mxu1 %v11510_v54 }
 0xb82   :  { %7015 = vmatprep.subr.bf16.mxu0 %v11514_v39  ;;  %7056 = vmatprep.subr.bf16.mxu1 %v11516_v40 }
 0xb85   :  { %7016 = vmatpush1.bf16.msra.mxu0 %v11520_v10  ;;  %7057 = vmatpush1.bf16.msra.mxu1 %v11522_v49 }
 0xb86   :  { %7017 = vmatprep.subr.bf16.mxu0 %v11526_v56  ;;  %7058 = vmatprep.subr.bf16.mxu1 %v11528_v57 }
 0xb89   :  { %7018 = vmatpush1.bf16.msra.mxu0 %v11532_v23  ;;  %7059 = vmatpush1.bf16.msra.mxu1 %v11534_v33 }
 0xb8a   :  { %7118 = vmatprep.subr.bf16.mxu0 %v11444_v18  ;;  %7159 = vmatprep.subr.bf16.mxu1 %v11446_v21 }
 0xc3f   :  { %v6922_v7 = vpop.f32.mrb[124].mxu0  ;;  %v6963_v61 = vpop.f32.mrb[124].mxu1 }
 0xc40   :  { %v6970_v28 = vadd.f32 %v6922_v7, %v11581_v19  ;;  %v6972_v9 = vadd.f32 %v6963_v61, %v11584_v36  ;;  %v6924_v11 = vpop.f32.mrb[125].mxu0  ;;  %v6965_v20 = vpop.f32.mrb[125].mxu1 }
 0xc41   :  { %v6971_v8 = vadd.f32 %v6924_v11, %v11587_v55  ;;  %v6973_v26 = vadd.f32 %v6965_v20, %v11590_v63  ;;  %v6926_v3 = vpop.f32.mrb[126].mxu0  ;;  %v6967_v59 = vpop.f32.mrb[126].mxu1  ;;  %v12280_v20 = vld [vmem:[#allocation77_spill] sm:$0xff] }
 0xc42   :  { %v8693_v16 = vmul.f32 -1.442695, %v6970_v28  ;;  %v6927_v34 = vpop.f32.mrb[127].mxu0  ;;  %v6968_v17 = vpop.f32.mrb[127].mxu1  ;;  %v12281_v59 = vld [vmem:[#allocation27_spill] sm:$0xff] }
 0xc43   :  { %v8694_v24 = vmul.f32 -1.442695, %v6971_v8  ;;  %v8695_v32 = vmul.f32 -1.442695, %v6973_v26  ;;  %v12282_v34 = vld [vmem:[#allocation28_spill] sm:$0xff] }
 0xc44   :  { %9589 = vpow2.f32 %v8693_v16 }
 0xc45   :  { %9591 = vpow2.f32 %v8694_v24 }
 0xc46   :  { %9593 = vpow2.f32 %v8695_v32 }
 0xc47   :  { %9595 = vtanh.f32 %v6972_v9 }
 0xc4e   :  { %v9590_v29 = vpop.eup %9589 }
 0xc4f   :  { %v9592_v12 = vpop.eup %9591  ;;  %v6977_v19 = vadd.f32 1.0, %v9590_v29 }
 0xc50   :  { %v6983_v36 = vadd.f32 1.0, %v9592_v12  ;;  %v9594_v55 = vpop.eup %9593 }
 0xc51   :  { %9597 = vrcp.f32 %v6977_v19  ;;  %v9596_v43 = vpop.eup %9595  ;;  %v6990_v47 = vadd.f32 1.0, %v9594_v55 }
 0xc52   :  { %9599 = vrcp.f32 %v6983_v36 }
 0xc53   :  { %9601 = vrcp.f32 %v6990_v47 }
 0xc5b   :  { %v9598_v63 = vpop.eup %9597 }
 0xc5c   :  { %v9600_v60 = vpop.eup %9599  ;;  %v6994_v22 = vmul.f32 %v9598_v63, %v9596_v43 }
 0xc5d   :  { %v6993_v13 = vmul.f32 %v9600_v60, %v11707_v30  ;;  %v9602_v51 = vpop.eup %9601 }
 0xc5f   :  { %v11749_v48 = vadd.f32 %v6994_v22, %v6993_v13 }
 0xc61   :  { %9603 = vtanh.f32 %v11749_v48 }
 0xc6b   :  { %v9604_v7 = vpop.eup %9603 }
 0xc6c   :  { %v6997_v61 = vmul.f32 %v9604_v7, %v9602_v51 }
 0xc6e   :  { %v6998_v28 = vpack.c.bf16 %v6997_v61, %v6997_v61 }
 0xc70   :  { %7036 = vmatmul.mubr.bf16.vlgmr.msra.gmra.mrb[128].mxu0 %v6998_v28  ;;  %7077 = vmatmul.mubr.bf16.vlgmr.msra.gmra.mrb[128].mxu1 %v6998_v28 }
 0xc71   :  { %7119 = vmatpush1.bf16.msra.mxu0 %v11448_v6  ;;  %7160 = vmatpush1.bf16.msra.mxu1 %v11450_v31 }
 0xc72   :  { %7120 = vmatprep.subr.bf16.mxu0 %v11456_v14  ;;  %7161 = vmatprep.subr.bf16.mxu1 %v11458_v15 }
 0xc73   :  { %7150 = vmatprep.mubr.bf16.mxu0 %v12097_v2  ;;  %7191 = vmatprep.mubr.bf16.mxu1 %v12097_v2 }
 0xc75   :  { %7121 = vmatpush1.bf16.msra.mxu0 %v11460_v0  ;;  %7162 = vmatpush1.bf16.msra.mxu1 %v11462_v38 }
 0xc76   :  { %7122 = vmatprep.subr.bf16.mxu0 %v11468_v45  ;;  %7163 = vmatprep.subr.bf16.mxu1 %v11470_v37 }
 0xc79   :  { %7123 = vmatpush1.bf16.msra.mxu0 %v11472_v42  ;;  %7164 = vmatpush1.bf16.msra.mxu1 %v11474_v25 }
 0xc7a   :  { %7124 = vmatprep.subr.bf16.mxu0 %v11480_v4  ;;  %7165 = vmatprep.subr.bf16.mxu1 %v11482_v50 }
 0xc7d   :  { %7125 = vmatpush1.bf16.msra.mxu0 %v11484_v35  ;;  %7166 = vmatpush1.bf16.msra.mxu1 %v11486_v52 }
 0xc7e   :  { %7126 = vmatprep.subr.bf16.mxu0 %v11492_v62  ;;  %7167 = vmatprep.subr.bf16.mxu1 %v11494_v44 }
 0xc81   :  { %7127 = vmatpush1.bf16.msra.mxu0 %v11496_v1  ;;  %7168 = vmatpush1.bf16.msra.mxu1 %v11498_v5 }
 0xc82   :  { %7128 = vmatprep.subr.bf16.mxu0 %v11502_v46  ;;  %7169 = vmatprep.subr.bf16.mxu1 %v11504_v53 }
 0xc85   :  { %7129 = vmatpush1.bf16.msra.mxu0 %v11508_v41  ;;  %7170 = vmatpush1.bf16.msra.mxu1 %v11510_v54 }
 0xc86   :  { %7130 = vmatprep.subr.bf16.mxu0 %v11514_v39  ;;  %7171 = vmatprep.subr.bf16.mxu1 %v11516_v40 }
 0xc89   :  { %7131 = vmatpush1.bf16.msra.mxu0 %v11520_v10  ;;  %7172 = vmatpush1.bf16.msra.mxu1 %v11522_v49 }
 0xc8a   :  { %7132 = vmatprep.subr.bf16.mxu0 %v11526_v56  ;;  %7173 = vmatprep.subr.bf16.mxu1 %v11528_v57 }
 0xc8d   :  { %7133 = vmatpush1.bf16.msra.mxu0 %v11532_v23  ;;  %7174 = vmatpush1.bf16.msra.mxu1 %v11534_v33 }
 0xc8e   :  { %7233 = vmatprep.subr.bf16.mxu0 %v11444_v18  ;;  %7274 = vmatprep.subr.bf16.mxu1 %v11446_v21 }
 0xd43   :  { %v7037_v30 = vpop.f32.mrb[128].mxu0  ;;  %v7078_v9 = vpop.f32.mrb[128].mxu1 }
 0xd44   :  { %v7085_v11 = vadd.f32 %v7037_v30, %v11593_v58  ;;  %v7087_v8 = vadd.f32 %v7078_v9, %v12280_v20  ;;  %v7039_v26 = vpop.f32.mrb[129].mxu0  ;;  %v7080_v3 = vpop.f32.mrb[129].mxu1 }
 0xd45   :  { %v7086_v16 = vadd.f32 %v7039_v26, %v12281_v59  ;;  %v7088_v17 = vadd.f32 %v7080_v3, %v12282_v34  ;;  %v7041_v24 = vpop.f32.mrb[130].mxu0  ;;  %v7082_v32 = vpop.f32.mrb[130].mxu1  ;;  %v12283_v3 = vld [vmem:[#allocation29_spill] sm:$0xff] }
 0xd46   :  { %v8696_v29 = vmul.f32 -1.442695, %v7085_v11  ;;  %v7042_v12 = vpop.f32.mrb[131].mxu0  ;;  %v7083_v19 = vpop.f32.mrb[131].mxu1  ;;  %v12285_v32 = vld [vmem:[#allocation64_spill] sm:$0xff] }
 0xd47   :  { %v8697_v36 = vmul.f32 -1.442695, %v7086_v16  ;;  %v8698_v55 = vmul.f32 -1.442695, %v7088_v17  ;;  %v12284_v16 = vld [vmem:[#allocation30_spill] sm:$0xff]  ;;  %v12286_v12 = vld [vmem:[#allocation65_spill] sm:$0xff] }
 0xd48   :  { %9605 = vpow2.f32 %v8696_v29 }
 0xd49   :  { %9607 = vpow2.f32 %v8697_v36 }
 0xd4a   :  { %9609 = vpow2.f32 %v8698_v55 }
 0xd4b   :  { %9611 = vtanh.f32 %v7087_v8 }
 0xd52   :  { %v9606_v43 = vpop.eup %9605 }
 0xd53   :  { %v9608_v63 = vpop.eup %9607  ;;  %v7092_v58 = vadd.f32 1.0, %v9606_v43 }
 0xd54   :  { %v7098_v60 = vadd.f32 1.0, %v9608_v63  ;;  %v9610_v22 = vpop.eup %9609 }
 0xd55   :  { %9613 = vrcp.f32 %v7092_v58  ;;  %v9612_v47 = vpop.eup %9611  ;;  %v7105_v61 = vadd.f32 1.0, %v9610_v22 }
 0xd56   :  { %9615 = vrcp.f32 %v7098_v60 }
 0xd57   :  { %9617 = vrcp.f32 %v7105_v61 }
 0xd5f   :  { %v9614_v13 = vpop.eup %9613 }
 0xd60   :  { %v9616_v51 = vpop.eup %9615  ;;  %v7109_v7 = vmul.f32 %v9614_v13, %v9612_v47 }
 0xd61   :  { %v7108_v28 = vmul.f32 %v9616_v51, %v11749_v48  ;;  %v9618_v9 = vpop.eup %9617 }
 0xd63   :  { %v11791_v30 = vadd.f32 %v7109_v7, %v7108_v28 }
 0xd65   :  { %9619 = vtanh.f32 %v11791_v30 }
 0xd6f   :  { %v9620_v11 = vpop.eup %9619 }
 0xd70   :  { %v7112_v20 = vmul.f32 %v9620_v11, %v9618_v9 }
 0xd72   :  { %v7113_v8 = vpack.c.bf16 %v7112_v20, %v7112_v20 }
 0xd74   :  { %7151 = vmatmul.mubr.bf16.vlgmr.msra.gmra.mrb[132].mxu0 %v7113_v8  ;;  %7192 = vmatmul.mubr.bf16.vlgmr.msra.gmra.mrb[132].mxu1 %v7113_v8 }
 0xd75   :  { %7234 = vmatpush1.bf16.msra.mxu0 %v11448_v6  ;;  %7275 = vmatpush1.bf16.msra.mxu1 %v11450_v31 }
 0xd76   :  { %7235 = vmatprep.subr.bf16.mxu0 %v11456_v14  ;;  %7276 = vmatprep.subr.bf16.mxu1 %v11458_v15 }
 0xd77   :  { %7265 = vmatprep.mubr.bf16.mxu0 %v12097_v2  ;;  %7306 = vmatprep.mubr.bf16.mxu1 %v12097_v2 }
 0xd79   :  { %7236 = vmatpush1.bf16.msra.mxu0 %v11460_v0  ;;  %7277 = vmatpush1.bf16.msra.mxu1 %v11462_v38 }
 0xd7a   :  { %7237 = vmatprep.subr.bf16.mxu0 %v11468_v45  ;;  %7278 = vmatprep.subr.bf16.mxu1 %v11470_v37 }
 0xd7d   :  { %7238 = vmatpush1.bf16.msra.mxu0 %v11472_v42  ;;  %7279 = vmatpush1.bf16.msra.mxu1 %v11474_v25 }
 0xd7e   :  { %7239 = vmatprep.subr.bf16.mxu0 %v11480_v4  ;;  %7280 = vmatprep.subr.bf16.mxu1 %v11482_v50 }
 0xd81   :  { %7240 = vmatpush1.bf16.msra.mxu0 %v11484_v35  ;;  %7281 = vmatpush1.bf16.msra.mxu1 %v11486_v52 }
 0xd82   :  { %7241 = vmatprep.subr.bf16.mxu0 %v11492_v62  ;;  %7282 = vmatprep.subr.bf16.mxu1 %v11494_v44 }
 0xd85   :  { %7242 = vmatpush1.bf16.msra.mxu0 %v11496_v1  ;;  %7283 = vmatpush1.bf16.msra.mxu1 %v11498_v5 }
 0xd86   :  { %7243 = vmatprep.subr.bf16.mxu0 %v11502_v46  ;;  %7284 = vmatprep.subr.bf16.mxu1 %v11504_v53 }
 0xd89   :  { %7244 = vmatpush1.bf16.msra.mxu0 %v11508_v41  ;;  %7285 = vmatpush1.bf16.msra.mxu1 %v11510_v54 }
 0xd8a   :  { %7245 = vmatprep.subr.bf16.mxu0 %v11514_v39  ;;  %7286 = vmatprep.subr.bf16.mxu1 %v11516_v40 }
 0xd8d   :  { %7246 = vmatpush1.bf16.msra.mxu0 %v11520_v10  ;;  %7287 = vmatpush1.bf16.msra.mxu1 %v11522_v49 }
 0xd8e   :  { %7247 = vmatprep.subr.bf16.mxu0 %v11526_v56  ;;  %7288 = vmatprep.subr.bf16.mxu1 %v11528_v57 }
 0xd91   :  { %7248 = vmatpush1.bf16.msra.mxu0 %v11532_v23  ;;  %7289 = vmatpush1.bf16.msra.mxu1 %v11534_v33 }
 0xd92   :  { %7348 = vmatprep.subr.bf16.mxu0 %v11444_v18  ;;  %7389 = vmatprep.subr.bf16.mxu1 %v11446_v21 }
 0xe47   :  { %v7152_v48 = vpop.f32.mrb[132].mxu0  ;;  %v7193_v26 = vpop.f32.mrb[132].mxu1 }
 0xe48   :  { %v7200_v59 = vadd.f32 %v7152_v48, %v12283_v3  ;;  %v7202_v34 = vadd.f32 %v7193_v26, %v12284_v16  ;;  %v7154_v17 = vpop.f32.mrb[133].mxu0  ;;  %v7195_v24 = vpop.f32.mrb[133].mxu1 }
 0xe49   :  { %v7201_v29 = vadd.f32 %v7154_v17, %v12285_v32  ;;  %v7203_v19 = vadd.f32 %v7195_v24, %v12286_v12  ;;  %v7156_v36 = vpop.f32.mrb[134].mxu0  ;;  %v7197_v55 = vpop.f32.mrb[134].mxu1  ;;  %v9691_v12 = vld [vmem:[#allocation12] ss:$16 sps:$4 sm:$0xff]  }
 0xe4a   :  { %v8699_v43 = vmul.f32 -1.442695, %v7200_v59  ;;  %v7157_v63 = vpop.f32.mrb[135].mxu0  ;;  %v7198_v58 = vpop.f32.mrb[135].mxu1  ;;  %v9693_v36 = vld [vmem:[#allocation12 + $0x24] ss:$16 sps:$4 sm:$0xff]  }
 0xe4b   :  { %v8700_v18 = vmul.f32 -1.442695, %v7201_v29  ;;  %v8701_v21 = vmul.f32 -1.442695, %v7203_v19  ;;  %v9692_v19 = vld [vmem:[#allocation12 + $0x8] ss:$16 sps:$4 sm:$0xff]  }
 0xe4c   :  { %9621 = vpow2.f32 %v8699_v43  ;;  %v9694_v55 = vld [vmem:[#allocation12 + $0x2c] ss:$16 sps:$4 sm:$0xff]   ;;  %v9695_v43 = vld [vmem:[#allocation12 + $0x20] ss:$16 sps:$4 sm:$0xff]   ;;  %v9696_v63 = vld [vmem:[#allocation12 + $0x28] ss:$16 sps:$4 sm:$0xff]  }
 0xe4d   :  { %9623 = vpow2.f32 %v8700_v18  ;;  %v9697_v58 = vld [vmem:[#allocation12 + $0x44] ss:$16 sps:$4 sm:$0xff]   ;;  %v9698_v18 = vld [vmem:[#allocation12 + $0x4c] ss:$16 sps:$4 sm:$0xff]  }
 0xe4e   :  { %9625 = vpow2.f32 %v8701_v21  ;;  %v9699_v21 = vld [vmem:[#allocation12 + $0x40] ss:$16 sps:$4 sm:$0xff]  }
 0xe4f   :  { %9627 = vtanh.f32 %v7202_v34 }
 0xe56   :  { %v9622_v60 = vpop.eup %9621 }
 0xe57   :  { %v9624_v22 = vpop.eup %9623  ;;  %v7207_v47 = vadd.f32 1.0, %v9622_v60  ;;  %v9700_v60 = vld [vmem:[#allocation12 + $0x48] ss:$16 sps:$4 sm:$0xff]  }
 0xe58   :  { %v7213_v13 = vadd.f32 1.0, %v9624_v22  ;;  %v9626_v51 = vpop.eup %9625  ;;  %v9701_v22 = vld [vmem:[#allocation12 + $0x64] ss:$16 sps:$4 sm:$0xff]  }
 0xe59   :  { %9629 = vrcp.f32 %v7207_v47  ;;  %v9628_v7 = vpop.eup %9627  ;;  %v7220_v11 = vadd.f32 1.0, %v9626_v51  ;;  %v9702_v47 = vld [vmem:[#allocation12 + $0x6c] ss:$16 sps:$4 sm:$0xff]   ;;  %v9704_v51 = vld [vmem:[#allocation12 + $0x68] ss:$16 sps:$4 sm:$0xff]  }
 0xe5a   :  { %9631 = vrcp.f32 %v7213_v13  ;;  %v9703_v13 = vld [vmem:[#allocation12 + $0x60] ss:$16 sps:$4 sm:$0xff]  }
 0xe5b   :  { %9633 = vrcp.f32 %v7220_v11  ;;  %v9710_v11 = vld [vmem:[#allocation12 + $0xac] ss:$16 sps:$4 sm:$0xff]  }
 0xe63   :  { %v9630_v61 = vpop.eup %9629 }
 0xe64   :  { %v9632_v28 = vpop.eup %9631  ;;  %v7224_v9 = vmul.f32 %v9630_v61, %v9628_v7  ;;  %v9706_v7 = vld [vmem:[#allocation12 + $0x8c] ss:$16 sps:$4 sm:$0xff]   ;;  %v9707_v61 = vld [vmem:[#allocation12 + $0x80] ss:$16 sps:$4 sm:$0xff]  }
 0xe65   :  { %v7223_v20 = vmul.f32 %v9632_v28, %v11791_v30  ;;  %v9634_v48 = vpop.eup %9633  ;;  %v9708_v28 = vld [vmem:[#allocation12 + $0x88] ss:$16 sps:$4 sm:$0xff]  }
 0xe67   :  { %v11833_v8 = vadd.f32 %v7224_v9, %v7223_v20  ;;  %v9709_v9 = vld [vmem:[#allocation12 + $0xa4] ss:$16 sps:$4 sm:$0xff]   ;;  %v9711_v20 = vld [vmem:[#allocation12 + $0xa0] ss:$16 sps:$4 sm:$0xff]  }
 0xe69   :  { %9635 = vtanh.f32 %v11833_v8 }
 0xe73   :  { %v9636_v26 = vpop.eup %9635 }
 0xe74   :  { %v7227_v3 = vmul.f32 %v9636_v26, %v9634_v48  ;;  %v9713_v48 = vld [vmem:[#allocation12 + $0xc4] ss:$16 sps:$4 sm:$0xff]   ;;  %v9714_v26 = vld [vmem:[#allocation12 + $0xcc] ss:$16 sps:$4 sm:$0xff]  }
 0xe76   :  { %v7228_v59 = vpack.c.bf16 %v7227_v3, %v7227_v3  ;;  %v9715_v3 = vld [vmem:[#allocation12 + $0xc0] ss:$16 sps:$4 sm:$0xff]  }
 0xe78   :  { %7266 = vmatmul.mubr.bf16.vlgmr.msra.gmra.mrb[136].mxu0 %v7228_v59  ;;  %7307 = vmatmul.mubr.bf16.vlgmr.msra.gmra.mrb[136].mxu1 %v7228_v59  ;;  %v9716_v59 = vld [vmem:[#allocation12 + $0xc8] ss:$16 sps:$4 sm:$0xff]  }
 0xe79   :  { %7349 = vmatpush1.bf16.msra.mxu0 %v11448_v6  ;;  %7390 = vmatpush1.bf16.msra.mxu1 %v11450_v31  ;;  %v9689_v6 = vld [vmem:[#allocation12 + $0x4] ss:$16 sps:$4 sm:$0xff]   ;;  %v9690_v31 = vld [vmem:[#allocation12 + $0xc] ss:$16 sps:$4 sm:$0xff]  }
 0xe7a   :  { %7350 = vmatprep.subr.bf16.mxu0 %v11456_v14  ;;  %7391 = vmatprep.subr.bf16.mxu1 %v11458_v15 }
 0xe7b   :  { %7380 = vmatprep.mubr.bf16.mxu0 %v12097_v2  ;;  %7421 = vmatprep.mubr.bf16.mxu1 %v12097_v2 }
 0xe7d   :  { %7351 = vmatpush1.bf16.msra.mxu0 %v11460_v0  ;;  %7392 = vmatpush1.bf16.msra.mxu1 %v11462_v38  ;;  %v12287_v0 = vld [vmem:[#allocation66_spill] sm:$0xff] }
 0xe7e   :  { %7352 = vmatprep.subr.bf16.mxu0 %v11468_v45  ;;  %7393 = vmatprep.subr.bf16.mxu1 %v11470_v37  ;;  %v12288_v45 = vld [vmem:[#allocation67_spill] sm:$0xff] }
 0xe81   :  { %7353 = vmatpush1.bf16.msra.mxu0 %v11472_v42  ;;  %7394 = vmatpush1.bf16.msra.mxu1 %v11474_v25 }
 0xe82   :  { %7354 = vmatprep.subr.bf16.mxu0 %v11480_v4  ;;  %7395 = vmatprep.subr.bf16.mxu1 %v11482_v50  ;;  %v12289_v4 = vld [vmem:[#allocation68_spill] sm:$0xff] }
 0xe85   :  { %7355 = vmatpush1.bf16.msra.mxu0 %v11484_v35  ;;  %7396 = vmatpush1.bf16.msra.mxu1 %v11486_v52  ;;  %v12290_v35 = vld [vmem:[#allocation69_spill] sm:$0xff] }
 0xe86   :  { %7356 = vmatprep.subr.bf16.mxu0 %v11492_v62  ;;  %7397 = vmatprep.subr.bf16.mxu1 %v11494_v44 }
 0xe89   :  { %7357 = vmatpush1.bf16.msra.mxu0 %v11496_v1  ;;  %7398 = vmatpush1.bf16.msra.mxu1 %v11498_v5 }
 0xe8a   :  { %7358 = vmatprep.subr.bf16.mxu0 %v11502_v46  ;;  %7399 = vmatprep.subr.bf16.mxu1 %v11504_v53 }
 0xe8d   :  { %7359 = vmatpush1.bf16.msra.mxu0 %v11508_v41  ;;  %7400 = vmatpush1.bf16.msra.mxu1 %v11510_v54 }
 0xe8e   :  { %7360 = vmatprep.subr.bf16.mxu0 %v11514_v39  ;;  %7401 = vmatprep.subr.bf16.mxu1 %v11516_v40 }
 0xe91   :  { %7361 = vmatpush1.bf16.msra.mxu0 %v11520_v10  ;;  %7402 = vmatpush1.bf16.msra.mxu1 %v11522_v49 }
 0xe92   :  { %7362 = vmatprep.subr.bf16.mxu0 %v11526_v56  ;;  %7403 = vmatprep.subr.bf16.mxu1 %v11528_v57 }
 0xe95   :  { %7363 = vmatpush1.bf16.msra.mxu0 %v11532_v23  ;;  %7404 = vmatpush1.bf16.msra.mxu1 %v11534_v33 }
 0xe96   :  { %7463 = vmatprep.subr.bf16.mxu0 %v9689_v6  ;;  %7504 = vmatprep.subr.bf16.mxu1 %v9690_v31  ;;  %v9717_v6 = vld [vmem:[#allocation12 + $0xe4] ss:$16 sps:$4 sm:$0xff]   ;;  %v9718_v31 = vld [vmem:[#allocation12 + $0xec] ss:$16 sps:$4 sm:$0xff]  }
 0xf4b   :  { %v7267_v14 = vpop.f32.mrb[136].mxu0  ;;  %v7308_v15 = vpop.f32.mrb[136].mxu1 }
 0xf4c   :  { %v7315_v38 = vadd.f32 %v7267_v14, %v12287_v0  ;;  %v7317_v37 = vadd.f32 %v7308_v15, %v12288_v45  ;;  %v7269_v42 = vpop.f32.mrb[137].mxu0  ;;  %v7310_v25 = vpop.f32.mrb[137].mxu1  ;;  %v9719_v14 = vld [vmem:[#allocation12 + $0xe0] ss:$16 sps:$4 sm:$0xff]   ;;  %v9720_v15 = vld [vmem:[#allocation12 + $0xe8] ss:$16 sps:$4 sm:$0xff]  }
 0xf4d   :  { %v7316_v50 = vadd.f32 %v7269_v42, %v12289_v4  ;;  %v7318_v52 = vadd.f32 %v7310_v25, %v12290_v35  ;;  %v7271_v62 = vpop.f32.mrb[138].mxu0  ;;  %v7312_v44 = vpop.f32.mrb[138].mxu1  ;;  %v9922_v0 = vmov 0.0   ;;  %v12292_v25 = vld [vmem:[#allocation70_spill] sm:$0xff] }
 0xf4e   :  { %v8702_v1 = vmul.f32 -1.442695, %v7315_v38  ;;  %v7272_v5 = vpop.f32.mrb[139].mxu0  ;;  %v7313_v46 = vpop.f32.mrb[139].mxu1  ;;  %v12294_v44 = vld [vmem:[#allocation74_spill] sm:$0xff] }
 0xf4f   :  { %v8703_v53 = vmul.f32 -1.442695, %v7316_v50  ;;  %v8704_v41 = vmul.f32 -1.442695, %v7318_v52  ;;  %v12293_v52 = vld [vmem:[#allocation71_spill] sm:$0xff] }
 0xf50   :  { %9637 = vpow2.f32 %v8702_v1 }
 0xf51   :  { %9639 = vpow2.f32 %v8703_v53 }
 0xf52   :  { %9641 = vpow2.f32 %v8704_v41 }
 0xf53   :  { %9643 = vtanh.f32 %v7317_v37  ;;  %v12291_v37 = vld [vmem:[#allocation47_spill] sm:$0xff] }
 0xf5a   :  { %v9638_v54 = vpop.eup %9637 }
 0xf5b   :  { %v9640_v39 = vpop.eup %9639  ;;  %v7322_v40 = vadd.f32 1.0, %v9638_v54 }
 0xf5c   :  { %v7328_v10 = vadd.f32 1.0, %v9640_v39  ;;  %v9642_v49 = vpop.eup %9641 }
 0xf5d   :  { %9645 = vrcp.f32 %v7322_v40  ;;  %v9644_v56 = vpop.eup %9643  ;;  %v7335_v30 = vadd.f32 1.0, %v9642_v49 }
 0xf5e   :  { %9647 = vrcp.f32 %v7328_v10 }
 0xf5f   :  { %9649 = vrcp.f32 %v7335_v30 }
 0xf67   :  { %v9646_v57 = vpop.eup %9645 }
 0xf68   :  { %v9648_v23 = vpop.eup %9647  ;;  %v7339_v33 = vmul.f32 %v9646_v57, %v9644_v56 }
 0xf69   :  { %v7338_v16 = vmul.f32 %v9648_v23, %v11833_v8  ;;  %v9650_v17 = vpop.eup %9649  ;;  %v9712_v8 = vld [vmem:[#allocation12 + $0xa8] ss:$16 sps:$4 sm:$0xff]  }
 0xf6b   :  { %v11873_v34 = vadd.f32 %v7339_v33, %v7338_v16 }
 0xf6d   :  { %9651 = vtanh.f32 %v11873_v34 }
 0xf77   :  { %v9652_v24 = vpop.eup %9651 }
 0xf78   :  { %v7342_v32 = vmul.f32 %v9652_v24, %v9650_v17 }
 0xf7a   :  { %v7343_v29 = vpack.c.bf16 %v7342_v32, %v7342_v32 }
 0xf7c   :  { %7381 = vmatmul.mubr.bf16.vlgmr.msra.gmra.mrb[140].mxu0 %v7343_v29  ;;  %7422 = vmatmul.mubr.bf16.vlgmr.msra.gmra.mrb[140].mxu1 %v7343_v29 }
 0xf7d   :  { %7464 = vmatpush1.bf16.msra.mxu0 %v9691_v12  ;;  %7505 = vmatpush1.bf16.msra.mxu1 %v9692_v19 }
 0xf7e   :  { %7465 = vmatprep.subr.bf16.mxu0 %v9693_v36  ;;  %7506 = vmatprep.subr.bf16.mxu1 %v9694_v55  ;;  %v9277_v55 = vld [vmem:[#allocation15 + $0x40] sm:$0xff]  }
 0xf7f   :  { %7495 = vmatprep.mubr.bf16.mxu0 %v12097_v2  ;;  %7536 = vmatprep.mubr.bf16.mxu1 %v12097_v2  ;;  %v9705_v2 = vld [vmem:[#allocation12 + $0x84] ss:$16 sps:$4 sm:$0xff]  }
 0xf81   :  { %7466 = vmatpush1.bf16.msra.mxu0 %v9695_v43  ;;  %7507 = vmatpush1.bf16.msra.mxu1 %v9696_v63  ;;  %v9278_v63 = vld [vmem:[#allocation15 + $0x48] sm:$0xff]  }
 0xf82   :  { %7467 = vmatprep.subr.bf16.mxu0 %v9697_v58  ;;  %7508 = vmatprep.subr.bf16.mxu1 %v9698_v18  ;;  %v9280_v58 = vld [vmem:[#allocation15 + $0x58] sm:$0xff]   ;;  %v9281_v18 = vld [vmem:[#allocation15 + $0x60] sm:$0xff]  }
 0xf85   :  { %7468 = vmatpush1.bf16.msra.mxu0 %v9699_v21  ;;  %7509 = vmatpush1.bf16.msra.mxu1 %v9700_v60  ;;  %v9282_v21 = vld [vmem:[#allocation15 + $0x68] sm:$0xff]   ;;  %v9283_v60 = vld [vmem:[#allocation15 + $0x70] sm:$0xff]  }
 0xf86   :  { %7469 = vmatprep.subr.bf16.mxu0 %v9701_v22  ;;  %7510 = vmatprep.subr.bf16.mxu1 %v9702_v47  ;;  %v9284_v22 = vld [vmem:[#allocation15 + $0x78] sm:$0xff]   ;;  %v6576_v47 = vpack.c.bf16 %v11699_v27, %v11699_v27  ;;  %v9289_v27 = vld [vmem:[#allocation15 + $0x20] sm:$0xff]  }
 0xf89   :  { %7470 = vmatpush1.bf16.msra.mxu0 %v9703_v13  ;;  %7511 = vmatpush1.bf16.msra.mxu1 %v9704_v51  ;;  %v9285_v13 = vld [vmem:[#allocation15] sm:$0xff]   ;;  %v9286_v51 = vld [vmem:[#allocation15 + $0x8] sm:$0xff]  }
 0xf8a   :  { %7471 = vmatprep.subr.bf16.mxu0 %v9705_v2  ;;  %7512 = vmatprep.subr.bf16.mxu1 %v9706_v7  ;;  %v9287_v2 = vld [vmem:[#allocation15 + $0x10] sm:$0xff]   ;;  %v9288_v7 = vld [vmem:[#allocation15 + $0x18] sm:$0xff]  }
 0xf8d   :  { %7472 = vmatpush1.bf16.msra.mxu0 %v9707_v61  ;;  %7513 = vmatpush1.bf16.msra.mxu1 %v9708_v28  ;;  %v9290_v61 = vld [vmem:[#allocation15 + $0x28] sm:$0xff]   ;;  %v9291_v28 = vld [vmem:[#allocation15 + $0x30] sm:$0xff]  }
 0xf8e   :  { %7473 = vmatprep.subr.bf16.mxu0 %v9709_v9  ;;  %7514 = vmatprep.subr.bf16.mxu1 %v9710_v11  ;;  %v9292_v9 = vld [vmem:[#allocation15 + $0x38] sm:$0xff]   ;;  %v9293_v11 = vld [vmem:[%s11976_s11] sm:$0xff]  }
 0xf91   :  { %7474 = vmatpush1.bf16.msra.mxu0 %v9711_v20  ;;  %7515 = vmatpush1.bf16.msra.mxu1 %v9712_v8  ;;  %v9294_v20 = vld [vmem:[%s11976_s11 + $0x8] sm:$0xff]   ;;  %v9295_v8 = vld [vmem:[%s11976_s11 + $0x10] sm:$0xff]  }
 0xf92   :  { %7475 = vmatprep.subr.bf16.mxu0 %v9713_v48  ;;  %7516 = vmatprep.subr.bf16.mxu1 %v9714_v26  ;;  %v9296_v48 = vld [vmem:[%s11976_s11 + $0x18] sm:$0xff]   ;;  %v9297_v26 = vld [vmem:[%s11976_s11 + $0x20] sm:$0xff]  }
 0xf95   :  { %7476 = vmatpush1.bf16.msra.mxu0 %v9715_v3  ;;  %7517 = vmatpush1.bf16.msra.mxu1 %v9716_v59  ;;  %v9298_v3 = vld [vmem:[%s11976_s11 + $0x28] sm:$0xff]  }
 0xf96   :  { %7477 = vmatprep.subr.bf16.mxu0 %v9717_v6  ;;  %7518 = vmatprep.subr.bf16.mxu1 %v9718_v31  ;;  %v12295_v31 = vld [vmem:[#allocation75_spill] sm:$0xff] }
 0xf99   :  { %7478 = vmatpush1.bf16.msra.mxu0 %v9719_v14  ;;  %7519 = vmatpush1.bf16.msra.mxu1 %v9720_v15  ;;  %v12296_v15 = vld [vmem:[#allocation82_spill] sm:$0xff] }
 0xf9a   :  { %8765 = vmatprep.subr.bf16.mxu0 %v9922_v0  ;;  %8785 = vmatprep.subr.bf16.mxu1 %v9922_v0 }
0x104f   :  { %v7382_v38 = vpop.f32.mrb[140].mxu0  ;;  %v7423_v45 = vpop.f32.mrb[140].mxu1 }
0x1050   :  { %v7430_v42 = vadd.f32 %v7382_v38, %v12291_v37  ;;  %v7432_v4 = vadd.f32 %v7423_v45, %v12292_v25  ;;  %v7384_v50 = vpop.f32.mrb[141].mxu0  ;;  %v7425_v35 = vpop.f32.mrb[141].mxu1 }
0x1051   :  { %v7431_v62 = vadd.f32 %v7384_v50, %v12293_v52  ;;  %v7433_v1 = vadd.f32 %v7425_v35, %v12294_v44  ;;  %v7386_v5 = vpop.f32.mrb[142].mxu0  ;;  %v7427_v46 = vpop.f32.mrb[142].mxu1 }
0x1052   :  { %v8705_v53 = vmul.f32 -1.442695, %v7430_v42  ;;  %v7387_v41 = vpop.f32.mrb[143].mxu0  ;;  %v7428_v54 = vpop.f32.mrb[143].mxu1  ;;  %v12297_v42 = vld [vmem:[#allocation78_spill] sm:$0xff] }
0x1053   :  { %v8706_v39 = vmul.f32 -1.442695, %v7431_v62  ;;  %v8707_v40 = vmul.f32 -1.442695, %v7433_v1 }
0x1054   :  { %9653 = vpow2.f32 %v8705_v53 }
0x1055   :  { %9655 = vpow2.f32 %v8706_v39 }
0x1056   :  { %9657 = vpow2.f32 %v8707_v40 }
0x1057   :  { %9659 = vtanh.f32 %v7432_v4  ;;  %v12298_v4 = vld [vmem:[#allocation79_spill] sm:$0xff] }
0x105e   :  { %v9654_v10 = vpop.eup %9653 }
0x105f   :  { %v9656_v49 = vpop.eup %9655  ;;  %v7437_v56 = vadd.f32 1.0, %v9654_v10 }
0x1060   :  { %v7443_v57 = vadd.f32 1.0, %v9656_v49  ;;  %v9658_v23 = vpop.eup %9657 }
0x1061   :  { %9661 = vrcp.f32 %v7437_v56  ;;  %v9660_v33 = vpop.eup %9659  ;;  %v7450_v24 = vadd.f32 1.0, %v9658_v23 }
0x1062   :  { %9663 = vrcp.f32 %v7443_v57 }
0x1063   :  { %9665 = vrcp.f32 %v7450_v24 }
0x106b   :  { %v9662_v30 = vpop.eup %9661 }
0x106c   :  { %v9664_v16 = vpop.eup %9663  ;;  %v7454_v17 = vmul.f32 %v9662_v30, %v9660_v33 }
0x106d   :  { %v7453_v32 = vmul.f32 %v9664_v16, %v11873_v34  ;;  %v9666_v12 = vpop.eup %9665  ;;  %v9279_v34 = vld [vmem:[#allocation15 + $0x50] sm:$0xff]  }
0x106f   :  { %v11885_v29 = vadd.f32 %v7454_v17, %v7453_v32 }
0x1071   :  { %9667 = vtanh.f32 %v11885_v29 }
0x107b   :  { %v9668_v19 = vpop.eup %9667 }
0x107c   :  { %v7457_v36 = vmul.f32 %v9668_v19, %v9666_v12 }
0x107e   :  { %v7458_v43 = vpack.c.bf16 %v7457_v36, %v7457_v36 }
0x1080   :  { %7496 = vmatmul.mubr.bf16.vlgmr.msra.gmra.mrb[144].mxu0 %v7458_v43  ;;  %7537 = vmatmul.mubr.bf16.vlgmr.msra.gmra.mrb[144].mxu1 %v7458_v43  ;;  %v9299_v43 = vld [vmem:[%s11976_s11 + $0x30] sm:$0xff]  }
0x1081   :  { %8766 = vmatpush3.bf16.msra.mxu0 %v9277_v55  ;;  %8781 = vmatprep.mubr.msk.bf16.mxu0 %vm9923_vm12, %v9922_v0 }
0x1082   :  { %8767 = vmatprep.subr.bf16.mxu0 %v9922_v0  ;;  %8801 = vmatprep.mubr.msk.bf16.mxu1 %vm9923_vm12, %v9922_v0 }
0x1083   :  { %8786 = vmatpush3.bf16.msra.mxu1 %v9285_v13 }
0x1084   :  { %8787 = vmatprep.subr.bf16.mxu1 %v9922_v0 }
0x1085   :  { %8768 = vmatpush3.bf16.msra.mxu0 %v9278_v63 }
0x1086   :  { %8769 = vmatprep.subr.bf16.mxu0 %v9922_v0 }
0x1087   :  { %8788 = vmatpush3.bf16.msra.mxu1 %v9286_v51 }
0x1088   :  { %8789 = vmatprep.subr.bf16.mxu1 %v9922_v0 }
0x1089   :  { %8770 = vmatpush3.bf16.msra.mxu0 %v9279_v34  ;;  %v8727_v34 = vld [vmem:[%s11975_s10] ss:$0 sm:$0xff]  ;;  %s9924_s10 = smov [#allocation16]  }
0x108a   :  { %8771 = vmatprep.subr.bf16.mxu0 %v9922_v0 }
0x108b   :  { %8790 = vmatpush3.bf16.msra.mxu1 %v9287_v2 }
0x108c   :  { %8791 = vmatprep.subr.bf16.mxu1 %v9922_v0 }
0x108d   :  { %8772 = vmatpush3.bf16.msra.mxu0 %v9280_v58 }
0x108e   :  { %8773 = vmatprep.subr.bf16.mxu0 %v9922_v0 }
0x108f   :  { %8792 = vmatpush3.bf16.msra.mxu1 %v9288_v7 }
0x1090   :  { %8793 = vmatprep.subr.bf16.mxu1 %v9922_v0 }
0x1091   :  { %8774 = vmatpush3.bf16.msra.mxu0 %v9281_v18 }
0x1092   :  { %8775 = vmatprep.subr.bf16.mxu0 %v9922_v0 }
0x1093   :  { %8794 = vmatpush3.bf16.msra.mxu1 %v9289_v27 }
0x1094   :  { %8795 = vmatprep.subr.bf16.mxu1 %v9922_v0 }
0x1095   :  { %8776 = vmatpush3.bf16.msra.mxu0 %v9282_v21 }
0x1096   :  { %8777 = vmatprep.subr.bf16.mxu0 %v9922_v0 }
0x1097   :  { %8796 = vmatpush3.bf16.msra.mxu1 %v9290_v61 }
0x1098   :  { %8797 = vmatprep.subr.bf16.mxu1 %v9922_v0 }
0x1099   :  { %8778 = vmatpush3.bf16.msra.mxu0 %v9283_v60 }
0x109a   :  { %8779 = vmatprep.subr.bf16.mxu0 %v9922_v0 }
0x109b   :  { %8798 = vmatpush3.bf16.msra.mxu1 %v9291_v28 }
0x109c   :  { %8799 = vmatprep.subr.bf16.mxu1 %v9922_v0 }
0x109d   :  { %8780 = vmatpush3.bf16.msra.mxu0 %v9284_v22 }
0x109e   :  { %8805 = vmatprep.subr.bf16.mxu0 %v9922_v0 }
0x109f   :  { %8800 = vmatpush3.bf16.msra.mxu1 %v9292_v9 }
0x10a0   :  { %8782 = vmatmul.mubr.bf16.vlgmr.msra.gmra.mrb[148].mxu0 %v6576_v47 }
0x10a1   :  { %8821 = vmatprep.mubr.msk.bf16.mxu0 %vm9923_vm12, %v9922_v0  ;;  %8806 = vmatpush3.bf16.msra.mxu0 %v9293_v11 }
0x10a2   :  { %8807 = vmatprep.subr.bf16.mxu0 %v9922_v0 }
0x10a5   :  { %8808 = vmatpush3.bf16.msra.mxu0 %v9294_v20 }
0x10a6   :  { %8809 = vmatprep.subr.bf16.mxu0 %v9922_v0 }
0x10a9   :  { %8810 = vmatpush3.bf16.msra.mxu0 %v9295_v8 }
0x10aa   :  { %8811 = vmatprep.subr.bf16.mxu0 %v9922_v0 }
0x10ad   :  { %8812 = vmatpush3.bf16.msra.mxu0 %v9296_v48 }
0x10ae   :  { %8813 = vmatprep.subr.bf16.mxu0 %v9922_v0 }
0x10b1   :  { %8814 = vmatpush3.bf16.msra.mxu0 %v9297_v26 }
0x10b2   :  { %8815 = vmatprep.subr.bf16.mxu0 %v9922_v0 }
0x10b5   :  { %8816 = vmatpush3.bf16.msra.mxu0 %v9298_v3 }
0x10b6   :  { %8817 = vmatprep.subr.bf16.mxu0 %v9922_v0 }
0x10b9   :  { %8818 = vmatpush3.bf16.msra.mxu0 %v9299_v43 }
0x10ba   :  { %8819 = vmatprep.subr.bf16.mxu0 %v9922_v0  ;;  %v8728_v0 = vld [vmem:[%s11977_s12] ss:$0 sm:$0xff] }
0x1153   :  { %v7497_v59 = vpop.f32.mrb[144].mxu0  ;;  %v7538_v6 = vpop.f32.mrb[144].mxu1 }
0x1154   :  { %v7545_v14 = vadd.f32 %v7497_v59, %v12295_v31  ;;  %v7547_v38 = vadd.f32 %v7538_v6, %v12296_v15  ;;  %v7499_v45 = vpop.f32.mrb[145].mxu0  ;;  %v7540_v37 = vpop.f32.mrb[145].mxu1 }
0x1155   :  { %v7546_v25 = vadd.f32 %v7499_v45, %v12297_v42  ;;  %v7548_v50 = vadd.f32 %v7540_v37, %v12298_v4  ;;  %v7501_v35 = vpop.f32.mrb[146].mxu0  ;;  %v7542_v52 = vpop.f32.mrb[146].mxu1 }
0x1156   :  { %v8708_v62 = vmul.f32 -1.442695, %v7545_v14  ;;  %v7502_v44 = vpop.f32.mrb[147].mxu0  ;;  %v7543_v1 = vpop.f32.mrb[147].mxu1 }
0x1157   :  { %v8709_v5 = vmul.f32 -1.442695, %v7546_v25  ;;  %v8710_v46 = vmul.f32 -1.442695, %v7548_v50 }
0x1158   :  { %9669 = vpow2.f32 %v8708_v62 }
0x1159   :  { %9671 = vpow2.f32 %v8709_v5 }
0x115a   :  { %9673 = vpow2.f32 %v8710_v46 }
0x115b   :  { %9675 = vtanh.f32 %v7547_v38 }
0x1162   :  { %v9670_v53 = vpop.eup %9669 }
0x1163   :  { %v9672_v41 = vpop.eup %9671  ;;  %v7552_v54 = vadd.f32 1.0, %v9670_v53 }
0x1164   :  { %v7558_v39 = vadd.f32 1.0, %v9672_v41  ;;  %v9674_v40 = vpop.eup %9673 }
0x1165   :  { %9677 = vrcp.f32 %v7552_v54  ;;  %v9676_v10 = vpop.eup %9675  ;;  %v7565_v23 = vadd.f32 1.0, %v9674_v40 }
0x1166   :  { %9679 = vrcp.f32 %v7558_v39 }
0x1167   :  { %9681 = vrcp.f32 %v7565_v23 }
0x116f   :  { %v9678_v49 = vpop.eup %9677 }
0x1170   :  { %v9680_v56 = vpop.eup %9679  ;;  %v7569_v57 = vmul.f32 %v9678_v49, %v9676_v10 }
0x1171   :  { %v7568_v33 = vmul.f32 %v9680_v56, %v11885_v29  ;;  %v9682_v12 = vpop.eup %9681  ;;  %v9300_v29 = vld [vmem:[%s11976_s11 + $0x38] sm:$0xff]   ;;  %s7916_s11 = sshll.u32 %s9924_s10, 4  ;;  %s7917_s11 = int_to_ptr.vmem [resolvable:$true] %s7916_s11 }
0x1172   :  { %8820 = vmatpush3.bf16.msra.mxu0 %v9300_v29  ;;  %s9875_s24 = scalar_lea.vmem %s7917_s11, 128  ;;  %p9880_p1 = scmp.lt.s32.totalorder %s7917_s11, %s7917_s11 }
0x1173   :  { %v7570_v30 = vadd.f32 %v7569_v57, %v7568_v33  ;;  %v7688_v16 = vpop.f32.mrb[148].mxu0  ;;  %p9876_p0 = scmp.ne.s32.totalorder %s7917_s11, %s9875_s24  ;;  %p9881_p2 = scmp.lt.s32.totalorder %s9875_s24, %s9875_s24 }
0x1174   :  { %v8783_v17 = vpop.f32.mrb[149].mxu0 }
0x1175   :  { %9683 = vtanh.f32 %v7570_v30  ;;  %v7691_v24 = vpop.f32.mrb[150].mxu0  ;;  %p9882_p3 = por %p9881_p2, %p9880_p1 }
0x1176   :  { %v8784_v32 = vpop.f32.mrb[151].mxu0 }
0x1177   :  { %p9883_p4 = pnand %p9882_p3, %p9876_p0 }
0x117f   :  { %v9684_v19 = vpop.eup %9683 }
0x1180   :  { %v7572_v36 = vmul.f32 %v9684_v19, %v9682_v12 }
0x1182   :  { %v7573_v55 = vpack.c.bf16 %v7572_v36, %v7572_v36 }
0x1184   :  { %8802 = vmatmul.mubr.bf16.vlgmr.msra.gmra.mrb[148].mxu1 %v7573_v55 }
0x1257   :  { %v7776_v63 = vpop.f32.mrb[148].mxu1 }
0x1258   :  { %v7777_v58 = vadd.f32 %v7776_v63, %v7688_v16  ;;  %v8803_v18 = vpop.f32.mrb[149].mxu1 }
0x1259   :  { %v7779_v21 = vpop.f32.mrb[150].mxu1 }
0x125a   :  { %v7789_v60 = vadd.f32 %v8727_v34, %v7777_v58  ;;  %v8804_v22 = vpop.f32.mrb[151].mxu1 }
0x125c   :  { %v7790_v47 = vmax.f32 %v7789_v60, 0.0 }
0x125e   :  { %v7791_v13 = vpack.c.bf16 %v7790_v47, %v7790_v47 }
0x1260   :  { %8822 = vmatmul.mubr.bf16.vlgmr.msra.gmra.mrb[152].mxu0 %v7791_v13 }
0x1333   :  { %v7897_v51 = vpop.f32.mrb[152].mxu0 }
0x1334   :  { %v7898_v2 = vadd.f32 %v8728_v0, %v7897_v51  ;;  %v8823_v7 = vpop.f32.mrb[153].mxu0 }
0x1335   :  { %v7900_v27 = vpop.f32.mrb[154].mxu0 }
0x1336   :  { %v8737_v61 = vmul.f32 -1.442695, %v7898_v2  ;;  %v8824_v28 = vpop.f32.mrb[155].mxu0 }
0x1338   :  { %9685 = vpow2.f32 %v8737_v61 }
0x1342   :  { %v9686_v9 = vpop.eup %9685 }
0x1343   :  { %v7906_v11 = vadd.f32 1.0, %v9686_v9 }
0x1345   :  { %9687 = vrcp.f32 %v7906_v11 }
0x134f   :  { %v9688_v20 = vpop.eup %9687 }
0x1350   :  { %7909 = vst [vmem:[#allocation16] sm:$0xff] %v9688_v20 }
0x1351   :  { %9886 = shalt.err (!%p9883_p4)
}
0x1352   :  { %s9887_s28 = scalar_lea.hbm %s11978_s13, 128 }
0x1353   :  { %p9888_p5 = scmp.ne.s32.totalorder %s11978_s13, %s9887_s28  ;;  %p9891_p6 = scmp.lt.u32.totalorder %s9887_s28, %s11978_s13 }
0x1355   :  { %p9893_p7 = pnand %p9891_p6, %p9888_p5 }
0x1357   :  { %9896 = shalt.err (!%p9893_p7)
}
0x1358   :  { %7919 = dma.vmem_to_hbm [thread:$0]  %s7917_s11, 128, %s11978_s13, [#allocation6]  }
0x1359   :  { %9905 = dma.done.wait [#allocation6], 128  }
0x135a   :  { %9906 = vsyncadd [#allocation6], 4294967168 }
0x135b   :  { %7923 = vsyncpa [#allocation5], 1 }
0x135c   :  { %7924 = vsyncpa [#allocation8], 1 }
0x135d   :  { %7925 = vsyncpa [#allocation11], 1 }
0x135e   :  { %7926 = vsyncpa [#allocation14], 1 }
0x135f   :  { %7927 = vsyncpa [#allocation6], 1 }

</bundles_post_ra>
